<compile_context>
chip_gen: v5e
topology: v5e:2x2
jax: 0.10.0
libtpu: 0.0.40
codegen_flags: <defaults>
</compile_context>

<pallas_src>
import functools

import jax
import jax.numpy as jnp
from jax.experimental import pallas as pl
from jax.experimental.pallas import tpu as pltpu

_EPS = 1e-5
_LANE = 128


def _round_up(x, m):
    return (x + m - 1) // m * m


def _vmem_limit_bytes():
    # Generation-aware scoped-VMEM limit: ~80% of physical, capped at 100 MiB
    # (v5e/v6e: 128 MiB physical -> 100 MiB; v7x: 64 MiB physical -> ~51 MiB).
    try:
        cap = int(pltpu.get_tpu_info().vmem_capacity_bytes)
        return max(32 << 20, min(int(cap * 0.8), 100 << 20))
    except Exception:
        return 48 << 20


def _cparams():
    return pltpu.CompilerParams(
        dimension_semantics=("parallel",),      # shard batch steps across TCs (v7x)
        vmem_limit_bytes=_vmem_limit_bytes())


# ----------------------------------------------------------------------------
# Pallas kernels
# ----------------------------------------------------------------------------
def _fused_conv_kernel(taps, m2p, x_ref, w_ref, m_ref, y_ref, stats_ref, acc_ref):
    """Fused im2col + conv matmul (+ folded 1x1 shortcut) + masked BN stats.

    x_ref:     (1, s*s, Lq, Cin_pad)   bf16 phase-decomposed image
    w_ref:     (9, Cin_pad, Cout_tot)  bf16 per-tap weight slabs
    m_ref:     (m2p, 1)                f32 validity mask over output rows
    y_ref:     (1, m2p, Cout_tot)      bf16 conv output (flat "wrapped" layout)
    stats_ref: (1, 2, Cout_tot)        f32 per-image [sum; sum-of-squares]
    acc_ref:   (m2p, Cout_tot)         f32 VMEM accumulator scratch
    """
    for i, (t, p_idx, start) in enumerate(taps):
        tap = x_ref[0, p_idx, start:start + m2p, :]              # static slice
        contrib = jnp.dot(tap, w_ref[t], preferred_element_type=jnp.float32)
        if i == 0:
            acc_ref[...] = contrib
        else:
            acc_ref[...] += contrib
    acc = acc_ref[...]
    y_ref[0] = acc.astype(y_ref.dtype)
    mask = m_ref[...]                                            # (m2p, 1)
    ym = acc * mask
    s = jnp.sum(ym, axis=0, keepdims=True)                       # (1, C)
    ss = jnp.sum(ym * acc, axis=0, keepdims=True)                # (1, C)
    stats_ref[0] = jnp.concatenate([s, ss], axis=0)


def _epilogue_kernel(y_ref, sc_ref, sh_ref, r_ref, o_ref):
    """bn2 scale/shift + ReLU + residual add + ReLU (f32 math, bf16 inputs)."""
    y = y_ref[0].astype(jnp.float32)
    h = jnp.maximum(y * sc_ref[...] + sh_ref[...], 0.0)
    r = r_ref[0].astype(jnp.float32)
    o_ref[0] = jnp.maximum(h + r, 0.0).astype(o_ref.dtype)


# ----------------------------------------------------------------------------
# pallas_call wrappers
# ----------------------------------------------------------------------------
def _fused_conv(xph, w_taps, mask, taps, m2p):
    n, p, lq, cin_pad = xph.shape
    cout_tot = w_taps.shape[2]
    kernel = functools.partial(_fused_conv_kernel, taps, m2p)
    flops = 2 * n * 9 * m2p * cin_pad * cout_tot
    bytes_accessed = (xph.size * 2 + w_taps.size * 2 + mask.size * 4
                      + n * m2p * cout_tot * 2 + n * 2 * cout_tot * 4)
    return pl.pallas_call(
        kernel,
        out_shape=(jax.ShapeDtypeStruct((n, m2p, cout_tot), jnp.bfloat16),
                   jax.ShapeDtypeStruct((n, 2, cout_tot), jnp.float32)),
        grid=(n,),
        in_specs=[pl.BlockSpec((1, p, lq, cin_pad), lambda b: (b, 0, 0, 0)),
                  pl.BlockSpec((9, cin_pad, cout_tot), lambda b: (0, 0, 0)),
                  pl.BlockSpec((m2p, 1), lambda b: (0, 0))],
        out_specs=(pl.BlockSpec((1, m2p, cout_tot), lambda b: (b, 0, 0)),
                   pl.BlockSpec((1, 2, cout_tot), lambda b: (b, 0, 0))),
        scratch_shapes=[pltpu.VMEM((m2p, cout_tot), jnp.float32)],
        compiler_params=_cparams(),
        cost_estimate=pl.CostEstimate(flops=flops, transcendentals=0,
                                      bytes_accessed=bytes_accessed),
    )(xph, w_taps, mask)


def _epilogue(y2, sc2, sh2, res):
    n, m2p, cpad = y2.shape
    return pl.pallas_call(
        _epilogue_kernel,
        out_shape=jax.ShapeDtypeStruct((n, m2p, cpad), jnp.float32),
        grid=(n,),
        in_specs=[pl.BlockSpec((1, m2p, cpad), lambda b: (b, 0, 0)),
                  pl.BlockSpec((1, cpad), lambda b: (0, 0)),
                  pl.BlockSpec((1, cpad), lambda b: (0, 0)),
                  pl.BlockSpec((1, m2p, cpad), lambda b: (b, 0, 0))],
        out_specs=pl.BlockSpec((1, m2p, cpad), lambda b: (b, 0, 0)),
        compiler_params=_cparams(),
    )(y2, sc2, sh2, res)


# ----------------------------------------------------------------------------
# Wrapper-side layout helpers (plain JAX, fused by XLA)
# ----------------------------------------------------------------------------
def _build_phases(x_nhwc, stride, pad, ho, wo, cin_pad):
    """Space-to-depth phase layout so every 3x3 tap is a contiguous row slice.

    Returns (phases (N, s*s, Lq, cin_pad) bf16, wq, taps, m2, m2p) where
    output position (h, w) lives at flat row r = h*wq + w of every tap slice.
    """
    n, h, w, c = x_nhwc.shape
    s = stride
    k = 2 // s                                   # halo size in phase space
    hq, wq = ho + k, wo + k
    m2 = (ho - 1) * wq + wo                      # last valid flat row + 1
    m2p = _round_up(m2, 8)
    max_start = k * wq + k
    lq = _round_up(max(hq * wq, max_start + m2p), 8)
    pb = s * hq - h - pad
    pr = s * wq - w - pad
    assert pb >= 0 and pr >= 0
    xp = jnp.pad(x_nhwc, ((0, 0), (pad, pb), (pad, pr), (0, cin_pad - c)))
    xph = xp.reshape(n, hq, s, wq, s, cin_pad).transpose(0, 2, 4, 1, 3, 5)
    xph = xph.reshape(n, s * s, hq * wq, cin_pad)
    if hq * wq < lq:
        xph = jnp.pad(xph, ((0, 0), (0, 0), (0, lq - hq * wq), (0, 0)))
    taps = tuple((dy * 3 + dx,
                  (dy % s) * s + (dx % s),
                  (dy // s) * wq + (dx // s))
                 for dy in range(3) for dx in range(3))
    return xph.astype(jnp.bfloat16), wq, taps, m2, m2p


def _build_weights(conv_w, cin_pad, cout_tot_pad, shortcut_w=None, shortcut_col=0):
    """(Cout,Cin,3,3) -> (9, cin_pad, cout_tot_pad) bf16; 1x1 shortcut folded
    into the center tap at columns [shortcut_col, shortcut_col+Cout)."""
    cout, cin, kh, kw = conv_w.shape
    assert kh == 3 and kw == 3
    wt = jnp.transpose(conv_w, (2, 3, 1, 0)).reshape(9, cin, cout).astype(jnp.float32)
    wt = jnp.pad(wt, ((0, 0), (0, cin_pad - cin), (0, cout_tot_pad - cout)))
    if shortcut_w is not None:
        co, ci = shortcut_w.shape[0], shortcut_w.shape[1]
        ws = shortcut_w.reshape(co, ci).T.astype(jnp.float32)          # (Cin, Cout)
        ws = jnp.pad(ws, ((0, cin_pad - ci),
                          (shortcut_col, cout_tot_pad - shortcut_col - co)))
        wt = wt.at[4].add(ws)                                          # center tap
    return wt.astype(jnp.bfloat16)


def _make_mask(m2p, m2, wq, wo):
    r = jnp.arange(m2p, dtype=jnp.int32)
    valid = (r < m2) & ((r % wq) < wo)
    return valid.astype(jnp.float32).reshape(m2p, 1)


def _flat_to_grid(flat, ho, wo, wq):
    n, length, c = flat.shape
    need = ho * wq
    if length < need:
        flat = jnp.pad(flat, ((0, 0), (0, need - length), (0, 0)))
    elif length > need:
        flat = flat[:, :need, :]
    return flat.reshape(n, ho, wq, c)[:, :, :wo, :]


def _grid_to_flat(grid, wq, length):
    n, ho, wo, c = grid.shape
    g = jnp.pad(grid, ((0, 0), (0, 0), (0, wq - wo), (0, 0)))
    flat = g.reshape(n, ho * wq, c)
    if flat.shape[1] < length:
        flat = jnp.pad(flat, ((0, 0), (0, length - flat.shape[1]), (0, 0)))
    elif flat.shape[1] > length:
        flat = flat[:, :length, :]
    return flat


def _bn_scale_shift(stats, count, gamma, beta, cpad):
    """Reduce per-image (sum, sumsq) -> per-channel scale/shift (biased var)."""
    s = jnp.sum(stats[:, 0, :], axis=0)
    ss = jnp.sum(stats[:, 1, :], axis=0)
    mu = s / count
    var = jnp.maximum(ss / count - mu * mu, 0.0)
    inv = jax.lax.rsqrt(var + _EPS)
    g = jnp.pad(gamma.astype(jnp.float32), (0, cpad - gamma.shape[0]))
    b = jnp.pad(beta.astype(jnp.float32), (0, cpad - beta.shape[0]))
    scale = g * inv
    shift = b - mu * scale
    return scale.reshape(1, cpad), shift.reshape(1, cpad)


# ----------------------------------------------------------------------------
# Forward pass
# ----------------------------------------------------------------------------
def plainblock_forward(x_nchw, params, stride=1):
    x = jnp.transpose(x_nchw, (0, 2, 3, 1)).astype(jnp.float32)       # NHWC
    n, h, w, cin = x.shape
    cout = params["conv1_w"].shape[0]
    cin_pad = _round_up(cin, _LANE)
    cout_pad = _round_up(cout, _LANE)
    with_proj = "convs_w" in params

    ho1 = (h + 2 - 3) // stride + 1
    wo1 = (w + 2 - 3) // stride + 1

    # --- conv1 (3x3, stride, pad 1) with folded 1x1 projection shortcut ------
    cout_tot = 2 * cout_pad if with_proj else cout_pad
    xph1, wq1, taps1, m2_1, m2p_1 = _build_phases(x, stride, 1, ho1, wo1, cin_pad)
    w1 = _build_weights(params["conv1_w"], cin_pad, cout_tot,
                        shortcut_w=params.get("convs_w"), shortcut_col=cout_pad)
    mask1 = _make_mask(m2p_1, m2_1, wq1, wo1)
    y1, st1 = _fused_conv(xph1, w1, mask1, taps1, m2p_1)

    count1 = n * ho1 * wo1
    sc1, sh1 = _bn_scale_shift(st1[:, :, :cout_pad], count1,
                               params["bn1_g"], params["bn1_b"], cout_pad)

    # bn1 + ReLU in plain JAX (fused by XLA into the conv2 layout work)
    h1_flat = jnp.maximum(y1[:, :, :cout_pad].astype(jnp.float32) * sc1 + sh1, 0.0)
    h1 = _flat_to_grid(h1_flat, ho1, wo1, wq1)                 # (n, ho1, wo1, Cp)

    # --- conv2 (3x3, stride 1, pad 0) + bn2 stats -----------------------------
    ho2, wo2 = ho1 - 2, wo1 - 2
    xph2, wq2, taps2, m2_2, m2p_2 = _build_phases(h1, 1, 0, ho2, wo2, cout_pad)
    w2 = _build_weights(params["conv2_w"], cout_pad, cout_pad)
    mask2 = _make_mask(m2p_2, m2_2, wq2, wo2)
    y2, st2 = _fused_conv(xph2, w2, mask2, taps2, m2p_2)
    count2 = n * ho2 * wo2
    sc2, sh2 = _bn_scale_shift(st2, count2, params["bn2_g"], params["bn2_b"], cout_pad)

    # --- shortcut branch: BN applied in XLA during the crop -------------------
    if with_proj:
        scs, shs = _bn_scale_shift(st1[:, :, cout_pad:], count1,
                                   params["bns_g"], params["bns_b"], cout_pad)
        sc_flat1 = y1[:, :, cout_pad:].astype(jnp.float32) * scs + shs
        sc_grid = _flat_to_grid(sc_flat1, ho1, wo1, wq1)
    else:
        assert stride == 1 and cin == cout, \
            "identity shortcut requires stride == 1 and in_channel == out_channel"
        sc_grid = jnp.pad(x, ((0, 0), (0, 0), (0, 0), (0, cout_pad - cin)))
    # center-crop the shortcut to conv2's spatial size (see TODO at top)
    sc_crop = sc_grid[:, 1:1 + ho2, 1:1 + wo2, :]
    res = _grid_to_flat(sc_crop, wq2, m2p_2).astype(jnp.bfloat16)

    # --- bn2 + relu + residual add + relu (fused epilogue kernel) -------------
    out_flat = _epilogue(y2, sc2, sh2, res)
    out = _flat_to_grid(out_flat, ho2, wo2, wq2)[:, :, :, :cout]
    return jnp.transpose(out, (0, 3, 1, 2))                    # back to NCHW


# ----------------------------------------------------------------------------
# Pure-JAX reference (same cropped-residual convention)
# ----------------------------------------------------------------------------
def _ref_forward(x, params, stride=1):
    def conv(a, w, s, pad):
        return jax.lax.conv_general_dilated(
            a, w, window_strides=(s, s), padding=((pad, pad), (pad, pad)),
            dimension_numbers=("NCHW", "OIHW", "NCHW"))

    def bn(a, g, b):
        mu = a.mean(axis=(0, 2, 3), keepdims=True)
        var = jnp.square(a - mu).mean(axis=(0, 2, 3), keepdims=True)
        return ((a - mu) * jax.lax.rsqrt(var + _EPS) * g.reshape(1, -1, 1, 1)
                + b.reshape(1, -1, 1, 1))

    out = jax.nn.relu(bn(conv(x, params["conv1_w"], stride, 1),
                         params["bn1_g"], params["bn1_b"]))
    out = jax.nn.relu(bn(conv(out, params["conv2_w"], 1, 0),
                         params["bn2_g"], params["bn2_b"]))
    if "convs_w" in params:
        sc = bn(conv(x, params["convs_w"], stride, 0),
                params["bns_g"], params["bns_b"])
    else:
        sc = x
    sc = sc[:, :, 1:1 + out.shape[2], 1:1 + out.shape[3]]
    return jax.nn.relu(out + sc)


# ----------------------------------------------------------------------------
def _make_params(key, in_c, out_c, with_proj):
    ks = jax.random.split(key, 8)
    params = {
        "conv1_w": 0.1 * jax.random.normal(ks[0], (out_c, in_c, 3, 3), jnp.float32),
        "bn1_g": 1.0 + 0.1 * jax.random.normal(ks[1], (out_c,), jnp.float32),
        "bn1_b": 0.1 * jax.random.normal(ks[2], (out_c,), jnp.float32),
        "conv2_w": 0.1 * jax.random.normal(ks[3], (out_c, out_c, 3, 3), jnp.float32),
        "bn2_g": 1.0 + 0.1 * jax.random.normal(ks[4], (out_c,), jnp.float32),
        "bn2_b": 0.1 * jax.random.normal(ks[5], (out_c,), jnp.float32),
    }
    if with_proj:
        params["convs_w"] = 0.1 * jax.random.normal(ks[6], (out_c, in_c, 1, 1), jnp.float32)
        params["bns_g"] = 1.0 + 0.1 * jax.random.normal(ks[7], (out_c,), jnp.float32)
        params["bns_b"] = jnp.zeros((out_c,), jnp.float32)
    return params


if __name__ == "__main__":
    configs = [
        dict(in_c=4, out_c=8, stride=1),   # projection shortcut (channel change)
        dict(in_c=8, out_c=8, stride=1),   # identity shortcut
        dict(in_c=4, out_c=8, stride=2),   # strided projection shortcut
    ]
    key = jax.random.PRNGKey(0)
    for cfg in configs:
        key, kp, kx = jax.random.split(key, 3)
        with_proj = cfg["stride"] != 1 or cfg["in_c"] != cfg["out_c"]
        params = _make_params(kp, cfg["in_c"], cfg["out_c"], with_proj)
        x = jax.random.normal(kx, (2, cfg["in_c"], 16, 16), jnp.float32)

        fwd = jax.jit(functools.partial(plainblock_forward, stride=cfg["stride"]))
        ref_fn = jax.jit(functools.partial(_ref_forward, stride=cfg["stride"]))

        out = jax.block_until_ready(fwd(x, params))
        ref = jax.block_until_ready(ref_fn(x, params))

        assert out.shape == ref.shape, (cfg, out.shape, ref.shape)
        max_err = float(jnp.max(jnp.abs(out - ref)))
        assert max_err < 5e-2, f"cfg={cfg} max abs err {max_err}"
    print("KERNEL_OK")
</pallas_src>

<mosaic_0001>
module attributes {stable_mosaic.version = 11 : i64} {
  func.func @_fused_conv_kernel(%arg0: i32, %arg1: memref<1x1x328x128xbf16, #tpu.memory_space<vmem>>, %arg2: memref<9x128x256xbf16, #tpu.memory_space<vmem>>, %arg3: memref<288x1xf32, #tpu.memory_space<vmem>>, %arg4: memref<1x288x256xbf16, #tpu.memory_space<vmem>>, %arg5: memref<1x2x256xf32, #tpu.memory_space<vmem>>, %arg6: memref<288x256xf32, #tpu.memory_space<vmem>>) attributes {dimension_semantics = [#tpu.dimension_semantics<parallel>], iteration_bounds = array<i64: 2>, scalar_prefetch = 0 : i64, scratch_operands = 1 : i64, tpu.core_type = #tpu.core_type<tc>, window_params = [{transform_indices = @transform_0, window_bounds = array<i64: 1, 1, 328, 128>}, {pipeline_mode = #tpu.pipeline_mode<synchronous>, transform_indices = @transform_1, window_bounds = array<i64: 9, 128, 256>}, {pipeline_mode = #tpu.pipeline_mode<synchronous>, transform_indices = @transform_2, window_bounds = array<i64: 288, 1>}, {transform_indices = @transform_3, window_bounds = array<i64: 1, 288, 256>}, {transform_indices = @transform_4, window_bounds = array<i64: 1, 2, 256>}]} {
    %c0 = arith.constant 0 : index
    %c0_0 = arith.constant 0 : index
    %c0_1 = arith.constant 0 : index
    %c0_2 = arith.constant 0 : index
    %0 = vector.load %arg1[%c0, %c0_0, %c0_1, %c0_2] : memref<1x1x328x128xbf16, #tpu.memory_space<vmem>>, vector<1x1x288x128xbf16>
    %1 = vector.shape_cast %0 : vector<1x1x288x128xbf16> to vector<288x128xbf16>
    %c0_3 = arith.constant 0 : index
    %c0_4 = arith.constant 0 : index
    %c0_5 = arith.constant 0 : index
    %2 = vector.load %arg2[%c0_3, %c0_4, %c0_5] : memref<9x128x256xbf16, #tpu.memory_space<vmem>>, vector<1x128x256xbf16>
    %3 = vector.shape_cast %2 : vector<1x128x256xbf16> to vector<128x256xbf16>
    %cst = arith.constant dense<0.000000e+00> : vector<288x256xf32>
    %4 = tpu.matmul %1, %3, %cst {dimension_numbers = #tpu.dot_dimension_numbers<[1], [0], [0], [1], [0, 0, 1, 1], [], []>} : vector<288x128xbf16>, vector<128x256xbf16>, vector<288x256xf32> -> vector<288x256xf32>
    %c0_6 = arith.constant 0 : index
    %c0_7 = arith.constant 0 : index
    %5 = vector.load %arg6[%c0_6, %c0_7] : memref<288x256xf32, #tpu.memory_space<vmem>>, vector<288x256xf32>
    tpu.vector_store %arg6[%c0_6, %c0_7], %4 {strides = array<i32>} : memref<288x256xf32, #tpu.memory_space<vmem>>, vector<288x256xf32>,
    %c0_8 = arith.constant 0 : index
    %c0_9 = arith.constant 0 : index
    %c1 = arith.constant 1 : index
    %c0_10 = arith.constant 0 : index
    %6 = vector.load %arg1[%c0_8, %c0_9, %c1, %c0_10] : memref<1x1x328x128xbf16, #tpu.memory_space<vmem>>, vector<1x1x288x128xbf16>
    %7 = vector.shape_cast %6 : vector<1x1x288x128xbf16> to vector<288x128xbf16>
    %c1_11 = arith.constant 1 : index
    %c0_12 = arith.constant 0 : index
    %c0_13 = arith.constant 0 : index
    %8 = vector.load %arg2[%c1_11, %c0_12, %c0_13] : memref<9x128x256xbf16, #tpu.memory_space<vmem>>, vector<1x128x256xbf16>
    %9 = vector.shape_cast %8 : vector<1x128x256xbf16> to vector<128x256xbf16>
    %cst_14 = arith.constant dense<0.000000e+00> : vector<288x256xf32>
    %10 = tpu.matmul %7, %9, %cst_14 {dimension_numbers = #tpu.dot_dimension_numbers<[1], [0], [0], [1], [0, 0, 1, 1], [], []>} : vector<288x128xbf16>, vector<128x256xbf16>, vector<288x256xf32> -> vector<288x256xf32>
    %c0_15 = arith.constant 0 : index
    %c0_16 = arith.constant 0 : index
    %11 = vector.load %arg6[%c0_15, %c0_16] : memref<288x256xf32, #tpu.memory_space<vmem>>, vector<288x256xf32>
    %12 = arith.addf %11, %10 : vector<288x256xf32>
    %c0_17 = arith.constant 0 : index
    %c0_18 = arith.constant 0 : index
    %13 = vector.load %arg6[%c0_17, %c0_18] : memref<288x256xf32, #tpu.memory_space<vmem>>, vector<288x256xf32>
    tpu.vector_store %arg6[%c0_17, %c0_18], %12 {strides = array<i32>} : memref<288x256xf32, #tpu.memory_space<vmem>>, vector<288x256xf32>,
    %c0_19 = arith.constant 0 : index
    %c0_20 = arith.constant 0 : index
    %c2 = arith.constant 2 : index
    %c0_21 = arith.constant 0 : index
    %14 = vector.load %arg1[%c0_19, %c0_20, %c2, %c0_21] : memref<1x1x328x128xbf16, #tpu.memory_space<vmem>>, vector<1x1x288x128xbf16>
    %15 = vector.shape_cast %14 : vector<1x1x288x128xbf16> to vector<288x128xbf16>
    %c2_22 = arith.constant 2 : index
    %c0_23 = arith.constant 0 : index
    %c0_24 = arith.constant 0 : index
    %16 = vector.load %arg2[%c2_22, %c0_23, %c0_24] : memref<9x128x256xbf16, #tpu.memory_space<vmem>>, vector<1x128x256xbf16>
    %17 = vector.shape_cast %16 : vector<1x128x256xbf16> to vector<128x256xbf16>
    %cst_25 = arith.constant dense<0.000000e+00> : vector<288x256xf32>
    %18 = tpu.matmul %15, %17, %cst_25 {dimension_numbers = #tpu.dot_dimension_numbers<[1], [0], [0], [1], [0, 0, 1, 1], [], []>} : vector<288x128xbf16>, vector<128x256xbf16>, vector<288x256xf32> -> vector<288x256xf32>
    %c0_26 = arith.constant 0 : index
    %c0_27 = arith.constant 0 : index
    %19 = vector.load %arg6[%c0_26, %c0_27] : memref<288x256xf32, #tpu.memory_space<vmem>>, vector<288x256xf32>
    %20 = arith.addf %19, %18 : vector<288x256xf32>
    %c0_28 = arith.constant 0 : index
    %c0_29 = arith.constant 0 : index
    %21 = vector.load %arg6[%c0_28, %c0_29] : memref<288x256xf32, #tpu.memory_space<vmem>>, vector<288x256xf32>
    tpu.vector_store %arg6[%c0_28, %c0_29], %20 {strides = array<i32>} : memref<288x256xf32, #tpu.memory_space<vmem>>, vector<288x256xf32>,
    %c0_30 = arith.constant 0 : index
    %c0_31 = arith.constant 0 : index
    %c18 = arith.constant 18 : index
    %c0_32 = arith.constant 0 : index
    %22 = vector.load %arg1[%c0_30, %c0_31, %c18, %c0_32] : memref<1x1x328x128xbf16, #tpu.memory_space<vmem>>, vector<1x1x288x128xbf16>
    %23 = vector.shape_cast %22 : vector<1x1x288x128xbf16> to vector<288x128xbf16>
    %c3 = arith.constant 3 : index
    %c0_33 = arith.constant 0 : index
    %c0_34 = arith.constant 0 : index
    %24 = vector.load %arg2[%c3, %c0_33, %c0_34] : memref<9x128x256xbf16, #tpu.memory_space<vmem>>, vector<1x128x256xbf16>
    %25 = vector.shape_cast %24 : vector<1x128x256xbf16> to vector<128x256xbf16>
    %cst_35 = arith.constant dense<0.000000e+00> : vector<288x256xf32>
    %26 = tpu.matmul %23, %25, %cst_35 {dimension_numbers = #tpu.dot_dimension_numbers<[1], [0], [0], [1], [0, 0, 1, 1], [], []>} : vector<288x128xbf16>, vector<128x256xbf16>, vector<288x256xf32> -> vector<288x256xf32>
    %c0_36 = arith.constant 0 : index
    %c0_37 = arith.constant 0 : index
    %27 = vector.load %arg6[%c0_36, %c0_37] : memref<288x256xf32, #tpu.memory_space<vmem>>, vector<288x256xf32>
    %28 = arith.addf %27, %26 : vector<288x256xf32>
    %c0_38 = arith.constant 0 : index
    %c0_39 = arith.constant 0 : index
    %29 = vector.load %arg6[%c0_38, %c0_39] : memref<288x256xf32, #tpu.memory_space<vmem>>, vector<288x256xf32>
    tpu.vector_store %arg6[%c0_38, %c0_39], %28 {strides = array<i32>} : memref<288x256xf32, #tpu.memory_space<vmem>>, vector<288x256xf32>,
    %c0_40 = arith.constant 0 : index
    %c0_41 = arith.constant 0 : index
    %c19 = arith.constant 19 : index
    %c0_42 = arith.constant 0 : index
    %30 = vector.load %arg1[%c0_40, %c0_41, %c19, %c0_42] : memref<1x1x328x128xbf16, #tpu.memory_space<vmem>>, vector<1x1x288x128xbf16>
    %31 = vector.shape_cast %30 : vector<1x1x288x128xbf16> to vector<288x128xbf16>
    %c4 = arith.constant 4 : index
    %c0_43 = arith.constant 0 : index
    %c0_44 = arith.constant 0 : index
    %32 = vector.load %arg2[%c4, %c0_43, %c0_44] : memref<9x128x256xbf16, #tpu.memory_space<vmem>>, vector<1x128x256xbf16>
    %33 = vector.shape_cast %32 : vector<1x128x256xbf16> to vector<128x256xbf16>
    %cst_45 = arith.constant dense<0.000000e+00> : vector<288x256xf32>
    %34 = tpu.matmul %31, %33, %cst_45 {dimension_numbers = #tpu.dot_dimension_numbers<[1], [0], [0], [1], [0, 0, 1, 1], [], []>} : vector<288x128xbf16>, vector<128x256xbf16>, vector<288x256xf32> -> vector<288x256xf32>
    %c0_46 = arith.constant 0 : index
    %c0_47 = arith.constant 0 : index
    %35 = vector.load %arg6[%c0_46, %c0_47] : memref<288x256xf32, #tpu.memory_space<vmem>>, vector<288x256xf32>
    %36 = arith.addf %35, %34 : vector<288x256xf32>
    %c0_48 = arith.constant 0 : index
    %c0_49 = arith.constant 0 : index
    %37 = vector.load %arg6[%c0_48, %c0_49] : memref<288x256xf32, #tpu.memory_space<vmem>>, vector<288x256xf32>
    tpu.vector_store %arg6[%c0_48, %c0_49], %36 {strides = array<i32>} : memref<288x256xf32, #tpu.memory_space<vmem>>, vector<288x256xf32>,
    %c0_50 = arith.constant 0 : index
    %c0_51 = arith.constant 0 : index
    %c20 = arith.constant 20 : index
    %c0_52 = arith.constant 0 : index
    %38 = vector.load %arg1[%c0_50, %c0_51, %c20, %c0_52] : memref<1x1x328x128xbf16, #tpu.memory_space<vmem>>, vector<1x1x288x128xbf16>
    %39 = vector.shape_cast %38 : vector<1x1x288x128xbf16> to vector<288x128xbf16>
    %c5 = arith.constant 5 : index
    %c0_53 = arith.constant 0 : index
    %c0_54 = arith.constant 0 : index
    %40 = vector.load %arg2[%c5, %c0_53, %c0_54] : memref<9x128x256xbf16, #tpu.memory_space<vmem>>, vector<1x128x256xbf16>
    %41 = vector.shape_cast %40 : vector<1x128x256xbf16> to vector<128x256xbf16>
    %cst_55 = arith.constant dense<0.000000e+00> : vector<288x256xf32>
    %42 = tpu.matmul %39, %41, %cst_55 {dimension_numbers = #tpu.dot_dimension_numbers<[1], [0], [0], [1], [0, 0, 1, 1], [], []>} : vector<288x128xbf16>, vector<128x256xbf16>, vector<288x256xf32> -> vector<288x256xf32>
    %c0_56 = arith.constant 0 : index
    %c0_57 = arith.constant 0 : index
    %43 = vector.load %arg6[%c0_56, %c0_57] : memref<288x256xf32, #tpu.memory_space<vmem>>, vector<288x256xf32>
    %44 = arith.addf %43, %42 : vector<288x256xf32>
    %c0_58 = arith.constant 0 : index
    %c0_59 = arith.constant 0 : index
    %45 = vector.load %arg6[%c0_58, %c0_59] : memref<288x256xf32, #tpu.memory_space<vmem>>, vector<288x256xf32>
    tpu.vector_store %arg6[%c0_58, %c0_59], %44 {strides = array<i32>} : memref<288x256xf32, #tpu.memory_space<vmem>>, vector<288x256xf32>,
    %c0_60 = arith.constant 0 : index
    %c0_61 = arith.constant 0 : index
    %c36 = arith.constant 36 : index
    %c0_62 = arith.constant 0 : index
    %46 = vector.load %arg1[%c0_60, %c0_61, %c36, %c0_62] : memref<1x1x328x128xbf16, #tpu.memory_space<vmem>>, vector<1x1x288x128xbf16>
    %47 = vector.shape_cast %46 : vector<1x1x288x128xbf16> to vector<288x128xbf16>
    %c6 = arith.constant 6 : index
    %c0_63 = arith.constant 0 : index
    %c0_64 = arith.constant 0 : index
    %48 = vector.load %arg2[%c6, %c0_63, %c0_64] : memref<9x128x256xbf16, #tpu.memory_space<vmem>>, vector<1x128x256xbf16>
    %49 = vector.shape_cast %48 : vector<1x128x256xbf16> to vector<128x256xbf16>
    %cst_65 = arith.constant dense<0.000000e+00> : vector<288x256xf32>
    %50 = tpu.matmul %47, %49, %cst_65 {dimension_numbers = #tpu.dot_dimension_numbers<[1], [0], [0], [1], [0, 0, 1, 1], [], []>} : vector<288x128xbf16>, vector<128x256xbf16>, vector<288x256xf32> -> vector<288x256xf32>
    %c0_66 = arith.constant 0 : index
    %c0_67 = arith.constant 0 : index
    %51 = vector.load %arg6[%c0_66, %c0_67] : memref<288x256xf32, #tpu.memory_space<vmem>>, vector<288x256xf32>
    %52 = arith.addf %51, %50 : vector<288x256xf32>
    %c0_68 = arith.constant 0 : index
    %c0_69 = arith.constant 0 : index
    %53 = vector.load %arg6[%c0_68, %c0_69] : memref<288x256xf32, #tpu.memory_space<vmem>>, vector<288x256xf32>
    tpu.vector_store %arg6[%c0_68, %c0_69], %52 {strides = array<i32>} : memref<288x256xf32, #tpu.memory_space<vmem>>, vector<288x256xf32>,
    %c0_70 = arith.constant 0 : index
    %c0_71 = arith.constant 0 : index
    %c37 = arith.constant 37 : index
    %c0_72 = arith.constant 0 : index
    %54 = vector.load %arg1[%c0_70, %c0_71, %c37, %c0_72] : memref<1x1x328x128xbf16, #tpu.memory_space<vmem>>, vector<1x1x288x128xbf16>
    %55 = vector.shape_cast %54 : vector<1x1x288x128xbf16> to vector<288x128xbf16>
    %c7 = arith.constant 7 : index
    %c0_73 = arith.constant 0 : index
    %c0_74 = arith.constant 0 : index
    %56 = vector.load %arg2[%c7, %c0_73, %c0_74] : memref<9x128x256xbf16, #tpu.memory_space<vmem>>, vector<1x128x256xbf16>
    %57 = vector.shape_cast %56 : vector<1x128x256xbf16> to vector<128x256xbf16>
    %cst_75 = arith.constant dense<0.000000e+00> : vector<288x256xf32>
    %58 = tpu.matmul %55, %57, %cst_75 {dimension_numbers = #tpu.dot_dimension_numbers<[1], [0], [0], [1], [0, 0, 1, 1], [], []>} : vector<288x128xbf16>, vector<128x256xbf16>, vector<288x256xf32> -> vector<288x256xf32>
    %c0_76 = arith.constant 0 : index
    %c0_77 = arith.constant 0 : index
    %59 = vector.load %arg6[%c0_76, %c0_77] : memref<288x256xf32, #tpu.memory_space<vmem>>, vector<288x256xf32>
    %60 = arith.addf %59, %58 : vector<288x256xf32>
    %c0_78 = arith.constant 0 : index
    %c0_79 = arith.constant 0 : index
    %61 = vector.load %arg6[%c0_78, %c0_79] : memref<288x256xf32, #tpu.memory_space<vmem>>, vector<288x256xf32>
    tpu.vector_store %arg6[%c0_78, %c0_79], %60 {strides = array<i32>} : memref<288x256xf32, #tpu.memory_space<vmem>>, vector<288x256xf32>,
    %c0_80 = arith.constant 0 : index
    %c0_81 = arith.constant 0 : index
    %c38 = arith.constant 38 : index
    %c0_82 = arith.constant 0 : index
    %62 = vector.load %arg1[%c0_80, %c0_81, %c38, %c0_82] : memref<1x1x328x128xbf16, #tpu.memory_space<vmem>>, vector<1x1x288x128xbf16>
    %63 = vector.shape_cast %62 : vector<1x1x288x128xbf16> to vector<288x128xbf16>
    %c8 = arith.constant 8 : index
    %c0_83 = arith.constant 0 : index
    %c0_84 = arith.constant 0 : index
    %64 = vector.load %arg2[%c8, %c0_83, %c0_84] : memref<9x128x256xbf16, #tpu.memory_space<vmem>>, vector<1x128x256xbf16>
    %65 = vector.shape_cast %64 : vector<1x128x256xbf16> to vector<128x256xbf16>
    %cst_85 = arith.constant dense<0.000000e+00> : vector<288x256xf32>
    %66 = tpu.matmul %63, %65, %cst_85 {dimension_numbers = #tpu.dot_dimension_numbers<[1], [0], [0], [1], [0, 0, 1, 1], [], []>} : vector<288x128xbf16>, vector<128x256xbf16>, vector<288x256xf32> -> vector<288x256xf32>
    %c0_86 = arith.constant 0 : index
    %c0_87 = arith.constant 0 : index
    %67 = vector.load %arg6[%c0_86, %c0_87] : memref<288x256xf32, #tpu.memory_space<vmem>>, vector<288x256xf32>
    %68 = arith.addf %67, %66 : vector<288x256xf32>
    %c0_88 = arith.constant 0 : index
    %c0_89 = arith.constant 0 : index
    %69 = vector.load %arg6[%c0_88, %c0_89] : memref<288x256xf32, #tpu.memory_space<vmem>>, vector<288x256xf32>
    tpu.vector_store %arg6[%c0_88, %c0_89], %68 {strides = array<i32>} : memref<288x256xf32, #tpu.memory_space<vmem>>, vector<288x256xf32>,
    %c0_90 = arith.constant 0 : index
    %c0_91 = arith.constant 0 : index
    %70 = vector.load %arg6[%c0_90, %c0_91] : memref<288x256xf32, #tpu.memory_space<vmem>>, vector<288x256xf32>
    %71 = arith.truncf %70 : vector<288x256xf32> to vector<288x256xbf16>
    %c0_92 = arith.constant 0 : index
    %c0_93 = arith.constant 0 : index
    %c0_94 = arith.constant 0 : index
    %72 = vector.load %arg4[%c0_92, %c0_93, %c0_94] : memref<1x288x256xbf16, #tpu.memory_space<vmem>>, vector<1x288x256xbf16>
    %73 = vector.shape_cast %72 : vector<1x288x256xbf16> to vector<288x256xbf16>
    %74 = vector.shape_cast %71 : vector<288x256xbf16> to vector<1x288x256xbf16>
    tpu.vector_store %arg4[%c0_92, %c0_93, %c0_94], %74 {strides = array<i32>} : memref<1x288x256xbf16, #tpu.memory_space<vmem>>, vector<1x288x256xbf16>,
    %c0_95 = arith.constant 0 : index
    %c0_96 = arith.constant 0 : index
    %75 = vector.load %arg3[%c0_95, %c0_96] : memref<288x1xf32, #tpu.memory_space<vmem>>, vector<288x1xf32>
    %76 = vector.broadcast %75 : vector<288x1xf32> to vector<288x256xf32>
    %77 = arith.mulf %70, %76 : vector<288x256xf32>
    %cst_97 = arith.constant dense<0.000000e+00> : vector<256xf32>
    %78 = vector.multi_reduction <add>, %77, %cst_97 [0] : vector<288x256xf32> to vector<256xf32>
    %79 = vector.shape_cast %78 : vector<256xf32> to vector<1x256xf32>
    %80 = arith.mulf %77, %70 : vector<288x256xf32>
    %cst_98 = arith.constant dense<0.000000e+00> : vector<256xf32>
    %81 = vector.multi_reduction <add>, %80, %cst_98 [0] : vector<288x256xf32> to vector<256xf32>
    %82 = vector.shape_cast %81 : vector<256xf32> to vector<1x256xf32>
    %83 = tpu.concatenate %79, %82 in 0 : vector<1x256xf32>, vector<1x256xf32> -> vector<2x256xf32>
    %c0_99 = arith.constant 0 : index
    %c0_100 = arith.constant 0 : index
    %c0_101 = arith.constant 0 : index
    %84 = vector.load %arg5[%c0_99, %c0_100, %c0_101] : memref<1x2x256xf32, #tpu.memory_space<vmem>>, vector<1x2x256xf32>
    %85 = vector.shape_cast %84 : vector<1x2x256xf32> to vector<2x256xf32>
    %86 = vector.shape_cast %83 : vector<2x256xf32> to vector<1x2x256xf32>
    tpu.vector_store %arg5[%c0_99, %c0_100, %c0_101], %86 {strides = array<i32>} : memref<1x2x256xf32, #tpu.memory_space<vmem>>, vector<1x2x256xf32>,
    return
  }
  func.func @transform_0(%arg0: i32) -> (i32, i32, i32, i32) {
    %c0_i32 = arith.constant 0 : i32
    %c0_i32_0 = arith.constant 0 : i32
    %c0_i32_1 = arith.constant 0 : i32
    %c0_i32_2 = arith.constant 0 : i32
    return %arg0, %c0_i32, %c0_i32_0, %c0_i32_1 : i32, i32, i32, i32
  }
  func.func @transform_1(%arg0: i32) -> (i32, i32, i32) {
    %c0_i32 = arith.constant 0 : i32
    %c0_i32_0 = arith.constant 0 : i32
    %c0_i32_1 = arith.constant 0 : i32
    %c0_i32_2 = arith.constant 0 : i32
    return %c0_i32, %c0_i32_0, %c0_i32_1 : i32, i32, i32
  }
  func.func @transform_2(%arg0: i32) -> (i32, i32) {
    %c0_i32 = arith.constant 0 : i32
    %c0_i32_0 = arith.constant 0 : i32
    %c0_i32_1 = arith.constant 0 : i32
    return %c0_i32, %c0_i32_0 : i32, i32
  }
  func.func @transform_3(%arg0: i32) -> (i32, i32, i32) {
    %c0_i32 = arith.constant 0 : i32
    %c0_i32_0 = arith.constant 0 : i32
    %c0_i32_1 = arith.constant 0 : i32
    return %arg0, %c0_i32, %c0_i32_0 : i32, i32, i32
  }
  func.func @transform_4(%arg0: i32) -> (i32, i32, i32) {
    %c0_i32 = arith.constant 0 : i32
    %c0_i32_0 = arith.constant 0 : i32
    %c0_i32_1 = arith.constant 0 : i32
    return %arg0, %c0_i32, %c0_i32_0 : i32, i32, i32
  }
}

module attributes {stable_mosaic.version = 11 : i64} {
  func.func @_fused_conv_kernel(%arg0: i32, %arg1: memref<1x1x264x128xbf16, #tpu.memory_space<vmem>>, %arg2: memref<9x128x128xbf16, #tpu.memory_space<vmem>>, %arg3: memref<224x1xf32, #tpu.memory_space<vmem>>, %arg4: memref<1x224x128xbf16, #tpu.memory_space<vmem>>, %arg5: memref<1x2x128xf32, #tpu.memory_space<vmem>>, %arg6: memref<224x128xf32, #tpu.memory_space<vmem>>) attributes {dimension_semantics = [#tpu.dimension_semantics<parallel>], iteration_bounds = array<i64: 2>, scalar_prefetch = 0 : i64, scratch_operands = 1 : i64, tpu.core_type = #tpu.core_type<tc>, window_params = [{transform_indices = @transform_0, window_bounds = array<i64: 1, 1, 264, 128>}, {pipeline_mode = #tpu.pipeline_mode<synchronous>, transform_indices = @transform_1, window_bounds = array<i64: 9, 128, 128>}, {pipeline_mode = #tpu.pipeline_mode<synchronous>, transform_indices = @transform_2, window_bounds = array<i64: 224, 1>}, {transform_indices = @transform_3, window_bounds = array<i64: 1, 224, 128>}, {transform_indices = @transform_4, window_bounds = array<i64: 1, 2, 128>}]} {
    %c0 = arith.constant 0 : index
    %c0_0 = arith.constant 0 : index
    %c0_1 = arith.constant 0 : index
    %c0_2 = arith.constant 0 : index
    %0 = vector.load %arg1[%c0, %c0_0, %c0_1, %c0_2] : memref<1x1x264x128xbf16, #tpu.memory_space<vmem>>, vector<1x1x224x128xbf16>
    %1 = vector.shape_cast %0 : vector<1x1x224x128xbf16> to vector<224x128xbf16>
    %c0_3 = arith.constant 0 : index
    %c0_4 = arith.constant 0 : index
    %c0_5 = arith.constant 0 : index
    %2 = vector.load %arg2[%c0_3, %c0_4, %c0_5] : memref<9x128x128xbf16, #tpu.memory_space<vmem>>, vector<1x128x128xbf16>
    %3 = vector.shape_cast %2 : vector<1x128x128xbf16> to vector<128x128xbf16>
    %cst = arith.constant dense<0.000000e+00> : vector<224x128xf32>
    %4 = tpu.matmul %1, %3, %cst {dimension_numbers = #tpu.dot_dimension_numbers<[1], [0], [0], [1], [0, 0, 1, 1], [], []>} : vector<224x128xbf16>, vector<128x128xbf16>, vector<224x128xf32> -> vector<224x128xf32>
    %c0_6 = arith.constant 0 : index
    %c0_7 = arith.constant 0 : index
    %5 = vector.load %arg6[%c0_6, %c0_7] : memref<224x128xf32, #tpu.memory_space<vmem>>, vector<224x128xf32>
    tpu.vector_store %arg6[%c0_6, %c0_7], %4 {strides = array<i32>} : memref<224x128xf32, #tpu.memory_space<vmem>>, vector<224x128xf32>,
    %c0_8 = arith.constant 0 : index
    %c0_9 = arith.constant 0 : index
    %c1 = arith.constant 1 : index
    %c0_10 = arith.constant 0 : index
    %6 = vector.load %arg1[%c0_8, %c0_9, %c1, %c0_10] : memref<1x1x264x128xbf16, #tpu.memory_space<vmem>>, vector<1x1x224x128xbf16>
    %7 = vector.shape_cast %6 : vector<1x1x224x128xbf16> to vector<224x128xbf16>
    %c1_11 = arith.constant 1 : index
    %c0_12 = arith.constant 0 : index
    %c0_13 = arith.constant 0 : index
    %8 = vector.load %arg2[%c1_11, %c0_12, %c0_13] : memref<9x128x128xbf16, #tpu.memory_space<vmem>>, vector<1x128x128xbf16>
    %9 = vector.shape_cast %8 : vector<1x128x128xbf16> to vector<128x128xbf16>
    %cst_14 = arith.constant dense<0.000000e+00> : vector<224x128xf32>
    %10 = tpu.matmul %7, %9, %cst_14 {dimension_numbers = #tpu.dot_dimension_numbers<[1], [0], [0], [1], [0, 0, 1, 1], [], []>} : vector<224x128xbf16>, vector<128x128xbf16>, vector<224x128xf32> -> vector<224x128xf32>
    %c0_15 = arith.constant 0 : index
    %c0_16 = arith.constant 0 : index
    %11 = vector.load %arg6[%c0_15, %c0_16] : memref<224x128xf32, #tpu.memory_space<vmem>>, vector<224x128xf32>
    %12 = arith.addf %11, %10 : vector<224x128xf32>
    %c0_17 = arith.constant 0 : index
    %c0_18 = arith.constant 0 : index
    %13 = vector.load %arg6[%c0_17, %c0_18] : memref<224x128xf32, #tpu.memory_space<vmem>>, vector<224x128xf32>
    tpu.vector_store %arg6[%c0_17, %c0_18], %12 {strides = array<i32>} : memref<224x128xf32, #tpu.memory_space<vmem>>, vector<224x128xf32>,
    %c0_19 = arith.constant 0 : index
    %c0_20 = arith.constant 0 : index
    %c2 = arith.constant 2 : index
    %c0_21 = arith.constant 0 : index
    %14 = vector.load %arg1[%c0_19, %c0_20, %c2, %c0_21] : memref<1x1x264x128xbf16, #tpu.memory_space<vmem>>, vector<1x1x224x128xbf16>
    %15 = vector.shape_cast %14 : vector<1x1x224x128xbf16> to vector<224x128xbf16>
    %c2_22 = arith.constant 2 : index
    %c0_23 = arith.constant 0 : index
    %c0_24 = arith.constant 0 : index
    %16 = vector.load %arg2[%c2_22, %c0_23, %c0_24] : memref<9x128x128xbf16, #tpu.memory_space<vmem>>, vector<1x128x128xbf16>
    %17 = vector.shape_cast %16 : vector<1x128x128xbf16> to vector<128x128xbf16>
    %cst_25 = arith.constant dense<0.000000e+00> : vector<224x128xf32>
    %18 = tpu.matmul %15, %17, %cst_25 {dimension_numbers = #tpu.dot_dimension_numbers<[1], [0], [0], [1], [0, 0, 1, 1], [], []>} : vector<224x128xbf16>, vector<128x128xbf16>, vector<224x128xf32> -> vector<224x128xf32>
    %c0_26 = arith.constant 0 : index
    %c0_27 = arith.constant 0 : index
    %19 = vector.load %arg6[%c0_26, %c0_27] : memref<224x128xf32, #tpu.memory_space<vmem>>, vector<224x128xf32>
    %20 = arith.addf %19, %18 : vector<224x128xf32>
    %c0_28 = arith.constant 0 : index
    %c0_29 = arith.constant 0 : index
    %21 = vector.load %arg6[%c0_28, %c0_29] : memref<224x128xf32, #tpu.memory_space<vmem>>, vector<224x128xf32>
    tpu.vector_store %arg6[%c0_28, %c0_29], %20 {strides = array<i32>} : memref<224x128xf32, #tpu.memory_space<vmem>>, vector<224x128xf32>,
    %c0_30 = arith.constant 0 : index
    %c0_31 = arith.constant 0 : index
    %c16 = arith.constant 16 : index
    %c0_32 = arith.constant 0 : index
    %22 = vector.load %arg1[%c0_30, %c0_31, %c16, %c0_32] : memref<1x1x264x128xbf16, #tpu.memory_space<vmem>>, vector<1x1x224x128xbf16>
    %23 = vector.shape_cast %22 : vector<1x1x224x128xbf16> to vector<224x128xbf16>
    %c3 = arith.constant 3 : index
    %c0_33 = arith.constant 0 : index
    %c0_34 = arith.constant 0 : index
    %24 = vector.load %arg2[%c3, %c0_33, %c0_34] : memref<9x128x128xbf16, #tpu.memory_space<vmem>>, vector<1x128x128xbf16>
    %25 = vector.shape_cast %24 : vector<1x128x128xbf16> to vector<128x128xbf16>
    %cst_35 = arith.constant dense<0.000000e+00> : vector<224x128xf32>
    %26 = tpu.matmul %23, %25, %cst_35 {dimension_numbers = #tpu.dot_dimension_numbers<[1], [0], [0], [1], [0, 0, 1, 1], [], []>} : vector<224x128xbf16>, vector<128x128xbf16>, vector<224x128xf32> -> vector<224x128xf32>
    %c0_36 = arith.constant 0 : index
    %c0_37 = arith.constant 0 : index
    %27 = vector.load %arg6[%c0_36, %c0_37] : memref<224x128xf32, #tpu.memory_space<vmem>>, vector<224x128xf32>
    %28 = arith.addf %27, %26 : vector<224x128xf32>
    %c0_38 = arith.constant 0 : index
    %c0_39 = arith.constant 0 : index
    %29 = vector.load %arg6[%c0_38, %c0_39] : memref<224x128xf32, #tpu.memory_space<vmem>>, vector<224x128xf32>
    tpu.vector_store %arg6[%c0_38, %c0_39], %28 {strides = array<i32>} : memref<224x128xf32, #tpu.memory_space<vmem>>, vector<224x128xf32>,
    %c0_40 = arith.constant 0 : index
    %c0_41 = arith.constant 0 : index
    %c17 = arith.constant 17 : index
    %c0_42 = arith.constant 0 : index
    %30 = vector.load %arg1[%c0_40, %c0_41, %c17, %c0_42] : memref<1x1x264x128xbf16, #tpu.memory_space<vmem>>, vector<1x1x224x128xbf16>
    %31 = vector.shape_cast %30 : vector<1x1x224x128xbf16> to vector<224x128xbf16>
    %c4 = arith.constant 4 : index
    %c0_43 = arith.constant 0 : index
    %c0_44 = arith.constant 0 : index
    %32 = vector.load %arg2[%c4, %c0_43, %c0_44] : memref<9x128x128xbf16, #tpu.memory_space<vmem>>, vector<1x128x128xbf16>
    %33 = vector.shape_cast %32 : vector<1x128x128xbf16> to vector<128x128xbf16>
    %cst_45 = arith.constant dense<0.000000e+00> : vector<224x128xf32>
    %34 = tpu.matmul %31, %33, %cst_45 {dimension_numbers = #tpu.dot_dimension_numbers<[1], [0], [0], [1], [0, 0, 1, 1], [], []>} : vector<224x128xbf16>, vector<128x128xbf16>, vector<224x128xf32> -> vector<224x128xf32>
    %c0_46 = arith.constant 0 : index
    %c0_47 = arith.constant 0 : index
    %35 = vector.load %arg6[%c0_46, %c0_47] : memref<224x128xf32, #tpu.memory_space<vmem>>, vector<224x128xf32>
    %36 = arith.addf %35, %34 : vector<224x128xf32>
    %c0_48 = arith.constant 0 : index
    %c0_49 = arith.constant 0 : index
    %37 = vector.load %arg6[%c0_48, %c0_49] : memref<224x128xf32, #tpu.memory_space<vmem>>, vector<224x128xf32>
    tpu.vector_store %arg6[%c0_48, %c0_49], %36 {strides = array<i32>} : memref<224x128xf32, #tpu.memory_space<vmem>>, vector<224x128xf32>,
    %c0_50 = arith.constant 0 : index
    %c0_51 = arith.constant 0 : index
    %c18 = arith.constant 18 : index
    %c0_52 = arith.constant 0 : index
    %38 = vector.load %arg1[%c0_50, %c0_51, %c18, %c0_52] : memref<1x1x264x128xbf16, #tpu.memory_space<vmem>>, vector<1x1x224x128xbf16>
    %39 = vector.shape_cast %38 : vector<1x1x224x128xbf16> to vector<224x128xbf16>
    %c5 = arith.constant 5 : index
    %c0_53 = arith.constant 0 : index
    %c0_54 = arith.constant 0 : index
    %40 = vector.load %arg2[%c5, %c0_53, %c0_54] : memref<9x128x128xbf16, #tpu.memory_space<vmem>>, vector<1x128x128xbf16>
    %41 = vector.shape_cast %40 : vector<1x128x128xbf16> to vector<128x128xbf16>
    %cst_55 = arith.constant dense<0.000000e+00> : vector<224x128xf32>
    %42 = tpu.matmul %39, %41, %cst_55 {dimension_numbers = #tpu.dot_dimension_numbers<[1], [0], [0], [1], [0, 0, 1, 1], [], []>} : vector<224x128xbf16>, vector<128x128xbf16>, vector<224x128xf32> -> vector<224x128xf32>
    %c0_56 = arith.constant 0 : index
    %c0_57 = arith.constant 0 : index
    %43 = vector.load %arg6[%c0_56, %c0_57] : memref<224x128xf32, #tpu.memory_space<vmem>>, vector<224x128xf32>
    %44 = arith.addf %43, %42 : vector<224x128xf32>
    %c0_58 = arith.constant 0 : index
    %c0_59 = arith.constant 0 : index
    %45 = vector.load %arg6[%c0_58, %c0_59] : memref<224x128xf32, #tpu.memory_space<vmem>>, vector<224x128xf32>
    tpu.vector_store %arg6[%c0_58, %c0_59], %44 {strides = array<i32>} : memref<224x128xf32, #tpu.memory_space<vmem>>, vector<224x128xf32>,
    %c0_60 = arith.constant 0 : index
    %c0_61 = arith.constant 0 : index
    %c32 = arith.constant 32 : index
    %c0_62 = arith.constant 0 : index
    %46 = vector.load %arg1[%c0_60, %c0_61, %c32, %c0_62] : memref<1x1x264x128xbf16, #tpu.memory_space<vmem>>, vector<1x1x224x128xbf16>
    %47 = vector.shape_cast %46 : vector<1x1x224x128xbf16> to vector<224x128xbf16>
    %c6 = arith.constant 6 : index
    %c0_63 = arith.constant 0 : index
    %c0_64 = arith.constant 0 : index
    %48 = vector.load %arg2[%c6, %c0_63, %c0_64] : memref<9x128x128xbf16, #tpu.memory_space<vmem>>, vector<1x128x128xbf16>
    %49 = vector.shape_cast %48 : vector<1x128x128xbf16> to vector<128x128xbf16>
    %cst_65 = arith.constant dense<0.000000e+00> : vector<224x128xf32>
    %50 = tpu.matmul %47, %49, %cst_65 {dimension_numbers = #tpu.dot_dimension_numbers<[1], [0], [0], [1], [0, 0, 1, 1], [], []>} : vector<224x128xbf16>, vector<128x128xbf16>, vector<224x128xf32> -> vector<224x128xf32>
    %c0_66 = arith.constant 0 : index
    %c0_67 = arith.constant 0 : index
    %51 = vector.load %arg6[%c0_66, %c0_67] : memref<224x128xf32, #tpu.memory_space<vmem>>, vector<224x128xf32>
    %52 = arith.addf %51, %50 : vector<224x128xf32>
    %c0_68 = arith.constant 0 : index
    %c0_69 = arith.constant 0 : index
    %53 = vector.load %arg6[%c0_68, %c0_69] : memref<224x128xf32, #tpu.memory_space<vmem>>, vector<224x128xf32>
    tpu.vector_store %arg6[%c0_68, %c0_69], %52 {strides = array<i32>} : memref<224x128xf32, #tpu.memory_space<vmem>>, vector<224x128xf32>,
    %c0_70 = arith.constant 0 : index
    %c0_71 = arith.constant 0 : index
    %c33 = arith.constant 33 : index
    %c0_72 = arith.constant 0 : index
    %54 = vector.load %arg1[%c0_70, %c0_71, %c33, %c0_72] : memref<1x1x264x128xbf16, #tpu.memory_space<vmem>>, vector<1x1x224x128xbf16>
    %55 = vector.shape_cast %54 : vector<1x1x224x128xbf16> to vector<224x128xbf16>
    %c7 = arith.constant 7 : index
    %c0_73 = arith.constant 0 : index
    %c0_74 = arith.constant 0 : index
    %56 = vector.load %arg2[%c7, %c0_73, %c0_74] : memref<9x128x128xbf16, #tpu.memory_space<vmem>>, vector<1x128x128xbf16>
    %57 = vector.shape_cast %56 : vector<1x128x128xbf16> to vector<128x128xbf16>
    %cst_75 = arith.constant dense<0.000000e+00> : vector<224x128xf32>
    %58 = tpu.matmul %55, %57, %cst_75 {dimension_numbers = #tpu.dot_dimension_numbers<[1], [0], [0], [1], [0, 0, 1, 1], [], []>} : vector<224x128xbf16>, vector<128x128xbf16>, vector<224x128xf32> -> vector<224x128xf32>
    %c0_76 = arith.constant 0 : index
    %c0_77 = arith.constant 0 : index
    %59 = vector.load %arg6[%c0_76, %c0_77] : memref<224x128xf32, #tpu.memory_space<vmem>>, vector<224x128xf32>
    %60 = arith.addf %59, %58 : vector<224x128xf32>
    %c0_78 = arith.constant 0 : index
    %c0_79 = arith.constant 0 : index
    %61 = vector.load %arg6[%c0_78, %c0_79] : memref<224x128xf32, #tpu.memory_space<vmem>>, vector<224x128xf32>
    tpu.vector_store %arg6[%c0_78, %c0_79], %60 {strides = array<i32>} : memref<224x128xf32, #tpu.memory_space<vmem>>, vector<224x128xf32>,
    %c0_80 = arith.constant 0 : index
    %c0_81 = arith.constant 0 : index
    %c34 = arith.constant 34 : index
    %c0_82 = arith.constant 0 : index
    %62 = vector.load %arg1[%c0_80, %c0_81, %c34, %c0_82] : memref<1x1x264x128xbf16, #tpu.memory_space<vmem>>, vector<1x1x224x128xbf16>
    %63 = vector.shape_cast %62 : vector<1x1x224x128xbf16> to vector<224x128xbf16>
    %c8 = arith.constant 8 : index
    %c0_83 = arith.constant 0 : index
    %c0_84 = arith.constant 0 : index
    %64 = vector.load %arg2[%c8, %c0_83, %c0_84] : memref<9x128x128xbf16, #tpu.memory_space<vmem>>, vector<1x128x128xbf16>
    %65 = vector.shape_cast %64 : vector<1x128x128xbf16> to vector<128x128xbf16>
    %cst_85 = arith.constant dense<0.000000e+00> : vector<224x128xf32>
    %66 = tpu.matmul %63, %65, %cst_85 {dimension_numbers = #tpu.dot_dimension_numbers<[1], [0], [0], [1], [0, 0, 1, 1], [], []>} : vector<224x128xbf16>, vector<128x128xbf16>, vector<224x128xf32> -> vector<224x128xf32>
    %c0_86 = arith.constant 0 : index
    %c0_87 = arith.constant 0 : index
    %67 = vector.load %arg6[%c0_86, %c0_87] : memref<224x128xf32, #tpu.memory_space<vmem>>, vector<224x128xf32>
    %68 = arith.addf %67, %66 : vector<224x128xf32>
    %c0_88 = arith.constant 0 : index
    %c0_89 = arith.constant 0 : index
    %69 = vector.load %arg6[%c0_88, %c0_89] : memref<224x128xf32, #tpu.memory_space<vmem>>, vector<224x128xf32>
    tpu.vector_store %arg6[%c0_88, %c0_89], %68 {strides = array<i32>} : memref<224x128xf32, #tpu.memory_space<vmem>>, vector<224x128xf32>,
    %c0_90 = arith.constant 0 : index
    %c0_91 = arith.constant 0 : index
    %70 = vector.load %arg6[%c0_90, %c0_91] : memref<224x128xf32, #tpu.memory_space<vmem>>, vector<224x128xf32>
    %71 = arith.truncf %70 : vector<224x128xf32> to vector<224x128xbf16>
    %c0_92 = arith.constant 0 : index
    %c0_93 = arith.constant 0 : index
    %c0_94 = arith.constant 0 : index
    %72 = vector.load %arg4[%c0_92, %c0_93, %c0_94] : memref<1x224x128xbf16, #tpu.memory_space<vmem>>, vector<1x224x128xbf16>
    %73 = vector.shape_cast %72 : vector<1x224x128xbf16> to vector<224x128xbf16>
    %74 = vector.shape_cast %71 : vector<224x128xbf16> to vector<1x224x128xbf16>
    tpu.vector_store %arg4[%c0_92, %c0_93, %c0_94], %74 {strides = array<i32>} : memref<1x224x128xbf16, #tpu.memory_space<vmem>>, vector<1x224x128xbf16>,
    %c0_95 = arith.constant 0 : index
    %c0_96 = arith.constant 0 : index
    %75 = vector.load %arg3[%c0_95, %c0_96] : memref<224x1xf32, #tpu.memory_space<vmem>>, vector<224x1xf32>
    %76 = vector.broadcast %75 : vector<224x1xf32> to vector<224x128xf32>
    %77 = arith.mulf %70, %76 : vector<224x128xf32>
    %cst_97 = arith.constant dense<0.000000e+00> : vector<128xf32>
    %78 = vector.multi_reduction <add>, %77, %cst_97 [0] : vector<224x128xf32> to vector<128xf32>
    %79 = vector.shape_cast %78 : vector<128xf32> to vector<1x128xf32>
    %80 = arith.mulf %77, %70 : vector<224x128xf32>
    %cst_98 = arith.constant dense<0.000000e+00> : vector<128xf32>
    %81 = vector.multi_reduction <add>, %80, %cst_98 [0] : vector<224x128xf32> to vector<128xf32>
    %82 = vector.shape_cast %81 : vector<128xf32> to vector<1x128xf32>
    %83 = tpu.concatenate %79, %82 in 0 : vector<1x128xf32>, vector<1x128xf32> -> vector<2x128xf32>
    %c0_99 = arith.constant 0 : index
    %c0_100 = arith.constant 0 : index
    %c0_101 = arith.constant 0 : index
    %84 = vector.load %arg5[%c0_99, %c0_100, %c0_101] : memref<1x2x128xf32, #tpu.memory_space<vmem>>, vector<1x2x128xf32>
    %85 = vector.shape_cast %84 : vector<1x2x128xf32> to vector<2x128xf32>
    %86 = vector.shape_cast %83 : vector<2x128xf32> to vector<1x2x128xf32>
    tpu.vector_store %arg5[%c0_99, %c0_100, %c0_101], %86 {strides = array<i32>} : memref<1x2x128xf32, #tpu.memory_space<vmem>>, vector<1x2x128xf32>,
    return
  }
  func.func @transform_0(%arg0: i32) -> (i32, i32, i32, i32) {
    %c0_i32 = arith.constant 0 : i32
    %c0_i32_0 = arith.constant 0 : i32
    %c0_i32_1 = arith.constant 0 : i32
    %c0_i32_2 = arith.constant 0 : i32
    return %arg0, %c0_i32, %c0_i32_0, %c0_i32_1 : i32, i32, i32, i32
  }
  func.func @transform_1(%arg0: i32) -> (i32, i32, i32) {
    %c0_i32 = arith.constant 0 : i32
    %c0_i32_0 = arith.constant 0 : i32
    %c0_i32_1 = arith.constant 0 : i32
    %c0_i32_2 = arith.constant 0 : i32
    return %c0_i32, %c0_i32_0, %c0_i32_1 : i32, i32, i32
  }
  func.func @transform_2(%arg0: i32) -> (i32, i32) {
    %c0_i32 = arith.constant 0 : i32
    %c0_i32_0 = arith.constant 0 : i32
    %c0_i32_1 = arith.constant 0 : i32
    return %c0_i32, %c0_i32_0 : i32, i32
  }
  func.func @transform_3(%arg0: i32) -> (i32, i32, i32) {
    %c0_i32 = arith.constant 0 : i32
    %c0_i32_0 = arith.constant 0 : i32
    %c0_i32_1 = arith.constant 0 : i32
    return %arg0, %c0_i32, %c0_i32_0 : i32, i32, i32
  }
  func.func @transform_4(%arg0: i32) -> (i32, i32, i32) {
    %c0_i32 = arith.constant 0 : i32
    %c0_i32_0 = arith.constant 0 : i32
    %c0_i32_1 = arith.constant 0 : i32
    return %arg0, %c0_i32, %c0_i32_0 : i32, i32, i32
  }
}

module attributes {stable_mosaic.version = 11 : i64} {
  func.func @_epilogue_kernel(%arg0: i32, %arg1: memref<1x224x128xbf16, #tpu.memory_space<vmem>>, %arg2: memref<1x128xf32, #tpu.memory_space<vmem>>, %arg3: memref<1x128xf32, #tpu.memory_space<vmem>>, %arg4: memref<1x224x128xbf16, #tpu.memory_space<vmem>>, %arg5: memref<1x224x128xf32, #tpu.memory_space<vmem>>) attributes {dimension_semantics = [#tpu.dimension_semantics<parallel>], iteration_bounds = array<i64: 2>, scalar_prefetch = 0 : i64, scratch_operands = 0 : i64, tpu.core_type = #tpu.core_type<tc>, window_params = [{transform_indices = @transform_0, window_bounds = array<i64: 1, 224, 128>}, {pipeline_mode = #tpu.pipeline_mode<synchronous>, transform_indices = @transform_1, window_bounds = array<i64: 1, 128>}, {pipeline_mode = #tpu.pipeline_mode<synchronous>, transform_indices = @transform_2, window_bounds = array<i64: 1, 128>}, {transform_indices = @transform_3, window_bounds = array<i64: 1, 224, 128>}, {transform_indices = @transform_4, window_bounds = array<i64: 1, 224, 128>}]} {
    %c0 = arith.constant 0 : index
    %c0_0 = arith.constant 0 : index
    %c0_1 = arith.constant 0 : index
    %0 = vector.load %arg1[%c0, %c0_0, %c0_1] : memref<1x224x128xbf16, #tpu.memory_space<vmem>>, vector<1x224x128xbf16>
    %1 = vector.shape_cast %0 : vector<1x224x128xbf16> to vector<224x128xbf16>
    %2 = arith.extf %1 : vector<224x128xbf16> to vector<224x128xf32>
    %c0_2 = arith.constant 0 : index
    %c0_3 = arith.constant 0 : index
    %3 = vector.load %arg2[%c0_2, %c0_3] : memref<1x128xf32, #tpu.memory_space<vmem>>, vector<1x128xf32>
    %4 = vector.broadcast %3 : vector<1x128xf32> to vector<224x128xf32>
    %5 = arith.mulf %2, %4 : vector<224x128xf32>
    %c0_4 = arith.constant 0 : index
    %c0_5 = arith.constant 0 : index
    %6 = vector.load %arg3[%c0_4, %c0_5] : memref<1x128xf32, #tpu.memory_space<vmem>>, vector<1x128xf32>
    %7 = vector.broadcast %6 : vector<1x128xf32> to vector<224x128xf32>
    %8 = arith.addf %5, %7 : vector<224x128xf32>
    %cst = arith.constant 0.000000e+00 : f32
    %9 = vector.broadcast %cst : f32 to vector<224x128xf32>
    %10 = arith.maximumf %8, %9 : vector<224x128xf32>
    %c0_6 = arith.constant 0 : index
    %c0_7 = arith.constant 0 : index
    %c0_8 = arith.constant 0 : index
    %11 = vector.load %arg4[%c0_6, %c0_7, %c0_8] : memref<1x224x128xbf16, #tpu.memory_space<vmem>>, vector<1x224x128xbf16>
    %12 = vector.shape_cast %11 : vector<1x224x128xbf16> to vector<224x128xbf16>
    %13 = arith.extf %12 : vector<224x128xbf16> to vector<224x128xf32>
    %14 = arith.addf %10, %13 : vector<224x128xf32>
    %cst_9 = arith.constant 0.000000e+00 : f32
    %15 = vector.broadcast %cst_9 : f32 to vector<224x128xf32>
    %16 = arith.maximumf %14, %15 : vector<224x128xf32>
    %c0_10 = arith.constant 0 : index
    %c0_11 = arith.constant 0 : index
    %c0_12 = arith.constant 0 : index
    %17 = vector.load %arg5[%c0_10, %c0_11, %c0_12] : memref<1x224x128xf32, #tpu.memory_space<vmem>>, vector<1x224x128xf32>
    %18 = vector.shape_cast %17 : vector<1x224x128xf32> to vector<224x128xf32>
    %19 = vector.shape_cast %16 : vector<224x128xf32> to vector<1x224x128xf32>
    tpu.vector_store %arg5[%c0_10, %c0_11, %c0_12], %19 {strides = array<i32>} : memref<1x224x128xf32, #tpu.memory_space<vmem>>, vector<1x224x128xf32>,
    return
  }
  func.func @transform_0(%arg0: i32) -> (i32, i32, i32) {
    %c0_i32 = arith.constant 0 : i32
    %c0_i32_0 = arith.constant 0 : i32
    %c0_i32_1 = arith.constant 0 : i32
    return %arg0, %c0_i32, %c0_i32_0 : i32, i32, i32
  }
  func.func @transform_1(%arg0: i32) -> (i32, i32) {
    %c0_i32 = arith.constant 0 : i32
    %c0_i32_0 = arith.constant 0 : i32
    %c0_i32_1 = arith.constant 0 : i32
    return %c0_i32, %c0_i32_0 : i32, i32
  }
  func.func @transform_2(%arg0: i32) -> (i32, i32) {
    %c0_i32 = arith.constant 0 : i32
    %c0_i32_0 = arith.constant 0 : i32
    %c0_i32_1 = arith.constant 0 : i32
    return %c0_i32, %c0_i32_0 : i32, i32
  }
  func.func @transform_3(%arg0: i32) -> (i32, i32, i32) {
    %c0_i32 = arith.constant 0 : i32
    %c0_i32_0 = arith.constant 0 : i32
    %c0_i32_1 = arith.constant 0 : i32
    return %arg0, %c0_i32, %c0_i32_0 : i32, i32, i32
  }
  func.func @transform_4(%arg0: i32) -> (i32, i32, i32) {
    %c0_i32 = arith.constant 0 : i32
    %c0_i32_0 = arith.constant 0 : i32
    %c0_i32_1 = arith.constant 0 : i32
    return %arg0, %c0_i32, %c0_i32_0 : i32, i32, i32
  }
}

</mosaic_0001>

<bundles_post_ra>
// kernel: plainblock_forward.5
= control target key start
LH: loop header
LB: loop body
LE: loop exit
PB: predicated region body
PF: predicated region fallthrough
CT: control target
= control target key end

     0   :  { %s766_s15 = smov 0   ;;  %s922_s0 = inlined_call_operand.vmem [shape: bf16[2,224,128], index: 0, kind: input, shape index: {}]   ;;  %s923_s1 = inlined_call_operand.vmem [shape: f32[1,128], index: 1, kind: input, shape index: {}]   ;;  %s924_s2 = inlined_call_operand.vmem [shape: f32[1,128], index: 2, kind: input, shape index: {}]   ;;  %s925_s3 = inlined_call_operand.vmem [shape: bf16[2,224,128], index: 3, kind: input, shape index: {}]   ;;  %s926_s4 = inlined_call_operand.vmem [shape: f32[2,224,128], index: 4, kind: output, shape index: {}]  }
   0x1 LB: > { %s573_s16 = sadd.s32 4294967295, %s739_s15   ;;  %p577_p0 = scmp.ge.s32.totalorder %s739_s15, 1  ;;  %s739_s15 = sphi %s766_s15, %s14_s15  }
   0x2   : > { %p172_p1 = scmp.lt.s32.totalorder %s739_s15, 3 }
   0x4   : > { %p173_p2 = pnand %p577_p0, %p172_p1 }
   0x5   : > { %p203_p3 = scmp.lt.s32.totalorder (!%p173_p2), %s573_s16, 1 }
   0x6   : > { %176 = sbr.rel (%p173_p2) target bundleno = 71 (0x47), region = 36 }
   0xb   : > { %s928_s16 = smov (!%p203_p3, %s573_s16), 1  ;;  %v790_v0 = vld [vmem:[%s923_s1] ss:$0 sm:$0xff] }
   0xc   : > { %s721_s17 = smul.u32 112, %s928_s16  ;;  %v795_v1 = vld [vmem:[%s924_s2] ss:$0 sm:$0xff] }
   0xd   : > { %s722_s28 = smul.u32 224, %s928_s16 }
   0xe   : > { %s780_s20 = scalar_lea.vmem %s922_s0, %s721_s17  ;;  %s785_s23 = scalar_lea.vmem %s925_s3, %s721_s17 }
   0xf   : > { %v584_v2 = vld [vmem:[%s780_s20] sm:$0xff]   ;;  %v695_v4 = vld [vmem:[%s780_s20 + $0x8] sm:$0xff]   ;;  %v696_v10 = vld [vmem:[%s780_s20 + $0x10] sm:$0xff]   ;;  %s823_s5 = scalar_lea.vmem %s926_s4, %s722_s28 }
  0x10   : > { %v640_v3 = vld [vmem:[%s785_s23] sm:$0xff]   ;;  %v585_v5 = vunpack.c.l.bf16 %v584_v2  ;;  %v586_v7 = vunpack.c.h.bf16 %v584_v2  ;;  %v708_v9 = vld [vmem:[%s785_s23 + $0x8] sm:$0xff]   ;;  %v709_v11 = vld [vmem:[%s785_s23 + $0x10] sm:$0xff]   ;;  %v589_v12 = vunpack.c.l.bf16 %v695_v4  ;;  %v590_v14 = vunpack.c.h.bf16 %v695_v4 }
  0x11   : > { %v641_v6 = vunpack.c.l.bf16 %v640_v3  ;;  %v642_v8 = vunpack.c.h.bf16 %v640_v3  ;;  %v645_v13 = vunpack.c.l.bf16 %v708_v9  ;;  %v646_v15 = vunpack.c.h.bf16 %v708_v9  ;;  %v697_v16 = vld [vmem:[%s780_s20 + $0x18] sm:$0xff]   ;;  %v698_v50 = vld [vmem:[%s780_s20 + $0x20] sm:$0xff]   ;;  %v699_v60 = vld [vmem:[%s780_s20 + $0x28] sm:$0xff]  }
  0x12   : > { %v278_v17 = vmul.f32 %v790_v0, %v585_v5  ;;  %v279_v18 = vmul.f32 %v790_v0, %v586_v7  ;;  %v593_v19 = vunpack.c.l.bf16 %v696_v10  ;;  %v649_v20 = vunpack.c.l.bf16 %v709_v11  ;;  %v710_v21 = vld [vmem:[%s785_s23 + $0x18] sm:$0xff]   ;;  %v711_v55 = vld [vmem:[%s785_s23 + $0x20] sm:$0xff]   ;;  %v712_v3 = vld [vmem:[%s785_s23 + $0x28] sm:$0xff]  }
  0x13   : > { %v280_v22 = vmul.f32 %v790_v0, %v589_v12  ;;  %v281_v23 = vmul.f32 %v790_v0, %v590_v14  ;;  %v594_v24 = vunpack.c.h.bf16 %v696_v10  ;;  %v650_v25 = vunpack.c.h.bf16 %v709_v11 }
  0x14   : > { %v310_v26 = vadd.f32 %v795_v1, %v278_v17  ;;  %v311_v27 = vadd.f32 %v795_v1, %v279_v18  ;;  %v282_v28 = vmul.f32 %v790_v0, %v593_v19  ;;  %v597_v29 = vunpack.c.l.bf16 %v697_v16 }
  0x15   : > { %v312_v30 = vadd.f32 %v795_v1, %v280_v22  ;;  %v313_v31 = vadd.f32 %v795_v1, %v281_v23  ;;  %v283_v32 = vmul.f32 %v790_v0, %v594_v24  ;;  %v653_v33 = vunpack.c.l.bf16 %v710_v21  ;;  %v701_v22 = vld [vmem:[%s780_s20 + $0x38] sm:$0xff]  }
  0x16   : > { %v338_v34 = vmax.f32 %v310_v26, 0.0  ;;  %v339_v35 = vmax.f32 %v311_v27, 0.0  ;;  %v314_v36 = vadd.f32 %v795_v1, %v282_v28  ;;  %v284_v37 = vmul.f32 %v790_v0, %v597_v29 }
  0x17   : > { %v340_v38 = vmax.f32 %v312_v30, 0.0  ;;  %v341_v39 = vmax.f32 %v313_v31, 0.0  ;;  %v315_v40 = vadd.f32 %v795_v1, %v283_v32  ;;  %v598_v41 = vunpack.c.h.bf16 %v697_v16  ;;  %v850_v31 = vld [vmem:[%s785_s23 + $0x38] sm:$0xff]  }
  0x18   : > { %v422_v42 = vadd.f32 %v641_v6, %v338_v34  ;;  %v423_v43 = vadd.f32 %v642_v8, %v339_v35  ;;  %v342_v44 = vmax.f32 %v314_v36, 0.0  ;;  %v316_v45 = vadd.f32 %v795_v1, %v284_v37  ;;  %v700_v8 = vld [vmem:[%s780_s20 + $0x30] sm:$0xff]  }
  0x19   : > { %v424_v46 = vadd.f32 %v645_v13, %v340_v38  ;;  %v425_v47 = vadd.f32 %v646_v15, %v341_v39  ;;  %v343_v48 = vmax.f32 %v315_v40, 0.0  ;;  %v285_v49 = vmul.f32 %v790_v0, %v598_v41  ;;  %v713_v13 = vld [vmem:[%s785_s23 + $0x30] sm:$0xff]  }
  0x1a   : > { %v450_v51 = vmax.f32 %v422_v42, 0.0  ;;  %v451_v52 = vmax.f32 %v423_v43, 0.0  ;;  %v426_v53 = vadd.f32 %v649_v20, %v342_v44  ;;  %v344_v54 = vmax.f32 %v316_v45, 0.0 }
  0x1b   : > { %v452_v56 = vmax.f32 %v424_v46, 0.0  ;;  %v453_v57 = vmax.f32 %v425_v47, 0.0  ;;  %v427_v58 = vadd.f32 %v650_v25, %v343_v48  ;;  %v317_v59 = vadd.f32 %v795_v1, %v285_v49  ;;  %v702_v48 = vld [vmem:[%s780_s20 + $0x40] sm:$0xff]  }
  0x1c   : > { %478 = vst [vmem:[%s823_s5] sm:$0xff] %v450_v51  ;;  %v454_v61 = vmax.f32 %v426_v53, 0.0  ;;  %v428_v62 = vadd.f32 %v653_v33, %v344_v54  ;;  %v654_v63 = vunpack.c.h.bf16 %v710_v21  ;;  %v601_v2 = vunpack.c.l.bf16 %v698_v50 }
  0x1d   : > { %479 = vst [vmem:[%s823_s5 + $0x8] sm:$0xff] %v451_v52  ;;  %v455_v4 = vmax.f32 %v427_v58, 0.0  ;;  %v345_v5 = vmax.f32 %v317_v59, 0.0  ;;  %v657_v6 = vunpack.c.l.bf16 %v711_v55  ;;  %v602_v7 = vunpack.c.h.bf16 %v698_v50 }
  0x1e   : > { %480 = vst [vmem:[%s823_s5 + $0x10] sm:$0xff] %v452_v56  ;;  %v456_v9 = vmax.f32 %v428_v62, 0.0  ;;  %v286_v10 = vmul.f32 %v790_v0, %v601_v2  ;;  %v658_v11 = vunpack.c.h.bf16 %v711_v55  ;;  %v605_v12 = vunpack.c.l.bf16 %v699_v60  ;;  %v715_v56 = vld [vmem:[%s785_s23 + $0x40] sm:$0xff]  }
  0x1f   : > { %481 = vst [vmem:[%s823_s5 + $0x18] sm:$0xff] %v453_v57  ;;  %v429_v14 = vadd.f32 %v654_v63, %v345_v5  ;;  %v287_v15 = vmul.f32 %v790_v0, %v602_v7  ;;  %v661_v16 = vunpack.c.l.bf16 %v712_v3  ;;  %v606_v17 = vunpack.c.h.bf16 %v699_v60 }
  0x20   : > { %482 = vst [vmem:[%s823_s5 + $0x20] sm:$0xff] %v454_v61  ;;  %v318_v18 = vadd.f32 %v795_v1, %v286_v10  ;;  %v288_v19 = vmul.f32 %v790_v0, %v605_v12  ;;  %v662_v20 = vunpack.c.h.bf16 %v712_v3  ;;  %v609_v21 = vunpack.c.l.bf16 %v700_v8  ;;  %v703_v61 = vld [vmem:[%s780_s20 + $0x48] sm:$0xff]  }
  0x21   : > { %483 = vst [vmem:[%s823_s5 + $0x28] sm:$0xff] %v455_v4  ;;  %v457_v23 = vmax.f32 %v429_v14, 0.0  ;;  %v319_v24 = vadd.f32 %v795_v1, %v287_v15  ;;  %v289_v25 = vmul.f32 %v790_v0, %v606_v17  ;;  %v665_v26 = vunpack.c.l.bf16 %v713_v13 }
  0x22   : > { %484 = vst [vmem:[%s823_s5 + $0x30] sm:$0xff] %v456_v9  ;;  %v346_v27 = vmax.f32 %v318_v18, 0.0  ;;  %v320_v28 = vadd.f32 %v795_v1, %v288_v19  ;;  %v290_v29 = vmul.f32 %v790_v0, %v609_v21  ;;  %v610_v30 = vunpack.c.h.bf16 %v700_v8  ;;  %v716_v8 = vld [vmem:[%s785_s23 + $0x48] sm:$0xff]   ;;  %v704_v9 = vld [vmem:[%s780_s20 + $0x50] sm:$0xff]  }
  0x23   : > { %485 = vst [vmem:[%s823_s5 + $0x38] sm:$0xff] %v457_v23  ;;  %v347_v32 = vmax.f32 %v319_v24, 0.0  ;;  %v321_v33 = vadd.f32 %v795_v1, %v289_v25  ;;  %v666_v34 = vunpack.c.h.bf16 %v713_v13  ;;  %v613_v35 = vunpack.c.l.bf16 %v701_v22 }
  0x24   : > { %v430_v36 = vadd.f32 %v657_v6, %v346_v27  ;;  %v348_v37 = vmax.f32 %v320_v28, 0.0  ;;  %v322_v38 = vadd.f32 %v795_v1, %v290_v29  ;;  %v291_v39 = vmul.f32 %v790_v0, %v610_v30 }
  0x25   : > { %v431_v40 = vadd.f32 %v658_v11, %v347_v32  ;;  %v349_v41 = vmax.f32 %v321_v33, 0.0  ;;  %v292_v42 = vmul.f32 %v790_v0, %v613_v35  ;;  %v669_v43 = vunpack.c.l.bf16 %v850_v31 }
  0x26   : > { %v458_v44 = vmax.f32 %v430_v36, 0.0  ;;  %v432_v45 = vadd.f32 %v661_v16, %v348_v37  ;;  %v350_v46 = vmax.f32 %v322_v38, 0.0  ;;  %v323_v47 = vadd.f32 %v795_v1, %v291_v39 }
  0x27   : > { %v459_v49 = vmax.f32 %v431_v40, 0.0  ;;  %v433_v50 = vadd.f32 %v662_v20, %v349_v41  ;;  %v324_v51 = vadd.f32 %v795_v1, %v292_v42  ;;  %v614_v52 = vunpack.c.h.bf16 %v701_v22  ;;  %v717_v22 = vld [vmem:[%s785_s23 + $0x50] sm:$0xff]  }
  0x28   : > { %486 = vst [vmem:[%s823_s5 + $0x40] sm:$0xff] %v458_v44  ;;  %v460_v53 = vmax.f32 %v432_v45, 0.0  ;;  %v434_v54 = vadd.f32 %v665_v26, %v350_v46  ;;  %v351_v55 = vmax.f32 %v323_v47, 0.0  ;;  %v617_v60 = vunpack.c.l.bf16 %v702_v48  ;;  %v706_v44 = vld [vmem:[%s780_s20 + $0x60] sm:$0xff]  }
  0x29   : > { %487 = vst [vmem:[%s823_s5 + $0x48] sm:$0xff] %v459_v49  ;;  %v461_v57 = vmax.f32 %v433_v50, 0.0  ;;  %v352_v58 = vmax.f32 %v324_v51, 0.0  ;;  %v293_v59 = vmul.f32 %v790_v0, %v614_v52  ;;  %v670_v2 = vunpack.c.h.bf16 %v850_v31  ;;  %v705_v31 = vld [vmem:[%s780_s20 + $0x58] sm:$0xff]  }
  0x2a   : > { %488 = vst [vmem:[%s823_s5 + $0x50] sm:$0xff] %v460_v53  ;;  %v462_v62 = vmax.f32 %v434_v54, 0.0  ;;  %v435_v63 = vadd.f32 %v666_v34, %v351_v55  ;;  %v618_v3 = vunpack.c.h.bf16 %v702_v48  ;;  %v294_v6 = vmul.f32 %v790_v0, %v617_v60  ;;  %v718_v49 = vld [vmem:[%s785_s23 + $0x58] sm:$0xff]  }
  0x2b   : > { %489 = vst [vmem:[%s823_s5 + $0x58] sm:$0xff] %v461_v57  ;;  %v436_v4 = vadd.f32 %v669_v43, %v352_v58  ;;  %v325_v5 = vadd.f32 %v795_v1, %v293_v59  ;;  %v673_v7 = vunpack.c.l.bf16 %v715_v56  ;;  %v674_v12 = vunpack.c.h.bf16 %v715_v56  ;;  %v707_v57 = vld [vmem:[%s780_s20 + $0x68] sm:$0xff]  }
  0x2c   : > { %490 = vst [vmem:[%s823_s5 + $0x60] sm:$0xff] %v462_v62  ;;  %v463_v10 = vmax.f32 %v435_v63, 0.0  ;;  %v295_v11 = vmul.f32 %v790_v0, %v618_v3  ;;  %v621_v13 = vunpack.c.l.bf16 %v703_v61  ;;  %v326_v16 = vadd.f32 %v795_v1, %v294_v6  ;;  %v719_v62 = vld [vmem:[%s785_s23 + $0x60] sm:$0xff]  }
  0x2d   : > { %v464_v14 = vmax.f32 %v436_v4, 0.0  ;;  %v353_v15 = vmax.f32 %v325_v5, 0.0  ;;  %v622_v17 = vunpack.c.h.bf16 %v703_v61  ;;  %v677_v20 = vunpack.c.l.bf16 %v716_v8 }
  0x2e   : > { %491 = vst [vmem:[%s823_s5 + $0x68] sm:$0xff] %v463_v10  ;;  %v327_v18 = vadd.f32 %v795_v1, %v295_v11  ;;  %v296_v19 = vmul.f32 %v790_v0, %v621_v13  ;;  %v625_v21 = vunpack.c.l.bf16 %v704_v9  ;;  %v354_v24 = vmax.f32 %v326_v16, 0.0 }
  0x2f   : > { %492 = vst [vmem:[%s823_s5 + $0x70] sm:$0xff] %v464_v14  ;;  %v437_v23 = vadd.f32 %v670_v2, %v353_v15  ;;  %v297_v25 = vmul.f32 %v790_v0, %v622_v17  ;;  %v678_v26 = vunpack.c.h.bf16 %v716_v8  ;;  %v626_v30 = vunpack.c.h.bf16 %v704_v9  ;;  %v720_v9 = vld [vmem:[%s785_s23 + $0x68] sm:$0xff]  }
  0x30   : > { %v355_v27 = vmax.f32 %v327_v18, 0.0  ;;  %v328_v28 = vadd.f32 %v795_v1, %v296_v19  ;;  %v298_v29 = vmul.f32 %v790_v0, %v625_v21  ;;  %v438_v33 = vadd.f32 %v673_v7, %v354_v24 }
  0x31   : > { %v465_v32 = vmax.f32 %v437_v23, 0.0  ;;  %v329_v34 = vadd.f32 %v795_v1, %v297_v25  ;;  %v681_v35 = vunpack.c.l.bf16 %v717_v22  ;;  %v299_v39 = vmul.f32 %v790_v0, %v626_v30 }
  0x32   : > { %v439_v36 = vadd.f32 %v674_v12, %v355_v27  ;;  %v356_v37 = vmax.f32 %v328_v28, 0.0  ;;  %v330_v38 = vadd.f32 %v795_v1, %v298_v29  ;;  %v466_v40 = vmax.f32 %v438_v33, 0.0 }
  0x33   : > { %493 = vst [vmem:[%s823_s5 + $0x78] sm:$0xff] %v465_v32  ;;  %v357_v41 = vmax.f32 %v329_v34, 0.0  ;;  %v682_v42 = vunpack.c.h.bf16 %v717_v22  ;;  %v629_v43 = vunpack.c.l.bf16 %v705_v31  ;;  %v331_v48 = vadd.f32 %v795_v1, %v299_v39 }
  0x34   : > { %v467_v45 = vmax.f32 %v439_v36, 0.0  ;;  %v440_v46 = vadd.f32 %v677_v20, %v356_v37  ;;  %v358_v47 = vmax.f32 %v330_v38, 0.0  ;;  %494 = vst [vmem:[%s823_s5 + $0x80] sm:$0xff] %v466_v40  ;;  %v630_v52 = vunpack.c.h.bf16 %v705_v31 }
  0x35   : > { %v441_v50 = vadd.f32 %v678_v26, %v357_v41  ;;  %v300_v51 = vmul.f32 %v790_v0, %v629_v43  ;;  %v359_v55 = vmax.f32 %v331_v48, 0.0  ;;  %v633_v56 = vunpack.c.l.bf16 %v706_v44 }
  0x36   : > { %495 = vst [vmem:[%s823_s5 + $0x88] sm:$0xff] %v467_v45  ;;  %v468_v53 = vmax.f32 %v440_v46, 0.0  ;;  %v442_v54 = vadd.f32 %v681_v35, %v358_v47  ;;  %v685_v60 = vunpack.c.l.bf16 %v718_v49  ;;  %v301_v61 = vmul.f32 %v790_v0, %v630_v52 }
  0x37   : > { %v469_v58 = vmax.f32 %v441_v50, 0.0  ;;  %v332_v59 = vadd.f32 %v795_v1, %v300_v51  ;;  %v443_v2 = vadd.f32 %v682_v42, %v359_v55  ;;  %v302_v3 = vmul.f32 %v790_v0, %v633_v56 }
  0x38   : > { %496 = vst [vmem:[%s823_s5 + $0x90] sm:$0xff] %v468_v53  ;;  %v470_v63 = vmax.f32 %v442_v54, 0.0  ;;  %v634_v4 = vunpack.c.h.bf16 %v706_v44  ;;  %v333_v6 = vadd.f32 %v795_v1, %v301_v61  ;;  %v686_v7 = vunpack.c.h.bf16 %v718_v49 }
  0x39   : > { %497 = vst [vmem:[%s823_s5 + $0x98] sm:$0xff] %v469_v58  ;;  %v360_v5 = vmax.f32 %v332_v59, 0.0  ;;  %v637_v8 = vunpack.c.l.bf16 %v707_v57  ;;  %v471_v10 = vmax.f32 %v443_v2, 0.0  ;;  %v334_v11 = vadd.f32 %v795_v1, %v302_v3 }
  0x3a   : > { %498 = vst [vmem:[%s823_s5 + $0xa0] sm:$0xff] %v470_v63  ;;  %v689_v12 = vunpack.c.l.bf16 %v719_v62  ;;  %v303_v13 = vmul.f32 %v790_v0, %v634_v4  ;;  %v361_v15 = vmax.f32 %v333_v6, 0.0  ;;  %v638_v17 = vunpack.c.h.bf16 %v707_v57 }
  0x3b   : > { %v444_v14 = vadd.f32 %v685_v60, %v360_v5  ;;  %v304_v16 = vmul.f32 %v790_v0, %v637_v8  ;;  %499 = vst [vmem:[%s823_s5 + $0xa8] sm:$0xff] %v471_v10  ;;  %v362_v18 = vmax.f32 %v334_v11, 0.0  ;;  %v690_v20 = vunpack.c.h.bf16 %v719_v62 }
  0x3c   : > { %v335_v19 = vadd.f32 %v795_v1, %v303_v13  ;;  %v693_v21 = vunpack.c.l.bf16 %v720_v9  ;;  %v445_v23 = vadd.f32 %v686_v7, %v361_v15  ;;  %v305_v25 = vmul.f32 %v790_v0, %v638_v17 }
  0x3d   : > { %v472_v22 = vmax.f32 %v444_v14, 0.0  ;;  %v336_v24 = vadd.f32 %v795_v1, %v304_v16  ;;  %v446_v26 = vadd.f32 %v689_v12, %v362_v18  ;;  %v694_v31 = vunpack.c.h.bf16 %v720_v9 }
  0x3e   : > { %v363_v27 = vmax.f32 %v335_v19, 0.0  ;;  %v473_v28 = vmax.f32 %v445_v23, 0.0  ;;  %v337_v30 = vadd.f32 %v795_v1, %v305_v25 }
  0x3f   : > { %500 = vst [vmem:[%s823_s5 + $0xb0] sm:$0xff] %v472_v22  ;;  %v364_v29 = vmax.f32 %v336_v24, 0.0  ;;  %v474_v32 = vmax.f32 %v446_v26, 0.0 }
  0x40   : > { %v447_v33 = vadd.f32 %v690_v20, %v363_v27  ;;  %501 = vst [vmem:[%s823_s5 + $0xb8] sm:$0xff] %v473_v28  ;;  %v365_v35 = vmax.f32 %v337_v30, 0.0 }
  0x41   : > { %v448_v34 = vadd.f32 %v693_v21, %v364_v29  ;;  %502 = vst [vmem:[%s823_s5 + $0xc0] sm:$0xff] %v474_v32 }
  0x42   : > { %v475_v36 = vmax.f32 %v447_v33, 0.0  ;;  %v449_v0 = vadd.f32 %v694_v31, %v365_v35 }
  0x43   : > { %v476_v37 = vmax.f32 %v448_v34, 0.0 }
  0x44   : > { %503 = vst [vmem:[%s823_s5 + $0xc8] sm:$0xff] %v475_v36  ;;  %v477_v38 = vmax.f32 %v449_v0, 0.0 }
  0x45   : > { %504 = vst [vmem:[%s823_s5 + $0xd0] sm:$0xff] %v476_v37 }
  0x46   : > { %505 = vst [vmem:[%s823_s5 + $0xd8] sm:$0xff] %v477_v38 }
  0x47 PF: > { %s14_s15 = sadd.s32 1, %s739_s15  }
  0x48   : > { %p11_p4 = scmp.ge.s32.totalorder %s14_s15, 4  }
  0x4a   :  { %13 = sbr.rel (!%p11_p4) target bundleno = 1 (0x1), region = 69 }

// kernel: plainblock_forward.4
= control target key start
LH: loop header
LB: loop body
LE: loop exit
PB: predicated region body
PF: predicated region fallthrough
CT: control target
= control target key end

     0   :  { %s5419_s15 = smov 0   ;;  %s6305_s0 = inlined_call_operand.vmem [shape: bf16[2,1,264,128], index: 0, kind: input, shape index: {}]   ;;  %s6306_s1 = inlined_call_operand.vmem [shape: bf16[9,128,128], index: 1, kind: input, shape index: {}]   ;;  %s6307_s2 = inlined_call_operand.vmem [shape: f32[224,1], index: 2, kind: input, shape index: {}]   ;;  %s6308_s3 = inlined_call_operand.vmem [shape: bf16[2,224,128], index: 3, kind: output, shape index: {0}]   ;;  %s6309_s4 = inlined_call_operand.vmem [shape: f32[2,2,128], index: 4, kind: output, shape index: {1}]  }
   0x1 LB: > { %s4136_s16 = sadd.s32 4294967295, %s5391_s15   ;;  %p4140_p0 = scmp.ge.s32.totalorder %s5391_s15, 1  ;;  %s5391_s15 = sphi %s5419_s15, %s15_s15  }
   0x2   : > { %p165_p1 = scmp.lt.s32.totalorder %s5391_s15, 3 }
   0x4   : > { %p166_p2 = pnand %p4140_p0, %p165_p1 }
   0x5   : > { %p195_p3 = scmp.lt.s32.totalorder (!%p166_p2), %s4136_s16, 1 }
   0x6   : > { %169 = sbr.rel (%p166_p2) target bundleno = 706 (0x2c2), region = 32 }
   0xb   : > { %v5087_v0 = vld [vmem:[%s6306_s1 + $0x38] sm:$0xff]  ;;  %v5086_v1 = vld [vmem:[%s6306_s1 + $0x30] sm:$0xff]  ;;  %v5085_v2 = vld [vmem:[%s6306_s1 + $0x28] sm:$0xff]  ;;  %s6311_s16 = smov (!%p195_p3, %s4136_s16), 1  ;;  %vm1072_vm0 = vcmask 1046528   ;;  %vm4047_vm2 = vcmask 1040384  }
   0xc   : > { %385 = vmatpush.bf16.msra.mxu0 %v5087_v0  ;;  %5347 = vmatpush.bf16.msra.mxu1 %v5087_v0  ;;  %v5084_v3 = vld [vmem:[%s6306_s1 + $0x20] sm:$0xff]  ;;  %v5083_v4 = vld [vmem:[%s6306_s1 + $0x18] sm:$0xff]  ;;  %v5082_v5 = vld [vmem:[%s6306_s1 + $0x10] sm:$0xff]  ;;  %s5371_s5 = smul.u32 132, %s6311_s16  ;;  %vm611_vm1 = vsmask.f32 7424 }
   0xd   : > { %5349 = vmatpush.bf16.msra.mxu3 %v5087_v0  ;;  %5348 = vmatpush.bf16.msra.mxu2 %v5087_v0  ;;  %v5081_v6 = vld [vmem:[%s6306_s1 + $0x8] sm:$0xff]  ;;  %v5080_v7 = vld [vmem:[%s6306_s1] sm:$0xff]  ;;  %v5109_v8 = vld [vmem:[%s6306_s1 + $0x78] sm:$0xff]  ;;  %s5372_s30 = smul.u32 112, %s6311_s16 }
   0xe   : > { %s5461_s10 = scalar_lea.vmem %s6305_s0, %s5371_s5  ;;  %v5153_v9 = vld [vmem:[%s6306_s1 + $0xf8] sm:$0xff]  ;;  %v5108_v14 = vld [vmem:[%s6306_s1 + $0x70] sm:$0xff]  ;;  %v5107_v19 = vld [vmem:[%s6306_s1 + $0x68] sm:$0xff] }
   0xf   : > { %v5175_v10 = vld [vmem:[%s6306_s1 + $0x138] sm:$0xff]  ;;  %v5066_v11 = vld [vmem:[%s5461_s10] sm:$0xff]  ;;  %v5076_v13 = vld [vmem:[%s5461_s10 + $0x50] sm:$0xff]  ;;  %s6164_s7 = scalar_lea.vmem %s6308_s3, %s5372_s30 }
  0x10   : > { %386 = vmatpush.bf16.msra.mxu0 %v5086_v1  ;;  %5350 = vmatpush.bf16.msra.mxu1 %v5086_v1  ;;  %v5070_v12 = vld [vmem:[%s5461_s10 + $0x20] sm:$0xff]  ;;  %v5131_v15 = vld [vmem:[%s6306_s1 + $0xb8] sm:$0xff]  ;;  %v5152_v16 = vld [vmem:[%s6306_s1 + $0xf0] sm:$0xff] }
  0x11   : > { %5352 = vmatpush.bf16.msra.mxu3 %v5086_v1  ;;  %5351 = vmatpush.bf16.msra.mxu2 %v5086_v1  ;;  %v5174_v17 = vld [vmem:[%s6306_s1 + $0x130] sm:$0xff]  ;;  %v5074_v18 = vld [vmem:[%s5461_s10 + $0x40] sm:$0xff]  ;;  %v5151_v21 = vld [vmem:[%s6306_s1 + $0xe8] sm:$0xff] }
  0x12   : > { %v5130_v20 = vld [vmem:[%s6306_s1 + $0xb0] sm:$0xff]  ;;  %v5173_v22 = vld [vmem:[%s6306_s1 + $0x128] sm:$0xff]  ;;  %v5106_v23 = vld [vmem:[%s6306_s1 + $0x60] sm:$0xff] }
  0x13   : > { %v5129_v24 = vld [vmem:[%s6306_s1 + $0xa8] sm:$0xff]  ;;  %v5150_v25 = vld [vmem:[%s6306_s1 + $0xe0] sm:$0xff]  ;;  %v5105_v27 = vld [vmem:[%s6306_s1 + $0x58] sm:$0xff] }
  0x14   : > { %387 = vmatpush.bf16.msra.mxu0 %v5085_v2  ;;  %5353 = vmatpush.bf16.msra.mxu1 %v5085_v2  ;;  %v5172_v26 = vld [vmem:[%s6306_s1 + $0x120] sm:$0xff]  ;;  %v5149_v29 = vld [vmem:[%s6306_s1 + $0xd8] sm:$0xff]  ;;  %v5067_v31 = vld [vmem:[%s5461_s10 + $0x8] sm:$0xff] }
  0x15   : > { %5355 = vmatpush.bf16.msra.mxu3 %v5085_v2  ;;  %5354 = vmatpush.bf16.msra.mxu2 %v5085_v2  ;;  %v5128_v28 = vld [vmem:[%s6306_s1 + $0xa0] sm:$0xff]  ;;  %v5171_v30 = vld [vmem:[%s6306_s1 + $0x118] sm:$0xff]  ;;  %v5071_v32 = vld [vmem:[%s5461_s10 + $0x28] sm:$0xff] }
  0x16   : > { %v5077_v33 = vld [vmem:[%s5461_s10 + $0x58] sm:$0xff]  ;;  %v5104_v35 = vld [vmem:[%s6306_s1 + $0x50] sm:$0xff]  ;;  %v5075_v37 = vld [vmem:[%s5461_s10 + $0x48] sm:$0xff] }
  0x17   : > { %v5127_v34 = vld [vmem:[%s6306_s1 + $0x98] sm:$0xff]  ;;  %v5148_v36 = vld [vmem:[%s6306_s1 + $0xd0] sm:$0xff]  ;;  %v5103_v40 = vld [vmem:[%s6306_s1 + $0x48] sm:$0xff] }
  0x18   : > { %388 = vmatpush.bf16.msra.mxu0 %v5084_v3  ;;  %5356 = vmatpush.bf16.msra.mxu1 %v5084_v3  ;;  %v5170_v38 = vld [vmem:[%s6306_s1 + $0x110] sm:$0xff]  ;;  %v5147_v41 = vld [vmem:[%s6306_s1 + $0xc8] sm:$0xff]  ;;  %v4354_v44 = vld [vmem:[%s5461_s10] sm:$0xe] }
  0x19   : > { %5358 = vmatpush.bf16.msra.mxu3 %v5084_v3  ;;  %5357 = vmatpush.bf16.msra.mxu2 %v5084_v3  ;;  %v5126_v39 = vld [vmem:[%s6306_s1 + $0x90] sm:$0xff]  ;;  %v5169_v42 = vld [vmem:[%s6306_s1 + $0x108] sm:$0xff]  ;;  %v5110_v45 = vld [vmem:[%s5461_s10] sm:$0xf0] }
  0x1a   : > { %v5125_v43 = vld [vmem:[%s6306_s1 + $0x88] sm:$0xff]  ;;  %v5102_v46 = vld [vmem:[%s6306_s1 + $0x40] sm:$0xff]  ;;  %v4355_v50 = vor.u32 %v5110_v45, %v4354_v44  ;;  %v5219_v52 = vld [vmem:[%s6306_s1 + $0x1b8] sm:$0xff] }
  0x1b   : > { %v5146_v47 = vld [vmem:[%s6306_s1 + $0xc0] sm:$0xff]  ;;  %v5111_v49 = vld [vmem:[%s5461_s10 + $0x8] sm:$0xff]  ;;  %v5068_v53 = vld [vmem:[%s5461_s10 + $0x10] sm:$0xff] }
  0x1c   : > { %389 = vmatpush.bf16.msra.mxu0 %v5083_v4  ;;  %5359 = vmatpush.bf16.msra.mxu1 %v5083_v4  ;;  %v5168_v48 = vld [vmem:[%s6306_s1 + $0x100] sm:$0xff]  ;;  %v5072_v54 = vld [vmem:[%s5461_s10 + $0x30] sm:$0xff]  ;;  %v1073_v56 = vrot.slane %v4355_v50, 1  ;;  %v1074_v57 = vrot.slane %v5111_v49, 1  ;;  %v5241_v59 = vld [vmem:[%s6306_s1 + $0x1f8] sm:$0xff] }
  0x1d   : > { %5361 = vmatpush.bf16.msra.mxu3 %v5083_v4  ;;  %5360 = vmatpush.bf16.msra.mxu2 %v5083_v4  ;;  %v5124_v51 = vld [vmem:[%s6306_s1 + $0x80] sm:$0xff]  ;;  %v5197_v60 = vld [vmem:[%s6306_s1 + $0x178] sm:$0xff]  ;;  %v5112_v62 = vld [vmem:[%s5461_s10 + $0x10] sm:$0xff] }
  0x1e   : > { %v5078_v55 = vld [vmem:[%s5461_s10 + $0x60] sm:$0xff]  ;;  %v1075_v58 = vsel %vm1072_vm0, %v1073_v56, %v1074_v57  ;;  %v5263_v61 = vld [vmem:[%s6306_s1 + $0x238] sm:$0xff]  ;;  %v5079_v1 = vld [vmem:[%s5461_s10 + $0x68] sm:$0xff]  ;;  %v1076_v4 = vrot.slane %v5112_v62, 1 }
  0x1f   : > { %v5069_v63 = vld [vmem:[%s5461_s10 + $0x18] sm:$0xff]  ;;  %v5088_v2 = vld [vmem:[%s5461_s10] sm:$0xff]  ;;  %v5154_v3 = vld [vmem:[%s5461_s10 + $0x8] sm:$0xff] }
  0x20   : > { %390 = vmatpush.bf16.msra.mxu0 %v5082_v5  ;;  %5362 = vmatpush.bf16.msra.mxu1 %v5082_v5  ;;  %v5073_v0 = vld [vmem:[%s5461_s10 + $0x38] sm:$0xff]  ;;  %v5239_v49 = vld [vmem:[%s6306_s1 + $0x1e8] sm:$0xff] }
  0x21   : > { %5364 = vmatpush.bf16.msra.mxu3 %v5082_v5  ;;  %5363 = vmatpush.bf16.msra.mxu2 %v5082_v5  ;;  %v5089_v5 = vld [vmem:[%s5461_s10 + $0x8] sm:$0xff]  ;;  %v5091_v45 = vld [vmem:[%s5461_s10 + $0x18] sm:$0xff] }
  0x22   : > { %v5195_v50 = vld [vmem:[%s6306_s1 + $0x168] sm:$0xff] }
  0x24   : > { %391 = vmatpush.bf16.msra.mxu0 %v5081_v6  ;;  %5365 = vmatpush.bf16.msra.mxu1 %v5081_v6 }
  0x25   : > { %5367 = vmatpush.bf16.msra.mxu3 %v5081_v6  ;;  %5366 = vmatpush.bf16.msra.mxu2 %v5081_v6  ;;  %v615_v6 = vshll.u32 %v5088_v2, 16 }
  0x28   : > { %392 = vmatpush.bf16.msra.mxu0 %v5080_v7  ;;  %5368 = vmatpush.bf16.msra.mxu1 %v5080_v7 }
  0x29   : > { %5370 = vmatpush.bf16.msra.mxu3 %v5080_v7  ;;  %5369 = vmatpush.bf16.msra.mxu2 %v5080_v7  ;;  %v5155_v7 = vld [vmem:[%s5461_s10 + $0x10] sm:$0xff] }
  0x2b   : > { %393 = vmatmul.bf16.vlgmr.msra.gmra.mxu0 %v5066_v11  ;;  %413 = vmatmul.bf16.vlgmr.msra.gmra.mxu1 %v5070_v12  ;;  %v5240_v11 = vld [vmem:[%s6306_s1 + $0x1f0] sm:$0xff] }
  0x2c   : > { %790 = vmatpush.bf16.msrb.mxu1 %v5109_v8  ;;  %1964 = vmatpush.bf16.msrb.mxu0 %v5175_v10  ;;  %v1789_v8 = vshll.u32 %v5154_v3, 16  ;;  %v5218_v10 = vld [vmem:[%s6306_s1 + $0x1b0] sm:$0xff] }
  0x2d   : > { %1504 = vmatpush.bf16.msrb.mxu3 %v5153_v9  ;;  %1164 = vmatpush.bf16.msrb.mxu2 %v5131_v15  ;;  %v1077_v9 = vsel %vm1072_vm0, %v1074_v57, %v1076_v4  ;;  %v5196_v12 = vld [vmem:[%s6306_s1 + $0x170] sm:$0xff]  ;;  %v617_v15 = vrot.slane %v615_v6, 1 }
  0x2e   : > { %443 = vmatmul.bf16.vlgmr.msra.gmra.mxu3 %v5076_v13  ;;  %433 = vmatmul.bf16.vlgmr.msra.gmra.mxu2 %v5074_v18  ;;  %v613_v13 = vshrl.u32 %v5088_v2, 16  ;;  %v1794_v18 = vshll.u32 %v5155_v7, 16 }
  0x30   : > { %791 = vmatpush.bf16.msrb.mxu1 %v5108_v14  ;;  %1965 = vmatpush.bf16.msrb.mxu0 %v5174_v17  ;;  %v620_v14 = vshll.u32 %v5089_v5, 16  ;;  %v1791_v17 = vrot.slane %v1789_v8, 1 }
  0x31   : > { %1505 = vmatpush.bf16.msrb.mxu3 %v5152_v16  ;;  %1165 = vmatpush.bf16.msrb.mxu2 %v5130_v20  ;;  %v1787_v16 = vshrl.u32 %v5154_v3, 16  ;;  %v5261_v3 = vld [vmem:[%s6306_s1 + $0x228] sm:$0xff] }
  0x32   : > { %v622_v20 = vrot.slane %v620_v14, 1  ;;  %v5135_v14 = vld [vmem:[%s5461_s10 + $0x20] sm:$0xff] }
  0x34   : > { %792 = vmatpush.bf16.msrb.mxu1 %v5107_v19  ;;  %1966 = vmatpush.bf16.msrb.mxu0 %v5173_v22  ;;  %v618_v19 = vor.u32 %v617_v15, %v613_v13  ;;  %v1796_v22 = vrot.slane %v1794_v18, 1  ;;  %v5159_v18 = vld [vmem:[%s5461_s10 + $0x30] sm:$0xff] }
  0x35   : > { %1506 = vmatpush.bf16.msrb.mxu3 %v5151_v21  ;;  %1166 = vmatpush.bf16.msrb.mxu2 %v5129_v24  ;;  %v1792_v21 = vor.u32 %v1791_v17, %v1787_v16  ;;  %v5093_v17 = vld [vmem:[%s5461_s10 + $0x28] sm:$0xff] }
  0x36   : > { %v623_v24 = vsel %vm611_vm1, %v618_v19, %v622_v20 }
  0x38   : > { %793 = vmatpush.bf16.msrb.mxu1 %v5106_v23  ;;  %1967 = vmatpush.bf16.msrb.mxu0 %v5172_v26  ;;  %v5113_v23 = vld [vmem:[%s5461_s10 + $0x18] sm:$0xff]  ;;  %v1797_v26 = vsel %vm611_vm1, %v1792_v21, %v1796_v22  ;;  %v5238_v21 = vld [vmem:[%s6306_s1 + $0x1e0] sm:$0xff] }
  0x39   : > { %1507 = vmatpush.bf16.msrb.mxu3 %v5150_v25  ;;  %1167 = vmatpush.bf16.msrb.mxu2 %v5128_v28  ;;  %v5132_v25 = vld [vmem:[%s5461_s10 + $0x8] sm:$0xff]  ;;  %v5090_v28 = vld [vmem:[%s5461_s10 + $0x10] sm:$0xff] }
  0x3b   : > { %398 = vmatmul.bf16.gmra.mxu0 %v5067_v31  ;;  %418 = vmatmul.bf16.gmra.mxu1 %v5071_v32  ;;  %v5262_v31 = vld [vmem:[%s6306_s1 + $0x230] sm:$0xff]  ;;  %v624_v32 = vshrl.u32 %v5089_v5, 16 }
  0x3c   : > { %794 = vmatpush.bf16.msrb.mxu1 %v5105_v27  ;;  %1968 = vmatpush.bf16.msrb.mxu0 %v5171_v30  ;;  %v1078_v27 = vrot.slane %v5113_v23, 1  ;;  %v652_v23 = vshll.u32 %v5093_v17, 16 }
  0x3d   : > { %1508 = vmatpush.bf16.msrb.mxu3 %v5149_v29  ;;  %1168 = vmatpush.bf16.msrb.mxu2 %v5127_v34  ;;  %v5156_v29 = vld [vmem:[%s5461_s10 + $0x18] sm:$0xff]  ;;  %v1798_v34 = vshrl.u32 %v5155_v7, 16 }
  0x3e   : > { %448 = vmatmul.bf16.gmra.mxu3 %v5077_v33  ;;  %438 = vmatmul.bf16.gmra.mxu2 %v5075_v37  ;;  %v1079_v30 = vsel %vm1072_vm0, %v1076_v4, %v1078_v27  ;;  %v628_v33 = vshll.u32 %v5090_v28, 16  ;;  %v640_v4 = vshrl.u32 %v5091_v45, 16 }
  0x40   : > { %795 = vmatpush.bf16.msrb.mxu1 %v5104_v35  ;;  %1969 = vmatpush.bf16.msrb.mxu0 %v5170_v38  ;;  %v1802_v35 = vshll.u32 %v5156_v29, 16  ;;  %v630_v37 = vrot.slane %v628_v33, 1  ;;  %v1800_v38 = vor.u32 %v1798_v34, %v1796_v22 }
  0x41   : > { %1509 = vmatpush.bf16.msrb.mxu3 %v5148_v36  ;;  %1169 = vmatpush.bf16.msrb.mxu2 %v5126_v39  ;;  %v626_v36 = vor.u32 %v624_v32, %v622_v20  ;;  %v5216_v20 = vld [vmem:[%s6306_s1 + $0x1a0] sm:$0xff] }
  0x42   : > { %v1804_v39 = vrot.slane %v1802_v35, 1  ;;  %v5260_v32 = vld [vmem:[%s6306_s1 + $0x220] sm:$0xff] }
  0x44   : > { %796 = vmatpush.bf16.msrb.mxu1 %v5103_v40  ;;  %1970 = vmatpush.bf16.msrb.mxu0 %v5169_v42  ;;  %v5114_v40 = vld [vmem:[%s5461_s10 + $0x20] sm:$0xff]  ;;  %v5133_v42 = vld [vmem:[%s5461_s10 + $0x10] sm:$0xff] }
  0x45   : > { %1510 = vmatpush.bf16.msrb.mxu3 %v5147_v41  ;;  %1170 = vmatpush.bf16.msrb.mxu2 %v5125_v43  ;;  %v631_v41 = vsel %vm611_vm1, %v626_v36, %v630_v37  ;;  %v1805_v43 = vsel %vm611_vm1, %v1800_v38, %v1804_v39  ;;  %v1080_v44 = vrot.slane %v5114_v40, 1  ;;  %v5136_v36 = vld [vmem:[%s5461_s10 + $0x28] sm:$0xff]  ;;  %v5160_v40 = vld [vmem:[%s5461_s10 + $0x38] sm:$0xff] }
  0x48   : > { %797 = vmatpush.bf16.msrb.mxu1 %v5102_v46  ;;  %1971 = vmatpush.bf16.msrb.mxu0 %v5168_v48  ;;  %v5157_v46 = vld [vmem:[%s5461_s10 + $0x20] sm:$0xff]  ;;  %v5217_v48 = vld [vmem:[%s6306_s1 + $0x1a8] sm:$0xff] }
  0x49   : > { %1511 = vmatpush.bf16.msrb.mxu3 %v5146_v47  ;;  %1171 = vmatpush.bf16.msrb.mxu2 %v5124_v51  ;;  %v1081_v47 = vsel %vm1072_vm0, %v1078_v27, %v1080_v44  ;;  %v632_v51 = vshrl.u32 %v5090_v28, 16  ;;  %v1814_v6 = vshrl.u32 %v5157_v46, 16  ;;  %v654_v28 = vrot.slane %v652_v23, 1  ;;  %v5138_v23 = vld [vmem:[%s5461_s10 + $0x38] sm:$0xff] }
  0x4b   : > { %403 = vmatmul.bf16.gmra.mxu0 %v5068_v53  ;;  %423 = vmatmul.bf16.gmra.mxu1 %v5072_v54  ;;  %v1806_v53 = vshrl.u32 %v5156_v29, 16  ;;  %v1810_v54 = vshll.u32 %v5157_v46, 16 }
  0x4c   : > { %2337 = vmatpush.bf16.msra.mxu1 %v5197_v60  ;;  %3510 = vmatpush.bf16.msra.mxu0 %v5263_v61  ;;  %v5134_v61 = vld [vmem:[%s5461_s10 + $0x18] sm:$0xff] }
  0x4d   : > { %2677 = vmatpush.bf16.msra.mxu2 %v5219_v52  ;;  %3137 = vmatpush.bf16.msra.mxu3 %v5241_v59  ;;  %v636_v52 = vshll.u32 %v5091_v45, 16  ;;  %v1808_v57 = vor.u32 %v1806_v53, %v1804_v39  ;;  %v5115_v59 = vld [vmem:[%s5461_s10 + $0x28] sm:$0xff]  ;;  %v5094_v39 = vld [vmem:[%s5461_s10 + $0x30] sm:$0xff]  ;;  %v656_v45 = vshrl.u32 %v5093_v17, 16 }
  0x4e   : > { %453 = vmatmul.bf16.gmra.mxu3 %v5078_v55  ;;  %1172 = vmatmul.bf16.vlgmr.msrb.gmra.mxu2 %v1075_v58  ;;  %v634_v55 = vor.u32 %v632_v51, %v630_v37  ;;  %v1812_v58 = vrot.slane %v1810_v54, 1  ;;  %v660_v46 = vshll.u32 %v5094_v39, 16  ;;  %v5118_v54 = vld [vmem:[%s5461_s10 + $0x40] sm:$0xff] }
  0x4f   : > { %v638_v56 = vrot.slane %v636_v52, 1 }
  0x50   : > { %2338 = vmatpush.bf16.msra.mxu1 %v5196_v12  ;;  %3511 = vmatpush.bf16.msra.mxu0 %v5262_v31  ;;  %v1813_v62 = vsel %vm611_vm1, %v1808_v57, %v1812_v58  ;;  %v5116_v12 = vld [vmem:[%s5461_s10 + $0x30] sm:$0xff]  ;;  %v5117_v31 = vld [vmem:[%s5461_s10 + $0x38] sm:$0xff]  ;;  %v662_v51 = vrot.slane %v660_v46, 1 }
  0x51   : > { %2678 = vmatpush.bf16.msra.mxu2 %v5218_v10  ;;  %3138 = vmatpush.bf16.msra.mxu3 %v5240_v11  ;;  %v639_v60 = vsel %vm611_vm1, %v634_v55, %v638_v56  ;;  %v642_v8 = vor.u32 %v640_v4, %v638_v56  ;;  %v1816_v10 = vor.u32 %v1814_v6, %v1812_v58  ;;  %v1084_v16 = vrot.slane %v5116_v12, 1  ;;  %v5193_v4 = vld [vmem:[%s6306_s1 + $0x158] sm:$0xff] }
  0x52   : > { %v1086_v38 = vrot.slane %v5117_v31, 1  ;;  %v5259_v12 = vld [vmem:[%s6306_s1 + $0x218] sm:$0xff] }
  0x54   : > { %2339 = vmatpush.bf16.msra.mxu1 %v5195_v50  ;;  %3512 = vmatpush.bf16.msra.mxu0 %v5261_v3  ;;  %v658_v50 = vor.u32 %v656_v45, %v654_v28  ;;  %v5237_v3 = vld [vmem:[%s6306_s1 + $0x1d8] sm:$0xff] }
  0x55   : > { %2679 = vmatpush.bf16.msra.mxu2 %v5217_v48  ;;  %3139 = vmatpush.bf16.msra.mxu3 %v5239_v49  ;;  %v1834_v48 = vshll.u32 %v5160_v40, 16 }
  0x56   : > { %v663_v58 = vsel %vm611_vm1, %v658_v50, %v662_v51 }
  0x57   : > { %v1836_v53 = vrot.slane %v1834_v48, 1  ;;  %v5120_v48 = vld [vmem:[%s5461_s10 + $0x50] sm:$0xff] }
  0x58   : > { %3513 = vmatpush.bf16.msra.mxu0 %v5260_v32 }
  0x59   : > { %2680 = vmatpush.bf16.msra.mxu2 %v5216_v20  ;;  %3140 = vmatpush.bf16.msra.mxu3 %v5238_v21 }
  0x5b   : > { %408 = vmatmul.bf16.gmra.mxu0 %v5069_v63  ;;  %428 = vmatmul.bf16.gmra.mxu1 %v5073_v0  ;;  %v1082_v63 = vrot.slane %v5115_v59, 1  ;;  %v5092_v0 = vld [vmem:[%s5461_s10 + $0x20] sm:$0xff]  ;;  %v5137_v59 = vld [vmem:[%s5461_s10 + $0x30] sm:$0xff] }
  0x5c   : > { %v644_v5 = vshll.u32 %v5092_v0, 16  ;;  %v648_v22 = vshrl.u32 %v5092_v0, 16  ;;  %v5095_v0 = vld [vmem:[%s5461_s10 + $0x38] sm:$0xff]  ;;  %3514 = vmatpush.bf16.msra.mxu0 %v5259_v12 }
  0x5d   : > { %v1083_v2 = vsel %vm1072_vm0, %v1080_v44, %v1082_v63  ;;  %v1085_v19 = vsel %vm1072_vm0, %v1082_v63, %v1084_v16  ;;  %3141 = vmatpush.bf16.msra.mxu3 %v5237_v3 }
  0x5e   : > { %458 = vmatmul.bf16.gmra.mxu3 %v5079_v1  ;;  %1177 = vmatmul.bf16.gmra.mxu2 %v1077_v9  ;;  %v5158_v1 = vld [vmem:[%s5461_s10 + $0x28] sm:$0xff]  ;;  %v646_v9 = vrot.slane %v644_v5, 1 }
  0x5f   : > { %v1818_v7 = vshll.u32 %v5158_v1, 16 }
  0x60   : > { %v647_v13 = vsel %vm611_vm1, %v642_v8, %v646_v9  ;;  %v650_v27 = vor.u32 %v648_v22, %v646_v9  ;;  %v664_v8 = vshrl.u32 %v5094_v39, 16  ;;  %v668_v9 = vshll.u32 %v5095_v0, 16  ;;  %v5214_v39 = vld [vmem:[%s6306_s1 + $0x190] sm:$0xff] }
  0x61   : > { %v1820_v11 = vrot.slane %v1818_v7, 1 }
  0x62   : > { %v655_v35 = vsel %vm611_vm1, %v650_v27, %v654_v28  ;;  %v5096_v27 = vld [vmem:[%s5461_s10 + $0x40] sm:$0xff]  ;;  %v5162_v28 = vld [vmem:[%s5461_s10 + $0x48] sm:$0xff] }
  0x63   : > { %v1821_v15 = vsel %vm611_vm1, %v1816_v10, %v1820_v11  ;;  %v1838_v10 = vshrl.u32 %v5160_v40, 16 }
  0x6b   : > { %798 = vmatmul.bf16.vlgmr.msrb.gmra.mxu1 %v623_v24  ;;  %1972 = vmatmul.bf16.vlgmr.msrb.gmra.mxu0 %v1797_v26  ;;  %v1822_v24 = vshrl.u32 %v5158_v1, 16  ;;  %v5194_v26 = vld [vmem:[%s6306_s1 + $0x160] sm:$0xff] }
  0x6c   : > { %2340 = vmatpush.bf16.msra.mxu1 %v5194_v26  ;;  %v5161_v1 = vld [vmem:[%s5461_s10 + $0x40] sm:$0xff] }
  0x6d   : > { %v1824_v29 = vor.u32 %v1822_v24, %v1820_v11  ;;  %v1842_v11 = vshll.u32 %v5161_v1, 16 }
  0x6e   : > { %1512 = vmatmul.bf16.vlgmr.msrb.gmra.mxu3 %v5132_v25  ;;  %1182 = vmatmul.bf16.gmra.mxu2 %v1079_v30  ;;  %v1826_v25 = vshll.u32 %v5159_v18, 16 }
  0x6f   : > { %v1844_v17 = vrot.slane %v1842_v11, 1  ;;  %v1854_v11 = vshrl.u32 %v5162_v28, 16 }
  0x70   : > { %v1828_v30 = vrot.slane %v1826_v25, 1  ;;  %2341 = vmatpush.bf16.msra.mxu1 %v5193_v4 }
  0x72   : > { %v1829_v37 = vsel %vm611_vm1, %v1824_v29, %v1828_v30 }
  0x7b   : > { %803 = vmatmul.bf16.gmra.mxu1 %v631_v41  ;;  %1977 = vmatmul.bf16.gmra.mxu0 %v1805_v43  ;;  %v1087_v41 = vsel %vm1072_vm0, %v1084_v16, %v1086_v38  ;;  %v1840_v16 = vor.u32 %v1838_v10, %v1836_v53 }
  0x7d   : > { %v1845_v24 = vsel %vm611_vm1, %v1840_v16, %v1844_v17 }
  0x7e   : > { %1517 = vmatmul.bf16.gmra.mxu3 %v5133_v42  ;;  %1187 = vmatmul.bf16.gmra.mxu2 %v1081_v47  ;;  %v1830_v47 = vshrl.u32 %v5159_v18, 16  ;;  %v5119_v18 = vld [vmem:[%s5461_s10 + $0x48] sm:$0xff] }
  0x7f   : > { %v1090_v25 = vrot.slane %v5119_v18, 1 }
  0x80   : > { %v1832_v52 = vor.u32 %v1830_v47, %v1828_v30 }
  0x8b   : > { %808 = vmatmul.bf16.gmra.mxu1 %v639_v60  ;;  %1982 = vmatmul.bf16.gmra.mxu0 %v1813_v62  ;;  %v1837_v60 = vsel %vm611_vm1, %v1832_v52, %v1836_v53  ;;  %v5215_v62 = vld [vmem:[%s6306_s1 + $0x198] sm:$0xff] }
  0x8c   : > { %2681 = vmatpush.bf16.msra.mxu2 %v5215_v62 }
  0x8e   : > { %1522 = vmatmul.bf16.gmra.mxu3 %v5134_v61  ;;  %1192 = vmatmul.bf16.gmra.mxu2 %v1083_v2  ;;  %v1088_v61 = vrot.slane %v5118_v54, 1  ;;  %v5139_v54 = vld [vmem:[%s5461_s10 + $0x40] sm:$0xff] }
  0x90   : > { %v1089_v2 = vsel %vm1072_vm0, %v1086_v38, %v1088_v61  ;;  %v1091_v29 = vsel %vm1072_vm0, %v1088_v61, %v1090_v25  ;;  %v1850_v38 = vshll.u32 %v5162_v28, 16  ;;  %2682 = vmatpush.bf16.msra.mxu2 %v5214_v39  ;;  %v5192_v61 = vld [vmem:[%s6306_s1 + $0x150] sm:$0xff] }
  0x91   : > { %2342 = vmatpush.bf16.msra.mxu1 %v5192_v61 }
  0x92   : > { %v1852_v47 = vrot.slane %v1850_v38, 1 }
  0x94   : > { %v1856_v18 = vor.u32 %v1854_v11, %v1852_v47 }
  0x9b   : > { %813 = vmatmul.bf16.gmra.mxu1 %v647_v13  ;;  %1987 = vmatmul.bf16.gmra.mxu0 %v1821_v15  ;;  %v670_v15 = vrot.slane %v668_v9, 1  ;;  %v680_v9 = vshrl.u32 %v5096_v27, 16 }
  0x9e   : > { %1527 = vmatmul.bf16.gmra.mxu3 %v5135_v14  ;;  %1197 = vmatmul.bf16.gmra.mxu2 %v1085_v19  ;;  %v666_v14 = vor.u32 %v664_v8, %v662_v51 }
  0xa0   : > { %v671_v22 = vsel %vm611_vm1, %v666_v14, %v670_v15  ;;  %v5258_v14 = vld [vmem:[%s6306_s1 + $0x210] sm:$0xff] }
  0xa1   : > { %3515 = vmatpush.bf16.msra.mxu0 %v5258_v14 }
  0xa8   : > { %v5660_v33 = vpop.f32.mrf.mxu0  ;;  %v5662_v34 = vpop.f32.mrf.mxu1 }
  0xab   : > { %818 = vmatmul.bf16.gmra.mxu1 %v655_v35  ;;  %1992 = vmatmul.bf16.gmra.mxu0 %v1829_v37  ;;  %v672_v35 = vshrl.u32 %v5095_v0, 16  ;;  %v1846_v37 = vshrl.u32 %v5161_v1, 16  ;;  %v5097_v0 = vld [vmem:[%s5461_s10 + $0x48] sm:$0xff]  ;;  %v5163_v1 = vld [vmem:[%s5461_s10 + $0x50] sm:$0xff] }
  0xac   : > { %v684_v10 = vshll.u32 %v5097_v0, 16  ;;  %v1858_v12 = vshll.u32 %v5163_v1, 16  ;;  %v1862_v61 = vshrl.u32 %v5163_v1, 16 }
  0xad   : > { %v1848_v46 = vor.u32 %v1846_v37, %v1844_v17 }
  0xae   : > { %1532 = vmatmul.bf16.gmra.mxu3 %v5136_v36  ;;  %1202 = vmatmul.bf16.gmra.mxu2 %v1087_v41  ;;  %v676_v36 = vshll.u32 %v5096_v27, 16  ;;  %v674_v41 = vor.u32 %v672_v35, %v670_v15  ;;  %v686_v17 = vrot.slane %v684_v10, 1 }
  0xb0   : > { %v5672_v43 = vpop.f32.mrf.mxu0  ;;  %v5674_v44 = vpop.f32.mrf.mxu1  ;;  %v678_v45 = vrot.slane %v676_v36, 1 }
  0xb1   : > { %v5670_v42 = vpop.f32.mrf.mxu3  ;;  %v5676_v49 = vpop.f32.mrf.mxu2 }
  0xb2   : > { %v679_v53 = vsel %vm611_vm1, %v674_v41, %v678_v45  ;;  %v682_v16 = vor.u32 %v680_v9, %v678_v45  ;;  %v5098_v41 = vld [vmem:[%s5461_s10 + $0x50] sm:$0xff]  ;;  %v5164_v45 = vld [vmem:[%s5461_s10 + $0x58] sm:$0xff] }
  0xb4   : > { %v687_v28 = vsel %vm611_vm1, %v682_v16, %v686_v17  ;;  %v5122_v16 = vld [vmem:[%s5461_s10 + $0x60] sm:$0xff] }
  0xb8   : > { %v5681_v56 = vpop.f32.mrf.mxu0  ;;  %v5683_v57 = vpop.f32.mrf.mxu1 }
  0xb9   : > { %v5679_v55 = vpop.f32.mrf.mxu3  ;;  %v5691_v63 = vpop.f32.mrf.mxu2 }
  0xbb   : > { %823 = vmatmul.bf16.gmra.mxu1 %v663_v58  ;;  %1997 = vmatmul.bf16.gmra.mxu0 %v1837_v60  ;;  %v1853_v58 = vsel %vm611_vm1, %v1848_v46, %v1852_v47  ;;  %v5236_v60 = vld [vmem:[%s6306_s1 + $0x1d0] sm:$0xff] }
  0xbc   : > { %3142 = vmatpush.bf16.msra.mxu3 %v5236_v60  ;;  %v692_v60 = vshll.u32 %v5098_v41, 16 }
  0xbe   : > { %1537 = vmatmul.bf16.gmra.mxu3 %v5137_v59  ;;  %1207 = vmatmul.bf16.gmra.mxu2 %v1089_v2  ;;  %v1092_v59 = vrot.slane %v5120_v48, 1  ;;  %v688_v48 = vshrl.u32 %v5097_v0, 16  ;;  %v5191_v0 = vld [vmem:[%s6306_s1 + $0x148] sm:$0xff]  ;;  %v694_v11 = vrot.slane %v692_v60, 1 }
  0xbf   : > { %2343 = vmatpush.bf16.msra.mxu1 %v5191_v0 }
  0xc0   : > { %v5704_v6 = vpop.f32.mrf.mxu0  ;;  %v5706_v7 = vpop.f32.mrf.mxu1  ;;  %v1093_v2 = vsel %vm1072_vm0, %v1090_v25, %v1092_v59 }
  0xc1   : > { %v5702_v5 = vpop.f32.mrf.mxu3  ;;  %v5711_v13 = vpop.f32.mrf.mxu2 }
  0xc8   : > { %v5716_v20 = vpop.f32.mrf.mxu0  ;;  %v5718_v21 = vpop.f32.mrf.mxu1 }
  0xc9   : > { %v5714_v19 = vpop.f32.mrf.mxu3  ;;  %v5723_v26 = vpop.f32.mrf.mxu2 }
  0xcb   : > { %828 = vmatmul.bf16.gmra.mxu1 %v671_v22  ;;  %2002 = vmatmul.bf16.gmra.mxu0 %v1845_v24  ;;  %v1860_v22 = vrot.slane %v1858_v12, 1 }
  0xcd   : > { %v1861_v35 = vsel %vm611_vm1, %v1856_v18, %v1860_v22  ;;  %v1864_v12 = vor.u32 %v1862_v61, %v1860_v22 }
  0xce   : > { %1542 = vmatmul.bf16.gmra.mxu3 %v5138_v23  ;;  %1212 = vmatmul.bf16.gmra.mxu2 %v1091_v29  ;;  %v5121_v23 = vld [vmem:[%s5461_s10 + $0x58] sm:$0xff]  ;;  %v5140_v29 = vld [vmem:[%s5461_s10 + $0x48] sm:$0xff] }
  0xcf   : > { %v1094_v36 = vrot.slane %v5121_v23, 1 }
  0xd0   : > { %v5730_v31 = vpop.f32.mrf.mxu0  ;;  %v5732_v32 = vpop.f32.mrf.mxu1 }
  0xd1   : > { %v5728_v30 = vpop.f32.mrf.mxu3  ;;  %v1173_v40 = vpop.f32.mrf.mxu2  ;;  %v1095_v46 = vsel %vm1072_vm0, %v1092_v59, %v1094_v36  ;;  %v5235_v59 = vld [vmem:[%s6306_s1 + $0x1c8] sm:$0xff] }
  0xd2   : > { %3143 = vmatpush.bf16.msra.mxu3 %v5235_v59 }
  0xd8   : > { %v5740_v51 = vpop.f32.mrf.mxu0  ;;  %v5742_v52 = vpop.f32.mrf.mxu1 }
  0xd9   : > { %v5738_v50 = vpop.f32.mrf.mxu3  ;;  %v1175_v62 = vpop.f32.mrf.mxu2 }
  0xdb   : > { %833 = vmatmul.bf16.gmra.mxu1 %v679_v53  ;;  %2007 = vmatmul.bf16.gmra.mxu0 %v1853_v58 }
  0xde   : > { %1547 = vmatmul.bf16.gmra.mxu3 %v5139_v54  ;;  %1217 = vmatmul.bf16.gmra.mxu2 %v1093_v2 }
  0xe0   : > { %v5758_v4 = vpop.f32.mrf.mxu0  ;;  %v5760_v8 = vpop.f32.mrf.mxu1 }
  0xe1   : > { %v5756_v3 = vpop.f32.mrf.mxu3  ;;  %v1178_v15 = vpop.f32.mrf.mxu2 }
  0xe8   : > { %v799_v25 = vpop.f32.mrf.mxu1  ;;  %v1973_v27 = vpop.f32.mrf.mxu0 }
  0xe9   : > { %v5766_v24 = vpop.f32.mrf.mxu3  ;;  %v897_v37 = vadd.f32 %v799_v25, %v5660_v33  ;;  %v5772_v38 = vpop.f32.mrf.mxu2  ;;  %v1866_v33 = vshll.u32 %v5164_v45, 16 }
  0xeb   : > { %838 = vmatmul.bf16.gmra.mxu1 %v687_v28  ;;  %2012 = vmatmul.bf16.gmra.mxu0 %v1861_v35  ;;  %v1271_v39 = vadd.f32 %v1173_v40, %v897_v37  ;;  %v5213_v40 = vld [vmem:[%s6306_s1 + $0x188] sm:$0xff]  ;;  %v1868_v14 = vrot.slane %v1866_v33, 1  ;;  %v5141_v35 = vld [vmem:[%s5461_s10 + $0x50] sm:$0xff] }
  0xec   : > { %2683 = vmatpush.bf16.msra.mxu2 %v5213_v40 }
  0xee   : > { %1552 = vmatmul.bf16.gmra.mxu3 %v5140_v29  ;;  %1222 = vmatmul.bf16.gmra.mxu2 %v1095_v46  ;;  %v5099_v46 = vld [vmem:[%s5461_s10 + $0x58] sm:$0xff] }
  0xef   : > { %v700_v33 = vshll.u32 %v5099_v46, 16 }
  0xf0   : > { %v801_v54 = vpop.f32.mrf.mxu1  ;;  %v1975_v58 = vpop.f32.mrf.mxu0 }
  0xf1   : > { %v1513_v47 = vpop.f32.mrf.mxu3  ;;  %v898_v2 = vadd.f32 %v801_v54, %v5672_v43  ;;  %v1183_v9 = vpop.f32.mrf.mxu2  ;;  %v690_v43 = vor.u32 %v688_v48, %v686_v17 }
  0xf2   : > { %v1611_v53 = vadd.f32 %v1513_v47, %v1271_v39  ;;  %v5800_v47 = vld [vmem:[%s5461_s10 + $0x60] sm:$0xff] }
  0xf3   : > { %v1272_v1 = vadd.f32 %v1175_v62, %v898_v2  ;;  %v695_v29 = vsel %vm611_vm1, %v690_v43, %v694_v11  ;;  %v1096_v62 = vrot.slane %v5122_v16, 1  ;;  %v1874_v2 = vshll.u32 %v5800_v47, 16  ;;  %v5814_v16 = vld [vmem:[%s5461_s10 + $0x68] sm:$0xff] }
  0xf4   : > { %v5787_v10 = vadd.f32 %v1973_v27, %v1611_v53  ;;  %v1869_v27 = vsel %vm611_vm1, %v1864_v12, %v1868_v14  ;;  %v5257_v53 = vld [vmem:[%s6306_s1 + $0x208] sm:$0xff] }
  0xf5   : > { %v1097_v48 = vsel %vm1072_vm0, %v1094_v36, %v1096_v62  ;;  %3516 = vmatpush.bf16.msra.mxu0 %v5257_v53  ;;  %v1876_v12 = vrot.slane %v1874_v2, 1  ;;  %v5212_v53 = vld [vmem:[%s6306_s1 + $0x180] sm:$0xff] }
  0xf6   : > { %2684 = vmatpush.bf16.msra.mxu2 %v5212_v53 }
  0xf8   : > { %v804_v25 = vpop.f32.mrf.mxu1  ;;  %v1978_v28 = vpop.f32.mrf.mxu0 }
  0xf9   : > { %v1515_v18 = vpop.f32.mrf.mxu3  ;;  %v899_v37 = vadd.f32 %v804_v25, %v5681_v56  ;;  %v5794_v17 = vpop.f32.mrf.mxu2  ;;  %v696_v56 = vshrl.u32 %v5098_v41, 16  ;;  %v702_v41 = vrot.slane %v700_v33, 1  ;;  %v1878_v33 = vshrl.u32 %v5800_v47, 16 }
  0xfa   : > { %v1612_v23 = vadd.f32 %v1515_v18, %v1272_v1 }
  0xfb   : > { %843 = vmatmul.bf16.gmra.mxu1 %v695_v29  ;;  %2017 = vmatmul.bf16.gmra.mxu0 %v1869_v27  ;;  %v1273_v39 = vadd.f32 %v1178_v15, %v899_v37  ;;  %v1870_v15 = vshrl.u32 %v5164_v45, 16  ;;  %v698_v1 = vor.u32 %v696_v56, %v694_v11  ;;  %v5142_v29 = vld [vmem:[%s5461_s10 + $0x58] sm:$0xff]  ;;  %v5826_v37 = vld [vmem:[%s5461_s10 + $0x60] sm:$0xff]  ;;  %v704_v56 = vshrl.u32 %v5099_v46, 16 }
  0xfc   : > { %v5796_v22 = vadd.f32 %v1975_v58, %v1612_v23  ;;  %v5190_v46 = vld [vmem:[%s6306_s1 + $0x140] sm:$0xff] }
  0xfd   : > { %v1872_v43 = vor.u32 %v1870_v15, %v1868_v14  ;;  %2344 = vmatpush.bf16.msra.mxu1 %v5190_v46 }
  0xfe   : > { %1557 = vmatmul.bf16.gmra.mxu3 %v5141_v35  ;;  %1227 = vmatmul.bf16.gmra.mxu2 %v1097_v48 }
 0x100   : > { %v806_v60 = vpop.f32.mrf.mxu1  ;;  %v1980_v61 = vpop.f32.mrf.mxu0 }
 0x101   : > { %v1518_v54 = vpop.f32.mrf.mxu3  ;;  %v900_v40 = vadd.f32 %v806_v60, %v5704_v6  ;;  %v5808_v36 = vpop.f32.mrf.mxu2  ;;  %v703_v6 = vsel %vm611_vm1, %v698_v1, %v702_v41 }
 0x102   : > { %v1613_v58 = vadd.f32 %v1518_v54, %v1273_v39  ;;  %v5829_v39 = vld [vmem:[%s5461_s10 + $0x68] sm:$0xff]  ;;  %v981_v54 = vld [vmem:[%s5461_s10 + $0x70] sm:$0x1] }
 0x103   : > { %v1274_v0 = vadd.f32 %v5772_v38, %v900_v40  ;;  %v1098_v38 = vrot.slane %v5814_v16, 1  ;;  %v1882_v15 = vshll.u32 %v5829_v39, 16  ;;  %v1056_v2 = vunpack.c.l.b16 %v981_v54 }
 0x104   : > { %v5810_v59 = vadd.f32 %v1978_v28, %v1613_v58  ;;  %v1877_v28 = vsel %vm611_vm1, %v1872_v43, %v1876_v12  ;;  %v708_v58 = vshll.u32 %v5826_v37, 16  ;;  %v706_v43 = vor.u32 %v704_v56, %v702_v41  ;;  %v5167_v56 = vld [vmem:[%s5461_s10 + $0x70] sm:$0xff] }
 0x105   : > { %v1099_v48 = vsel %vm1072_vm0, %v1096_v62, %v1098_v38  ;;  %v5234_v62 = vld [vmem:[%s6306_s1 + $0x1c0] sm:$0xff] }
 0x106   : > { %3144 = vmatpush.bf16.msra.mxu3 %v5234_v62  ;;  %v710_v16 = vrot.slane %v708_v58, 1  ;;  %v1886_v62 = vshrl.u32 %v5829_v39, 16 }
 0x108   : > { %v809_v23 = vpop.f32.mrf.mxu1  ;;  %v1983_v25 = vpop.f32.mrf.mxu0 }
 0x109   : > { %v1520_v18 = vpop.f32.mrf.mxu3  ;;  %v901_v11 = vadd.f32 %v809_v23, %v5716_v20  ;;  %v5821_v14 = vpop.f32.mrf.mxu2  ;;  %v1071_v23 = vpack.c.b16 %v1056_v2, %v1056_v2  ;;  %v1890_v2 = vshll.u32 %v5167_v56, 16 }
 0x10a   : > { %v1614_v45 = vadd.f32 %v1520_v18, %v1274_v0  ;;  %v1880_v18 = vor.u32 %v1878_v33, %v1876_v12 }
 0x10b   : > { %848 = vmatmul.bf16.gmra.mxu1 %v703_v6  ;;  %2022 = vmatmul.bf16.gmra.mxu0 %v1877_v28  ;;  %v1275_v27 = vadd.f32 %v1183_v9, %v901_v11  ;;  %v711_v11 = vsel %vm611_vm1, %v706_v43, %v710_v16 }
 0x10c   : > { %v5823_v35 = vadd.f32 %v1980_v61, %v1614_v45  ;;  %v1884_v45 = vrot.slane %v1882_v15, 1 }
 0x10e   : > { %1562 = vmatmul.bf16.gmra.mxu3 %v5142_v29  ;;  %1232 = vmatmul.bf16.gmra.mxu2 %v1099_v48  ;;  %v1100_v48 = vrot.slane %v1071_v23, 1  ;;  %v1888_v43 = vor.u32 %v1886_v62, %v1884_v45  ;;  %v520_v23 = vld [vmem:[%s5461_s10 + $0x70] sm:$0x1] }
 0x110   : > { %v811_v9 = vpop.f32.mrf.mxu1  ;;  %v1985_v61 = vpop.f32.mrf.mxu0  ;;  %v1101_v58 = vsel %vm1072_vm0, %v1098_v38, %v1100_v48 }
 0x111   : > { %v1523_v20 = vpop.f32.mrf.mxu3  ;;  %v902_v40 = vadd.f32 %v811_v9, %v5730_v31  ;;  %v5846_v0 = vpop.f32.mrf.mxu2  ;;  %v712_v9 = vshrl.u32 %v5826_v37, 16 }
 0x112   : > { %v1615_v60 = vadd.f32 %v1523_v20, %v1275_v27  ;;  %v5143_v27 = vld [vmem:[%s5461_s10 + $0x60] sm:$0xff]  ;;  %v5101_v20 = vld [vmem:[%s5461_s10 + $0x68] sm:$0xff] }
 0x113   : > { %v1276_v47 = vadd.f32 %v5794_v17, %v902_v40  ;;  %v5256_v17 = vld [vmem:[%s6306_s1 + $0x200] sm:$0xff]  ;;  %v716_v33 = vshll.u32 %v5101_v20, 16 }
 0x114   : > { %v5848_v1 = vadd.f32 %v1983_v25, %v1615_v60  ;;  %v1885_v25 = vsel %vm611_vm1, %v1880_v18, %v1884_v45  ;;  %3517 = vmatpush.bf16.msra.mxu0 %v5256_v17  ;;  %v1892_v18 = vrot.slane %v1890_v2, 1 }
 0x115   : > { %v718_v37 = vrot.slane %v716_v33, 1 }
 0x118   : > { %v814_v29 = vpop.f32.mrf.mxu1  ;;  %v1988_v28 = vpop.f32.mrf.mxu0 }
 0x119   : > { %v1525_v6 = vpop.f32.mrf.mxu3  ;;  %v903_v41 = vadd.f32 %v814_v29, %v5740_v51  ;;  %v1195_v12 = vpop.f32.mrf.mxu2 }
 0x11a   : > { %v1616_v31 = vadd.f32 %v1525_v6, %v1276_v47  ;;  %v714_v47 = vor.u32 %v712_v9, %v710_v16  ;;  %v1695_v6 = vld [vmem:[%s5461_s10 + $0x78] sm:$0x1]  ;;  %v720_v9 = vshrl.u32 %v5101_v20, 16 }
 0x11b   : > { %853 = vmatmul.bf16.gmra.mxu1 %v711_v11  ;;  %2027 = vmatmul.bf16.gmra.mxu0 %v1885_v25  ;;  %v1277_v54 = vadd.f32 %v5808_v36, %v903_v41  ;;  %v5144_v25 = vld [vmem:[%s5461_s10 + $0x68] sm:$0xff]  ;;  %v1770_v48 = vunpack.c.l.b16 %v1695_v6  ;;  %v5198_v41 = vld [vmem:[%s5461_s10 + $0x10] sm:$0xff] }
 0x11c   : > { %v5858_v53 = vadd.f32 %v1985_v61, %v1616_v31  ;;  %v719_v29 = vsel %vm611_vm1, %v714_v47, %v718_v37  ;;  %v722_v47 = vor.u32 %v720_v9, %v718_v37 }
 0x11e   : > { %1567 = vmatmul.bf16.gmra.mxu3 %v5143_v27  ;;  %1237 = vmatmul.bf16.gmra.mxu2 %v1101_v58  ;;  %v1785_v58 = vpack.c.b16 %v1770_v48, %v1770_v48  ;;  %v5899_v48 = vld [vmem:[%s5461_s10 + $0x18] sm:$0xff] }
 0x120   : > { %v816_v15 = vpop.f32.mrf.mxu1  ;;  %v1990_v61 = vpop.f32.mrf.mxu0  ;;  %v1898_v2 = vshll.u32 %v1785_v58, 16 }
 0x121   : > { %v1528_v60 = vpop.f32.mrf.mxu3  ;;  %v904_v36 = vadd.f32 %v816_v15, %v5758_v4  ;;  %v1198_v40 = vpop.f32.mrf.mxu2  ;;  %v1893_v4 = vsel %vm611_vm1, %v1888_v43, %v1892_v18 }
 0x122   : > { %v1617_v51 = vadd.f32 %v1528_v60, %v1277_v54  ;;  %v1900_v20 = vrot.slane %v1898_v2, 1 }
 0x123   : > { %v1278_v38 = vadd.f32 %v5821_v14, %v904_v36 }
 0x124   : > { %v5867_v46 = vadd.f32 %v1988_v28, %v1617_v51  ;;  %v595_v28 = vunpack.c.l.b16 %v520_v23 }
 0x126   : > { %v610_v54 = vpack.c.b16 %v595_v28, %v595_v28  ;;  %v4666_v28 = vld [vmem:[%s5461_s10 + $0x8] sm:$0xe] }
 0x128   : > { %v819_v11 = vpop.f32.mrf.mxu1  ;;  %v1993_v27 = vpop.f32.mrf.mxu0  ;;  %v724_v62 = vshll.u32 %v610_v54, 16  ;;  %v5242_v54 = vld [vmem:[%s5461_s10 + $0x10] sm:$0xf0] }
 0x129   : > { %v1530_v31 = vpop.f32.mrf.mxu3  ;;  %v905_v14 = vadd.f32 %v819_v11, %v5662_v34  ;;  %v5876_v16 = vpop.f32.mrf.mxu2  ;;  %v1894_v34 = vshrl.u32 %v5167_v56, 16 }
 0x12a   : > { %v1618_v39 = vadd.f32 %v1530_v31, %v1278_v38  ;;  %v726_v43 = vrot.slane %v724_v62, 1  ;;  %v5393_v62 = vmov 0  }
 0x12b   : > { %858 = vmatmul.bf16.gmra.mxu1 %v719_v29  ;;  %2032 = vmatmul.bf16.gmra.mxu0 %v1893_v4  ;;  %v1279_v17 = vadd.f32 %v5846_v0, %v905_v14  ;;  %v1896_v23 = vor.u32 %v1894_v34, %v1892_v18  ;;  %v5199_v4 = vld [vmem:[%s5461_s10 + $0x18] sm:$0xff]  ;;  %v3757_v34 = vld [vmem:[%s6307_s2] sm:$0xff] }
 0x12c   : > { %v5878_v45 = vadd.f32 %v1990_v61, %v1618_v39  ;;  %v727_v39 = vsel %vm611_vm1, %v722_v47, %v726_v43  ;;  %5382 = vset.pattern.permute.xlu0 %v5393_v62  ;;  %5383 = vset.pattern.permute.xlu1 %v5393_v62  ;;  %v2967_v47 = vshll.u32 %v5899_v48, 16 }
 0x12d   : > { %v1901_v11 = vsel %vm611_vm1, %v1896_v23, %v1900_v20  ;;  %3787 = vperm.xlu0 %5382, %v3757_v34   ;;  %5384 = vset.pattern.permute.xlu2 %v5393_v62  ;;  %v3759_v62 = vld [vmem:[%s6307_s2 + $0x10] sm:$0xff]  ;;  %v2971_v34 = vshrl.u32 %v5899_v48, 16 }
 0x12e   : > { %1572 = vmatmul.bf16.gmra.mxu3 %v5144_v25  ;;  %2685 = vmatmul.bf16.vlgmr.msra.gmra.mxu2 %v5198_v41  ;;  %v4978_v41 = vld [vmem:[%s5461_s10 + $0x10] sm:$0xe] }
 0x12f   : > { %3797 = vperm.xlu1 %5383, %v3759_v62  }
 0x130   : > { %v821_v51 = vpop.f32.mrf.mxu1  ;;  %v1995_v15 = vpop.f32.mrf.mxu0 }
 0x131   : > { %v1533_v60 = vpop.f32.mrf.mxu3  ;;  %v906_v61 = vadd.f32 %v821_v51, %v5674_v44  ;;  %v5883_v36 = vpop.f32.mrf.mxu2  ;;  %v5145_v44 = vld [vmem:[%s5461_s10 + $0x70] sm:$0xff] }
 0x132   : > { %v1619_v33 = vadd.f32 %v1533_v60, %v1279_v17  ;;  %v5176_v17 = vld [vmem:[%s5461_s10 + $0x8] sm:$0xf0] }
 0x133   : > { %v1280_v38 = vadd.f32 %v1195_v12, %v906_v61  ;;  %v5220_v12 = vld [vmem:[%s5461_s10 + $0x10] sm:$0xff]  ;;  %v4667_v51 = vor.u32 %v5176_v17, %v4666_v28 }
 0x134   : > { %v5885_v0 = vadd.f32 %v1993_v27, %v1619_v33  ;;  %v2962_v14 = vshll.u32 %v5220_v12, 16  ;;  %v5905_v33 = vld [vmem:[%s5461_s10 + $0x10] sm:$0xff]  ;;  %v2960_v61 = vshrl.u32 %v5220_v12, 16 }
 0x138   : > { %v824_v29 = vpop.f32.mrf.mxu1  ;;  %v1998_v56 = vpop.f32.mrf.mxu0 }
 0x139   : > { %v1535_v6 = vpop.f32.mrf.mxu3  ;;  %v907_v37 = vadd.f32 %v824_v29, %v5683_v57  ;;  %v5892_v18 = vpop.f32.mrf.mxu2 }
 0x13a   : > { %v1620_v31 = vadd.f32 %v1535_v6, %v1280_v38  ;;  %v2964_v38 = vrot.slane %v2962_v14, 1  ;;  %v2246_v6 = vrot.slane %v4667_v51, 1 }
 0x13b   : > { %863 = vmatmul.bf16.gmra.mxu1 %v727_v39  ;;  %2037 = vmatmul.bf16.gmra.mxu0 %v1901_v11  ;;  %v1281_v25 = vadd.f32 %v1198_v40, %v907_v37  ;;  %v4979_v40 = vor.u32 %v5242_v54, %v4978_v41  ;;  %v2969_v11 = vrot.slane %v2967_v47, 1 }
 0x13c   : > { %v5894_v27 = vadd.f32 %v1995_v15, %v1620_v31  ;;  %v5908_v15 = vld [vmem:[%s5461_s10 + $0x18] sm:$0xff]  ;;  %v2247_v31 = vrot.slane %v5905_v33, 1 }
 0x13d   : > { %v3419_v29 = vrot.slane %v4979_v40, 1  ;;  %v3420_v39 = vrot.slane %v5908_v15, 1  ;;  %v5178_v15 = vld [vmem:[%s5461_s10 + $0x18] sm:$0xff]  ;;  %v5244_v40 = vld [vmem:[%s5461_s10 + $0x20] sm:$0xff] }
 0x13e   : > { %1577 = vmatmul.bf16.gmra.mxu3 %v5145_v44  ;;  %2690 = vmatmul.bf16.gmra.mxu2 %v5199_v4  ;;  %v2965_v44 = vor.u32 %v2964_v38, %v2960_v61  ;;  %v2248_v4 = vsel %vm1072_vm0, %v2246_v6, %v2247_v31  ;;  %v2249_v47 = vrot.slane %v5178_v15, 1  ;;  %v2973_v6 = vor.u32 %v2971_v34, %v2969_v11 }
 0x140   : > { %v826_v60 = vpop.f32.mrf.mxu1  ;;  %v2000_v9 = vpop.f32.mrf.mxu0  ;;  %v2970_v14 = vsel %vm611_vm1, %v2965_v44, %v2969_v11 }
 0x141   : > { %v1538_v58 = vpop.f32.mrf.mxu3  ;;  %v908_v2 = vadd.f32 %v826_v60, %v5706_v7  ;;  %v1208_v43 = vpop.f32.mrf.mxu2 }
 0x142   : > { %v1621_v57 = vadd.f32 %v1538_v58, %v1281_v25  ;;  %v5200_v58 = vld [vmem:[%s5461_s10 + $0x20] sm:$0xff] }
 0x143   : > { %v1282_v20 = vadd.f32 %v5876_v16, %v908_v2  ;;  %v3758_v16 = vld [vmem:[%s6307_s2 + $0x8] sm:$0xff] }
 0x144   : > { %v5915_v23 = vadd.f32 %v1998_v56, %v1621_v57  ;;  %v3421_v56 = vsel %vm1072_vm0, %v3419_v29, %v3420_v39  ;;  %3792 = vperm.xlu0 %5382, %v3758_v16   ;;  %v5222_v57 = vld [vmem:[%s5461_s10 + $0x20] sm:$0xff] }
 0x145   : > { %v2975_v2 = vshll.u32 %v5222_v57, 16 }
 0x147   : > { %v2977_v29 = vrot.slane %v2975_v2, 1 }
 0x148   : > { %v829_v37 = vpop.f32.mrf.mxu1  ;;  %v2003_v25 = vpop.f32.mrf.mxu0 }
 0x149   : > { %v1540_v7 = vpop.f32.mrf.mxu3  ;;  %v909_v28 = vadd.f32 %v829_v37, %v5718_v21  ;;  %v1210_v17 = vpop.f32.mrf.mxu2  ;;  %v2978_v11 = vsel %vm611_vm1, %v2973_v6, %v2977_v29 }
 0x14a   : > { %v1622_v12 = vadd.f32 %v1540_v7, %v1282_v20  ;;  %v3422_v20 = vrot.slane %v5244_v40, 1 }
 0x14b   : > { %2345 = vmatmul.bf16.vlgmr.msra.gmra.mxu1 %v2248_v4  ;;  %3518 = vmatmul.bf16.vlgmr.msra.gmra.mxu0 %v3421_v56  ;;  %v1283_v54 = vadd.f32 %v5883_v36, %v909_v28 }
 0x14c   : > { %v5927_v41 = vadd.f32 %v2000_v9, %v1622_v12  ;;  %v3423_v48 = vsel %vm1072_vm0, %v3420_v39, %v3422_v20  ;;  %v5223_v39 = vld [vmem:[%s5461_s10 + $0x28] sm:$0xff] }
 0x14d   : > { %v2983_v15 = vshll.u32 %v5223_v39, 16 }
 0x14e   : > { %3145 = vmatmul.bf16.vlgmr.msra.gmra.mxu3 %v2970_v14  ;;  %2695 = vmatmul.bf16.gmra.mxu2 %v5200_v58 }
 0x14f   : > { %v2985_v2 = vrot.slane %v2983_v15, 1 }
 0x150   : > { %v831_v51 = vpop.f32.mrf.mxu1  ;;  %v2005_v21 = vpop.f32.mrf.mxu0 }
 0x151   : > { %v1543_v60 = vpop.f32.mrf.mxu3  ;;  %v910_v9 = vadd.f32 %v831_v51, %v5732_v32  ;;  %v1213_v36 = vpop.f32.mrf.mxu2  ;;  %v2250_v32 = vsel %vm1072_vm0, %v2247_v31, %v2249_v47  ;;  %v5201_v31 = vld [vmem:[%s5461_s10 + $0x28] sm:$0xff]  ;;  %v2979_v51 = vshrl.u32 %v5222_v57, 16 }
 0x152   : > { %v1623_v33 = vadd.f32 %v1543_v60, %v1283_v54  ;;  %v5245_v60 = vld [vmem:[%s5461_s10 + $0x28] sm:$0xff] }
 0x153   : > { %v1284_v38 = vadd.f32 %v5892_v18, %v910_v9  ;;  %v2981_v34 = vor.u32 %v2979_v51, %v2977_v29 }
 0x154   : > { %v5939_v61 = vadd.f32 %v2003_v25, %v1623_v33  ;;  %v3760_v25 = vld [vmem:[%s6307_s2 + $0x18] sm:$0xff] }
 0x155   : > { %3802 = vperm.xlu1 %5383, %v3760_v25   ;;  %v5224_v25 = vld [vmem:[%s5461_s10 + $0x30] sm:$0xff] }
 0x158   : > { %v834_v12 = vpop.f32.mrf.mxu1  ;;  %v2008_v37 = vpop.f32.mrf.mxu0 }
 0x159   : > { %v1545_v44 = vpop.f32.mrf.mxu3  ;;  %v911_v18 = vadd.f32 %v834_v12, %v5742_v52  ;;  %v1215_v4 = vpop.f32.mrf.mxu2  ;;  %v5179_v52 = vld [vmem:[%s5461_s10 + $0x20] sm:$0xff] }
 0x15a   : > { %v1624_v7 = vadd.f32 %v1545_v44, %v1284_v38  ;;  %v2251_v9 = vrot.slane %v5179_v52, 1 }
 0x15b   : > { %2350 = vmatmul.bf16.gmra.mxu1 %v2250_v32  ;;  %3523 = vmatmul.bf16.gmra.mxu0 %v3423_v48  ;;  %v1285_v16 = vadd.f32 %v1208_v43, %v911_v18  ;;  %v3424_v43 = vrot.slane %v5245_v60, 1  ;;  %v5202_v48 = vld [vmem:[%s5461_s10 + $0x30] sm:$0xff] }
 0x15c   : > { %v5949_v56 = vadd.f32 %v2005_v21, %v1624_v7  ;;  %v2252_v12 = vsel %vm1072_vm0, %v2249_v47, %v2251_v9 }
 0x15e   : > { %3150 = vmatmul.bf16.gmra.mxu3 %v2978_v11  ;;  %2700 = vmatmul.bf16.gmra.mxu2 %v5201_v31  ;;  %v5246_v31 = vld [vmem:[%s5461_s10 + $0x30] sm:$0xff] }
 0x160   : > { %v836_v54 = vpop.f32.mrf.mxu1  ;;  %v2010_v58 = vpop.f32.mrf.mxu0 }
 0x161   : > { %v1548_v28 = vpop.f32.mrf.mxu3  ;;  %v912_v33 = vadd.f32 %v836_v54, %v5760_v8  ;;  %v1218_v40 = vpop.f32.mrf.mxu2  ;;  %v3425_v8 = vsel %vm1072_vm0, %v3422_v20, %v3424_v43  ;;  %v2991_v54 = vshll.u32 %v5224_v25, 16 }
 0x162   : > { %v1625_v14 = vadd.f32 %v1548_v28, %v1285_v16  ;;  %v5180_v16 = vld [vmem:[%s5461_s10 + $0x28] sm:$0xff] }
 0x163   : > { %v1286_v62 = vadd.f32 %v1210_v17, %v912_v33  ;;  %v2986_v17 = vsel %vm611_vm1, %v2981_v34, %v2985_v2  ;;  %v2253_v60 = vrot.slane %v5180_v16, 1  ;;  %v3426_v33 = vrot.slane %v5246_v31, 1 }
 0x164   : > { %v5956_v21 = vadd.f32 %v2008_v37, %v1625_v14  ;;  %v2987_v14 = vshrl.u32 %v5223_v39, 16  ;;  %v2993_v15 = vrot.slane %v2991_v54, 1  ;;  %v3761_v39 = vld [vmem:[%s6307_s2 + $0x20] sm:$0xff]  ;;  %v2995_v16 = vshrl.u32 %v5224_v25, 16  ;;  %v3766_v25 = vld [vmem:[%s6307_s2 + $0x48] sm:$0xff] }
 0x165   : > { %3807 = vperm.xlu2 %5384, %v3761_v39  }
 0x166   : > { %v2989_v51 = vor.u32 %v2987_v14, %v2985_v2 }
 0x168   : > { %v839_v44 = vpop.f32.mrf.mxu1  ;;  %v2013_v7 = vpop.f32.mrf.mxu0 }
 0x169   : > { %v1550_v38 = vpop.f32.mrf.mxu3  ;;  %v913_v57 = vadd.f32 %v839_v44, %v5676_v49  ;;  %v1220_v37 = vpop.f32.mrf.mxu2  ;;  %v3763_v49 = vld [vmem:[%s6307_s2 + $0x30] sm:$0xff]  ;;  %v2254_v44 = vsel %vm1072_vm0, %v2251_v9, %v2253_v60 }
 0x16a   : > { %v1626_v6 = vadd.f32 %v1550_v38, %v1286_v62  ;;  %3817 = vperm.xlu0 %5382, %v3763_v49  }
 0x16b   : > { %2355 = vmatmul.bf16.gmra.mxu1 %v2252_v12  ;;  %3528 = vmatmul.bf16.gmra.mxu0 %v3425_v8  ;;  %v1287_v29 = vadd.f32 %v1213_v36, %v913_v57  ;;  %v5203_v8 = vld [vmem:[%s5461_s10 + $0x38] sm:$0xff] }
 0x16c   : > { %v5962_v32 = vadd.f32 %v2010_v58, %v1626_v6  ;;  %v5225_v57 = vld [vmem:[%s5461_s10 + $0x38] sm:$0xff] }
 0x16d   : > { %v2999_v31 = vshll.u32 %v5225_v57, 16 }
 0x16e   : > { %3155 = vmatmul.bf16.gmra.mxu3 %v2986_v17  ;;  %2705 = vmatmul.bf16.gmra.mxu2 %v5202_v48 }
 0x170   : > { %v841_v11 = vpop.f32.mrf.mxu1  ;;  %v2015_v20 = vpop.f32.mrf.mxu0 }
 0x171   : > { %v1553_v18 = vpop.f32.mrf.mxu3  ;;  %v914_v28 = vadd.f32 %v841_v11, %v5691_v63  ;;  %v1223_v36 = vpop.f32.mrf.mxu2  ;;  %v3427_v63 = vsel %vm1072_vm0, %v3424_v43, %v3426_v33  ;;  %v3762_v11 = vld [vmem:[%s6307_s2 + $0x28] sm:$0xff] }
 0x172   : > { %v1627_v47 = vadd.f32 %v1553_v18, %v1287_v29  ;;  %v5181_v18 = vld [vmem:[%s5461_s10 + $0x30] sm:$0xff]  ;;  %3812 = vperm.xlu2 %5384, %v3762_v11   ;;  %3832 = vperm.xlu0 %5382, %v3766_v25  }
 0x173   : > { %v1288_v52 = vadd.f32 %v1215_v4, %v914_v28  ;;  %v3764_v4 = vld [vmem:[%s6307_s2 + $0x38] sm:$0xff]  ;;  %v2255_v14 = vrot.slane %v5181_v18, 1 }
 0x174   : > { %v5972_v58 = vadd.f32 %v2013_v7, %v1627_v47  ;;  %v2994_v7 = vsel %vm611_vm1, %v2989_v51, %v2993_v15  ;;  %3822 = vperm.xlu1 %5383, %v3764_v4   ;;  %v5247_v47 = vld [vmem:[%s5461_s10 + $0x38] sm:$0xff]  ;;  %v3001_v51 = vrot.slane %v2999_v31, 1 }
 0x175   : > { %v3428_v54 = vrot.slane %v5247_v47, 1 }
 0x178   : > { %v844_v38 = vpop.f32.mrf.mxu1  ;;  %v2018_v6 = vpop.f32.mrf.mxu0 }
 0x179   : > { %v1555_v62 = vpop.f32.mrf.mxu3  ;;  %v915_v2 = vadd.f32 %v844_v38, %v5711_v13  ;;  %v1225_v12 = vpop.f32.mrf.mxu2 }
 0x17a   : > { %v1628_v34 = vadd.f32 %v1555_v62, %v1288_v52  ;;  %v2997_v52 = vor.u32 %v2995_v16, %v2993_v15 }
 0x17b   : > { %2360 = vmatmul.bf16.gmra.mxu1 %v2254_v44  ;;  %3533 = vmatmul.bf16.gmra.mxu0 %v3427_v63  ;;  %v1289_v43 = vadd.f32 %v1218_v40, %v915_v2  ;;  %v2256_v63 = vsel %vm1072_vm0, %v2253_v60, %v2255_v14  ;;  %v5204_v60 = vld [vmem:[%s5461_s10 + $0x40] sm:$0xff] }
 0x17c   : > { %v5984_v9 = vadd.f32 %v2015_v20, %v1628_v34  ;;  %v3002_v15 = vsel %vm611_vm1, %v2997_v52, %v3001_v51 }
 0x17e   : > { %3160 = vmatmul.bf16.gmra.mxu3 %v2994_v7  ;;  %2710 = vmatmul.bf16.gmra.mxu2 %v5203_v8 }
 0x180   : > { %v846_v48 = vpop.f32.mrf.mxu1  ;;  %v2020_v13 = vpop.f32.mrf.mxu0 }
 0x181   : > { %v1558_v17 = vpop.f32.mrf.mxu3  ;;  %v916_v20 = vadd.f32 %v846_v48, %v5723_v26  ;;  %v1228_v40 = vpop.f32.mrf.mxu2  ;;  %v3429_v26 = vsel %vm1072_vm0, %v3426_v33, %v3428_v54  ;;  %v5226_v33 = vld [vmem:[%s5461_s10 + $0x40] sm:$0xff] }
 0x182   : > { %v1629_v29 = vadd.f32 %v1558_v17, %v1289_v43  ;;  %v5248_v17 = vld [vmem:[%s5461_s10 + $0x40] sm:$0xff]  ;;  %v3007_v18 = vshll.u32 %v5226_v33, 16 }
 0x183   : > { %v1290_v28 = vadd.f32 %v1220_v37, %v916_v20  ;;  %v3430_v16 = vrot.slane %v5248_v17, 1 }
 0x184   : > { %v5994_v49 = vadd.f32 %v2018_v6, %v1629_v29  ;;  %v3767_v29 = vld [vmem:[%s6307_s2 + $0x50] sm:$0xff] }
 0x185   : > { %3837 = vperm.xlu1 %5383, %v3767_v29  }
 0x188   : > { %v849_v38 = vpop.f32.mrf.mxu1  ;;  %v2023_v44 = vpop.f32.mrf.mxu0 }
 0x189   : > { %v1560_v62 = vpop.f32.mrf.mxu3  ;;  %v917_v37 = vadd.f32 %v849_v38, %v5670_v42  ;;  %v1230_v6 = vpop.f32.mrf.mxu2  ;;  %v5182_v42 = vld [vmem:[%s5461_s10 + $0x38] sm:$0xff] }
 0x18a   : > { %v1630_v34 = vadd.f32 %v1560_v62, %v1290_v28  ;;  %v2257_v20 = vrot.slane %v5182_v42, 1  ;;  %v3009_v28 = vrot.slane %v3007_v18, 1 }
 0x18b   : > { %2365 = vmatmul.bf16.gmra.mxu1 %v2256_v63  ;;  %3538 = vmatmul.bf16.gmra.mxu0 %v3429_v26  ;;  %v1291_v4 = vadd.f32 %v1223_v36, %v917_v37 }
 0x18c   : > { %v6003_v39 = vadd.f32 %v2020_v13, %v1630_v34  ;;  %v3003_v13 = vshrl.u32 %v5225_v57, 16  ;;  %v2258_v63 = vsel %vm1072_vm0, %v2255_v14, %v2257_v20  ;;  %v3765_v57 = vld [vmem:[%s6307_s2 + $0x40] sm:$0xff]  ;;  %v5205_v14 = vld [vmem:[%s5461_s10 + $0x48] sm:$0xff] }
 0x18d   : > { %3827 = vperm.xlu2 %5384, %v3765_v57  }
 0x18e   : > { %3165 = vmatmul.bf16.gmra.mxu3 %v3002_v15  ;;  %2715 = vmatmul.bf16.gmra.mxu2 %v5204_v60  ;;  %v3005_v31 = vor.u32 %v3003_v13, %v3001_v51 }
 0x190   : > { %v851_v43 = vpop.f32.mrf.mxu1  ;;  %v2025_v8 = vpop.f32.mrf.mxu0  ;;  %v3010_v51 = vsel %vm611_vm1, %v3005_v31, %v3009_v28 }
 0x191   : > { %v1563_v2 = vpop.f32.mrf.mxu3  ;;  %v918_v48 = vadd.f32 %v851_v43, %v5679_v55  ;;  %v1233_v36 = vpop.f32.mrf.mxu2  ;;  %v3431_v55 = vsel %vm1072_vm0, %v3428_v54, %v3430_v16  ;;  %v5227_v54 = vld [vmem:[%s5461_s10 + $0x48] sm:$0xff] }
 0x192   : > { %v1631_v7 = vadd.f32 %v1563_v2, %v1291_v4  ;;  %v5249_v2 = vld [vmem:[%s5461_s10 + $0x48] sm:$0xff]  ;;  %v3015_v42 = vshll.u32 %v5227_v54, 16 }
 0x193   : > { %v1292_v11 = vadd.f32 %v1225_v12, %v918_v48  ;;  %v3432_v13 = vrot.slane %v5249_v2, 1 }
 0x194   : > { %v6013_v47 = vadd.f32 %v2023_v44, %v1631_v7  ;;  %v3769_v7 = vld [vmem:[%s6307_s2 + $0x60] sm:$0xff] }
 0x195   : > { %3847 = vperm.xlu0 %5382, %v3769_v7  }
 0x198   : > { %v854_v34 = vpop.f32.mrf.mxu1  ;;  %v2028_v38 = vpop.f32.mrf.mxu0 }
 0x199   : > { %v1565_v52 = vpop.f32.mrf.mxu3  ;;  %v919_v12 = vadd.f32 %v854_v34, %v5702_v5  ;;  %v1235_v44 = vpop.f32.mrf.mxu2  ;;  %v5183_v5 = vld [vmem:[%s5461_s10 + $0x40] sm:$0xff] }
 0x19a   : > { %v1632_v62 = vadd.f32 %v1565_v52, %v1292_v11  ;;  %v2259_v48 = vrot.slane %v5183_v5, 1  ;;  %v3017_v11 = vrot.slane %v3015_v42, 1 }
 0x19b   : > { %2370 = vmatmul.bf16.gmra.mxu1 %v2258_v63  ;;  %3543 = vmatmul.bf16.gmra.mxu0 %v3431_v55  ;;  %v1293_v25 = vadd.f32 %v1228_v40, %v919_v12 }
 0x19c   : > { %v6022_v26 = vadd.f32 %v2025_v8, %v1632_v62  ;;  %v3011_v8 = vshrl.u32 %v5226_v33, 16  ;;  %v3433_v33 = vsel %vm1072_vm0, %v3430_v16, %v3432_v13  ;;  %v5228_v16 = vld [vmem:[%s5461_s10 + $0x50] sm:$0xff] }
 0x19d   : > { %v3023_v5 = vshll.u32 %v5228_v16, 16 }
 0x19e   : > { %3170 = vmatmul.bf16.gmra.mxu3 %v3010_v51  ;;  %2720 = vmatmul.bf16.gmra.mxu2 %v5205_v14  ;;  %v3013_v18 = vor.u32 %v3011_v8, %v3009_v28  ;;  %v6048_v51 = vld [vmem:[%s5461_s10 + $0x48] sm:$0xff] }
 0x19f   : > { %v2261_v8 = vrot.slane %v6048_v51, 1  ;;  %v6085_v51 = vld [vmem:[%s5461_s10 + $0x50] sm:$0xff] }
 0x1a0   : > { %v856_v4 = vpop.f32.mrf.mxu1  ;;  %v2030_v60 = vpop.f32.mrf.mxu0  ;;  %v3018_v28 = vsel %vm611_vm1, %v3013_v18, %v3017_v11  ;;  %v3025_v18 = vrot.slane %v3023_v5, 1 }
 0x1a1   : > { %v1568_v37 = vpop.f32.mrf.mxu3  ;;  %v920_v43 = vadd.f32 %v856_v4, %v5714_v19  ;;  %v1238_v40 = vpop.f32.mrf.mxu2  ;;  %v2260_v19 = vsel %vm1072_vm0, %v2257_v20, %v2259_v48  ;;  %v5206_v20 = vld [vmem:[%s5461_s10 + $0x50] sm:$0xff] }
 0x1a2   : > { %v1633_v15 = vadd.f32 %v1568_v37, %v1293_v25  ;;  %v6051_v37 = vld [vmem:[%s5461_s10 + $0x50] sm:$0xff] }
 0x1a3   : > { %v1294_v29 = vadd.f32 %v1230_v6, %v920_v43  ;;  %v3434_v42 = vrot.slane %v6051_v37, 1 }
 0x1a4   : > { %v6032_v17 = vadd.f32 %v2028_v38, %v1633_v15  ;;  %v3770_v38 = vld [vmem:[%s6307_s2 + $0x68] sm:$0xff]  ;;  %v3768_v15 = vld [vmem:[%s6307_s2 + $0x58] sm:$0xff] }
 0x1a5   : > { %3852 = vperm.xlu1 %5383, %v3770_v38   ;;  %3842 = vperm.xlu2 %5384, %v3768_v15  }
 0x1a8   : > { %v859_v62 = vpop.f32.mrf.mxu1  ;;  %v2033_v34 = vpop.f32.mrf.mxu0 }
 0x1a9   : > { %v1570_v31 = vpop.f32.mrf.mxu3  ;;  %v921_v6 = vadd.f32 %v859_v62, %v5728_v30  ;;  %v6041_v63 = vpop.f32.mrf.mxu2 }
 0x1aa   : > { %v1634_v52 = vadd.f32 %v1570_v31, %v1294_v29 }
 0x1ab   : > { %2375 = vmatmul.bf16.gmra.mxu1 %v2260_v19  ;;  %3548 = vmatmul.bf16.gmra.mxu0 %v3433_v33  ;;  %v1295_v57 = vadd.f32 %v1233_v36, %v921_v6  ;;  %v3772_v36 = vld [vmem:[%s6307_s2 + $0x78] sm:$0xff]  ;;  %v3435_v19 = vsel %vm1072_vm0, %v3432_v13, %v3434_v42  ;;  %v3773_v13 = vld [vmem:[%s6307_s2 + $0x80] sm:$0xff] }
 0x1ac   : > { %v6043_v55 = vadd.f32 %v2030_v60, %v1634_v52  ;;  %v3019_v60 = vshrl.u32 %v5227_v54, 16  ;;  %3862 = vperm.xlu0 %5382, %v3772_v36   ;;  %v2262_v54 = vsel %vm1072_vm0, %v2259_v48, %v2261_v8  ;;  %v5207_v6 = vld [vmem:[%s5461_s10 + $0x58] sm:$0xff] }
 0x1ad   : > { %3867 = vperm.xlu1 %5383, %v3773_v13   ;;  %v3788_v13 = vpop.permute.xlu0 %3787 }
 0x1ae   : > { %3175 = vmatmul.bf16.gmra.mxu3 %v3018_v28  ;;  %2725 = vmatmul.bf16.gmra.mxu2 %v5206_v20  ;;  %v3021_v29 = vor.u32 %v3019_v60, %v3017_v11  ;;  %v6082_v28 = vld [vmem:[%s5461_s10 + $0x58] sm:$0xff]  ;;  %v2263_v60 = vrot.slane %v6085_v51, 1  ;;  %v6131_v51 = vld [vmem:[%s5461_s10 + $0x60] sm:$0xff] }
 0x1af   : > { %v3031_v37 = vshll.u32 %v6082_v28, 16 }
 0x1b0   : > { %v861_v30 = vpop.f32.mrf.mxu1  ;;  %v2035_v14 = vpop.f32.mrf.mxu0  ;;  %v3026_v33 = vsel %vm611_vm1, %v3021_v29, %v3025_v18 }
 0x1b1   : > { %v1573_v12 = vpop.f32.mrf.mxu3  ;;  %v922_v4 = vadd.f32 %v861_v30, %v5738_v50  ;;  %v6060_v2 = vpop.f32.mrf.mxu2 }
 0x1b2   : > { %v1635_v25 = vadd.f32 %v1573_v12, %v1295_v57 }
 0x1b3   : > { %v1296_v43 = vadd.f32 %v1235_v44, %v922_v4  ;;  %v3775_v44 = vld [vmem:[%s6307_s2 + $0x90] sm:$0xff] }
 0x1b4   : > { %v6062_v7 = vadd.f32 %v2033_v34, %v1635_v25  ;;  %3877 = vperm.xlu0 %5382, %v3775_v44   ;;  %v6088_v25 = vld [vmem:[%s5461_s10 + $0x58] sm:$0xff] }
 0x1b5   : > { %v3436_v5 = vrot.slane %v6088_v25, 1  ;;  %v3035_v25 = vshrl.u32 %v6082_v28, 16 }
 0x1b8   : > { %v864_v62 = vpop.f32.mrf.mxu1  ;;  %v2038_v50 = vpop.f32.mrf.mxu0 }
 0x1b9   : > { %v1575_v31 = vpop.f32.mrf.mxu3  ;;  %v923_v34 = vadd.f32 %v864_v62, %v5756_v3  ;;  %v6073_v11 = vpop.f32.mrf.mxu2 }
 0x1ba   : > { %v1636_v52 = vadd.f32 %v1575_v31, %v1296_v43  ;;  %v3776_v43 = vld [vmem:[%s6307_s2 + $0x98] sm:$0xff] }
 0x1bb   : > { %2380 = vmatmul.bf16.gmra.mxu1 %v2262_v54  ;;  %3553 = vmatmul.bf16.gmra.mxu0 %v3435_v19  ;;  %v1297_v48 = vadd.f32 %v1238_v40, %v923_v34  ;;  %v3778_v40 = vld [vmem:[%s6307_s2 + $0xa8] sm:$0xff]  ;;  %v3771_v54 = vld [vmem:[%s6307_s2 + $0x70] sm:$0xff] }
 0x1bc   : > { %v6075_v38 = vadd.f32 %v2035_v14, %v1636_v52  ;;  %v3027_v14 = vshrl.u32 %v5228_v16, 16  ;;  %3892 = vperm.xlu0 %5382, %v3778_v40   ;;  %3882 = vperm.xlu1 %5383, %v3776_v43   ;;  %v3782_v43 = vld [vmem:[%s6307_s2 + $0xc8] sm:$0xff] }
 0x1bd   : > { %3857 = vperm.xlu2 %5384, %v3771_v54  }
 0x1be   : > { %3180 = vmatmul.bf16.gmra.mxu3 %v3026_v33  ;;  %2730 = vmatmul.bf16.gmra.mxu2 %v5207_v6  ;;  %v3029_v29 = vor.u32 %v3027_v14, %v3025_v18  ;;  %v3781_v18 = vld [vmem:[%s6307_s2 + $0xc0] sm:$0xff]  ;;  %v3779_v33 = vld [vmem:[%s6307_s2 + $0xb0] sm:$0xff] }
 0x1c0   : > { %v866_v20 = vpop.f32.mrf.mxu1  ;;  %v2040_v12 = vpop.f32.mrf.mxu0 }
 0x1c1   : > { %v1578_v3 = vpop.f32.mrf.mxu3  ;;  %v924_v30 = vadd.f32 %v866_v20, %v5766_v24  ;;  %v6095_v15 = vpop.f32.mrf.mxu2  ;;  %v3033_v24 = vrot.slane %v3031_v37, 1 }
 0x1c2   : > { %v1637_v57 = vadd.f32 %v1578_v3, %v1297_v48  ;;  %v6124_v48 = vld [vmem:[%s5461_s10 + $0x60] sm:$0xff] }
 0x1c3   : > { %v1298_v4 = vadd.f32 %v6041_v63, %v924_v30  ;;  %v3437_v63 = vsel %vm1072_vm0, %v3434_v42, %v3436_v5  ;;  %v3034_v19 = vsel %vm611_vm1, %v3029_v29, %v3033_v24  ;;  %v3039_v40 = vshll.u32 %v6124_v48, 16 }
 0x1c4   : > { %v6097_v36 = vadd.f32 %v2038_v50, %v1637_v57  ;;  %v2264_v50 = vsel %vm1072_vm0, %v2261_v8, %v2263_v60  ;;  %3907 = vperm.xlu0 %5382, %v3781_v18   ;;  %v5208_v8 = vld [vmem:[%s5461_s10 + $0x60] sm:$0xff]  ;;  %3897 = vperm.xlu1 %5383, %v3779_v33   ;;  %v3037_v29 = vor.u32 %v3035_v25, %v3033_v24 }
 0x1c8   : > { %v2346_v52 = vpop.f32.mrf.mxu1  ;;  %v3519_v62 = vpop.f32.mrf.mxu0 }
 0x1c9   : > { %v1580_v16 = vpop.f32.mrf.mxu3  ;;  %v6114_v44 = vpop.f32.mrf.mxu2  ;;  %v2444_v42 = vadd.f32 %v2346_v52, %v5787_v10  ;;  %v3784_v10 = vld [vmem:[%s6307_s2 + $0xd8] sm:$0xff] }
 0x1ca   : > { %v1638_v31 = vadd.f32 %v1580_v16, %v1298_v4  ;;  %v3438_v4 = vrot.slane %v6131_v51, 1  ;;  %v3041_v16 = vrot.slane %v3039_v40, 1  ;;  %v3798_v40 = vpop.permute.xlu1 %3797 }
 0x1cb   : > { %2385 = vmatmul.bf16.gmra.mxu1 %v2264_v50  ;;  %3558 = vmatmul.bf16.gmra.mxu0 %v3437_v63  ;;  %v2784_v3 = vadd.f32 %v6060_v2, %v2444_v42 }
 0x1cc   : > { %v6116_v34 = vadd.f32 %v2040_v12, %v1638_v31  ;;  %v6128_v12 = vld [vmem:[%s5461_s10 + $0x58] sm:$0xff]  ;;  %3922 = vperm.xlu0 %5382, %v3784_v10   ;;  %3912 = vperm.xlu1 %5383, %v3782_v43   ;;  %v3042_v18 = vsel %vm611_vm1, %v3037_v29, %v3041_v16  ;;  %v3777_v10 = vld [vmem:[%s6307_s2 + $0xa0] sm:$0xff] }
 0x1cd   : > { %v2265_v37 = vrot.slane %v6128_v12, 1  ;;  %v6204_v12 = vld [vmem:[%s5461_s10 + $0x70] sm:$0xff] }
 0x1ce   : > { %3185 = vmatmul.bf16.gmra.mxu3 %v3034_v19  ;;  %2735 = vmatmul.bf16.gmra.mxu2 %v5208_v8 }
 0x1cf   : > { %v2266_v24 = vsel %vm1072_vm0, %v2263_v60, %v2265_v37  ;;  %v5209_v60 = vld [vmem:[%s5461_s10 + $0x68] sm:$0xff] }
 0x1d0   : > { %v2348_v57 = vpop.f32.mrf.mxu1  ;;  %v3521_v20 = vpop.f32.mrf.mxu0 }
 0x1d1   : > { %v3146_v6 = vpop.f32.mrf.mxu3  ;;  %v2445_v14 = vadd.f32 %v2348_v57, %v5796_v22  ;;  %v6139_v2 = vpop.f32.mrf.mxu2  ;;  %v3774_v22 = vld [vmem:[%s6307_s2 + $0x88] sm:$0xff] }
 0x1d2   : > { %v3244_v30 = vadd.f32 %v3146_v6, %v2784_v3  ;;  %3872 = vperm.xlu2 %5384, %v3774_v22   ;;  %v6168_v3 = vld [vmem:[%s5461_s10 + $0x68] sm:$0xff]  ;;  %v3043_v22 = vshrl.u32 %v6124_v48, 16  ;;  %v3780_v48 = vld [vmem:[%s6307_s2 + $0xb8] sm:$0xff] }
 0x1d3   : > { %v2785_v31 = vadd.f32 %v6073_v11, %v2445_v14  ;;  %v3439_v11 = vsel %vm1072_vm0, %v3436_v5, %v3438_v4 }
 0x1d4   : > { %v3617_v28 = vadd.f32 %v3519_v62, %v3244_v30  ;;  %v3793_v62 = vpop.permute.xlu0 %3792 }
 0x1d6   : > { %v3925_v19 = vmul.f32 %v3788_v13, %v3617_v28 }
 0x1d8   : > { %v2351_v63 = vpop.f32.mrf.mxu1  ;;  %v3524_v54 = vpop.f32.mrf.mxu0  ;;  %v3986_v13 = vmul.f32 %v3925_v19, %v3617_v28 }
 0x1d9   : > { %v3148_v52 = vpop.f32.mrf.mxu3  ;;  %v2446_v42 = vadd.f32 %v2351_v63, %v5810_v59  ;;  %v6159_v33 = vpop.f32.mrf.mxu2 }
 0x1da   : > { %v3245_v50 = vadd.f32 %v3148_v52, %v2785_v31  ;;  %3887 = vperm.xlu2 %5384, %v3777_v10   ;;  %v6176_v31 = vld [vmem:[%s5461_s10 + $0x60] sm:$0xff] }
 0x1db   : > { %2390 = vmatmul.bf16.gmra.mxu1 %v2266_v24  ;;  %3563 = vmatmul.bf16.gmra.mxu0 %v3439_v11  ;;  %v2267_v11 = vrot.slane %v6176_v31, 1 }
 0x1dc   : > { %v3618_v8 = vadd.f32 %v3521_v20, %v3245_v50  ;;  %v2786_v20 = vadd.f32 %v6095_v15, %v2446_v42  ;;  %v3047_v15 = vshll.u32 %v6168_v3, 16 }
 0x1de   : > { %v5267_v6 = vpack.c.bf16 %v3618_v8, %v3617_v28  ;;  %v3926_v5 = vmul.f32 %v3793_v62, %v3618_v8  ;;  %3190 = vmatmul.bf16.gmra.mxu3 %v3042_v18  ;;  %2740 = vmatmul.bf16.gmra.mxu2 %v5209_v60  ;;  %v6179_v28 = vld [vmem:[%s5461_s10 + $0x68] sm:$0xff]  ;;  %v3045_v18 = vor.u32 %v3043_v22, %v3041_v16 }
 0x1df   : > { %v3440_v62 = vrot.slane %v6179_v28, 1  ;;  %v2268_v16 = vsel %vm1072_vm0, %v2265_v37, %v2267_v11 }
 0x1e0   : > { %5268 = vst [vmem:[%s6164_s7] sm:$0xff] %v5267_v6   ;;  %v3953_v59 = vadd.f32 %v3926_v5, %v3925_v19  ;;  %v3987_v57 = vmul.f32 %v3926_v5, %v3618_v8  ;;  %v2353_v43 = vpop.f32.mrf.mxu1  ;;  %v3526_v29 = vpop.f32.mrf.mxu0  ;;  %v3049_v19 = vrot.slane %v3047_v15, 1 }
 0x1e1   : > { %v3151_v25 = vpop.f32.mrf.mxu3  ;;  %v2447_v50 = vadd.f32 %v2353_v43, %v5823_v35  ;;  %v6184_v63 = vpop.f32.mrf.mxu2 }
 0x1e2   : > { %v4014_v30 = vadd.f32 %v3987_v57, %v3986_v13  ;;  %v3246_v14 = vadd.f32 %v3151_v25, %v2786_v20  ;;  %3902 = vperm.xlu2 %5384, %v3780_v48   ;;  %v3050_v57 = vsel %vm611_vm1, %v3045_v18, %v3049_v19 }
 0x1e3   : > { %v2787_v60 = vadd.f32 %v6114_v44, %v2447_v50  ;;  %v3441_v44 = vsel %vm1072_vm0, %v3438_v4, %v3440_v62  ;;  %v6215_v50 = vld [vmem:[%s5461_s10 + $0x70] sm:$0xff] }
 0x1e4   : > { %v3619_v52 = vadd.f32 %v3524_v54, %v3246_v14 }
 0x1e6   : > { %v3927_v24 = vmul.f32 %v3798_v40, %v3619_v52  ;;  %v5210_v40 = vld [vmem:[%s5461_s10 + $0x70] sm:$0xff] }
 0x1e8   : > { %v3954_v8 = vadd.f32 %v3953_v59, %v3927_v24  ;;  %v3988_v42 = vmul.f32 %v3927_v24, %v3619_v52  ;;  %v2356_v5 = vpop.f32.mrf.mxu1  ;;  %v3529_v13 = vpop.f32.mrf.mxu0  ;;  %v3051_v24 = vshrl.u32 %v6168_v3, 16 }
 0x1e9   : > { %v3153_v54 = vpop.f32.mrf.mxu3  ;;  %v3803_v59 = vpop.permute.xlu1 %3802  ;;  %v2448_v10 = vadd.f32 %v2356_v5, %v5848_v1  ;;  %v3783_v1 = vld [vmem:[%s6307_s2 + $0xd0] sm:$0xff] }
 0x1ea   : > { %v4015_v35 = vadd.f32 %v4014_v30, %v3988_v42  ;;  %v3247_v6 = vadd.f32 %v3153_v54, %v2787_v60  ;;  %v6200_v25 = vpop.f32.mrf.mxu2  ;;  %3917 = vperm.xlu2 %5384, %v3783_v1   ;;  %v3442_v54 = vrot.slane %v6215_v50, 1  ;;  %v6233_v1 = vld [vmem:[%s5461_s10 + $0x78] sm:$0xff]  ;;  %v3818_v50 = vpop.permute.xlu0 %3817 }
 0x1eb   : > { %2395 = vmatmul.bf16.gmra.mxu1 %v2268_v16  ;;  %3568 = vmatmul.bf16.gmra.mxu0 %v3441_v44  ;;  %v2788_v4 = vadd.f32 %v6139_v2, %v2448_v10  ;;  %v3055_v2 = vshll.u32 %v6204_v12, 16 }
 0x1ec   : > { %v3620_v20 = vadd.f32 %v3526_v29, %v3247_v6  ;;  %v3808_v29 = vpop.permute.xlu2 %3807  ;;  %v3443_v10 = vsel %vm1072_vm0, %v3440_v62, %v3442_v54 }
 0x1ed   : > { %v3057_v6 = vrot.slane %v3055_v2, 1  ;;  %v3063_v2 = vshll.u32 %v6233_v1, 16 }
 0x1ee   : > { %v5272_v30 = vpack.c.bf16 %v3620_v20, %v3619_v52  ;;  %v3928_v14 = vmul.f32 %v3803_v59, %v3620_v20  ;;  %3195 = vmatmul.bf16.gmra.mxu3 %v3050_v57  ;;  %2745 = vmatmul.bf16.gmra.mxu2 %v5210_v40  ;;  %v6212_v52 = vld [vmem:[%s5461_s10 + $0x68] sm:$0xff] }
 0x1ef   : > { %v2269_v48 = vrot.slane %v6212_v52, 1  ;;  %v6241_v52 = vld [vmem:[%s5461_s10 + $0x78] sm:$0xff] }
 0x1f0   : > { %5334 = vst [vmem:[%s6164_s7 + $0x8] sm:$0xff] %v5272_v30   ;;  %v3955_v51 = vadd.f32 %v3954_v8, %v3928_v14  ;;  %v3989_v37 = vmul.f32 %v3928_v14, %v3620_v20  ;;  %v2358_v22 = vpop.f32.mrf.mxu1  ;;  %v3531_v15 = vpop.f32.mrf.mxu0 }
 0x1f1   : > { %v3156_v43 = vpop.f32.mrf.mxu3  ;;  %v2449_v8 = vadd.f32 %v2358_v22, %v5858_v53  ;;  %v2270_v20 = vsel %vm1072_vm0, %v2267_v11, %v2269_v48 }
 0x1f2   : > { %v4016_v31 = vadd.f32 %v4015_v35, %v3989_v37  ;;  %v3248_v28 = vadd.f32 %v3156_v43, %v2788_v4  ;;  %v6220_v42 = vpop.f32.mrf.mxu2  ;;  %v3053_v35 = vor.u32 %v3051_v24, %v3049_v19  ;;  %v3059_v24 = vshrl.u32 %v6204_v12, 16 }
 0x1f3   : > { %v2789_v44 = vadd.f32 %v6159_v33, %v2449_v8  ;;  %v5211_v33 = vld [vmem:[%s5461_s10 + $0x78] sm:$0xff] }
 0x1f4   : > { %v3621_v18 = vadd.f32 %v3529_v13, %v3248_v28  ;;  %v3813_v40 = vpop.permute.xlu2 %3812  ;;  %v3058_v19 = vsel %vm611_vm1, %v3053_v35, %v3057_v6 }
 0x1f6   : > { %v3929_v60 = vmul.f32 %v3808_v29, %v3621_v18 }
 0x1f8   : > { %v3956_v5 = vadd.f32 %v3955_v51, %v3929_v60  ;;  %v3990_v16 = vmul.f32 %v3929_v60, %v3621_v18  ;;  %v2361_v13 = vpop.f32.mrf.mxu1  ;;  %v3534_v53 = vpop.f32.mrf.mxu0 }
 0x1f9   : > { %v3158_v3 = vpop.f32.mrf.mxu3  ;;  %v2450_v14 = vadd.f32 %v2361_v13, %v5867_v46 }
 0x1fa   : > { %v4017_v59 = vadd.f32 %v4016_v31, %v3990_v16  ;;  %v3249_v57 = vadd.f32 %v3158_v3, %v2789_v44  ;;  %v6229_v51 = vpop.f32.mrf.mxu2  ;;  %v3061_v16 = vor.u32 %v3059_v24, %v3057_v6  ;;  %v3065_v44 = vrot.slane %v3063_v2, 1 }
 0x1fb   : > { %2400 = vmatmul.bf16.gmra.mxu1 %v2270_v20  ;;  %3573 = vmatmul.bf16.gmra.mxu0 %v3443_v10  ;;  %v2790_v43 = vadd.f32 %v6184_v63, %v2450_v14  ;;  %v2155_v14 = vld [vmem:[%s5461_s10 + $0x78] sm:$0x1] }
 0x1fc   : > { %v3622_v30 = vadd.f32 %v3531_v15, %v3249_v57  ;;  %v6238_v15 = vld [vmem:[%s5461_s10 + $0x70] sm:$0xff]  ;;  %v2868_v57 = vld [vmem:[%s5461_s10 + $0x80] sm:$0x1]  ;;  %v3066_v6 = vsel %vm611_vm1, %v3061_v16, %v3065_v44 }
 0x1fd   : > { %v2271_v35 = vrot.slane %v6238_v15, 1 }
 0x1fe   : > { %v5277_v37 = vpack.c.bf16 %v3622_v30, %v3621_v18  ;;  %v3930_v4 = vmul.f32 %v3813_v40, %v3622_v30  ;;  %3200 = vmatmul.bf16.gmra.mxu3 %v3058_v19  ;;  %2750 = vmatmul.bf16.gmra.mxu2 %v5211_v33  ;;  %v2943_v33 = vunpack.c.l.b16 %v2868_v57 }
 0x1ff   : > { %v2272_v40 = vsel %vm1072_vm0, %v2269_v48, %v2271_v35  ;;  %v2230_v48 = vunpack.c.l.b16 %v2155_v14 }
 0x200   : > { %5335 = vst [vmem:[%s6164_s7 + $0x10] sm:$0xff] %v5277_v37   ;;  %v3957_v11 = vadd.f32 %v3956_v5, %v3930_v4  ;;  %v3991_v62 = vmul.f32 %v3930_v4, %v3622_v30  ;;  %v2363_v28 = vpop.f32.mrf.mxu1  ;;  %v3536_v22 = vpop.f32.mrf.mxu0  ;;  %v3444_v5 = vrot.slane %v6241_v52, 1  ;;  %v3328_v37 = vld [vmem:[%s5461_s10 + $0x80] sm:$0x1]  ;;  %s4143_s10 = sshll.u32 %s6311_s16, 1 }
 0x201   : > { %v3161_v29 = vpop.f32.mrf.mxu3  ;;  %v2451_v8 = vadd.f32 %v2363_v28, %v5878_v45  ;;  %v3823_v30 = vpop.permute.xlu1 %3822  ;;  %v2245_v24 = vpack.c.b16 %v2230_v48, %v2230_v48  ;;  %s208_s19 = scalar_lea.vmem %s6309_s4, %s4143_s10 }
 0x202   : > { %v4018_v46 = vadd.f32 %v4017_v59, %v3991_v62  ;;  %v3250_v31 = vadd.f32 %v3161_v29, %v2790_v43  ;;  %v6246_v63 = vpop.f32.mrf.mxu2  ;;  %v3445_v19 = vsel %vm1072_vm0, %v3442_v54, %v3444_v5  ;;  %v3403_v29 = vunpack.c.l.b16 %v3328_v37 }
 0x203   : > { %v2791_v12 = vadd.f32 %v6200_v25, %v2451_v8  ;;  %v2958_v54 = vpack.c.b16 %v2943_v33, %v2943_v33  ;;  %v3828_v8 = vpop.permute.xlu2 %3827  ;;  %v3833_v33 = vpop.permute.xlu0 %3832 }
 0x204   : > { %v3623_v18 = vadd.f32 %v3534_v53, %v3250_v31  ;;  %v3418_v2 = vpack.c.b16 %v3403_v29, %v3403_v29 }
 0x206   : > { %v3931_v60 = vmul.f32 %v3818_v50, %v3623_v18 }
 0x208   : > { %v3958_v3 = vadd.f32 %v3957_v11, %v3931_v60  ;;  %v3992_v59 = vmul.f32 %v3931_v60, %v3623_v18  ;;  %v2366_v45 = vpop.f32.mrf.mxu1  ;;  %v3539_v10 = vpop.f32.mrf.mxu0  ;;  %v3071_v60 = vshll.u32 %v2958_v54, 16 }
 0x209   : > { %v3163_v13 = vpop.f32.mrf.mxu3  ;;  %v2452_v25 = vadd.f32 %v2366_v45, %v5885_v0 }
 0x20a   : > { %v4019_v53 = vadd.f32 %v4018_v46, %v3992_v59  ;;  %v3251_v20 = vadd.f32 %v3163_v13, %v2791_v12  ;;  %v6258_v11 = vpop.f32.mrf.mxu2  ;;  %v3446_v13 = vrot.slane %v3418_v2, 1 }
 0x20b   : > { %2405 = vmatmul.bf16.gmra.mxu1 %v2272_v40  ;;  %3578 = vmatmul.bf16.gmra.mxu0 %v3445_v19  ;;  %v2792_v28 = vadd.f32 %v6220_v42, %v2452_v25  ;;  %v3073_v42 = vrot.slane %v3071_v60, 1 }
 0x20c   : > { %v3624_v4 = vadd.f32 %v3536_v22, %v3251_v20 }
 0x20e   : > { %v5282_v62 = vpack.c.bf16 %v3624_v4, %v3623_v18  ;;  %v3932_v43 = vmul.f32 %v3823_v30, %v3624_v4  ;;  %3205 = vmatmul.bf16.gmra.mxu3 %v3066_v6  ;;  %v3067_v18 = vshrl.u32 %v6233_v1, 16 }
 0x210   : > { %5336 = vst [vmem:[%s6164_s7 + $0x18] sm:$0xff] %v5282_v62   ;;  %v3959_v46 = vadd.f32 %v3958_v3, %v3932_v43  ;;  %v3993_v31 = vmul.f32 %v3932_v43, %v3624_v4  ;;  %v2368_v50 = vpop.f32.mrf.mxu1  ;;  %v3541_v0 = vpop.f32.mrf.mxu0  ;;  %v2273_v3 = vrot.slane %v2245_v24, 1  ;;  %v3069_v20 = vor.u32 %v3067_v18, %v3065_v44 }
 0x211   : > { %v3166_v15 = vpop.f32.mrf.mxu3  ;;  %v2453_v59 = vadd.f32 %v2368_v50, %v5894_v27  ;;  %v3447_v27 = vsel %vm1072_vm0, %v3444_v5, %v3446_v13 }
 0x212   : > { %v4020_v52 = vadd.f32 %v4019_v53, %v3993_v31  ;;  %v3252_v22 = vadd.f32 %v3166_v15, %v2792_v28  ;;  %v2716_v12 = vpop.f32.mrf.mxu2  ;;  %v3074_v37 = vsel %vm611_vm1, %v3069_v20, %v3073_v42  ;;  %v3838_v28 = vpop.permute.xlu1 %3837 }
 0x213   : > { %v2793_v40 = vadd.f32 %v6229_v51, %v2453_v59 }
 0x214   : > { %v3625_v16 = vadd.f32 %v3539_v10, %v3252_v22  ;;  %v2274_v10 = vsel %vm1072_vm0, %v2271_v35, %v2273_v3 }
 0x216   : > { %v3933_v57 = vmul.f32 %v3828_v8, %v3625_v16 }
 0x218   : > { %v3960_v45 = vadd.f32 %v3959_v46, %v3933_v57  ;;  %v3994_v53 = vmul.f32 %v3933_v57, %v3625_v16  ;;  %v2371_v14 = vpop.f32.mrf.mxu1  ;;  %v3544_v1 = vpop.f32.mrf.mxu0 }
 0x219   : > { %v3168_v19 = vpop.f32.mrf.mxu3  ;;  %v2454_v44 = vadd.f32 %v2371_v14, %v5915_v23 }
 0x21a   : > { %v4021_v30 = vadd.f32 %v4020_v52, %v3994_v53  ;;  %v3253_v6 = vadd.f32 %v3168_v19, %v2793_v40  ;;  %v2718_v25 = vpop.f32.mrf.mxu2 }
 0x21b   : > { %2410 = vmatmul.bf16.gmra.mxu1 %v2274_v10  ;;  %3583 = vmatmul.bf16.gmra.mxu0 %v3447_v27  ;;  %v2794_v29 = vadd.f32 %v6246_v63, %v2454_v44 }
 0x21c   : > { %v3626_v4 = vadd.f32 %v3541_v0, %v3253_v6  ;;  %v3848_v6 = vpop.permute.xlu0 %3847 }
 0x21e   : > { %v5287_v51 = vpack.c.bf16 %v3626_v4, %v3625_v16  ;;  %v3934_v62 = vmul.f32 %v3833_v33, %v3626_v4  ;;  %3210 = vmatmul.bf16.gmra.mxu3 %v3074_v37  ;;  %v3843_v16 = vpop.permute.xlu2 %3842 }
 0x220   : > { %5337 = vst [vmem:[%s6164_s7 + $0x20] sm:$0xff] %v5287_v51   ;;  %v3961_v43 = vadd.f32 %v3960_v45, %v3934_v62  ;;  %v3995_v48 = vmul.f32 %v3934_v62, %v3626_v4  ;;  %v2373_v46 = vpop.f32.mrf.mxu1  ;;  %v3546_v31 = vpop.f32.mrf.mxu0 }
 0x221   : > { %v3171_v35 = vpop.f32.mrf.mxu3  ;;  %v2455_v23 = vadd.f32 %v2373_v46, %v5927_v41 }
 0x222   : > { %v4022_v54 = vadd.f32 %v4021_v30, %v3995_v48  ;;  %v3254_v5 = vadd.f32 %v3171_v35, %v2794_v29  ;;  %v2721_v52 = vpop.f32.mrf.mxu2 }
 0x223   : > { %v2795_v24 = vadd.f32 %v6258_v11, %v2455_v23 }
 0x224   : > { %v3627_v15 = vadd.f32 %v3544_v1, %v3254_v5 }
 0x226   : > { %v3935_v22 = vmul.f32 %v3838_v28, %v3627_v15 }
 0x228   : > { %v3962_v50 = vadd.f32 %v3961_v43, %v3935_v22  ;;  %v3996_v0 = vmul.f32 %v3935_v22, %v3627_v15  ;;  %v2376_v63 = vpop.f32.mrf.mxu1  ;;  %v3549_v60 = vpop.f32.mrf.mxu0 }
 0x229   : > { %v3173_v2 = vpop.f32.mrf.mxu3  ;;  %v2456_v57 = vadd.f32 %v2376_v63, %v5939_v61  ;;  %v3853_v43 = vpop.permute.xlu1 %3852 }
 0x22a   : > { %v4023_v8 = vadd.f32 %v4022_v54, %v3996_v0  ;;  %v3255_v18 = vadd.f32 %v3173_v2, %v2795_v24  ;;  %v2723_v20 = vpop.f32.mrf.mxu2  ;;  %v3858_v22 = vpop.permute.xlu2 %3857 }
 0x22b   : > { %v2796_v45 = vadd.f32 %v2716_v12, %v2456_v57 }
 0x22c   : > { %v3628_v59 = vadd.f32 %v3546_v31, %v3255_v18 }
 0x22e   : > { %v5292_v3 = vpack.c.bf16 %v3628_v59, %v3627_v15  ;;  %v3936_v13 = vmul.f32 %v3843_v16, %v3628_v59 }
 0x230   : > { %5338 = vst [vmem:[%s6164_s7 + $0x28] sm:$0xff] %v5292_v3   ;;  %v3963_v41 = vadd.f32 %v3962_v50, %v3936_v13  ;;  %v3997_v42 = vmul.f32 %v3936_v13, %v3628_v59  ;;  %v2378_v11 = vpop.f32.mrf.mxu1  ;;  %v3551_v30 = vpop.f32.mrf.mxu0 }
 0x231   : > { %v3176_v53 = vpop.f32.mrf.mxu3  ;;  %v2457_v1 = vadd.f32 %v2378_v11, %v5949_v56  ;;  %v3863_v13 = vpop.permute.xlu0 %3862 }
 0x232   : > { %v4024_v40 = vadd.f32 %v4023_v8, %v3997_v42  ;;  %v3256_v19 = vadd.f32 %v3176_v53, %v2796_v45  ;;  %v2726_v4 = vpop.f32.mrf.mxu2 }
 0x233   : > { %v2797_v33 = vadd.f32 %v2718_v25, %v2457_v1 }
 0x234   : > { %v3629_v14 = vadd.f32 %v3549_v60, %v3256_v19 }
 0x236   : > { %v3937_v10 = vmul.f32 %v3848_v6, %v3629_v14 }
 0x238   : > { %v3964_v27 = vadd.f32 %v3963_v41, %v3937_v10  ;;  %v3998_v61 = vmul.f32 %v3937_v10, %v3629_v14  ;;  %v2381_v62 = vpop.f32.mrf.mxu1  ;;  %v3554_v12 = vpop.f32.mrf.mxu0 }
 0x239   : > { %v3178_v37 = vpop.f32.mrf.mxu3  ;;  %v2458_v29 = vadd.f32 %v2381_v62, %v5956_v21  ;;  %v3868_v10 = vpop.permute.xlu1 %3867 }
 0x23a   : > { %v4025_v44 = vadd.f32 %v4024_v40, %v3998_v61  ;;  %v3257_v51 = vadd.f32 %v3178_v37, %v2797_v33  ;;  %v2728_v50 = vpop.f32.mrf.mxu2 }
 0x23b   : > { %v2798_v46 = vadd.f32 %v2721_v52, %v2458_v29  ;;  %v3873_v29 = vpop.permute.xlu2 %3872 }
 0x23c   : > { %v3630_v48 = vadd.f32 %v3551_v30, %v3257_v51 }
 0x23e   : > { %v5297_v35 = vpack.c.bf16 %v3630_v48, %v3629_v14  ;;  %v3938_v54 = vmul.f32 %v3853_v43, %v3630_v48 }
 0x240   : > { %5339 = vst [vmem:[%s6164_s7 + $0x30] sm:$0xff] %v5297_v35   ;;  %v3965_v5 = vadd.f32 %v3964_v27, %v3938_v54  ;;  %v3999_v56 = vmul.f32 %v3938_v54, %v3630_v48  ;;  %v2383_v25 = vpop.f32.mrf.mxu1  ;;  %v3556_v23 = vpop.f32.mrf.mxu0 }
 0x241   : > { %v3181_v31 = vpop.f32.mrf.mxu3  ;;  %v2459_v24 = vadd.f32 %v2383_v25, %v5962_v32 }
 0x242   : > { %v4026_v28 = vadd.f32 %v4025_v44, %v3999_v56  ;;  %v3258_v15 = vadd.f32 %v3181_v31, %v2798_v46  ;;  %v2731_v41 = vpop.f32.mrf.mxu2 }
 0x243   : > { %v2799_v18 = vadd.f32 %v2723_v20, %v2459_v24 }
 0x244   : > { %v3631_v0 = vadd.f32 %v3554_v12, %v3258_v15 }
 0x246   : > { %v3939_v2 = vmul.f32 %v3858_v22, %v3631_v0 }
 0x248   : > { %v3966_v8 = vadd.f32 %v3965_v5, %v3939_v2  ;;  %v4000_v21 = vmul.f32 %v3939_v2, %v3631_v0  ;;  %v2386_v59 = vpop.f32.mrf.mxu1  ;;  %v3559_v52 = vpop.f32.mrf.mxu0 }
 0x249   : > { %v3183_v63 = vpop.f32.mrf.mxu3  ;;  %v2460_v3 = vadd.f32 %v2386_v59, %v5972_v58 }
 0x24a   : > { %v4027_v60 = vadd.f32 %v4026_v28, %v4000_v21  ;;  %v3259_v16 = vadd.f32 %v3183_v63, %v2799_v18  ;;  %v2733_v58 = vpop.f32.mrf.mxu2 }
 0x24b   : > { %v2800_v40 = vadd.f32 %v2726_v4, %v2460_v3  ;;  %v3883_v3 = vpop.permute.xlu1 %3882 }
 0x24c   : > { %v3632_v57 = vadd.f32 %v3556_v23, %v3259_v16 }
 0x24e   : > { %v5302_v42 = vpack.c.bf16 %v3632_v57, %v3631_v0  ;;  %v3940_v45 = vmul.f32 %v3863_v13, %v3632_v57  ;;  %v3878_v0 = vpop.permute.xlu0 %3877 }
 0x250   : > { %5340 = vst [vmem:[%s6164_s7 + $0x38] sm:$0xff] %v5302_v42   ;;  %v3967_v53 = vadd.f32 %v3966_v8, %v3940_v45  ;;  %v4001_v32 = vmul.f32 %v3940_v45, %v3632_v57  ;;  %v2388_v20 = vpop.f32.mrf.mxu1  ;;  %v3561_v6 = vpop.f32.mrf.mxu0 }
 0x251   : > { %v3186_v19 = vpop.f32.mrf.mxu3  ;;  %v2461_v1 = vadd.f32 %v2388_v20, %v5984_v9 }
 0x252   : > { %v4028_v11 = vadd.f32 %v4027_v60, %v4001_v32  ;;  %v3260_v30 = vadd.f32 %v3186_v19, %v2800_v40  ;;  %v2736_v31 = vpop.f32.mrf.mxu2 }
 0x253   : > { %v2801_v37 = vadd.f32 %v2728_v50, %v2461_v1 }
 0x254   : > { %v3633_v14 = vadd.f32 %v3559_v52, %v3260_v30 }
 0x256   : > { %v3941_v27 = vmul.f32 %v3868_v10, %v3633_v14 }
 0x258   : > { %v3968_v61 = vadd.f32 %v3967_v53, %v3941_v27  ;;  %v4002_v33 = vmul.f32 %v3941_v27, %v3633_v14  ;;  %v2391_v12 = vpop.f32.mrf.mxu1  ;;  %v3564_v4 = vpop.f32.mrf.mxu0 }
 0x259   : > { %v3188_v44 = vpop.f32.mrf.mxu3  ;;  %v2462_v48 = vadd.f32 %v2391_v12, %v5994_v49  ;;  %v3893_v12 = vpop.permute.xlu0 %3892 }
 0x25a   : > { %v4029_v51 = vadd.f32 %v4028_v11, %v4002_v33  ;;  %v3261_v62 = vadd.f32 %v3188_v44, %v2801_v37  ;;  %v2738_v59 = vpop.f32.mrf.mxu2 }
 0x25b   : > { %v2802_v56 = vadd.f32 %v2731_v41, %v2462_v48 }
 0x25c   : > { %v3634_v43 = vadd.f32 %v3561_v6, %v3261_v62  ;;  %v3888_v6 = vpop.permute.xlu2 %3887 }
 0x25e   : > { %v5307_v35 = vpack.c.bf16 %v3634_v43, %v3633_v14  ;;  %v3942_v54 = vmul.f32 %v3873_v29, %v3634_v43 }
 0x260   : > { %5341 = vst [vmem:[%s6164_s7 + $0x40] sm:$0xff] %v5307_v35   ;;  %v3969_v9 = vadd.f32 %v3968_v61, %v3942_v54  ;;  %v4003_v5 = vmul.f32 %v3942_v54, %v3634_v43  ;;  %v2393_v25 = vpop.f32.mrf.mxu1  ;;  %v3566_v23 = vpop.f32.mrf.mxu0 }
 0x261   : > { %v3191_v46 = vpop.f32.mrf.mxu3  ;;  %v2463_v50 = vadd.f32 %v2393_v25, %v6003_v39 }
 0x262   : > { %v4030_v28 = vadd.f32 %v4029_v51, %v4003_v5  ;;  %v3262_v15 = vadd.f32 %v3191_v46, %v2802_v56  ;;  %v2741_v14 = vpop.f32.mrf.mxu2 }
 0x263   : > { %v2803_v8 = vadd.f32 %v2733_v58, %v2463_v50 }
 0x264   : > { %v3635_v22 = vadd.f32 %v3564_v4, %v3262_v15  ;;  %v3898_v15 = vpop.permute.xlu1 %3897 }
 0x266   : > { %v3943_v24 = vmul.f32 %v3878_v0, %v3635_v22 }
 0x268   : > { %v3970_v49 = vadd.f32 %v3969_v9, %v3943_v24  ;;  %v4004_v2 = vmul.f32 %v3943_v24, %v3635_v22  ;;  %v2396_v60 = vpop.f32.mrf.mxu1  ;;  %v3569_v16 = vpop.f32.mrf.mxu0 }
 0x269   : > { %v3193_v21 = vpop.f32.mrf.mxu3  ;;  %v2464_v57 = vadd.f32 %v2396_v60, %v6013_v47 }
 0x26a   : > { %v4031_v18 = vadd.f32 %v4030_v28, %v4004_v2  ;;  %v3263_v63 = vadd.f32 %v3193_v21, %v2803_v8  ;;  %v2743_v48 = vpop.f32.mrf.mxu2 }
 0x26b   : > { %v2804_v45 = vadd.f32 %v2736_v31, %v2464_v57 }
 0x26c   : > { %v3636_v52 = vadd.f32 %v3566_v23, %v3263_v63 }
 0x26e   : > { %v5312_v13 = vpack.c.bf16 %v3636_v52, %v3635_v22  ;;  %v3944_v41 = vmul.f32 %v3883_v3, %v3636_v52 }
 0x270   : > { %5342 = vst [vmem:[%s6164_s7 + $0x48] sm:$0xff] %v5312_v13   ;;  %v3971_v39 = vadd.f32 %v3970_v49, %v3944_v41  ;;  %v4005_v42 = vmul.f32 %v3944_v41, %v3636_v52  ;;  %v2398_v19 = vpop.f32.mrf.mxu1  ;;  %v3571_v11 = vpop.f32.mrf.mxu0 }
 0x271   : > { %v3196_v53 = vpop.f32.mrf.mxu3  ;;  %v2465_v20 = vadd.f32 %v2398_v19, %v6022_v26 }
 0x272   : > { %v4032_v32 = vadd.f32 %v4031_v18, %v4005_v42  ;;  %v3264_v40 = vadd.f32 %v3196_v53, %v2804_v45  ;;  %v2746_v50 = vpop.f32.mrf.mxu2  ;;  %v3903_v18 = vpop.permute.xlu2 %3902 }
 0x273   : > { %v2805_v27 = vadd.f32 %v2738_v59, %v2465_v20  ;;  %v3908_v53 = vpop.permute.xlu0 %3907 }
 0x274   : > { %v3637_v30 = vadd.f32 %v3569_v16, %v3264_v40 }
 0x276   : > { %v3945_v1 = vmul.f32 %v3888_v6, %v3637_v30 }
 0x278   : > { %v3972_v47 = vadd.f32 %v3971_v39, %v3945_v1  ;;  %v4006_v10 = vmul.f32 %v3945_v1, %v3637_v30  ;;  %v2401_v37 = vpop.f32.mrf.mxu1  ;;  %v3574_v44 = vpop.f32.mrf.mxu0 }
 0x279   : > { %v3198_v58 = vpop.f32.mrf.mxu3  ;;  %v2466_v62 = vadd.f32 %v2401_v37, %v6032_v17 }
 0x27a   : > { %v4033_v61 = vadd.f32 %v4032_v32, %v4006_v10  ;;  %v3265_v33 = vadd.f32 %v3198_v58, %v2805_v27  ;;  %v2748_v39 = vpop.f32.mrf.mxu2  ;;  %v3913_v10 = vpop.permute.xlu1 %3912 }
 0x27b   : > { %v2806_v35 = vadd.f32 %v2741_v14, %v2466_v62 }
 0x27c   : > { %v3638_v51 = vadd.f32 %v3571_v11, %v3265_v33 }
 0x27e   : > { %v5317_v4 = vpack.c.bf16 %v3638_v51, %v3637_v30  ;;  %v3946_v43 = vmul.f32 %v3893_v12, %v3638_v51 }
 0x280   : > { %5343 = vst [vmem:[%s6164_s7 + $0x50] sm:$0xff] %v5317_v4   ;;  %v3973_v26 = vadd.f32 %v3972_v47, %v3946_v43  ;;  %v4007_v29 = vmul.f32 %v3946_v43, %v3638_v51  ;;  %v2403_v56 = vpop.f32.mrf.mxu1  ;;  %v3576_v46 = vpop.f32.mrf.mxu0 }
 0x281   : > { %v3201_v54 = vpop.f32.mrf.mxu3  ;;  %v2467_v28 = vadd.f32 %v2403_v56, %v6043_v55 }
 0x282   : > { %v4034_v9 = vadd.f32 %v4033_v61, %v4007_v29  ;;  %v3266_v5 = vadd.f32 %v3201_v54, %v2806_v35  ;;  %v2751_v27 = vpop.f32.mrf.mxu2 }
 0x283   : > { %v2807_v22 = vadd.f32 %v2743_v48, %v2467_v28 }
 0x284   : > { %v3639_v31 = vadd.f32 %v3574_v44, %v3266_v5 }
 0x286   : > { %v3947_v25 = vmul.f32 %v3898_v15, %v3639_v31  ;;  %v3923_v15 = vpop.permute.xlu0 %3922 }
 0x288   : > { %v3974_v17 = vadd.f32 %v3973_v26, %v3947_v25  ;;  %v4008_v23 = vmul.f32 %v3947_v25, %v3639_v31  ;;  %v2406_v2 = vpop.f32.mrf.mxu1  ;;  %v3579_v63 = vpop.f32.mrf.mxu0 }
 0x289   : > { %v3203_v0 = vpop.f32.mrf.mxu3  ;;  %v2468_v21 = vadd.f32 %v2406_v2, %v6062_v7  ;;  %v3918_v26 = vpop.permute.xlu2 %3917 }
 0x28a   : > { %v4035_v24 = vadd.f32 %v4034_v9, %v4008_v23  ;;  %v3267_v49 = vadd.f32 %v3203_v0, %v2807_v22 }
 0x28b   : > { %v2808_v52 = vadd.f32 %v2746_v50, %v2468_v21 }
 0x28c   : > { %v3640_v8 = vadd.f32 %v3576_v46, %v3267_v49 }
 0x28e   : > { %v5322_v60 = vpack.c.bf16 %v3640_v8, %v3639_v31  ;;  %v3948_v16 = vmul.f32 %v3903_v18, %v3640_v8 }
 0x290   : > { %5344 = vst [vmem:[%s6164_s7 + $0x58] sm:$0xff] %v5322_v60   ;;  %v3975_v55 = vadd.f32 %v3974_v17, %v3948_v16  ;;  %v4009_v59 = vmul.f32 %v3948_v16, %v3640_v8  ;;  %v2408_v41 = vpop.f32.mrf.mxu1  ;;  %v3581_v7 = vpop.f32.mrf.mxu0 }
 0x291   : > { %v3206_v57 = vpop.f32.mrf.mxu3  ;;  %v2469_v45 = vadd.f32 %v2408_v41, %v6075_v38 }
 0x292   : > { %v4036_v3 = vadd.f32 %v4035_v24, %v4009_v59  ;;  %v3268_v13 = vadd.f32 %v3206_v57, %v2808_v52 }
 0x293   : > { %v2809_v11 = vadd.f32 %v2748_v39, %v2469_v45 }
 0x294   : > { %v3641_v42 = vadd.f32 %v3579_v63, %v3268_v13 }
 0x296   : > { %v3949_v32 = vmul.f32 %v3908_v53, %v3641_v42 }
 0x298   : > { %v3976_v40 = vadd.f32 %v3975_v55, %v3949_v32  ;;  %v4010_v19 = vmul.f32 %v3949_v32, %v3641_v42  ;;  %v2411_v14 = vpop.f32.mrf.mxu1  ;;  %v3584_v44 = vpop.f32.mrf.mxu0 }
 0x299   : > { %v3208_v30 = vpop.f32.mrf.mxu3  ;;  %v2470_v47 = vadd.f32 %v2411_v14, %v6097_v36  ;;  %v2753_v36 = vpop.f32.mrf.mxu2 }
 0x29a   : > { %v4037_v20 = vadd.f32 %v4036_v3, %v4010_v19  ;;  %v3269_v6 = vadd.f32 %v3208_v30, %v2809_v11 }
 0x29b   : > { %v2810_v37 = vadd.f32 %v2751_v27, %v2470_v47 }
 0x29c   : > { %v3642_v1 = vadd.f32 %v3581_v7, %v3269_v6 }
 0x29e   : > { %v5327_v58 = vpack.c.bf16 %v3642_v1, %v3641_v42  ;;  %v3950_v61 = vmul.f32 %v3913_v10, %v3642_v1 }
 0x2a0   : > { %5345 = vst [vmem:[%s6164_s7 + $0x60] sm:$0xff] %v5327_v58   ;;  %v3977_v38 = vadd.f32 %v3976_v40, %v3950_v61  ;;  %v4011_v33 = vmul.f32 %v3950_v61, %v3642_v1  ;;  %v2413_v4 = vpop.f32.mrf.mxu1  ;;  %v3586_v31 = vpop.f32.mrf.mxu0 }
 0x2a1   : > { %v3211_v51 = vpop.f32.mrf.mxu3  ;;  %v2471_v48 = vadd.f32 %v2413_v4, %v6116_v34 }
 0x2a2   : > { %v4038_v62 = vadd.f32 %v4037_v20, %v4011_v33  ;;  %v3270_v12 = vadd.f32 %v3211_v51, %v2810_v37 }
 0x2a3   : > { %v2811_v9 = vadd.f32 %v2753_v36, %v2471_v48 }
 0x2a4   : > { %v3643_v43 = vadd.f32 %v3584_v44, %v3270_v12 }
 0x2a6   : > { %v3951_v29 = vmul.f32 %v3918_v26, %v3643_v43 }
 0x2a8   : > { %v3978_v35 = vadd.f32 %v3977_v38, %v3951_v29  ;;  %v4012_v54 = vmul.f32 %v3951_v29, %v3643_v43 }
 0x2a9   : > { %v3213_v5 = vpop.f32.mrf.mxu3 }
 0x2aa   : > { %v4039_v56 = vadd.f32 %v4038_v62, %v4012_v54  ;;  %v3271_v46 = vadd.f32 %v3213_v5, %v2811_v9 }
 0x2ac   : > { %v3644_v28 = vadd.f32 %v3586_v31, %v3271_v46 }
 0x2ae   : > { %v5332_v25 = vpack.c.bf16 %v3644_v28, %v3643_v43  ;;  %v3952_v17 = vmul.f32 %v3923_v15, %v3644_v28 }
 0x2b0   : > { %5346 = vst [vmem:[%s6164_s7 + $0x68] sm:$0xff] %v5332_v25   ;;  %v3979_v23 = vadd.f32 %v3978_v35, %v3952_v17  ;;  %v4013_v22 = vmul.f32 %v3952_v17, %v3644_v28 }
 0x2b2   : > { %v3980_v50 = vrot.slane %v3979_v23, 4  ;;  %v4040_v34 = vadd.f32 %v4039_v56, %v4013_v22 }
 0x2b4   : > { %v3981_v0 = vadd.f32 %v3980_v50, %v3979_v23  ;;  %v4041_v24 = vrot.slane %v4040_v34, 4 }
 0x2b6   : > { %v3982_v49 = vrot.slane %v3981_v0, 2  ;;  %v4042_v2 = vadd.f32 %v4041_v24, %v4040_v34 }
 0x2b8   : > { %v3983_v8 = vadd.f32 %v3982_v49, %v3981_v0  ;;  %v4043_v21 = vrot.slane %v4042_v2, 2 }
 0x2ba   : > { %v3984_v18 = vrot.slane %v3983_v8, 1  ;;  %v4044_v63 = vadd.f32 %v4043_v21, %v4042_v2 }
 0x2bc   : > { %v4045_v60 = vrot.slane %v4044_v63, 1  ;;  %v3985_v16 = vadd.f32 %v3984_v18, %v3983_v8 }
 0x2be   : > { %v4046_v55 = vadd.f32 %v4045_v60, %v4044_v63 }
 0x2c0   : > { %v4048_v59 = vsel %vm4047_vm2, %v3985_v16, %v4046_v55 }
 0x2c1   : > { %4049 = vst [vmem:[%s208_s19] sm:$0x3] %v4048_v59 }
 0x2c2 PF: > { %s15_s15 = sadd.s32 1, %s5391_s15  }
 0x2c3   : > { %p12_p4 = scmp.ge.s32.totalorder %s15_s15, 4  }
 0x2c5   :  { %14 = sbr.rel (!%p12_p4) target bundleno = 1 (0x1), region = 82 }

// kernel: plainblock_forward.3
= control target key start
LH: loop header
LB: loop body
LE: loop exit
PB: predicated region body
PF: predicated region fallthrough
CT: control target
= control target key end

     0   :  { %s9172_s15 = smov 0   ;;  %s11492_s0 = inlined_call_operand.vmem [shape: bf16[2,1,328,128], index: 0, kind: input, shape index: {}]   ;;  %s11493_s1 = inlined_call_operand.vmem [shape: bf16[9,128,256], index: 1, kind: input, shape index: {}]   ;;  %s11494_s2 = inlined_call_operand.vmem [shape: f32[288,1], index: 2, kind: input, shape index: {}]   ;;  %s11495_s3 = inlined_call_operand.vmem [shape: bf16[2,288,256], index: 3, kind: output, shape index: {0}]   ;;  %s11496_s4 = inlined_call_operand.vmem [shape: f32[2,2,256], index: 4, kind: output, shape index: {1}]  }
   0x1 LB: > { %s7438_s16 = sadd.s32 4294967295, %s9144_s15   ;;  %p7442_p0 = scmp.ge.s32.totalorder %s9144_s15, 1  ;;  %s9144_s15 = sphi %s9172_s15, %s15_s15  }
   0x2   : > { %p165_p1 = scmp.lt.s32.totalorder %s9144_s15, 3 }
   0x4   : > { %p166_p2 = pnand %p7442_p0, %p165_p1 }
   0x6   : > { %169 = sbr.rel (%p166_p2) target bundleno = 1495 (0x5d7), region = 32 }
   0xb   : > { %v7577_v0 = vld [vmem:[%s11493_s1 + $0x70] sm:$0xf]  ;;  %v8835_v1 = vld [vmem:[%s11493_s1 + $0x74] sm:$0xf0]  ;;  %v8834_v2 = vld [vmem:[%s11493_s1 + $0x74] sm:$0xf] }
   0xc   : > { %v7578_v3 = vor.u32 %v8835_v1, %v7577_v0  ;;  %v7579_v4 = vld [vmem:[%s11493_s1 + $0x78] sm:$0xf0]  ;;  %v7569_v5 = vld [vmem:[%s11493_s1 + $0x60] sm:$0xf]  ;;  %v8833_v6 = vld [vmem:[%s11493_s1 + $0x64] sm:$0xf0] }
   0xd   : > { %v7582_v7 = vor.u32 %v8834_v2, %v7579_v4  ;;  %v8832_v8 = vld [vmem:[%s11493_s1 + $0x64] sm:$0xf]  ;;  %v7571_v9 = vld [vmem:[%s11493_s1 + $0x68] sm:$0xf0]  ;;  %v7570_v10 = vor.u32 %v8833_v6, %v7569_v5  ;;  %v7561_v12 = vld [vmem:[%s11493_s1 + $0x50] sm:$0xf] }
   0xe   : > { %9108 = vmatpush.bf16.msra.mxu2 %v7578_v3  ;;  %451 = vmatpush.bf16.msra.mxu0 %v7578_v3  ;;  %v7574_v11 = vor.u32 %v8832_v8, %v7571_v9  ;;  %v8831_v13 = vld [vmem:[%s11493_s1 + $0x54] sm:$0xf0]  ;;  %v8830_v14 = vld [vmem:[%s11493_s1 + $0x54] sm:$0xf]  ;;  %v7563_v15 = vld [vmem:[%s11493_s1 + $0x58] sm:$0xf0] }
   0xf   : > { %550 = vmatpush.bf16.msra.mxu1 %v7582_v7  ;;  %9116 = vmatpush.bf16.msra.mxu3 %v7582_v7  ;;  %v7562_v16 = vor.u32 %v8831_v13, %v7561_v12  ;;  %v7566_v17 = vor.u32 %v8830_v14, %v7563_v15  ;;  %v7553_v18 = vld [vmem:[%s11493_s1 + $0x40] sm:$0xf]  ;;  %v8829_v19 = vld [vmem:[%s11493_s1 + $0x44] sm:$0xf0]  ;;  %v8828_v20 = vld [vmem:[%s11493_s1 + $0x44] sm:$0xf] }
  0x10   : > { %v7555_v21 = vld [vmem:[%s11493_s1 + $0x48] sm:$0xf0]  ;;  %v7554_v22 = vor.u32 %v8829_v19, %v7553_v18  ;;  %v7545_v24 = vld [vmem:[%s11493_s1 + $0x30] sm:$0xf]  ;;  %v8827_v25 = vld [vmem:[%s11493_s1 + $0x34] sm:$0xf0] }
  0x11   : > { %v7558_v23 = vor.u32 %v8828_v20, %v7555_v21  ;;  %v8826_v26 = vld [vmem:[%s11493_s1 + $0x34] sm:$0xf]  ;;  %v7547_v27 = vld [vmem:[%s11493_s1 + $0x38] sm:$0xf0]  ;;  %p196_p3 = scmp.lt.s32.totalorder %s7438_s16, 1  ;;  %v7546_v28 = vor.u32 %v8827_v25, %v7545_v24  ;;  %vm1676_vm1 = vcmask 1046528  }
  0x12   : > { %9109 = vmatpush.bf16.msra.mxu2 %v7570_v10  ;;  %452 = vmatpush.bf16.msra.mxu0 %v7570_v10  ;;  %v7550_v29 = vor.u32 %v8826_v26, %v7547_v27  ;;  %v7537_v30 = vld [vmem:[%s11493_s1 + $0x20] sm:$0xf]  ;;  %v8825_v31 = vld [vmem:[%s11493_s1 + $0x24] sm:$0xf0]  ;;  %v8824_v32 = vld [vmem:[%s11493_s1 + $0x24] sm:$0xf] }
  0x13   : > { %551 = vmatpush.bf16.msra.mxu1 %v7574_v11  ;;  %9117 = vmatpush.bf16.msra.mxu3 %v7574_v11  ;;  %v7539_v33 = vld [vmem:[%s11493_s1 + $0x28] sm:$0xf0]  ;;  %s11752_s16 = smov (!%p196_p3, %s7438_s16), 1  ;;  %v7538_v34 = vor.u32 %v8825_v31, %v7537_v30  ;;  %v7529_v36 = vld [vmem:[%s11493_s1 + $0x10] sm:$0xf]  ;;  %vm3899_vm3 = vcmask 1045504  }
  0x14   : > { %v7542_v35 = vor.u32 %v8824_v32, %v7539_v33  ;;  %v8823_v37 = vld [vmem:[%s11493_s1 + $0x14] sm:$0xf0]  ;;  %v8822_v38 = vld [vmem:[%s11493_s1 + $0x14] sm:$0xf]  ;;  %v7531_v39 = vld [vmem:[%s11493_s1 + $0x18] sm:$0xf0] }
  0x15   : > { %s9124_s25 = smul.u32 164, %s11752_s16  ;;  %v7530_v40 = vor.u32 %v8823_v37, %v7529_v36  ;;  %v7534_v41 = vor.u32 %v8822_v38, %v7531_v39  ;;  %v7521_v42 = vld [vmem:[%s11493_s1] sm:$0xf]  ;;  %v8821_v43 = vld [vmem:[%s11493_s1 + $0x4] sm:$0xf0]  ;;  %vm6122_vm5 = vcmask 1044480  }
  0x16   : > { %9110 = vmatpush.bf16.msra.mxu2 %v7562_v16  ;;  %453 = vmatpush.bf16.msra.mxu0 %v7562_v16  ;;  %v8820_v44 = vld [vmem:[%s11493_s1 + $0x4] sm:$0xf]  ;;  %v7523_v45 = vld [vmem:[%s11493_s1 + $0x8] sm:$0xf0]  ;;  %v8868_v46 = vld [vmem:[%s11493_s1 + $0xf4] sm:$0xf]  ;;  %v7522_v50 = vor.u32 %v8821_v43, %v7521_v42 }
  0x17   : > { %552 = vmatpush.bf16.msra.mxu1 %v7566_v17  ;;  %9118 = vmatpush.bf16.msra.mxu3 %v7566_v17  ;;  %s9289_s12 = scalar_lea.vmem %s11492_s0, %s9124_s25  ;;  %v7731_v47 = vld [vmem:[%s11493_s1 + $0xf8] sm:$0xf0]  ;;  %v7729_v48 = vld [vmem:[%s11493_s1 + $0xf0] sm:$0xf]  ;;  %v8869_v49 = vld [vmem:[%s11493_s1 + $0xf4] sm:$0xf0]  ;;  %v7526_v51 = vor.u32 %v8820_v44, %v7523_v45 }
  0x18   : > { %v8902_v52 = vld [vmem:[%s11493_s1 + $0x174] sm:$0xf]  ;;  %v7883_v53 = vld [vmem:[%s11493_s1 + $0x178] sm:$0xf0]  ;;  %v7881_v54 = vld [vmem:[%s11493_s1 + $0x170] sm:$0xf]  ;;  %v7734_v56 = vor.u32 %v8868_v46, %v7731_v47  ;;  %v7730_v57 = vor.u32 %v8869_v49, %v7729_v48 }
  0x19   : > { %v8811_v55 = vld [vmem:[%s9289_s12 + $0x48] sm:$0xff]  ;;  %v8903_v58 = vld [vmem:[%s11493_s1 + $0x174] sm:$0xf0]  ;;  %v8866_v59 = vld [vmem:[%s11493_s1 + $0xe4] sm:$0xf]  ;;  %v7886_v0 = vor.u32 %v8902_v52, %v7883_v53  ;;  %s9125_s30 = smul.u32 288, %s11752_s16 }
  0x1a   : > { %9111 = vmatpush.bf16.msra.mxu2 %v7554_v22  ;;  %454 = vmatpush.bf16.msra.mxu0 %v7554_v22  ;;  %v7723_v60 = vld [vmem:[%s11493_s1 + $0xe8] sm:$0xf0]  ;;  %v7721_v61 = vld [vmem:[%s11493_s1 + $0xe0] sm:$0xf]  ;;  %v8867_v62 = vld [vmem:[%s11493_s1 + $0xe4] sm:$0xf0]  ;;  %v7882_v1 = vor.u32 %v8903_v58, %v7881_v54 }
  0x1b   : > { %553 = vmatpush.bf16.msra.mxu1 %v7558_v23  ;;  %9119 = vmatpush.bf16.msra.mxu3 %v7558_v23  ;;  %v8802_v63 = vld [vmem:[%s9289_s12] sm:$0xff]  ;;  %v7726_v3 = vor.u32 %v8866_v59, %v7723_v60  ;;  %v7722_v4 = vor.u32 %v8867_v62, %v7721_v61  ;;  %v7875_v5 = vld [vmem:[%s11493_s1 + $0x168] sm:$0xf0]  ;;  %v8901_v7 = vld [vmem:[%s11493_s1 + $0x164] sm:$0xf0]  ;;  %s11203_s9 = scalar_lea.vmem %s11495_s3, %s9125_s30  ;;  %vm7340_vm6 = vcmask 1040384  }
  0x1c   : > { %v8900_v2 = vld [vmem:[%s11493_s1 + $0x164] sm:$0xf]  ;;  %v7873_v6 = vld [vmem:[%s11493_s1 + $0x160] sm:$0xf]  ;;  %v8864_v8 = vld [vmem:[%s11493_s1 + $0xd4] sm:$0xf] }
  0x1d   : > { %v7715_v9 = vld [vmem:[%s11493_s1 + $0xd8] sm:$0xf0]  ;;  %v7713_v10 = vld [vmem:[%s11493_s1 + $0xd0] sm:$0xf]  ;;  %v7878_v11 = vor.u32 %v8900_v2, %v7875_v5  ;;  %v7874_v12 = vor.u32 %v8901_v7, %v7873_v6  ;;  %v8865_v13 = vld [vmem:[%s11493_s1 + $0xd4] sm:$0xf0] }
  0x1e   : > { %9112 = vmatpush.bf16.msra.mxu2 %v7546_v28  ;;  %455 = vmatpush.bf16.msra.mxu0 %v7546_v28  ;;  %v8898_v14 = vld [vmem:[%s11493_s1 + $0x154] sm:$0xf]  ;;  %v7718_v15 = vor.u32 %v8864_v8, %v7715_v9  ;;  %v7714_v16 = vor.u32 %v8865_v13, %v7713_v10  ;;  %v7867_v17 = vld [vmem:[%s11493_s1 + $0x158] sm:$0xf0]  ;;  %v7865_v18 = vld [vmem:[%s11493_s1 + $0x150] sm:$0xf] }
  0x1f   : > { %554 = vmatpush.bf16.msra.mxu1 %v7550_v29  ;;  %9120 = vmatpush.bf16.msra.mxu3 %v7550_v29  ;;  %v8899_v19 = vld [vmem:[%s11493_s1 + $0x154] sm:$0xf0]  ;;  %v7870_v20 = vor.u32 %v8898_v14, %v7867_v17  ;;  %v8812_v22 = vld [vmem:[%s9289_s12 + $0x50] sm:$0xff]  ;;  %v8803_v23 = vld [vmem:[%s9289_s12 + $0x8] sm:$0xff]  ;;  %vm868_vm0 = vsmask.f32 7424 }
  0x20   : > { %v7866_v21 = vor.u32 %v8899_v19, %v7865_v18  ;;  %v8862_v24 = vld [vmem:[%s11493_s1 + $0xc4] sm:$0xf]  ;;  %v7707_v25 = vld [vmem:[%s11493_s1 + $0xc8] sm:$0xf0]  ;;  %v7705_v26 = vld [vmem:[%s11493_s1 + $0xc0] sm:$0xf] }
  0x21   : > { %v7710_v27 = vor.u32 %v8862_v24, %v7707_v25  ;;  %v8863_v28 = vld [vmem:[%s11493_s1 + $0xc4] sm:$0xf0]  ;;  %v8896_v29 = vld [vmem:[%s11493_s1 + $0x144] sm:$0xf]  ;;  %v7859_v30 = vld [vmem:[%s11493_s1 + $0x148] sm:$0xf0] }
  0x22   : > { %9113 = vmatpush.bf16.msra.mxu2 %v7538_v34  ;;  %456 = vmatpush.bf16.msra.mxu0 %v7538_v34  ;;  %v7706_v31 = vor.u32 %v8863_v28, %v7705_v26  ;;  %v7862_v32 = vor.u32 %v8896_v29, %v7859_v30  ;;  %v8813_v33 = vld [vmem:[%s9289_s12 + $0x58] sm:$0xff]  ;;  %v8804_v34 = vld [vmem:[%s9289_s12 + $0x10] sm:$0xff]  ;;  %v8897_v36 = vld [vmem:[%s11493_s1 + $0x144] sm:$0xf0]  ;;  %vm3069_vm2 = vsmask.f32 6400 }
  0x23   : > { %555 = vmatpush.bf16.msra.mxu1 %v7542_v35  ;;  %9121 = vmatpush.bf16.msra.mxu3 %v7542_v35  ;;  %v7857_v35 = vld [vmem:[%s11493_s1 + $0x140] sm:$0xf]  ;;  %v8860_v37 = vld [vmem:[%s11493_s1 + $0xb4] sm:$0xf]  ;;  %v7699_v39 = vld [vmem:[%s11493_s1 + $0xb8] sm:$0xf0] }
  0x24   : > { %v7858_v38 = vor.u32 %v8897_v36, %v7857_v35  ;;  %v7702_v42 = vor.u32 %v8860_v37, %v7699_v39  ;;  %v8814_v44 = vld [vmem:[%s9289_s12 + $0x60] sm:$0xff]  ;;  %v8805_v45 = vld [vmem:[%s9289_s12 + $0x18] sm:$0xff]  ;;  %v8894_v46 = vld [vmem:[%s11493_s1 + $0x134] sm:$0xf]  ;;  %vm5292_vm4 = vsmask.f32 5376 }
  0x25   : > { %v7851_v47 = vld [vmem:[%s11493_s1 + $0x138] sm:$0xf0]  ;;  %v7849_v48 = vld [vmem:[%s11493_s1 + $0x130] sm:$0xf]  ;;  %v7691_v52 = vld [vmem:[%s11493_s1 + $0xa8] sm:$0xf0] }
  0x26   : > { %9114 = vmatpush.bf16.msra.mxu2 %v7530_v40  ;;  %457 = vmatpush.bf16.msra.mxu0 %v7530_v40  ;;  %v7697_v40 = vld [vmem:[%s11493_s1 + $0xb0] sm:$0xf]  ;;  %v7854_v49 = vor.u32 %v8894_v46, %v7851_v47  ;;  %v8815_v58 = vld [vmem:[%s9289_s12 + $0x68] sm:$0xff]  ;;  %v8806_v59 = vld [vmem:[%s9289_s12 + $0x20] sm:$0xff]  ;;  %vm7346_vm7 = vcmask 1041408  }
  0x27   : > { %556 = vmatpush.bf16.msra.mxu1 %v7534_v41  ;;  %9122 = vmatpush.bf16.msra.mxu3 %v7534_v41  ;;  %v8861_v41 = vld [vmem:[%s11493_s1 + $0xb4] sm:$0xf0]  ;;  %v8892_v60 = vld [vmem:[%s11493_s1 + $0x124] sm:$0xf]  ;;  %v7843_v61 = vld [vmem:[%s11493_s1 + $0x128] sm:$0xf0] }
  0x28   : > { %v7698_v43 = vor.u32 %v8861_v41, %v7697_v40  ;;  %v7841_v62 = vld [vmem:[%s11493_s1 + $0x120] sm:$0xf]  ;;  %v7683_v2 = vld [vmem:[%s11493_s1 + $0x98] sm:$0xf0]  ;;  %v7681_v5 = vld [vmem:[%s11493_s1 + $0x90] sm:$0xf] }
  0x29   : > { %v8857_v6 = vld [vmem:[%s11493_s1 + $0x94] sm:$0xf0]  ;;  %v8816_v8 = vld [vmem:[%s9289_s12 + $0x70] sm:$0xff]  ;;  %v8807_v9 = vld [vmem:[%s9289_s12 + $0x28] sm:$0xff] }
  0x2a   : > { %9115 = vmatpush.bf16.msra.mxu2 %v7522_v50  ;;  %458 = vmatpush.bf16.msra.mxu0 %v7522_v50  ;;  %v8895_v50 = vld [vmem:[%s11493_s1 + $0x134] sm:$0xf0]  ;;  %v7682_v7 = vor.u32 %v8857_v6, %v7681_v5  ;;  %v8890_v10 = vld [vmem:[%s11493_s1 + $0x114] sm:$0xf]  ;;  %v8854_v18 = vld [vmem:[%s11493_s1 + $0x84] sm:$0xf] }
  0x2b   : > { %557 = vmatpush.bf16.msra.mxu1 %v7526_v51  ;;  %9123 = vmatpush.bf16.msra.mxu3 %v7526_v51  ;;  %v8858_v51 = vld [vmem:[%s11493_s1 + $0xa4] sm:$0xf]  ;;  %v7850_v53 = vor.u32 %v8895_v50, %v7849_v48  ;;  %v8891_v14 = vld [vmem:[%s11493_s1 + $0x114] sm:$0xf0]  ;;  %v8808_v17 = vld [vmem:[%s9289_s12 + $0x30] sm:$0xff] }
  0x2c   : > { %v7694_v54 = vor.u32 %v8858_v51, %v7691_v52  ;;  %v7675_v19 = vld [vmem:[%s11493_s1 + $0x88] sm:$0xf0]  ;;  %v8888_v24 = vld [vmem:[%s11493_s1 + $0x104] sm:$0xf]  ;;  %v7825_v26 = vld [vmem:[%s11493_s1 + $0x100] sm:$0xf] }
  0x2d   : > { %504 = vmatmul.bf16.vlgmr.msra.gmra.mxu2 %v8811_v55  ;;  %459 = vmatmul.bf16.vlgmr.msra.gmra.mxu0 %v8802_v63  ;;  %v7827_v25 = vld [vmem:[%s11493_s1 + $0x108] sm:$0xf0]  ;;  %v8889_v28 = vld [vmem:[%s11493_s1 + $0x104] sm:$0xf0]  ;;  %v8818_v30 = vld [vmem:[%s9289_s12 + $0x80] sm:$0xff] }
  0x2e   : > { %1115 = vmatpush.bf16.msrb.mxu2 %v7730_v57  ;;  %558 = vmatmul.bf16.vlgmr.msra.gmra.mxu1 %v8802_v63  ;;  %v7846_v63 = vor.u32 %v8892_v60, %v7843_v61  ;;  %v7826_v29 = vor.u32 %v8889_v28, %v7825_v26  ;;  %v8937_v36 = vld [vmem:[%s11493_s1 + $0x1f4] sm:$0xf0]  ;;  %v8187_v39 = vld [vmem:[%s11493_s1 + $0x278] sm:$0xf0]  ;;  %v8185_v40 = vld [vmem:[%s11493_s1 + $0x270] sm:$0xf] }
  0x2f   : > { %1214 = vmatpush.bf16.msrb.mxu3 %v7734_v56  ;;  %1911 = vmatpush.bf16.msrb.mxu1 %v7886_v0  ;;  %v8859_v56 = vld [vmem:[%s11493_s1 + $0xa4] sm:$0xf0]  ;;  %v8810_v46 = vld [vmem:[%s9289_s12 + $0x40] sm:$0xff]  ;;  %v8179_v28 = vld [vmem:[%s11493_s1 + $0x268] sm:$0xf0] }
  0x30   : > { %603 = vmatmul.bf16.vlgmr.msra.gmra.mxu3 %v8811_v55  ;;  %1812 = vmatpush.bf16.msrb.mxu0 %v7882_v1  ;;  %v7689_v55 = vld [vmem:[%s11493_s1 + $0xa0] sm:$0xf]  ;;  %v8893_v0 = vld [vmem:[%s11493_s1 + $0x124] sm:$0xf0]  ;;  %v8856_v1 = vld [vmem:[%s11493_s1 + $0x94] sm:$0xf] }
  0x31   : > { %v7690_v57 = vor.u32 %v8859_v56, %v7689_v55  ;;  %v8836_v47 = vld [vmem:[%s9289_s12] sm:$0xff]  ;;  %v8871_v60 = vld [vmem:[%s9289_s12 + $0x8] sm:$0xff] }
  0x32   : > { %1116 = vmatpush.bf16.msrb.mxu2 %v7722_v4  ;;  %v7686_v4 = vor.u32 %v8856_v1, %v7683_v2  ;;  %v872_v50 = vshll.u32 %v8836_v47, 16  ;;  %v7753_v52 = vld [vmem:[%s9289_s12] sm:$0xe]  ;;  %v870_v56 = vshrl.u32 %v8836_v47, 16  ;;  %v1678_v1 = vrot.slane %v8871_v60, 1 }
  0x33   : > { %1215 = vmatpush.bf16.msrb.mxu3 %v7726_v3  ;;  %1912 = vmatpush.bf16.msrb.mxu1 %v7878_v11  ;;  %v7842_v3 = vor.u32 %v8893_v0, %v7841_v62  ;;  %v7835_v11 = vld [vmem:[%s11493_s1 + $0x118] sm:$0xf0]  ;;  %v8840_v60 = vld [vmem:[%s9289_s12 + $0x20] sm:$0xff] }
  0x34   : > { %1813 = vmatpush.bf16.msrb.mxu0 %v7874_v12  ;;  %v7833_v12 = vld [vmem:[%s11493_s1 + $0x110] sm:$0xf]  ;;  %v7838_v13 = vor.u32 %v8890_v10, %v7835_v11  ;;  %v8934_v11 = vld [vmem:[%s11493_s1 + $0x1e4] sm:$0xf] }
  0x36   : > { %1117 = vmatpush.bf16.msrb.mxu2 %v7714_v16  ;;  %v8817_v16 = vld [vmem:[%s9289_s12 + $0x78] sm:$0xff] }
  0x37   : > { %1216 = vmatpush.bf16.msrb.mxu3 %v7718_v15  ;;  %1913 = vmatpush.bf16.msrb.mxu1 %v7870_v20  ;;  %v7834_v15 = vor.u32 %v8891_v14, %v7833_v12  ;;  %v7678_v20 = vor.u32 %v8854_v18, %v7675_v19  ;;  %v8027_v12 = vld [vmem:[%s11493_s1 + $0x1e8] sm:$0xf0]  ;;  %v8872_v18 = vld [vmem:[%s9289_s12 + $0x10] sm:$0xff]  ;;  %v8025_v19 = vld [vmem:[%s11493_s1 + $0x1e0] sm:$0xf] }
  0x38   : > { %1814 = vmatpush.bf16.msrb.mxu0 %v7866_v21  ;;  %v7673_v21 = vld [vmem:[%s11493_s1 + $0x80] sm:$0xf] }
  0x3a   : > { %1118 = vmatpush.bf16.msrb.mxu2 %v7706_v31  ;;  %v8809_v31 = vld [vmem:[%s9289_s12 + $0x38] sm:$0xff] }
  0x3b   : > { %1217 = vmatpush.bf16.msrb.mxu3 %v7710_v27  ;;  %1914 = vmatpush.bf16.msrb.mxu1 %v7862_v32  ;;  %v7830_v27 = vor.u32 %v8888_v24, %v7827_v25  ;;  %v8936_v32 = vld [vmem:[%s11493_s1 + $0x1f4] sm:$0xf]  ;;  %v1680_v24 = vrot.slane %v8872_v18, 1 }
  0x3c   : > { %1815 = vmatpush.bf16.msrb.mxu0 %v7858_v38  ;;  %v8970_v38 = vld [vmem:[%s11493_s1 + $0x274] sm:$0xf] }
  0x3d   : > { %509 = vmatmul.bf16.gmra.mxu2 %v8812_v22  ;;  %464 = vmatmul.bf16.gmra.mxu0 %v8803_v23  ;;  %v8190_v41 = vor.u32 %v8970_v38, %v8187_v39 }
  0x3e   : > { %563 = vmatmul.bf16.gmra.mxu1 %v8803_v23  ;;  %1119 = vmatpush.bf16.msrb.mxu2 %v7698_v43 }
  0x3f   : > { %1218 = vmatpush.bf16.msrb.mxu3 %v7702_v42  ;;  %1915 = vmatpush.bf16.msrb.mxu1 %v7854_v49  ;;  %v8971_v42 = vld [vmem:[%s11493_s1 + $0x274] sm:$0xf0]  ;;  %v8837_v49 = vld [vmem:[%s9289_s12 + $0x8] sm:$0xff] }
  0x40   : > { %608 = vmatmul.bf16.gmra.mxu3 %v8812_v22  ;;  %1816 = vmatpush.bf16.msrb.mxu0 %v7850_v53  ;;  %v8855_v22 = vld [vmem:[%s11493_s1 + $0x84] sm:$0xf0]  ;;  %v8186_v43 = vor.u32 %v8971_v42, %v8185_v40  ;;  %v8870_v53 = vld [vmem:[%s9289_s12] sm:$0xf0]  ;;  %v881_v14 = vshrl.u32 %v8837_v49, 16 }
  0x41   : > { %v7674_v23 = vor.u32 %v8855_v22, %v7673_v21  ;;  %v7754_v61 = vor.u32 %v8870_v53, %v7753_v52 }
  0x42   : > { %1120 = vmatpush.bf16.msrb.mxu2 %v7690_v57  ;;  %v874_v57 = vrot.slane %v872_v50, 1 }
  0x43   : > { %1219 = vmatpush.bf16.msrb.mxu3 %v7694_v54  ;;  %1916 = vmatpush.bf16.msrb.mxu1 %v7846_v63  ;;  %v1677_v0 = vrot.slane %v7754_v61, 1 }
  0x44   : > { %1817 = vmatpush.bf16.msrb.mxu0 %v7842_v3  ;;  %v875_v62 = vor.u32 %v874_v57, %v870_v56 }
  0x46   : > { %1121 = vmatpush.bf16.msrb.mxu2 %v7682_v7  ;;  %v1679_v7 = vsel %vm1676_vm1, %v1677_v0, %v1678_v1 }
  0x47   : > { %1220 = vmatpush.bf16.msrb.mxu3 %v7686_v4  ;;  %1917 = vmatpush.bf16.msrb.mxu1 %v7838_v13 }
  0x48   : > { %1818 = vmatpush.bf16.msrb.mxu0 %v7834_v15 }
  0x4a   : > { %1122 = vmatpush.bf16.msrb.mxu2 %v7674_v23 }
  0x4b   : > { %1221 = vmatpush.bf16.msrb.mxu3 %v7678_v20  ;;  %1918 = vmatpush.bf16.msrb.mxu1 %v7830_v27  ;;  %v8935_v20 = vld [vmem:[%s11493_s1 + $0x1e4] sm:$0xf0]  ;;  %v8968_v27 = vld [vmem:[%s11493_s1 + $0x264] sm:$0xf] }
  0x4c   : > { %1819 = vmatpush.bf16.msrb.mxu0 %v7826_v29  ;;  %v8026_v21 = vor.u32 %v8935_v20, %v8025_v19 }
  0x4d   : > { %514 = vmatmul.bf16.gmra.mxu2 %v8813_v33  ;;  %469 = vmatmul.bf16.gmra.mxu0 %v8804_v34 }
  0x4e   : > { %568 = vmatmul.bf16.gmra.mxu1 %v8804_v34  ;;  %v8033_v34 = vld [vmem:[%s11493_s1 + $0x1f0] sm:$0xf] }
  0x4f   : > { %v8034_v37 = vor.u32 %v8937_v36, %v8033_v34  ;;  %3437 = vmatpush.bf16.msra.mxu1 %v8190_v41  ;;  %v8177_v34 = vld [vmem:[%s11493_s1 + $0x260] sm:$0xf] }
  0x50   : > { %613 = vmatmul.bf16.gmra.mxu3 %v8813_v33  ;;  %v8035_v33 = vld [vmem:[%s11493_s1 + $0x1f8] sm:$0xf0]  ;;  %3338 = vmatpush.bf16.msra.mxu0 %v8186_v43 }
  0x51   : > { %v8038_v35 = vor.u32 %v8936_v32, %v8035_v33  ;;  %2508 = vmatpush.bf16.msra.mxu2 %v8034_v37  ;;  %v1681_v33 = vsel %vm1676_vm1, %v1678_v1, %v1680_v24  ;;  %v8839_v37 = vld [vmem:[%s9289_s12 + $0x18] sm:$0xff]  ;;  %v901_v1 = vshll.u32 %v8840_v60, 16 }
  0x52   : > { %v893_v42 = vshll.u32 %v8839_v37, 16  ;;  %v897_v0 = vshrl.u32 %v8839_v37, 16 }
  0x53   : > { %2607 = vmatpush.bf16.msra.mxu3 %v8038_v35  ;;  %v8969_v35 = vld [vmem:[%s11493_s1 + $0x264] sm:$0xf0]  ;;  %v903_v19 = vrot.slane %v901_v1, 1 }
  0x54   : > { %v8178_v36 = vor.u32 %v8969_v35, %v8177_v34  ;;  %v895_v47 = vrot.slane %v893_v42, 1  ;;  %v8169_v34 = vld [vmem:[%s11493_s1 + $0x250] sm:$0xf] }
  0x55   : > { %2509 = vmatpush.bf16.msra.mxu2 %v8026_v21 }
  0x56   : > { %3339 = vmatpush.bf16.msra.mxu0 %v8178_v36  ;;  %v899_v18 = vor.u32 %v897_v0, %v895_v47  ;;  %v8967_v36 = vld [vmem:[%s11493_s1 + $0x254] sm:$0xf0] }
  0x5d   : > { %519 = vmatmul.bf16.gmra.mxu2 %v8814_v44  ;;  %474 = vmatmul.bf16.gmra.mxu0 %v8805_v45 }
  0x5e   : > { %573 = vmatmul.bf16.gmra.mxu1 %v8805_v45 }
  0x60   : > { %618 = vmatmul.bf16.gmra.mxu3 %v8814_v44  ;;  %v8819_v44 = vld [vmem:[%s9289_s12 + $0x88] sm:$0xff] }
  0x6d   : > { %524 = vmatmul.bf16.gmra.mxu2 %v8815_v58  ;;  %479 = vmatmul.bf16.gmra.mxu0 %v8806_v59 }
  0x6e   : > { %578 = vmatmul.bf16.gmra.mxu1 %v8806_v59 }
  0x70   : > { %623 = vmatmul.bf16.gmra.mxu3 %v8815_v58  ;;  %v877_v58 = vshll.u32 %v8837_v49, 16 }
  0x72   : > { %v879_v63 = vrot.slane %v877_v58, 1 }
  0x74   : > { %v880_v5 = vsel %vm868_vm0, %v875_v62, %v879_v63  ;;  %v883_v22 = vor.u32 %v881_v14, %v879_v63 }
  0x7d   : > { %529 = vmatmul.bf16.gmra.mxu2 %v8816_v8  ;;  %484 = vmatmul.bf16.gmra.mxu0 %v8807_v9 }
  0x7e   : > { %583 = vmatmul.bf16.gmra.mxu1 %v8807_v9 }
  0x80   : > { %628 = vmatmul.bf16.gmra.mxu3 %v8816_v8  ;;  %v8838_v8 = vld [vmem:[%s9289_s12 + $0x10] sm:$0xff] }
  0x81   : > { %v885_v15 = vshll.u32 %v8838_v8, 16  ;;  %v889_v41 = vshrl.u32 %v8838_v8, 16  ;;  %v8932_v8 = vld [vmem:[%s11493_s1 + $0x1d4] sm:$0xf] }
  0x83   : > { %v887_v23 = vrot.slane %v885_v15, 1  ;;  %v8933_v15 = vld [vmem:[%s11493_s1 + $0x1d4] sm:$0xf0] }
  0x8d   : > { %534 = vmatmul.bf16.gmra.mxu2 %v8817_v16  ;;  %489 = vmatmul.bf16.gmra.mxu0 %v8808_v17 }
  0x8e   : > { %588 = vmatmul.bf16.gmra.mxu1 %v8808_v17 }
  0x90   : > { %633 = vmatmul.bf16.gmra.mxu3 %v8817_v16  ;;  %v8030_v16 = vor.u32 %v8934_v11, %v8027_v12  ;;  %v8019_v11 = vld [vmem:[%s11493_s1 + $0x1d8] sm:$0xf0]  ;;  %v8017_v12 = vld [vmem:[%s11493_s1 + $0x1d0] sm:$0xf] }
  0x91   : > { %v8022_v14 = vor.u32 %v8932_v8, %v8019_v11 }
  0x92   : > { %2608 = vmatpush.bf16.msra.mxu3 %v8030_v16  ;;  %v8018_v16 = vor.u32 %v8933_v15, %v8017_v12  ;;  %v8842_v15 = vld [vmem:[%s9289_s12 + $0x30] sm:$0xff] }
  0x94   : > { %2510 = vmatpush.bf16.msra.mxu2 %v8018_v16 }
  0x96   : > { %2609 = vmatpush.bf16.msra.mxu3 %v8022_v14 }
  0x9d   : > { %539 = vmatmul.bf16.gmra.mxu2 %v8818_v30  ;;  %494 = vmatmul.bf16.gmra.mxu0 %v8809_v31 }
  0x9e   : > { %593 = vmatmul.bf16.gmra.mxu1 %v8809_v31  ;;  %v8182_v31 = vor.u32 %v8968_v27, %v8179_v28 }
  0xa0   : > { %638 = vmatmul.bf16.gmra.mxu3 %v8818_v30  ;;  %v888_v30 = vsel %vm868_vm0, %v883_v22, %v887_v23  ;;  %3438 = vmatpush.bf16.msra.mxu1 %v8182_v31  ;;  %v8966_v31 = vld [vmem:[%s11493_s1 + $0x254] sm:$0xf] }
  0xaa   : > { %v9521_v45 = vpop.f32.mrf.mxu0 }
  0xab   : > { %v9525_v48 = vpop.f32.mrf.mxu1 }
  0xad   : > { %544 = vmatmul.bf16.gmra.mxu2 %v8819_v44  ;;  %499 = vmatmul.bf16.gmra.mxu0 %v8810_v46 }
  0xae   : > { %598 = vmatmul.bf16.gmra.mxu1 %v8810_v46  ;;  %v891_v46 = vor.u32 %v889_v41, %v887_v23  ;;  %v8170_v41 = vor.u32 %v8967_v36, %v8169_v34 }
  0xb0   : > { %643 = vmatmul.bf16.gmra.mxu3 %v8819_v44  ;;  %v9528_v51 = vpop.f32.mrf.mxu2  ;;  %v8873_v44 = vld [vmem:[%s9289_s12 + $0x18] sm:$0xff]  ;;  %v896_v56 = vsel %vm868_vm0, %v891_v46, %v895_v47  ;;  %v905_v46 = vshrl.u32 %v8840_v60, 16  ;;  %3340 = vmatpush.bf16.msra.mxu0 %v8170_v41 }
  0xb1   : > { %v1682_v49 = vrot.slane %v8873_v44, 1 }
  0xb2   : > { %v9534_v55 = vpop.f32.mrf.mxu0 }
  0xb3   : > { %v9532_v54 = vpop.f32.mrf.mxu3  ;;  %v9536_v59 = vpop.f32.mrf.mxu1  ;;  %v1683_v58 = vsel %vm1676_vm1, %v1680_v24, %v1682_v49  ;;  %v904_v24 = vsel %vm868_vm0, %v899_v18, %v903_v19 }
  0xb8   : > { %v9539_v2 = vpop.f32.mrf.mxu2 }
  0xba   : > { %v9543_v4 = vpop.f32.mrf.mxu0 }
  0xbb   : > { %v9541_v3 = vpop.f32.mrf.mxu3  ;;  %v9546_v6 = vpop.f32.mrf.mxu1 }
  0xbd   : > { %1123 = vmatmul.bf16.vlgmr.msrb.gmra.mxu2 %v880_v5  ;;  %1820 = vmatmul.bf16.vlgmr.msrb.gmra.mxu0 %v1679_v7 }
  0xbe   : > { %1919 = vmatmul.bf16.vlgmr.msrb.gmra.mxu1 %v1679_v7 }
  0xc0   : > { %1222 = vmatmul.bf16.vlgmr.msrb.gmra.mxu3 %v880_v5  ;;  %v9550_v9 = vpop.f32.mrf.mxu2  ;;  %v8874_v5 = vld [vmem:[%s9289_s12 + $0x20] sm:$0xff] }
  0xc1   : > { %v1684_v20 = vrot.slane %v8874_v5, 1 }
  0xc2   : > { %v9560_v13 = vpop.f32.mrf.mxu0 }
  0xc3   : > { %v9552_v10 = vpop.f32.mrf.mxu3  ;;  %v9562_v17 = vpop.f32.mrf.mxu1  ;;  %v1685_v28 = vsel %vm1676_vm1, %v1682_v49, %v1684_v20 }
  0xc4   : > { %11498 = vst [vmem:[#allocation3_spill] sm:$0xff] %v9552_v10 }
  0xc8   : > { %v9571_v25 = vpop.f32.mrf.mxu2 }
  0xc9   : > { %11499 = vst [vmem:[#allocation4_spill] sm:$0xff] %v9571_v25 }
  0xca   : > { %v9581_v29 = vpop.f32.mrf.mxu0 }
  0xcb   : > { %v9573_v26 = vpop.f32.mrf.mxu3  ;;  %v9584_v32 = vpop.f32.mrf.mxu1 }
  0xcc   : > { %11500 = vst [vmem:[#allocation5_spill] sm:$0xff] %v9573_v26 }
  0xcd   : > { %1128 = vmatmul.bf16.gmra.mxu2 %v888_v30  ;;  %1825 = vmatmul.bf16.gmra.mxu0 %v1681_v33 }
  0xce   : > { %1924 = vmatmul.bf16.gmra.mxu1 %v1681_v33  ;;  %v8171_v33 = vld [vmem:[%s11493_s1 + $0x258] sm:$0xf0] }
  0xcf   : > { %v8174_v35 = vor.u32 %v8966_v31, %v8171_v33  ;;  %v8876_v33 = vld [vmem:[%s9289_s12 + $0x30] sm:$0xff] }
  0xd0   : > { %1227 = vmatmul.bf16.gmra.mxu3 %v888_v30  ;;  %v9594_v38 = vpop.f32.mrf.mxu2  ;;  %v8841_v30 = vld [vmem:[%s9289_s12 + $0x28] sm:$0xff]  ;;  %v1688_v36 = vrot.slane %v8876_v33, 1  ;;  %v8843_v33 = vld [vmem:[%s9289_s12 + $0x38] sm:$0xff] }
  0xd1   : > { %11501 = vst [vmem:[#allocation6_spill] sm:$0xff] %v9594_v38  ;;  %3439 = vmatpush.bf16.msra.mxu1 %v8174_v35  ;;  %v909_v47 = vshll.u32 %v8841_v30, 16 }
  0xd2   : > { %v9598_v40 = vpop.f32.mrf.mxu0 }
  0xd3   : > { %v9596_v39 = vpop.f32.mrf.mxu3  ;;  %v9600_v43 = vpop.f32.mrf.mxu1  ;;  %v911_v0 = vrot.slane %v909_v47, 1 }
  0xd4   : > { %11502 = vst [vmem:[#allocation7_spill] sm:$0xff] %v9596_v39 }
  0xd8   : > { %v9603_v50 = vpop.f32.mrf.mxu2 }
  0xd9   : > { %11503 = vst [vmem:[#allocation8_spill] sm:$0xff] %v9603_v50 }
  0xda   : > { %v9607_v53 = vpop.f32.mrf.mxu0 }
  0xdb   : > { %v9605_v52 = vpop.f32.mrf.mxu3  ;;  %v9610_v57 = vpop.f32.mrf.mxu1 }
  0xdc   : > { %11504 = vst [vmem:[#allocation9_spill] sm:$0xff] %v9605_v52 }
  0xdd   : > { %1133 = vmatmul.bf16.gmra.mxu2 %v896_v56  ;;  %1830 = vmatmul.bf16.gmra.mxu0 %v1683_v58 }
  0xde   : > { %1929 = vmatmul.bf16.gmra.mxu1 %v1683_v58  ;;  %v907_v58 = vor.u32 %v905_v46, %v903_v19  ;;  %v8930_v46 = vld [vmem:[%s11493_s1 + $0x1c4] sm:$0xf] }
  0xe0   : > { %1232 = vmatmul.bf16.gmra.mxu3 %v896_v56  ;;  %v9614_v61 = vpop.f32.mrf.mxu2  ;;  %v8875_v56 = vld [vmem:[%s9289_s12 + $0x28] sm:$0xff]  ;;  %v912_v12 = vsel %vm868_vm0, %v907_v58, %v911_v0 }
  0xe1   : > { %11505 = vst [vmem:[#allocation10_spill] sm:$0xff] %v9614_v61  ;;  %v1686_v1 = vrot.slane %v8875_v56, 1 }
  0xe2   : > { %v9618_v63 = vpop.f32.mrf.mxu0 }
  0xe3   : > { %v9616_v62 = vpop.f32.mrf.mxu3  ;;  %v9621_v7 = vpop.f32.mrf.mxu1  ;;  %v1687_v60 = vsel %vm1676_vm1, %v1684_v20, %v1686_v1 }
  0xe4   : > { %11506 = vst [vmem:[#allocation11_spill] sm:$0xff] %v9616_v62 }
  0xe8   : > { %v9635_v21 = vpop.f32.mrf.mxu2 }
  0xe9   : > { %11507 = vst [vmem:[#allocation12_spill] sm:$0xff] %v9635_v21  ;;  %v8879_v21 = vld [vmem:[%s9289_s12 + $0x48] sm:$0xff] }
  0xea   : > { %v9639_v23 = vpop.f32.mrf.mxu0 }
  0xeb   : > { %v9637_v22 = vpop.f32.mrf.mxu3  ;;  %v9642_v27 = vpop.f32.mrf.mxu1 }
  0xec   : > { %11508 = vst [vmem:[#allocation13_spill] sm:$0xff] %v9637_v22 }
  0xed   : > { %1138 = vmatmul.bf16.gmra.mxu2 %v904_v24  ;;  %1835 = vmatmul.bf16.gmra.mxu0 %v1685_v28 }
  0xee   : > { %1934 = vmatmul.bf16.gmra.mxu1 %v1685_v28  ;;  %v917_v28 = vshll.u32 %v8842_v15, 16 }
  0xf0   : > { %1237 = vmatmul.bf16.gmra.mxu3 %v904_v24  ;;  %v9658_v37 = vpop.f32.mrf.mxu2  ;;  %v913_v24 = vshrl.u32 %v8841_v30, 16  ;;  %v919_v35 = vrot.slane %v917_v28, 1  ;;  %v8011_v30 = vld [vmem:[%s11493_s1 + $0x1c8] sm:$0xf0] }
  0xf1   : > { %11509 = vst [vmem:[#allocation14_spill] sm:$0xff] %v9658_v37  ;;  %v8014_v58 = vor.u32 %v8930_v46, %v8011_v30  ;;  %v8964_v46 = vld [vmem:[%s11493_s1 + $0x244] sm:$0xf]  ;;  %v8163_v30 = vld [vmem:[%s11493_s1 + $0x248] sm:$0xf0] }
  0xf2   : > { %v9662_v44 = vpop.f32.mrf.mxu0  ;;  %v915_v34 = vor.u32 %v913_v24, %v911_v0  ;;  %v8931_v24 = vld [vmem:[%s11493_s1 + $0x1c4] sm:$0xf0] }
  0xf3   : > { %v9660_v42 = vpop.f32.mrf.mxu3  ;;  %v9664_v49 = vpop.f32.mrf.mxu1  ;;  %2610 = vmatpush.bf16.msra.mxu3 %v8014_v58 }
  0xf4   : > { %11510 = vst [vmem:[#allocation15_spill] sm:$0xff] %v9660_v42  ;;  %v920_v56 = vsel %vm868_vm0, %v915_v34, %v919_v35 }
  0xf8   : > { %v9667_v5 = vpop.f32.mrf.mxu2 }
  0xf9   : > { %11511 = vst [vmem:[#allocation16_spill] sm:$0xff] %v9667_v5 }
  0xfa   : > { %v9671_v11 = vpop.f32.mrf.mxu0 }
  0xfb   : > { %v9669_v8 = vpop.f32.mrf.mxu3  ;;  %v9674_v14 = vpop.f32.mrf.mxu1 }
  0xfc   : > { %11512 = vst [vmem:[#allocation17_spill] sm:$0xff] %v9669_v8 }
  0xfd   : > { %1143 = vmatmul.bf16.gmra.mxu2 %v912_v12  ;;  %1840 = vmatmul.bf16.gmra.mxu0 %v1687_v60 }
  0xfe   : > { %1939 = vmatmul.bf16.gmra.mxu1 %v1687_v60  ;;  %v8009_v60 = vld [vmem:[%s11493_s1 + $0x1c0] sm:$0xf] }
  0xff   : > { %v8010_v28 = vor.u32 %v8931_v24, %v8009_v60  ;;  %v921_v60 = vshrl.u32 %v8842_v15, 16  ;;  %v925_v24 = vshll.u32 %v8843_v33, 16 }
 0x100   : > { %1242 = vmatmul.bf16.gmra.mxu3 %v912_v12  ;;  %v9678_v16 = vpop.f32.mrf.mxu2  ;;  %v1689_v12 = vsel %vm1676_vm1, %v1686_v1, %v1688_v36 }
 0x101   : > { %11513 = vst [vmem:[#allocation18_spill] sm:$0xff] %v9678_v16  ;;  %2511 = vmatpush.bf16.msra.mxu2 %v8010_v28  ;;  %v8877_v28 = vld [vmem:[%s9289_s12 + $0x38] sm:$0xff] }
 0x102   : > { %v9682_v19 = vpop.f32.mrf.mxu0  ;;  %v1690_v15 = vrot.slane %v8877_v28, 1 }
 0x103   : > { %v9680_v18 = vpop.f32.mrf.mxu3  ;;  %v9684_v31 = vpop.f32.mrf.mxu1 }
 0x104   : > { %11514 = vst [vmem:[#allocation19_spill] sm:$0xff] %v9680_v18  ;;  %v927_v18 = vrot.slane %v925_v24, 1  ;;  %v1691_v42 = vsel %vm1676_vm1, %v1688_v36, %v1690_v15 }
 0x108   : > { %v9687_v20 = vpop.f32.mrf.mxu2 }
 0x109   : > { %11515 = vst [vmem:[#allocation20_spill] sm:$0xff] %v9687_v20  ;;  %v923_v20 = vor.u32 %v921_v60, %v919_v35  ;;  %v8844_v35 = vld [vmem:[%s9289_s12 + $0x40] sm:$0xff]  ;;  %v929_v60 = vshrl.u32 %v8843_v33, 16  ;;  %v8845_v33 = vld [vmem:[%s9289_s12 + $0x48] sm:$0xff] }
 0x10a   : > { %v9697_v47 = vpop.f32.mrf.mxu0  ;;  %v933_v24 = vshll.u32 %v8844_v35, 16  ;;  %v941_v22 = vshll.u32 %v8845_v33, 16 }
 0x10b   : > { %v9689_v41 = vpop.f32.mrf.mxu3  ;;  %v9700_v0 = vpop.f32.mrf.mxu1  ;;  %v928_v8 = vsel %vm868_vm0, %v923_v20, %v927_v18  ;;  %v8878_v20 = vld [vmem:[%s9289_s12 + $0x40] sm:$0xff]  ;;  %v931_v28 = vor.u32 %v929_v60, %v927_v18  ;;  %v8928_v18 = vld [vmem:[%s11493_s1 + $0x1b4] sm:$0xf]  ;;  %v8003_v60 = vld [vmem:[%s11493_s1 + $0x1b8] sm:$0xf0] }
 0x10c   : > { %11516 = vst [vmem:[#allocation21_spill] sm:$0xff] %v9689_v41  ;;  %v1692_v36 = vrot.slane %v8878_v20, 1  ;;  %v8006_v20 = vor.u32 %v8928_v18, %v8003_v60  ;;  %v8962_v18 = vld [vmem:[%s11493_s1 + $0x234] sm:$0xf]  ;;  %v8155_v60 = vld [vmem:[%s11493_s1 + $0x238] sm:$0xf0] }
 0x10d   : > { %1148 = vmatmul.bf16.gmra.mxu2 %v920_v56  ;;  %1845 = vmatmul.bf16.gmra.mxu0 %v1689_v12 }
 0x10e   : > { %1944 = vmatmul.bf16.gmra.mxu1 %v1689_v12  ;;  %v1693_v37 = vsel %vm1676_vm1, %v1690_v15, %v1692_v36  ;;  %v8929_v15 = vld [vmem:[%s11493_s1 + $0x1b4] sm:$0xf0]  ;;  %2611 = vmatpush.bf16.msra.mxu3 %v8006_v20  ;;  %v8158_v20 = vor.u32 %v8962_v18, %v8155_v60 }
 0x110   : > { %1247 = vmatmul.bf16.gmra.mxu3 %v920_v56  ;;  %v9710_v34 = vpop.f32.mrf.mxu2  ;;  %v8166_v56 = vor.u32 %v8964_v46, %v8163_v30 }
 0x111   : > { %11517 = vst [vmem:[#allocation22_spill] sm:$0xff] %v9710_v34  ;;  %v8965_v34 = vld [vmem:[%s11493_s1 + $0x244] sm:$0xf0] }
 0x112   : > { %v9720_v58 = vpop.f32.mrf.mxu0  ;;  %3440 = vmatpush.bf16.msra.mxu1 %v8166_v56 }
 0x113   : > { %v9712_v1 = vpop.f32.mrf.mxu3  ;;  %v9722_v12 = vpop.f32.mrf.mxu1 }
 0x114   : > { %11518 = vst [vmem:[#allocation23_spill] sm:$0xff] %v9712_v1  ;;  %v8161_v1 = vld [vmem:[%s11493_s1 + $0x240] sm:$0xf] }
 0x115   : > { %v8162_v41 = vor.u32 %v8965_v34, %v8161_v1 }
 0x116   : > { %3441 = vmatpush.bf16.msra.mxu1 %v8158_v20 }
 0x117   : > { %3341 = vmatpush.bf16.msra.mxu0 %v8162_v41 }
 0x118   : > { %v9731_v16 = vpop.f32.mrf.mxu2 }
 0x119   : > { %11519 = vst [vmem:[#allocation24_spill] sm:$0xff] %v9731_v16 }
 0x11a   : > { %v9735_v30 = vpop.f32.mrf.mxu0 }
 0x11b   : > { %v9733_v46 = vpop.f32.mrf.mxu3  ;;  %v9738_v5 = vpop.f32.mrf.mxu1 }
 0x11c   : > { %11520 = vst [vmem:[#allocation25_spill] sm:$0xff] %v9733_v46  ;;  %v935_v46 = vrot.slane %v933_v24, 1  ;;  %v8001_v24 = vld [vmem:[%s11493_s1 + $0x1b0] sm:$0xf] }
 0x11d   : > { %1153 = vmatmul.bf16.gmra.mxu2 %v928_v8  ;;  %1850 = vmatmul.bf16.gmra.mxu0 %v1691_v42 }
 0x11e   : > { %1949 = vmatmul.bf16.gmra.mxu1 %v1691_v42 }
 0x120   : > { %1252 = vmatmul.bf16.gmra.mxu3 %v928_v8  ;;  %v9742_v41 = vpop.f32.mrf.mxu2 }
 0x121   : > { %11521 = vst [vmem:[#allocation26_spill] sm:$0xff] %v9742_v41  ;;  %v936_v41 = vsel %vm868_vm0, %v931_v28, %v935_v46 }
 0x122   : > { %v9746_v1 = vpop.f32.mrf.mxu0 }
 0x123   : > { %v9744_v34 = vpop.f32.mrf.mxu3  ;;  %v9748_v56 = vpop.f32.mrf.mxu1 }
 0x124   : > { %11522 = vst [vmem:[#allocation27_spill] sm:$0xff] %v9744_v34 }
 0x128   : > { %v9751_v16 = vpop.f32.mrf.mxu2 }
 0x129   : > { %11523 = vst [vmem:[#allocation28_spill] sm:$0xff] %v9751_v16  ;;  %v937_v16 = vshrl.u32 %v8844_v35, 16  ;;  %v8963_v35 = vld [vmem:[%s11493_s1 + $0x234] sm:$0xf0] }
 0x12a   : > { %v9755_v42 = vpop.f32.mrf.mxu0 }
 0x12b   : > { %v9753_v8 = vpop.f32.mrf.mxu3  ;;  %v9758_v34 = vpop.f32.mrf.mxu1 }
 0x12c   : > { %11524 = vst [vmem:[#allocation29_spill] sm:$0xff] %v9753_v8 }
 0x12d   : > { %1158 = vmatmul.bf16.gmra.mxu2 %v936_v41  ;;  %1855 = vmatmul.bf16.gmra.mxu0 %v1693_v37 }
 0x12e   : > { %1954 = vmatmul.bf16.gmra.mxu1 %v1693_v37  ;;  %v8002_v37 = vor.u32 %v8929_v15, %v8001_v24  ;;  %v8153_v24 = vld [vmem:[%s11493_s1 + $0x230] sm:$0xf] }
 0x12f   : > { %v8154_v15 = vor.u32 %v8963_v35, %v8153_v24  ;;  %v945_v35 = vshrl.u32 %v8845_v33, 16 }
 0x130   : > { %1257 = vmatmul.bf16.gmra.mxu3 %v936_v41  ;;  %v9774_v28 = vpop.f32.mrf.mxu2  ;;  %2512 = vmatpush.bf16.msra.mxu2 %v8002_v37  ;;  %v939_v37 = vor.u32 %v937_v16, %v935_v46  ;;  %v8846_v16 = vld [vmem:[%s9289_s12 + $0x50] sm:$0xff] }
 0x131   : > { %11525 = vst [vmem:[#allocation30_spill] sm:$0xff] %v9774_v28  ;;  %v1694_v28 = vrot.slane %v8879_v21, 1  ;;  %3342 = vmatpush.bf16.msra.mxu0 %v8154_v15  ;;  %v949_v15 = vshll.u32 %v8846_v16, 16 }
 0x132   : > { %v9778_v8 = vpop.f32.mrf.mxu0 }
 0x133   : > { %v9776_v41 = vpop.f32.mrf.mxu3  ;;  %v9781_v62 = vpop.f32.mrf.mxu1  ;;  %v1695_v60 = vsel %vm1676_vm1, %v1692_v36, %v1694_v28  ;;  %v951_v26 = vrot.slane %v949_v15, 1  ;;  %v953_v15 = vshrl.u32 %v8846_v16, 16 }
 0x134   : > { %11526 = vst [vmem:[#allocation31_spill] sm:$0xff] %v9776_v41  ;;  %v943_v41 = vrot.slane %v941_v22, 1 }
 0x136   : > { %v944_v39 = vsel %vm868_vm0, %v939_v37, %v943_v41  ;;  %v8880_v37 = vld [vmem:[%s9289_s12 + $0x50] sm:$0xff]  ;;  %v947_v36 = vor.u32 %v945_v35, %v943_v41  ;;  %v8847_v41 = vld [vmem:[%s9289_s12 + $0x58] sm:$0xff] }
 0x138   : > { %v9795_v61 = vpop.f32.mrf.mxu2  ;;  %v952_v33 = vsel %vm868_vm0, %v947_v36, %v951_v26 }
 0x139   : > { %11527 = vst [vmem:[#allocation32_spill] sm:$0xff] %v9795_v61 }
 0x13a   : > { %v1821_v50 = vpop.f32.mrf.mxu0 }
 0x13b   : > { %v9797_v52 = vpop.f32.mrf.mxu3  ;;  %v1920_v18 = vpop.f32.mrf.mxu1 }
 0x13c   : > { %11528 = vst [vmem:[#allocation33_spill] sm:$0xff] %v9797_v52 }
 0x13d   : > { %1163 = vmatmul.bf16.gmra.mxu2 %v944_v39  ;;  %1860 = vmatmul.bf16.gmra.mxu0 %v1695_v60 }
 0x13e   : > { %1959 = vmatmul.bf16.gmra.mxu1 %v1695_v60 }
 0x140   : > { %1262 = vmatmul.bf16.gmra.mxu3 %v944_v39  ;;  %v1124_v22 = vpop.f32.mrf.mxu2  ;;  %v1696_v39 = vrot.slane %v8880_v37, 1  ;;  %v957_v37 = vshll.u32 %v8847_v41, 16 }
 0x141   : > { %v1385_v21 = vadd.f32 %v1124_v22, %v9521_v45 }
 0x142   : > { %v1823_v20 = vpop.f32.mrf.mxu0  ;;  %v1697_v10 = vsel %vm1676_vm1, %v1694_v28, %v1696_v39 }
 0x143   : > { %v1223_v46 = vpop.f32.mrf.mxu3  ;;  %v1922_v52 = vpop.f32.mrf.mxu1  ;;  %v9805_v61 = vadd.f32 %v1821_v50, %v1385_v21 }
 0x144   : > { %v1386_v24 = vadd.f32 %v1223_v46, %v9525_v48 }
 0x146   : > { %v9807_v38 = vadd.f32 %v1920_v18, %v1386_v24 }
 0x148   : > { %v1126_v60 = vpop.f32.mrf.mxu2 }
 0x149   : > { %v1387_v25 = vadd.f32 %v1126_v60, %v9534_v55 }
 0x14a   : > { %v1826_v48 = vpop.f32.mrf.mxu0 }
 0x14b   : > { %v1225_v45 = vpop.f32.mrf.mxu3  ;;  %v1925_v46 = vpop.f32.mrf.mxu1  ;;  %v9813_v50 = vadd.f32 %v1823_v20, %v1387_v25  ;;  %v8926_v25 = vld [vmem:[%s11493_s1 + $0x1a4] sm:$0xf] }
 0x14c   : > { %v1388_v22 = vadd.f32 %v1225_v45, %v9536_v59  ;;  %v955_v45 = vor.u32 %v953_v15, %v951_v26  ;;  %v8147_v26 = vld [vmem:[%s11493_s1 + $0x228] sm:$0xf0] }
 0x14d   : > { %11529 = vst [vmem:[#allocation34_spill] sm:$0xff] %v9813_v50  ;;  %1168 = vmatmul.bf16.gmra.mxu2 %v952_v33  ;;  %1865 = vmatmul.bf16.gmra.mxu0 %v1697_v10 }
 0x14e   : > { %v9815_v18 = vadd.f32 %v1922_v52, %v1388_v22  ;;  %1964 = vmatmul.bf16.gmra.mxu1 %v1697_v10  ;;  %v7995_v52 = vld [vmem:[%s11493_s1 + $0x1a8] sm:$0xf0]  ;;  %v8881_v10 = vld [vmem:[%s9289_s12 + $0x58] sm:$0xff]  ;;  %v959_v22 = vrot.slane %v957_v37, 1 }
 0x14f   : > { %v7998_v20 = vor.u32 %v8926_v25, %v7995_v52 }
 0x150   : > { %11530 = vst [vmem:[#allocation35_spill] sm:$0xff] %v9815_v18  ;;  %1267 = vmatmul.bf16.gmra.mxu3 %v952_v33  ;;  %v1129_v55 = vpop.f32.mrf.mxu2  ;;  %v1698_v33 = vrot.slane %v8881_v10, 1  ;;  %v960_v50 = vsel %vm868_vm0, %v955_v45, %v959_v22 }
 0x151   : > { %v1389_v21 = vadd.f32 %v1129_v55, %v9543_v4  ;;  %v7993_v4 = vld [vmem:[%s11493_s1 + $0x1a0] sm:$0xf]  ;;  %2612 = vmatpush.bf16.msra.mxu3 %v7998_v20 }
 0x152   : > { %v1828_v35 = vpop.f32.mrf.mxu0 }
 0x153   : > { %v1228_v59 = vpop.f32.mrf.mxu3  ;;  %v1927_v28 = vpop.f32.mrf.mxu1  ;;  %v9833_v16 = vadd.f32 %v1826_v48, %v1389_v21  ;;  %v8960_v48 = vld [vmem:[%s11493_s1 + $0x224] sm:$0xf]  ;;  %v1699_v21 = vsel %vm1676_vm1, %v1696_v39, %v1698_v33 }
 0x154   : > { %v1390_v24 = vadd.f32 %v1228_v59, %v9546_v6  ;;  %v8927_v6 = vld [vmem:[%s11493_s1 + $0x1a4] sm:$0xf0]  ;;  %v8848_v39 = vld [vmem:[%s9289_s12 + $0x60] sm:$0xff] }
 0x155   : > { %v7994_v36 = vor.u32 %v8927_v6, %v7993_v4 }
 0x156   : > { %v9835_v60 = vadd.f32 %v1925_v46, %v1390_v24  ;;  %v8150_v24 = vor.u32 %v8960_v48, %v8147_v26 }
 0x157   : > { %2513 = vmatpush.bf16.msra.mxu2 %v7994_v36 }
 0x158   : > { %v1131_v55 = vpop.f32.mrf.mxu2  ;;  %3442 = vmatpush.bf16.msra.mxu1 %v8150_v24 }
 0x159   : > { %v1391_v59 = vadd.f32 %v1131_v55, %v9560_v13  ;;  %v8145_v13 = vld [vmem:[%s11493_s1 + $0x220] sm:$0xf]  ;;  %v961_v55 = vshrl.u32 %v8847_v41, 16 }
 0x15a   : > { %v1831_v18 = vpop.f32.mrf.mxu0 }
 0x15b   : > { %v1230_v25 = vpop.f32.mrf.mxu3  ;;  %v1930_v46 = vpop.f32.mrf.mxu1  ;;  %v9853_v37 = vadd.f32 %v1828_v35, %v1391_v59  ;;  %v965_v35 = vshll.u32 %v8848_v39, 16 }
 0x15c   : > { %v1392_v52 = vadd.f32 %v1230_v25, %v9562_v17  ;;  %v8961_v17 = vld [vmem:[%s11493_s1 + $0x224] sm:$0xf0] }
 0x15d   : > { %v8146_v15 = vor.u32 %v8961_v17, %v8145_v13  ;;  %1173 = vmatmul.bf16.gmra.mxu2 %v960_v50  ;;  %1870 = vmatmul.bf16.gmra.mxu0 %v1699_v21  ;;  %v967_v48 = vrot.slane %v965_v35, 1  ;;  %v8883_v35 = vld [vmem:[%s9289_s12 + $0x68] sm:$0xff] }
 0x15e   : > { %v9855_v10 = vadd.f32 %v1927_v28, %v1392_v52  ;;  %1969 = vmatmul.bf16.gmra.mxu1 %v1699_v21  ;;  %v8882_v28 = vld [vmem:[%s9289_s12 + $0x60] sm:$0xff] }
 0x15f   : > { %3343 = vmatpush.bf16.msra.mxu0 %v8146_v15  ;;  %v1700_v26 = vrot.slane %v8882_v28, 1 }
 0x160   : > { %1272 = vmatmul.bf16.gmra.mxu3 %v960_v50  ;;  %v1134_v20 = vpop.f32.mrf.mxu2  ;;  %v963_v50 = vor.u32 %v961_v55, %v959_v22  ;;  %v8849_v22 = vld [vmem:[%s9289_s12 + $0x68] sm:$0xff] }
 0x161   : > { %v1393_v4 = vadd.f32 %v1134_v20, %v9581_v29  ;;  %v973_v55 = vshll.u32 %v8849_v22, 16 }
 0x162   : > { %v1833_v45 = vpop.f32.mrf.mxu0  ;;  %v968_v41 = vsel %vm868_vm0, %v963_v50, %v967_v48 }
 0x163   : > { %v1233_v6 = vpop.f32.mrf.mxu3  ;;  %v1932_v59 = vpop.f32.mrf.mxu1  ;;  %v9861_v25 = vadd.f32 %v1831_v18, %v1393_v4  ;;  %v1701_v18 = vsel %vm1676_vm1, %v1698_v33, %v1700_v26 }
 0x164   : > { %v1394_v36 = vadd.f32 %v1233_v6, %v9584_v32 }
 0x166   : > { %v9863_v52 = vadd.f32 %v1930_v46, %v1394_v36  ;;  %v969_v36 = vshrl.u32 %v8848_v39, 16  ;;  %v8925_v39 = vld [vmem:[%s11493_s1 + $0x194] sm:$0xf0] }
 0x168   : > { %v1136_v21 = vpop.f32.mrf.mxu2 }
 0x169   : > { %v1395_v24 = vadd.f32 %v1136_v21, %v9598_v40 }
 0x16a   : > { %v1836_v32 = vpop.f32.mrf.mxu0 }
 0x16b   : > { %v1235_v29 = vpop.f32.mrf.mxu3  ;;  %v1935_v17 = vpop.f32.mrf.mxu1  ;;  %v9869_v15 = vadd.f32 %v1833_v45, %v1395_v24  ;;  %v8924_v45 = vld [vmem:[%s11493_s1 + $0x194] sm:$0xf]  ;;  %v971_v24 = vor.u32 %v969_v36, %v967_v48 }
 0x16c   : > { %v1396_v13 = vadd.f32 %v1235_v29, %v9600_v43  ;;  %v975_v29 = vrot.slane %v973_v55, 1  ;;  %v8850_v36 = vld [vmem:[%s9289_s12 + $0x70] sm:$0xff]  ;;  %v8959_v55 = vld [vmem:[%s11493_s1 + $0x214] sm:$0xf0] }
 0x16d   : > { %1178 = vmatmul.bf16.gmra.mxu2 %v968_v41  ;;  %1875 = vmatmul.bf16.gmra.mxu0 %v1701_v18 }
 0x16e   : > { %v9871_v46 = vadd.f32 %v1932_v59, %v1396_v13  ;;  %1974 = vmatmul.bf16.gmra.mxu1 %v1701_v18  ;;  %v7987_v59 = vld [vmem:[%s11493_s1 + $0x198] sm:$0xf0]  ;;  %v1702_v13 = vrot.slane %v8883_v35, 1 }
 0x170   : > { %1277 = vmatmul.bf16.gmra.mxu3 %v968_v41  ;;  %v1139_v40 = vpop.f32.mrf.mxu2 }
 0x171   : > { %v1397_v20 = vadd.f32 %v1139_v40, %v9607_v53  ;;  %v7985_v53 = vld [vmem:[%s11493_s1 + $0x190] sm:$0xf] }
 0x172   : > { %v1838_v6 = vpop.f32.mrf.mxu0  ;;  %v7986_v21 = vor.u32 %v8925_v39, %v7985_v53 }
 0x173   : > { %v1238_v43 = vpop.f32.mrf.mxu3  ;;  %v1937_v33 = vpop.f32.mrf.mxu1  ;;  %v9886_v28 = vadd.f32 %v1836_v32, %v1397_v20 }
 0x174   : > { %v1398_v4 = vadd.f32 %v1238_v43, %v9610_v57  ;;  %v7990_v57 = vor.u32 %v8924_v45, %v7987_v59  ;;  %2514 = vmatpush.bf16.msra.mxu2 %v7986_v21  ;;  %v976_v43 = vsel %vm868_vm0, %v971_v24, %v975_v29  ;;  %v977_v21 = vshrl.u32 %v8849_v22, 16 }
 0x175   : > { %v981_v24 = vshll.u32 %v8850_v36, 16 }
 0x176   : > { %v9891_v50 = vadd.f32 %v1935_v17, %v1398_v4  ;;  %2613 = vmatpush.bf16.msra.mxu3 %v7990_v57  ;;  %v1703_v17 = vsel %vm1676_vm1, %v1700_v26, %v1702_v13  ;;  %v8137_v26 = vld [vmem:[%s11493_s1 + $0x210] sm:$0xf] }
 0x178   : > { %v1141_v41 = vpop.f32.mrf.mxu2 }
 0x179   : > { %v1399_v18 = vadd.f32 %v1141_v41, %v9618_v63  ;;  %v8958_v63 = vld [vmem:[%s11493_s1 + $0x214] sm:$0xf] }
 0x17a   : > { %v1841_v20 = vpop.f32.mrf.mxu0 }
 0x17b   : > { %v1240_v40 = vpop.f32.mrf.mxu3  ;;  %v1940_v45 = vpop.f32.mrf.mxu1  ;;  %v9897_v4 = vadd.f32 %v1838_v6, %v1399_v18  ;;  %v8884_v18 = vld [vmem:[%s9289_s12 + $0x70] sm:$0xff] }
 0x17c   : > { %v1400_v32 = vadd.f32 %v1240_v40, %v9621_v7  ;;  %v8139_v7 = vld [vmem:[%s11493_s1 + $0x218] sm:$0xf0] }
 0x17d   : > { %1183 = vmatmul.bf16.gmra.mxu2 %v976_v43  ;;  %1880 = vmatmul.bf16.gmra.mxu0 %v1703_v17  ;;  %v8142_v6 = vor.u32 %v8958_v63, %v8139_v7  ;;  %v1704_v63 = vrot.slane %v8884_v18, 1 }
 0x17e   : > { %v9899_v48 = vadd.f32 %v1937_v33, %v1400_v32  ;;  %1979 = vmatmul.bf16.gmra.mxu1 %v1703_v17  ;;  %v8138_v33 = vor.u32 %v8959_v55, %v8137_v26  ;;  %v983_v17 = vrot.slane %v981_v24, 1  ;;  %v8885_v24 = vld [vmem:[%s9289_s12 + $0x78] sm:$0xff] }
 0x17f   : > { %3443 = vmatpush.bf16.msra.mxu1 %v8142_v6 }
 0x180   : > { %1282 = vmatmul.bf16.gmra.mxu3 %v976_v43  ;;  %v1144_v35 = vpop.f32.mrf.mxu2  ;;  %3344 = vmatpush.bf16.msra.mxu0 %v8138_v33  ;;  %v979_v43 = vor.u32 %v977_v21, %v975_v29  ;;  %v8851_v29 = vld [vmem:[%s9289_s12 + $0x78] sm:$0xff] }
 0x181   : > { %v1401_v59 = vadd.f32 %v1144_v35, %v9639_v23  ;;  %v1705_v35 = vsel %vm1676_vm1, %v1702_v13, %v1704_v63  ;;  %v989_v21 = vshll.u32 %v8851_v29, 16 }
 0x182   : > { %v1843_v39 = vpop.f32.mrf.mxu0  ;;  %v984_v22 = vsel %vm868_vm0, %v979_v43, %v983_v17 }
 0x183   : > { %v1243_v53 = vpop.f32.mrf.mxu3  ;;  %v1942_v41 = vpop.f32.mrf.mxu1  ;;  %v9917_v40 = vadd.f32 %v1841_v20, %v1401_v59  ;;  %v991_v43 = vrot.slane %v989_v21, 1 }
 0x184   : > { %v1402_v57 = vadd.f32 %v1243_v53, %v9642_v27 }
 0x186   : > { %v9919_v32 = vadd.f32 %v1940_v45, %v1402_v57  ;;  %v985_v57 = vshrl.u32 %v8850_v36, 16  ;;  %v8922_v36 = vld [vmem:[%s11493_s1 + $0x184] sm:$0xf] }
 0x188   : > { %v1146_v7 = vpop.f32.mrf.mxu2  ;;  %v987_v18 = vor.u32 %v985_v57, %v983_v17  ;;  %v7979_v17 = vld [vmem:[%s11493_s1 + $0x188] sm:$0xf0] }
 0x189   : > { %v1403_v23 = vadd.f32 %v1146_v7, %v9662_v44  ;;  %v1706_v7 = vrot.slane %v8885_v24, 1 }
 0x18a   : > { %v1846_v6 = vpop.f32.mrf.mxu0 }
 0x18b   : > { %v1245_v26 = vpop.f32.mrf.mxu3  ;;  %v1945_v55 = vpop.f32.mrf.mxu1  ;;  %v9925_v20 = vadd.f32 %v1843_v39, %v1403_v23 }
 0x18c   : > { %v1404_v27 = vadd.f32 %v1245_v26, %v9664_v49 }
 0x18d   : > { %1188 = vmatmul.bf16.gmra.mxu2 %v984_v22  ;;  %1885 = vmatmul.bf16.gmra.mxu0 %v1705_v35 }
 0x18e   : > { %v9927_v45 = vadd.f32 %v1942_v41, %v1404_v27  ;;  %1984 = vmatmul.bf16.gmra.mxu1 %v1705_v35  ;;  %v7982_v35 = vor.u32 %v8922_v36, %v7979_v17 }
 0x190   : > { %1287 = vmatmul.bf16.gmra.mxu3 %v984_v22  ;;  %v1149_v44 = vpop.f32.mrf.mxu2 }
 0x191   : > { %v1405_v33 = vadd.f32 %v1149_v44, %v9671_v11  ;;  %2614 = vmatpush.bf16.msra.mxu3 %v7982_v35 }
 0x192   : > { %v1848_v53 = vpop.f32.mrf.mxu0 }
 0x193   : > { %v1248_v49 = vpop.f32.mrf.mxu3  ;;  %v1947_v13 = vpop.f32.mrf.mxu1  ;;  %v9933_v39 = vadd.f32 %v1846_v6, %v1405_v33 }
 0x194   : > { %v1406_v59 = vadd.f32 %v1248_v49, %v9674_v14  ;;  %v992_v14 = vsel %vm868_vm0, %v987_v18, %v991_v43 }
 0x196   : > { %v9935_v41 = vadd.f32 %v1945_v55, %v1406_v59  ;;  %v1707_v55 = vsel %vm1676_vm1, %v1704_v63, %v1706_v7  ;;  %v8852_v63 = vld [vmem:[%s9289_s12 + $0x80] sm:$0xff] }
 0x198   : > { %v1151_v23 = vpop.f32.mrf.mxu2 }
 0x199   : > { %v1407_v26 = vadd.f32 %v1151_v23, %v9682_v19  ;;  %v7977_v19 = vld [vmem:[%s11493_s1 + $0x180] sm:$0xf]  ;;  %v993_v23 = vshrl.u32 %v8851_v29, 16 }
 0x19a   : > { %v1851_v22 = vpop.f32.mrf.mxu0 }
 0x19b   : > { %v1250_v27 = vpop.f32.mrf.mxu3  ;;  %v1950_v6 = vpop.f32.mrf.mxu1  ;;  %v9953_v33 = vadd.f32 %v1848_v53, %v1407_v26  ;;  %v997_v53 = vshll.u32 %v8852_v63, 16  ;;  %v8131_v26 = vld [vmem:[%s11493_s1 + $0x208] sm:$0xf0] }
 0x19c   : > { %v1408_v11 = vadd.f32 %v1250_v27, %v9684_v31  ;;  %v8923_v31 = vld [vmem:[%s11493_s1 + $0x184] sm:$0xf0] }
 0x19d   : > { %v7978_v44 = vor.u32 %v8923_v31, %v7977_v19  ;;  %1193 = vmatmul.bf16.gmra.mxu2 %v992_v14  ;;  %1890 = vmatmul.bf16.gmra.mxu0 %v1707_v55  ;;  %v999_v35 = vrot.slane %v997_v53, 1 }
 0x19e   : > { %v9955_v49 = vadd.f32 %v1947_v13, %v1408_v11  ;;  %1989 = vmatmul.bf16.gmra.mxu1 %v1707_v55  ;;  %v8956_v13 = vld [vmem:[%s11493_s1 + $0x204] sm:$0xf]  ;;  %v995_v55 = vor.u32 %v993_v23, %v991_v43 }
 0x19f   : > { %2515 = vmatpush.bf16.msra.mxu2 %v7978_v44  ;;  %v8886_v11 = vld [vmem:[%s9289_s12 + $0x80] sm:$0xff] }
 0x1a0   : > { %1292 = vmatmul.bf16.gmra.mxu3 %v992_v14  ;;  %v1154_v59 = vpop.f32.mrf.mxu2  ;;  %v8134_v14 = vor.u32 %v8956_v13, %v8131_v26  ;;  %v1708_v19 = vrot.slane %v8886_v11, 1  ;;  %v1000_v26 = vsel %vm868_vm0, %v995_v55, %v999_v35 }
 0x1a1   : > { %v1409_v57 = vadd.f32 %v1154_v59, %v9697_v47  ;;  %v8129_v47 = vld [vmem:[%s11493_s1 + $0x200] sm:$0xf] }
 0x1a2   : > { %v1853_v18 = vpop.f32.mrf.mxu0  ;;  %3444 = vmatpush.bf16.msra.mxu1 %v8134_v14  ;;  %v1001_v14 = vshrl.u32 %v8852_v63, 16 }
 0x1a3   : > { %v1253_v21 = vpop.f32.mrf.mxu3  ;;  %v1952_v27 = vpop.f32.mrf.mxu1  ;;  %v9973_v29 = vadd.f32 %v1851_v22, %v1409_v57  ;;  %v1709_v57 = vsel %vm1676_vm1, %v1706_v7, %v1708_v19 }
 0x1a4   : > { %v1410_v24 = vadd.f32 %v1253_v21, %v9700_v0  ;;  %v8957_v0 = vld [vmem:[%s11493_s1 + $0x204] sm:$0xf0] }
 0x1a5   : > { %v8130_v36 = vor.u32 %v8957_v0, %v8129_v47 }
 0x1a6   : > { %v9975_v17 = vadd.f32 %v1950_v6, %v1410_v24 }
 0x1a7   : > { %3345 = vmatpush.bf16.msra.mxu0 %v8130_v36  ;;  %v1003_v36 = vor.u32 %v1001_v14, %v999_v35  ;;  %v1565_v35 = vld [vmem:[%s9289_s12 + $0x90] sm:$0x1]  ;;  %v9005_v14 = vld [vmem:[%s11493_s1 + $0x2f4] sm:$0xf0] }
 0x1a8   : > { %v1156_v31 = vpop.f32.mrf.mxu2 }
 0x1a9   : > { %v1411_v44 = vadd.f32 %v1156_v31, %v9720_v58  ;;  %v8853_v58 = vld [vmem:[%s9289_s12 + $0x88] sm:$0xff] }
 0x1aa   : > { %v1856_v13 = vpop.f32.mrf.mxu0  ;;  %v1005_v7 = vshll.u32 %v8853_v58, 16 }
 0x1ab   : > { %v1255_v59 = vpop.f32.mrf.mxu3  ;;  %v1955_v22 = vpop.f32.mrf.mxu1  ;;  %v9981_v6 = vadd.f32 %v1853_v18, %v1411_v44  ;;  %v9989_v18 = vld [vmem:[%s9289_s12 + $0x88] sm:$0xff]  ;;  %v757_v44 = vld [vmem:[%s9289_s12 + $0x90] sm:$0x1] }
 0x1ac   : > { %v1412_v21 = vadd.f32 %v1255_v59, %v9722_v12  ;;  %v1007_v55 = vrot.slane %v1005_v7, 1  ;;  %v1710_v31 = vrot.slane %v9989_v18, 1 }
 0x1ad   : > { %1198 = vmatmul.bf16.gmra.mxu2 %v1000_v26  ;;  %1895 = vmatmul.bf16.gmra.mxu0 %v1709_v57 }
 0x1ae   : > { %v9983_v43 = vadd.f32 %v1952_v27, %v1412_v21  ;;  %1994 = vmatmul.bf16.gmra.mxu1 %v1709_v57  ;;  %v848_v57 = vunpack.c.l.b16 %v757_v44 }
 0x1b0   : > { %1297 = vmatmul.bf16.gmra.mxu3 %v1000_v26  ;;  %v1159_v24 = vpop.f32.mrf.mxu2  ;;  %v1008_v26 = vsel %vm868_vm0, %v1003_v36, %v1007_v55 }
 0x1b1   : > { %v1413_v12 = vadd.f32 %v1159_v24, %v9735_v30  ;;  %v1711_v24 = vsel %vm1676_vm1, %v1708_v19, %v1710_v31  ;;  %v8337_v19 = vld [vmem:[%s11493_s1 + $0x2f0] sm:$0xf] }
 0x1b2   : > { %v1858_v11 = vpop.f32.mrf.mxu0 }
 0x1b3   : > { %v1258_v23 = vpop.f32.mrf.mxu3  ;;  %v1957_v47 = vpop.f32.mrf.mxu1  ;;  %v9991_v27 = vadd.f32 %v1856_v13, %v1413_v12 }
 0x1b4   : > { %v1414_v53 = vadd.f32 %v1258_v23, %v9738_v5  ;;  %v8339_v23 = vld [vmem:[%s11493_s1 + $0x2f8] sm:$0xf0] }
 0x1b6   : > { %v9993_v0 = vadd.f32 %v1955_v22, %v1414_v53  ;;  %v1656_v53 = vunpack.c.l.b16 %v1565_v35  ;;  %v9039_v35 = vld [vmem:[%s11493_s1 + $0x374] sm:$0xf0] }
 0x1b8   : > { %v1161_v30 = vpop.f32.mrf.mxu2 }
 0x1b9   : > { %v1415_v59 = vadd.f32 %v1161_v30, %v9746_v1  ;;  %v867_v1 = vpack.c.b16 %v848_v57, %v848_v57  ;;  %v9038_v57 = vld [vmem:[%s11493_s1 + $0x374] sm:$0xf] }
 0x1ba   : > { %v1861_v21 = vpop.f32.mrf.mxu0 }
 0x1bb   : > { %v1260_v5 = vpop.f32.mrf.mxu3  ;;  %v1960_v13 = vpop.f32.mrf.mxu1  ;;  %v10001_v22 = vadd.f32 %v1858_v11, %v1415_v59  ;;  %v1009_v59 = vshrl.u32 %v8853_v58, 16 }
 0x1bc   : > { %v1416_v63 = vadd.f32 %v1260_v5, %v9748_v56  ;;  %v9004_v56 = vld [vmem:[%s11493_s1 + $0x2f4] sm:$0xf]  ;;  %v1013_v5 = vshll.u32 %v867_v1, 16 }
 0x1bd   : > { %1203 = vmatmul.bf16.gmra.mxu2 %v1008_v26  ;;  %1900 = vmatmul.bf16.gmra.mxu0 %v1711_v24  ;;  %v8342_v11 = vor.u32 %v9004_v56, %v8339_v23  ;;  %v1011_v23 = vor.u32 %v1009_v59, %v1007_v55 }
 0x1be   : > { %v10004_v12 = vadd.f32 %v1957_v47, %v1416_v63  ;;  %1999 = vmatmul.bf16.gmra.mxu1 %v1711_v24  ;;  %v8338_v47 = vor.u32 %v9005_v14, %v8337_v19  ;;  %v1015_v19 = vrot.slane %v1013_v5, 1  ;;  %v8938_v14 = vld [vmem:[%s9289_s12 + $0x8] sm:$0xf0]  ;;  %v8939_v5 = vld [vmem:[%s9289_s12 + $0x10] sm:$0xff] }
 0x1bf   : > { %4134 = vmatpush.bf16.msrb.mxu3 %v8342_v11  ;;  %v8057_v11 = vld [vmem:[%s9289_s12 + $0x8] sm:$0xe] }
 0x1c0   : > { %1302 = vmatmul.bf16.gmra.mxu3 %v1008_v26  ;;  %v1164_v7 = vpop.f32.mrf.mxu2  ;;  %4035 = vmatpush.bf16.msrb.mxu2 %v8338_v47  ;;  %v1675_v26 = vpack.c.b16 %v1656_v53, %v1656_v53 }
 0x1c1   : > { %v1417_v18 = vadd.f32 %v1164_v7, %v9755_v42  ;;  %v8491_v42 = vld [vmem:[%s11493_s1 + $0x378] sm:$0xf0] }
 0x1c2   : > { %v1863_v30 = vpop.f32.mrf.mxu0  ;;  %v8494_v58 = vor.u32 %v9038_v57, %v8491_v42  ;;  %v1712_v53 = vrot.slane %v1675_v26, 1  ;;  %v7905_v42 = vld [vmem:[%s9289_s12 + $0x8] sm:$0xe] }
 0x1c3   : > { %v1263_v36 = vpop.f32.mrf.mxu3  ;;  %v1962_v63 = vpop.f32.mrf.mxu1  ;;  %v10029_v24 = vadd.f32 %v1861_v21, %v1417_v18 }
 0x1c4   : > { %v1418_v44 = vadd.f32 %v1263_v36, %v9758_v34  ;;  %v8489_v34 = vld [vmem:[%s11493_s1 + $0x370] sm:$0xf]  ;;  %4830 = vmatpush.bf16.msrb.mxu1 %v8494_v58  ;;  %v1713_v59 = vsel %vm1676_vm1, %v1710_v31, %v1712_v53  ;;  %v3079_v58 = vshrl.u32 %v8939_v5, 16 }
 0x1c5   : > { %v8490_v56 = vor.u32 %v9039_v35, %v8489_v34  ;;  %v8904_v34 = vld [vmem:[%s9289_s12 + $0x8] sm:$0xf0]  ;;  %v3082_v35 = vshll.u32 %v8939_v5, 16 }
 0x1c6   : > { %v10034_v1 = vadd.f32 %v1960_v13, %v1418_v44  ;;  %v1016_v13 = vsel %vm868_vm0, %v1011_v23, %v1015_v19  ;;  %v8058_v44 = vor.u32 %v8938_v14, %v8057_v11  ;;  %v7906_v53 = vor.u32 %v8904_v34, %v7905_v42 }
 0x1c7   : > { %4731 = vmatpush.bf16.msrb.mxu0 %v8490_v56 }
 0x1c8   : > { %v1166_v7 = vpop.f32.mrf.mxu2 }
 0x1c9   : > { %v1419_v21 = vadd.f32 %v1166_v7, %v9778_v8  ;;  %v3071_v8 = vshrl.u32 %v8058_v44, 16 }
 0x1ca   : > { %v1866_v36 = vpop.f32.mrf.mxu0 }
 0x1cb   : > { %v1265_v47 = vpop.f32.mrf.mxu3  ;;  %v1965_v55 = vpop.f32.mrf.mxu1  ;;  %v10043_v26 = vadd.f32 %v1863_v30, %v1419_v21  ;;  %v3073_v11 = vrot.slane %v3071_v8, 1  ;;  %v3081_v21 = vrot.slane %v3079_v58, 1 }
 0x1cc   : > { %v1420_v18 = vadd.f32 %v1265_v47, %v9781_v62  ;;  %v3074_v62 = vshll.u32 %v8058_v44, 16  ;;  %v3084_v47 = vrot.slane %v3082_v35, 2  ;;  %v2373_v44 = vrot.slane %v7906_v53, 1  ;;  %v11533_v53 = vld [vmem:[#allocation3_spill] sm:$0xff] }
 0x1cd   : > { %1208 = vmatmul.bf16.gmra.mxu2 %v1016_v13  ;;  %1905 = vmatmul.bf16.gmra.mxu0 %v1713_v59 }
 0x1ce   : > { %v10045_v57 = vadd.f32 %v1962_v63, %v1420_v18  ;;  %2004 = vmatmul.bf16.gmra.mxu1 %v1713_v59  ;;  %v8905_v63 = vld [vmem:[%s9289_s12 + $0x10] sm:$0xff]  ;;  %v3076_v7 = vrot.slane %v3074_v62, 2 }
 0x1cf   : > { %v2374_v59 = vrot.slane %v8905_v63, 1 }
 0x1d0   : > { %1307 = vmatmul.bf16.gmra.mxu3 %v1016_v13  ;;  %v1169_v56 = vpop.f32.mrf.mxu2  ;;  %v3077_v5 = vor.u32 %v3076_v7, %v3073_v11 }
 0x1d1   : > { %v1421_v23 = vadd.f32 %v1169_v56, %v9528_v51  ;;  %v3085_v51 = vor.u32 %v3084_v47, %v3081_v21  ;;  %v2375_v62 = vsel %vm1676_vm1, %v2373_v44, %v2374_v59  ;;  %v8906_v21 = vld [vmem:[%s9289_s12 + $0x18] sm:$0xff] }
 0x1d2   : > { %v1868_v19 = vpop.f32.mrf.mxu0 }
 0x1d3   : > { %v1268_v31 = vpop.f32.mrf.mxu3  ;;  %v1967_v14 = vpop.f32.mrf.mxu1  ;;  %v10052_v18 = vadd.f32 %v1866_v36, %v1421_v23  ;;  %v3086_v36 = vsel %vm3069_vm2, %v3077_v5, %v3085_v51 }
 0x1d4   : > { %v1422_v30 = vadd.f32 %v1268_v31, %v9532_v54 }
 0x1d6   : > { %v10054_v13 = vadd.f32 %v1965_v55, %v1422_v30  ;;  %v8940_v55 = vld [vmem:[%s9289_s12 + $0x18] sm:$0xff] }
 0x1d7   : > { %v3091_v23 = vshll.u32 %v8940_v55, 16 }
 0x1d8   : > { %v1171_v56 = vpop.f32.mrf.mxu2 }
 0x1d9   : > { %v1423_v54 = vadd.f32 %v1171_v56, %v9539_v2  ;;  %v3088_v2 = vshrl.u32 %v8940_v55, 16  ;;  %v3093_v5 = vrot.slane %v3091_v23, 2  ;;  %v11536_v23 = vld [vmem:[#allocation4_spill] sm:$0xff] }
 0x1da   : > { %v1871_v42 = vpop.f32.mrf.mxu0 }
 0x1db   : > { %v1270_v31 = vpop.f32.mrf.mxu3  ;;  %v1970_v34 = vpop.f32.mrf.mxu1  ;;  %v10061_v58 = vadd.f32 %v1868_v19, %v1423_v54  ;;  %v9002_v19 = vld [vmem:[%s11493_s1 + $0x2e4] sm:$0xf]  ;;  %v3090_v44 = vrot.slane %v3088_v2, 1  ;;  %v9003_v54 = vld [vmem:[%s11493_s1 + $0x2e4] sm:$0xf0] }
 0x1dc   : > { %v1424_v8 = vadd.f32 %v1270_v31, %v9541_v3 }
 0x1dd   : > { %11531 = vst [vmem:[#allocation36_spill] sm:$0xff] %v10061_v58  ;;  %2516 = vmatmul.bf16.vlgmr.msra.gmra.mxu2 %v2375_v62  ;;  %3346 = vmatmul.bf16.vlgmr.msra.gmra.mxu0 %v3086_v36  ;;  %v3094_v55 = vor.u32 %v3093_v5, %v3090_v44  ;;  %v8481_v5 = vld [vmem:[%s11493_s1 + $0x360] sm:$0xf] }
 0x1de   : > { %v10063_v35 = vadd.f32 %v1967_v14, %v1424_v8  ;;  %3445 = vmatmul.bf16.vlgmr.msra.gmra.mxu1 %v3086_v36  ;;  %v8331_v14 = vld [vmem:[%s11493_s1 + $0x2e8] sm:$0xf0]  ;;  %v2376_v36 = vrot.slane %v8906_v21, 1  ;;  %v8941_v21 = vld [vmem:[%s9289_s12 + $0x20] sm:$0xff] }
 0x1df   : > { %v8334_v56 = vor.u32 %v9002_v19, %v8331_v14 }
 0x1e0   : > { %11532 = vst [vmem:[#allocation37_spill] sm:$0xff] %v10063_v35  ;;  %2615 = vmatmul.bf16.vlgmr.msra.gmra.mxu3 %v2375_v62  ;;  %v1174_v30 = vpop.f32.mrf.mxu2  ;;  %v2377_v35 = vsel %vm1676_vm1, %v2374_v59, %v2376_v36  ;;  %v9037_v59 = vld [vmem:[%s11493_s1 + $0x364] sm:$0xf0] }
 0x1e1   : > { %v1425_v3 = vadd.f32 %v1174_v30, %v9550_v9  ;;  %v8329_v9 = vld [vmem:[%s11493_s1 + $0x2e0] sm:$0xf]  ;;  %4135 = vmatpush.bf16.msrb.mxu3 %v8334_v56 }
 0x1e2   : > { %v1873_v7 = vpop.f32.mrf.mxu0  ;;  %v8330_v8 = vor.u32 %v9003_v54, %v8329_v9  ;;  %v8482_v9 = vor.u32 %v9037_v59, %v8481_v5 }
 0x1e3   : > { %v1273_v63 = vpop.f32.mrf.mxu3  ;;  %v1972_v47 = vpop.f32.mrf.mxu1  ;;  %v10080_v31 = vadd.f32 %v1871_v42, %v1425_v3  ;;  %v9036_v42 = vld [vmem:[%s11493_s1 + $0x364] sm:$0xf] }
 0x1e4   : > { %v1426_v11 = vadd.f32 %v1273_v63, %v11533_v53  ;;  %4036 = vmatpush.bf16.msrb.mxu2 %v8330_v8  ;;  %v11537_v53 = vld [vmem:[#allocation5_spill] sm:$0xff]  ;;  %v3100_v8 = vshll.u32 %v8941_v21, 16  ;;  %4732 = vmatpush.bf16.msrb.mxu0 %v8482_v9  ;;  %v11544_v9 = vld [vmem:[#allocation8_spill] sm:$0xff] }
 0x1e5   : > { %11534 = vst [vmem:[#allocation3_spill] sm:$0xff] %v10080_v31 }
 0x1e6   : > { %v10082_v62 = vadd.f32 %v1970_v34, %v1426_v11  ;;  %v8483_v34 = vld [vmem:[%s11493_s1 + $0x368] sm:$0xf0]  ;;  %v3095_v11 = vsel %vm3069_vm2, %v3085_v51, %v3094_v55  ;;  %v3097_v51 = vshrl.u32 %v8941_v21, 16 }
 0x1e7   : > { %v8486_v44 = vor.u32 %v9036_v42, %v8483_v34  ;;  %v11541_v42 = vld [vmem:[#allocation7_spill] sm:$0xff] }
 0x1e8   : > { %11535 = vst [vmem:[#allocation38_spill] sm:$0xff] %v10082_v62  ;;  %v1176_v2 = vpop.f32.mrf.mxu2 }
 0x1e9   : > { %v1427_v30 = vadd.f32 %v1176_v2, %v11536_v23  ;;  %4831 = vmatpush.bf16.msrb.mxu1 %v8486_v44  ;;  %v11540_v23 = vld [vmem:[#allocation6_spill] sm:$0xff] }
 0x1ea   : > { %v1876_v14 = vpop.f32.mrf.mxu0 }
 0x1eb   : > { %v1275_v63 = vpop.f32.mrf.mxu3  ;;  %v1975_v3 = vpop.f32.mrf.mxu1  ;;  %v10101_v56 = vadd.f32 %v1873_v7, %v1427_v30  ;;  %v8907_v30 = vld [vmem:[%s9289_s12 + $0x20] sm:$0xff] }
 0x1ec   : > { %v1428_v19 = vadd.f32 %v1275_v63, %v11537_v53 }
 0x1ed   : > { %11538 = vst [vmem:[#allocation4_spill] sm:$0xff] %v10101_v56  ;;  %2521 = vmatmul.bf16.gmra.mxu2 %v2377_v35  ;;  %3351 = vmatmul.bf16.gmra.mxu0 %v3095_v11 }
 0x1ee   : > { %v10103_v54 = vadd.f32 %v1972_v47, %v1428_v19  ;;  %3450 = vmatmul.bf16.gmra.mxu1 %v3095_v11  ;;  %v3099_v47 = vrot.slane %v3097_v51, 1  ;;  %v3102_v19 = vrot.slane %v3100_v8, 2  ;;  %v2378_v11 = vrot.slane %v8907_v30, 1 }
 0x1f0   : > { %11539 = vst [vmem:[#allocation5_spill] sm:$0xff] %v10103_v54  ;;  %2620 = vmatmul.bf16.gmra.mxu3 %v2377_v35  ;;  %v1179_v2 = vpop.f32.mrf.mxu2  ;;  %v3103_v21 = vor.u32 %v3102_v19, %v3099_v47 }
 0x1f1   : > { %v1429_v63 = vadd.f32 %v1179_v2, %v11540_v23  ;;  %v11545_v2 = vld [vmem:[#allocation9_spill] sm:$0xff] }
 0x1f2   : > { %v1878_v7 = vpop.f32.mrf.mxu0  ;;  %v3104_v51 = vsel %vm3069_vm2, %v3094_v55, %v3103_v21 }
 0x1f3   : > { %v1278_v53 = vpop.f32.mrf.mxu3  ;;  %v1977_v5 = vpop.f32.mrf.mxu1  ;;  %v10108_v59 = vadd.f32 %v1876_v14, %v1429_v63 }
 0x1f4   : > { %v1430_v34 = vadd.f32 %v1278_v53, %v11541_v42  ;;  %v2379_v53 = vsel %vm1676_vm1, %v2376_v36, %v2378_v11  ;;  %v8942_v42 = vld [vmem:[%s9289_s12 + $0x28] sm:$0xff]  ;;  %v11549_v36 = vld [vmem:[#allocation11_spill] sm:$0xff] }
 0x1f5   : > { %11542 = vst [vmem:[#allocation6_spill] sm:$0xff] %v10108_v59  ;;  %v3106_v8 = vshrl.u32 %v8942_v42, 16  ;;  %v3109_v63 = vshll.u32 %v8942_v42, 16  ;;  %v8943_v59 = vld [vmem:[%s9289_s12 + $0x30] sm:$0xff] }
 0x1f6   : > { %v10110_v35 = vadd.f32 %v1975_v3, %v1430_v34 }
 0x1f7   : > { %v3111_v55 = vrot.slane %v3109_v63, 2 }
 0x1f8   : > { %11543 = vst [vmem:[#allocation7_spill] sm:$0xff] %v10110_v35  ;;  %v1181_v44 = vpop.f32.mrf.mxu2  ;;  %v11553_v35 = vld [vmem:[#allocation13_spill] sm:$0xff] }
 0x1f9   : > { %v1431_v54 = vadd.f32 %v1181_v44, %v11544_v9  ;;  %v8908_v9 = vld [vmem:[%s9289_s12 + $0x28] sm:$0xff] }
 0x1fa   : > { %v1881_v62 = vpop.f32.mrf.mxu0 }
 0x1fb   : > { %v1280_v56 = vpop.f32.mrf.mxu3  ;;  %v1980_v31 = vpop.f32.mrf.mxu1  ;;  %v10117_v14 = vadd.f32 %v1878_v7, %v1431_v54  ;;  %v9000_v7 = vld [vmem:[%s11493_s1 + $0x2d4] sm:$0xf] }
 0x1fc   : > { %v1432_v23 = vadd.f32 %v1280_v56, %v11545_v2  ;;  %v11548_v56 = vld [vmem:[#allocation10_spill] sm:$0xff]  ;;  %v3108_v2 = vrot.slane %v3106_v8, 1 }
 0x1fd   : > { %11546 = vst [vmem:[#allocation8_spill] sm:$0xff] %v10117_v14  ;;  %2526 = vmatmul.bf16.gmra.mxu2 %v2379_v53  ;;  %3356 = vmatmul.bf16.gmra.mxu0 %v3104_v51 }
 0x1fe   : > { %v10119_v3 = vadd.f32 %v1977_v5, %v1432_v23  ;;  %3455 = vmatmul.bf16.gmra.mxu1 %v3104_v51  ;;  %v8323_v5 = vld [vmem:[%s11493_s1 + $0x2d8] sm:$0xf0]  ;;  %v8321_v23 = vld [vmem:[%s11493_s1 + $0x2d0] sm:$0xf]  ;;  %v9001_v51 = vld [vmem:[%s11493_s1 + $0x2d4] sm:$0xf0] }
 0x1ff   : > { %v8326_v42 = vor.u32 %v9000_v7, %v8323_v5  ;;  %v8322_v63 = vor.u32 %v9001_v51, %v8321_v23 }
 0x200   : > { %11547 = vst [vmem:[#allocation9_spill] sm:$0xff] %v10119_v3  ;;  %2625 = vmatmul.bf16.gmra.mxu3 %v2379_v53  ;;  %v1184_v34 = vpop.f32.mrf.mxu2 }
 0x201   : > { %v1433_v30 = vadd.f32 %v1184_v34, %v11548_v56  ;;  %v2380_v34 = vrot.slane %v8908_v9, 1  ;;  %4136 = vmatpush.bf16.msrb.mxu3 %v8326_v42  ;;  %v3112_v56 = vor.u32 %v3111_v55, %v3108_v2  ;;  %4037 = vmatpush.bf16.msrb.mxu2 %v8322_v63  ;;  %v9035_v9 = vld [vmem:[%s11493_s1 + $0x354] sm:$0xf0]  ;;  %v11557_v42 = vld [vmem:[#allocation15_spill] sm:$0xff] }
 0x202   : > { %v1883_v44 = vpop.f32.mrf.mxu0 }
 0x203   : > { %v1283_v47 = vpop.f32.mrf.mxu3  ;;  %v1982_v54 = vpop.f32.mrf.mxu1  ;;  %v10133_v53 = vadd.f32 %v1881_v62, %v1433_v30  ;;  %v2381_v7 = vsel %vm1676_vm1, %v2378_v11, %v2380_v34  ;;  %v8475_v11 = vld [vmem:[%s11493_s1 + $0x358] sm:$0xf0] }
 0x204   : > { %v1434_v19 = vadd.f32 %v1283_v47, %v11549_v36  ;;  %v11552_v36 = vld [vmem:[#allocation12_spill] sm:$0xff] }
 0x205   : > { %11550 = vst [vmem:[#allocation10_spill] sm:$0xff] %v10133_v53  ;;  %v3113_v53 = vsel %vm3069_vm2, %v3103_v21, %v3112_v56  ;;  %v8473_v21 = vld [vmem:[%s11493_s1 + $0x350] sm:$0xf] }
 0x206   : > { %v10138_v8 = vadd.f32 %v1980_v31, %v1434_v19  ;;  %v8474_v55 = vor.u32 %v9035_v9, %v8473_v21  ;;  %v11560_v9 = vld [vmem:[#allocation16_spill] sm:$0xff] }
 0x208   : > { %11551 = vst [vmem:[#allocation11_spill] sm:$0xff] %v10138_v8  ;;  %v1186_v47 = vpop.f32.mrf.mxu2  ;;  %4733 = vmatpush.bf16.msrb.mxu0 %v8474_v55 }
 0x209   : > { %v1435_v3 = vadd.f32 %v1186_v47, %v11552_v36  ;;  %v8909_v47 = vld [vmem:[%s9289_s12 + $0x30] sm:$0xff] }
 0x20a   : > { %v1886_v30 = vpop.f32.mrf.mxu0 }
 0x20b   : > { %v1285_v14 = vpop.f32.mrf.mxu3  ;;  %v1985_v5 = vpop.f32.mrf.mxu1  ;;  %v10145_v31 = vadd.f32 %v1883_v44, %v1435_v3  ;;  %v3118_v3 = vshll.u32 %v8943_v59, 16 }
 0x20c   : > { %v1436_v62 = vadd.f32 %v1285_v14, %v11553_v35  ;;  %v9034_v35 = vld [vmem:[%s11493_s1 + $0x354] sm:$0xf]  ;;  %v3115_v14 = vshrl.u32 %v8943_v59, 16 }
 0x20d   : > { %11554 = vst [vmem:[#allocation12_spill] sm:$0xff] %v10145_v31  ;;  %2531 = vmatmul.bf16.gmra.mxu2 %v2381_v7  ;;  %3361 = vmatmul.bf16.gmra.mxu0 %v3113_v53  ;;  %v8478_v44 = vor.u32 %v9034_v35, %v8475_v11  ;;  %v3120_v59 = vrot.slane %v3118_v3, 2  ;;  %v2382_v11 = vrot.slane %v8909_v47, 1  ;;  %v8944_v3 = vld [vmem:[%s9289_s12 + $0x38] sm:$0xff] }
 0x20e   : > { %v10147_v19 = vadd.f32 %v1982_v54, %v1436_v62  ;;  %3460 = vmatmul.bf16.gmra.mxu1 %v3113_v53  ;;  %v11556_v54 = vld [vmem:[#allocation14_spill] sm:$0xff]  ;;  %v3117_v62 = vrot.slane %v3115_v14, 1 }
 0x20f   : > { %4832 = vmatpush.bf16.msrb.mxu1 %v8478_v44  ;;  %v11561_v44 = vld [vmem:[#allocation17_spill] sm:$0xff] }
 0x210   : > { %11555 = vst [vmem:[#allocation13_spill] sm:$0xff] %v10147_v19  ;;  %2630 = vmatmul.bf16.gmra.mxu3 %v2381_v7  ;;  %v1189_v2 = vpop.f32.mrf.mxu2  ;;  %v3121_v19 = vor.u32 %v3120_v59, %v3117_v62  ;;  %v11564_v62 = vld [vmem:[#allocation18_spill] sm:$0xff] }
 0x211   : > { %v1437_v23 = vadd.f32 %v1189_v2, %v11556_v54 }
 0x212   : > { %v1888_v63 = vpop.f32.mrf.mxu0  ;;  %v3122_v14 = vsel %vm3069_vm2, %v3112_v56, %v3121_v19 }
 0x213   : > { %v1288_v53 = vpop.f32.mrf.mxu3  ;;  %v1987_v36 = vpop.f32.mrf.mxu1  ;;  %v10164_v7 = vadd.f32 %v1886_v30, %v1437_v23  ;;  %v3124_v23 = vshrl.u32 %v8944_v3, 16 }
 0x214   : > { %v1438_v51 = vadd.f32 %v1288_v53, %v11557_v42  ;;  %v2383_v42 = vsel %vm1676_vm1, %v2380_v34, %v2382_v11  ;;  %v11565_v34 = vld [vmem:[#allocation19_spill] sm:$0xff] }
 0x215   : > { %11558 = vst [vmem:[#allocation14_spill] sm:$0xff] %v10164_v7 }
 0x216   : > { %v10166_v35 = vadd.f32 %v1985_v5, %v1438_v51  ;;  %v3127_v51 = vshll.u32 %v8944_v3, 16  ;;  %v11568_v3 = vld [vmem:[#allocation20_spill] sm:$0xff] }
 0x218   : > { %11559 = vst [vmem:[#allocation15_spill] sm:$0xff] %v10166_v35  ;;  %v1191_v21 = vpop.f32.mrf.mxu2  ;;  %v3126_v35 = vrot.slane %v3124_v23, 1  ;;  %v8998_v23 = vld [vmem:[%s11493_s1 + $0x2c4] sm:$0xf] }
 0x219   : > { %v1439_v2 = vadd.f32 %v1191_v21, %v11560_v9 }
 0x21a   : > { %v1891_v53 = vpop.f32.mrf.mxu0 }
 0x21b   : > { %v1290_v54 = vpop.f32.mrf.mxu3  ;;  %v1990_v55 = vpop.f32.mrf.mxu1  ;;  %v10173_v30 = vadd.f32 %v1888_v63, %v1439_v2  ;;  %v3129_v63 = vrot.slane %v3127_v51, 2  ;;  %v8945_v51 = vld [vmem:[%s9289_s12 + $0x40] sm:$0xff] }
 0x21c   : > { %v1440_v31 = vadd.f32 %v1290_v54, %v11561_v44  ;;  %v8910_v44 = vld [vmem:[%s9289_s12 + $0x38] sm:$0xff] }
 0x21d   : > { %11562 = vst [vmem:[#allocation16_spill] sm:$0xff] %v10173_v30  ;;  %2536 = vmatmul.bf16.gmra.mxu2 %v2383_v42  ;;  %3366 = vmatmul.bf16.gmra.mxu0 %v3122_v14  ;;  %v2384_v2 = vrot.slane %v8910_v44, 1 }
 0x21e   : > { %v10175_v5 = vadd.f32 %v1987_v36, %v1440_v31  ;;  %3465 = vmatmul.bf16.gmra.mxu1 %v3122_v14 }
 0x220   : > { %11563 = vst [vmem:[#allocation17_spill] sm:$0xff] %v10175_v5  ;;  %2635 = vmatmul.bf16.gmra.mxu3 %v2383_v42  ;;  %v1194_v47 = vpop.f32.mrf.mxu2  ;;  %v3130_v42 = vor.u32 %v3129_v63, %v3126_v35  ;;  %v3136_v63 = vshll.u32 %v8945_v51, 16 }
 0x221   : > { %v1441_v59 = vadd.f32 %v1194_v47, %v11564_v62  ;;  %v11569_v47 = vld [vmem:[#allocation21_spill] sm:$0xff] }
 0x222   : > { %v1893_v54 = vpop.f32.mrf.mxu0  ;;  %v3131_v35 = vsel %vm3069_vm2, %v3121_v19, %v3130_v42  ;;  %v3133_v19 = vshrl.u32 %v8945_v51, 16  ;;  %v3138_v51 = vrot.slane %v3136_v63, 2 }
 0x223   : > { %v1293_v21 = vpop.f32.mrf.mxu3  ;;  %v1992_v56 = vpop.f32.mrf.mxu1  ;;  %v10180_v31 = vadd.f32 %v1891_v53, %v1441_v59  ;;  %v8315_v53 = vld [vmem:[%s11493_s1 + $0x2c8] sm:$0xf0] }
 0x224   : > { %v1442_v9 = vadd.f32 %v1293_v21, %v11565_v34  ;;  %v2385_v21 = vsel %vm1676_vm1, %v2382_v11, %v2384_v2  ;;  %v8318_v59 = vor.u32 %v8998_v23, %v8315_v53  ;;  %v8999_v11 = vld [vmem:[%s11493_s1 + $0x2c4] sm:$0xf0]  ;;  %v11573_v53 = vld [vmem:[#allocation23_spill] sm:$0xff] }
 0x225   : > { %11566 = vst [vmem:[#allocation18_spill] sm:$0xff] %v10180_v31 }
 0x226   : > { %v10182_v36 = vadd.f32 %v1990_v55, %v1442_v9  ;;  %4137 = vmatpush.bf16.msrb.mxu3 %v8318_v59 }
 0x228   : > { %11567 = vst [vmem:[#allocation19_spill] sm:$0xff] %v10182_v36  ;;  %v1196_v14 = vpop.f32.mrf.mxu2 }
 0x229   : > { %v1443_v5 = vadd.f32 %v1196_v14, %v11568_v3  ;;  %v11572_v3 = vld [vmem:[#allocation22_spill] sm:$0xff] }
 0x22a   : > { %v1896_v7 = vpop.f32.mrf.mxu0 }
 0x22b   : > { %v1295_v30 = vpop.f32.mrf.mxu3  ;;  %v1995_v55 = vpop.f32.mrf.mxu1  ;;  %v10201_v34 = vadd.f32 %v1893_v54, %v1443_v5  ;;  %v8911_v54 = vld [vmem:[%s9289_s12 + $0x40] sm:$0xff] }
 0x22c   : > { %v1444_v62 = vadd.f32 %v1295_v30, %v11569_v47  ;;  %v8313_v30 = vld [vmem:[%s11493_s1 + $0x2c0] sm:$0xf] }
 0x22d   : > { %11570 = vst [vmem:[#allocation20_spill] sm:$0xff] %v10201_v34  ;;  %v8314_v9 = vor.u32 %v8999_v11, %v8313_v30  ;;  %2541 = vmatmul.bf16.gmra.mxu2 %v2385_v21  ;;  %3371 = vmatmul.bf16.gmra.mxu0 %v3131_v35  ;;  %v8465_v30 = vld [vmem:[%s11493_s1 + $0x340] sm:$0xf]  ;;  %v9033_v11 = vld [vmem:[%s11493_s1 + $0x344] sm:$0xf0] }
 0x22e   : > { %v10203_v44 = vadd.f32 %v1992_v56, %v1444_v62  ;;  %3470 = vmatmul.bf16.gmra.mxu1 %v3131_v35  ;;  %v9032_v56 = vld [vmem:[%s11493_s1 + $0x344] sm:$0xf]  ;;  %v8467_v62 = vld [vmem:[%s11493_s1 + $0x348] sm:$0xf0]  ;;  %v3135_v35 = vrot.slane %v3133_v19, 1 }
 0x22f   : > { %4038 = vmatpush.bf16.msrb.mxu2 %v8314_v9  ;;  %v8470_v59 = vor.u32 %v9032_v56, %v8467_v62 }
 0x230   : > { %11571 = vst [vmem:[#allocation21_spill] sm:$0xff] %v10203_v44  ;;  %2640 = vmatmul.bf16.gmra.mxu3 %v2385_v21  ;;  %v1199_v14 = vpop.f32.mrf.mxu2  ;;  %v3139_v19 = vor.u32 %v3138_v51, %v3135_v35  ;;  %v11576_v44 = vld [vmem:[#allocation25_spill] sm:$0xff] }
 0x231   : > { %v1445_v47 = vadd.f32 %v1199_v14, %v11572_v3  ;;  %v8466_v14 = vor.u32 %v9033_v11, %v8465_v30  ;;  %4833 = vmatpush.bf16.msrb.mxu1 %v8470_v59  ;;  %v11580_v30 = vld [vmem:[#allocation27_spill] sm:$0xff] }
 0x232   : > { %v1898_v5 = vpop.f32.mrf.mxu0 }
 0x233   : > { %v1298_v23 = vpop.f32.mrf.mxu3  ;;  %v1997_v21 = vpop.f32.mrf.mxu1  ;;  %v10220_v9 = vadd.f32 %v1896_v7, %v1445_v47  ;;  %4734 = vmatpush.bf16.msrb.mxu0 %v8466_v14  ;;  %v3140_v7 = vsel %vm3069_vm2, %v3130_v42, %v3139_v19  ;;  %v8946_v47 = vld [vmem:[%s9289_s12 + $0x48] sm:$0xff] }
 0x234   : > { %v1446_v36 = vadd.f32 %v1298_v23, %v11573_v53  ;;  %v2386_v23 = vrot.slane %v8911_v54, 1  ;;  %v11575_v53 = vld [vmem:[#allocation24_spill] sm:$0xff]  ;;  %v3142_v54 = vshrl.u32 %v8946_v47, 16  ;;  %v3145_v35 = vshll.u32 %v8946_v47, 16 }
 0x235   : > { %v8912_v42 = vld [vmem:[%s9289_s12 + $0x48] sm:$0xff] }
 0x236   : > { %v10222_v3 = vadd.f32 %v1995_v55, %v1446_v36  ;;  %v2387_v8 = vsel %vm1676_vm1, %v2384_v2, %v2386_v23 }
 0x238   : > { %11574 = vst [vmem:[#allocation22_spill] sm:$0xff] %v10222_v3  ;;  %v1201_v63 = vpop.f32.mrf.mxu2 }
 0x239   : > { %v1447_v56 = vadd.f32 %v1201_v63, %v11575_v53  ;;  %v3147_v53 = vrot.slane %v3145_v35, 2 }
 0x23a   : > { %v1901_v31 = vpop.f32.mrf.mxu0 }
 0x23b   : > { %v1300_v62 = vpop.f32.mrf.mxu3  ;;  %v2000_v58 = vpop.f32.mrf.mxu1  ;;  %v10229_v36 = vadd.f32 %v1898_v5, %v1447_v56  ;;  %v3144_v5 = vrot.slane %v3142_v54, 1 }
 0x23c   : > { %v1448_v34 = vadd.f32 %v1300_v62, %v11576_v44  ;;  %v11579_v44 = vld [vmem:[#allocation26_spill] sm:$0xff] }
 0x23d   : > { %11577 = vst [vmem:[#allocation23_spill] sm:$0xff] %v10229_v36  ;;  %2546 = vmatmul.bf16.gmra.mxu2 %v2387_v8  ;;  %3376 = vmatmul.bf16.gmra.mxu0 %v3140_v7  ;;  %v3148_v56 = vor.u32 %v3147_v53, %v3144_v5  ;;  %v8947_v36 = vld [vmem:[%s9289_s12 + $0x50] sm:$0xff] }
 0x23e   : > { %v10231_v55 = vadd.f32 %v1997_v21, %v1448_v34  ;;  %3475 = vmatmul.bf16.gmra.mxu1 %v3140_v7  ;;  %v11582_v7 = vld [vmem:[#allocation28_spill] sm:$0xff] }
 0x23f   : > { %v3149_v54 = vsel %vm3069_vm2, %v3139_v19, %v3148_v56  ;;  %v8305_v19 = vld [vmem:[%s11493_s1 + $0x2b0] sm:$0xf] }
 0x240   : > { %11578 = vst [vmem:[#allocation24_spill] sm:$0xff] %v10231_v55  ;;  %2645 = vmatmul.bf16.gmra.mxu3 %v2387_v8  ;;  %v1204_v51 = vpop.f32.mrf.mxu2  ;;  %v2388_v8 = vrot.slane %v8912_v42, 1 }
 0x241   : > { %v1449_v59 = vadd.f32 %v1204_v51, %v11579_v44  ;;  %v11583_v51 = vld [vmem:[#allocation29_spill] sm:$0xff] }
 0x242   : > { %v1903_v14 = vpop.f32.mrf.mxu0 }
 0x243   : > { %v1303_v2 = vpop.f32.mrf.mxu3  ;;  %v2002_v63 = vpop.f32.mrf.mxu1  ;;  %v10236_v34 = vadd.f32 %v1901_v31, %v1449_v59  ;;  %v3154_v59 = vshll.u32 %v8947_v36, 16 }
 0x244   : > { %v1450_v11 = vadd.f32 %v1303_v2, %v11580_v30  ;;  %v2389_v2 = vsel %vm1676_vm1, %v2386_v23, %v2388_v8  ;;  %v8307_v23 = vld [vmem:[%s11493_s1 + $0x2b8] sm:$0xf0] }
 0x246   : > { %v10238_v21 = vadd.f32 %v2000_v58, %v1450_v11  ;;  %v3151_v58 = vshrl.u32 %v8947_v36, 16 }
 0x248   : > { %11581 = vst [vmem:[#allocation25_spill] sm:$0xff] %v10238_v21  ;;  %v1206_v62 = vpop.f32.mrf.mxu2  ;;  %v11590_v21 = vld [vmem:[#allocation33_spill] sm:$0xff] }
 0x249   : > { %v1451_v47 = vadd.f32 %v1206_v62, %v11582_v7  ;;  %v11587_v62 = vld [vmem:[#allocation31_spill] sm:$0xff] }
 0x24a   : > { %v1906_v3 = vpop.f32.mrf.mxu0 }
 0x24b   : > { %v1305_v55 = vpop.f32.mrf.mxu3  ;;  %v2005_v30 = vpop.f32.mrf.mxu1  ;;  %v10245_v35 = vadd.f32 %v1903_v14, %v1451_v47  ;;  %v8997_v14 = vld [vmem:[%s11493_s1 + $0x2b4] sm:$0xf0] }
 0x24c   : > { %v1452_v44 = vadd.f32 %v1305_v55, %v11583_v51  ;;  %v8996_v55 = vld [vmem:[%s11493_s1 + $0x2b4] sm:$0xf]  ;;  %v8306_v42 = vor.u32 %v8997_v14, %v8305_v19  ;;  %v8457_v19 = vld [vmem:[%s11493_s1 + $0x330] sm:$0xf] }
 0x24d   : > { %11584 = vst [vmem:[#allocation26_spill] sm:$0xff] %v10245_v35  ;;  %2551 = vmatmul.bf16.gmra.mxu2 %v2389_v2  ;;  %3381 = vmatmul.bf16.gmra.mxu0 %v3149_v54  ;;  %v8310_v11 = vor.u32 %v8996_v55, %v8307_v23  ;;  %v8913_v51 = vld [vmem:[%s9289_s12 + $0x50] sm:$0xff]  ;;  %v8459_v23 = vld [vmem:[%s11493_s1 + $0x338] sm:$0xf0] }
 0x24e   : > { %v10247_v31 = vadd.f32 %v2002_v63, %v1452_v44  ;;  %3480 = vmatmul.bf16.gmra.mxu1 %v3149_v54  ;;  %v11586_v63 = vld [vmem:[#allocation30_spill] sm:$0xff]  ;;  %v3153_v44 = vrot.slane %v3151_v58, 1  ;;  %4039 = vmatpush.bf16.msrb.mxu2 %v8306_v42  ;;  %v9030_v55 = vld [vmem:[%s11493_s1 + $0x334] sm:$0xf]  ;;  %v2390_v42 = vrot.slane %v8913_v51, 1 }
 0x24f   : > { %4138 = vmatpush.bf16.msrb.mxu3 %v8310_v11  ;;  %v8462_v14 = vor.u32 %v9030_v55, %v8459_v23  ;;  %v9031_v58 = vld [vmem:[%s11493_s1 + $0x334] sm:$0xf0] }
 0x250   : > { %11585 = vst [vmem:[#allocation27_spill] sm:$0xff] %v10247_v31  ;;  %2650 = vmatmul.bf16.gmra.mxu3 %v2389_v2  ;;  %v1209_v36 = vpop.f32.mrf.mxu2  ;;  %v3156_v2 = vrot.slane %v3154_v59, 2  ;;  %v2391_v55 = vsel %vm1676_vm1, %v2388_v8, %v2390_v42 }
 0x251   : > { %v1453_v5 = vadd.f32 %v1209_v36, %v11586_v63  ;;  %v8458_v36 = vor.u32 %v9031_v58, %v8457_v19  ;;  %4834 = vmatpush.bf16.msrb.mxu1 %v8462_v14  ;;  %v8914_v58 = vld [vmem:[%s9289_s12 + $0x58] sm:$0xff] }
 0x252   : > { %v1908_v47 = vpop.f32.mrf.mxu0  ;;  %v3157_v63 = vor.u32 %v3156_v2, %v3153_v44 }
 0x253   : > { %v1308_v53 = vpop.f32.mrf.mxu3  ;;  %v2007_v54 = vpop.f32.mrf.mxu1  ;;  %v10273_v11 = vadd.f32 %v1906_v3, %v1453_v5  ;;  %4735 = vmatpush.bf16.msrb.mxu0 %v8458_v36 }
 0x254   : > { %v1454_v7 = vadd.f32 %v1308_v53, %v11587_v62  ;;  %v11589_v62 = vld [vmem:[#allocation32_spill] sm:$0xff] }
 0x255   : > { %11588 = vst [vmem:[#allocation28_spill] sm:$0xff] %v10273_v11  ;;  %v3158_v11 = vsel %vm3069_vm2, %v3148_v56, %v3157_v63 }
 0x256   : > { %v10278_v59 = vadd.f32 %v2005_v30, %v1454_v7  ;;  %v8948_v30 = vld [vmem:[%s9289_s12 + $0x58] sm:$0xff] }
 0x257   : > { %v3160_v44 = vshrl.u32 %v8948_v30, 16  ;;  %v3163_v2 = vshll.u32 %v8948_v30, 16 }
 0x258   : > { %v1211_v53 = vpop.f32.mrf.mxu2 }
 0x259   : > { %v1455_v31 = vadd.f32 %v1211_v53, %v11589_v62  ;;  %v2392_v53 = vrot.slane %v8914_v58, 1 }
 0x25a   : > { %v3347_v5 = vpop.f32.mrf.mxu0 }
 0x25b   : > { %v1310_v35 = vpop.f32.mrf.mxu3  ;;  %v3446_v23 = vpop.f32.mrf.mxu1  ;;  %v10285_v7 = vadd.f32 %v1908_v47, %v1455_v31  ;;  %v3162_v31 = vrot.slane %v3160_v44, 1  ;;  %v3165_v47 = vrot.slane %v3163_v2, 2  ;;  %v8949_v2 = vld [vmem:[%s9289_s12 + $0x60] sm:$0xff] }
 0x25c   : > { %v1456_v3 = vadd.f32 %v1310_v35, %v11590_v21 }
 0x25d   : > { %2556 = vmatmul.bf16.gmra.mxu2 %v2391_v55  ;;  %3386 = vmatmul.bf16.gmra.mxu0 %v3158_v11 }
 0x25e   : > { %v10287_v51 = vadd.f32 %v2007_v54, %v1456_v3  ;;  %3485 = vmatmul.bf16.gmra.mxu1 %v3158_v11  ;;  %v3166_v11 = vor.u32 %v3165_v47, %v3162_v31  ;;  %v11592_v3 = vld [vmem:[#allocation34_spill] sm:$0xff] }
 0x260   : > { %11591 = vst [vmem:[#allocation29_spill] sm:$0xff] %v10287_v51  ;;  %2655 = vmatmul.bf16.gmra.mxu3 %v2391_v55  ;;  %v2517_v19 = vpop.f32.mrf.mxu2  ;;  %v3167_v44 = vsel %vm3069_vm2, %v3157_v63, %v3166_v11  ;;  %v8994_v63 = vld [vmem:[%s11493_s1 + $0x2a4] sm:$0xf] }
 0x261   : > { %v2778_v21 = vadd.f32 %v2517_v19, %v9805_v61  ;;  %v11593_v61 = vld [vmem:[#allocation35_spill] sm:$0xff] }
 0x262   : > { %v3349_v14 = vpop.f32.mrf.mxu0 }
 0x263   : > { %v2616_v35 = vpop.f32.mrf.mxu3  ;;  %v3448_v56 = vpop.f32.mrf.mxu1  ;;  %v10292_v54 = vadd.f32 %v3347_v5, %v2778_v21  ;;  %v3169_v21 = vshrl.u32 %v8949_v2, 16 }
 0x264   : > { %v2779_v8 = vadd.f32 %v2616_v35, %v9807_v38  ;;  %v2393_v38 = vsel %vm1676_vm1, %v2390_v42, %v2392_v53 }
 0x266   : > { %v10294_v36 = vadd.f32 %v3446_v23, %v2779_v8  ;;  %v3172_v8 = vshll.u32 %v8949_v2, 16 }
 0x268   : > { %v2519_v62 = vpop.f32.mrf.mxu2 }
 0x269   : > { %v2780_v55 = vadd.f32 %v2519_v62, %v11592_v3  ;;  %v8915_v3 = vld [vmem:[%s9289_s12 + $0x60] sm:$0xff] }
 0x26a   : > { %v3352_v51 = vpop.f32.mrf.mxu0  ;;  %v2394_v2 = vrot.slane %v8915_v3, 1  ;;  %v8950_v3 = vld [vmem:[%s9289_s12 + $0x68] sm:$0xff] }
 0x26b   : > { %v2618_v30 = vpop.f32.mrf.mxu3  ;;  %v3451_v35 = vpop.f32.mrf.mxu1  ;;  %v10301_v5 = vadd.f32 %v3349_v14, %v2780_v55  ;;  %v8299_v14 = vld [vmem:[%s11493_s1 + $0x2a8] sm:$0xf0]  ;;  %v3171_v55 = vrot.slane %v3169_v21, 1 }
 0x26c   : > { %v2781_v19 = vadd.f32 %v2618_v30, %v11593_v61  ;;  %v3174_v30 = vrot.slane %v3172_v8, 2  ;;  %v8302_v61 = vor.u32 %v8994_v63, %v8299_v14 }
 0x26d   : > { %2561 = vmatmul.bf16.gmra.mxu2 %v2393_v38  ;;  %3391 = vmatmul.bf16.gmra.mxu0 %v3167_v44 }
 0x26e   : > { %v10303_v23 = vadd.f32 %v3448_v56, %v2781_v19  ;;  %3490 = vmatmul.bf16.gmra.mxu1 %v3167_v44  ;;  %4139 = vmatpush.bf16.msrb.mxu3 %v8302_v61  ;;  %v3175_v21 = vor.u32 %v3174_v30, %v3171_v55 }
 0x270   : > { %11594 = vst [vmem:[#allocation30_spill] sm:$0xff] %v10303_v23  ;;  %2660 = vmatmul.bf16.gmra.mxu3 %v2393_v38  ;;  %v2522_v58 = vpop.f32.mrf.mxu2  ;;  %v2395_v23 = vsel %vm1676_vm1, %v2392_v53, %v2394_v2 }
 0x271   : > { %v2782_v31 = vadd.f32 %v2522_v58, %v9833_v16  ;;  %v8297_v16 = vld [vmem:[%s11493_s1 + $0x2a0] sm:$0xf] }
 0x272   : > { %v3354_v62 = vpop.f32.mrf.mxu0 }
 0x273   : > { %v2621_v47 = vpop.f32.mrf.mxu3  ;;  %v3453_v56 = vpop.f32.mrf.mxu1  ;;  %v10320_v19 = vadd.f32 %v3352_v51, %v2782_v31  ;;  %v9028_v51 = vld [vmem:[%s11493_s1 + $0x324] sm:$0xf] }
 0x274   : > { %v2783_v42 = vadd.f32 %v2621_v47, %v9835_v60  ;;  %v8995_v60 = vld [vmem:[%s11493_s1 + $0x2a4] sm:$0xf0] }
 0x275   : > { %v8298_v38 = vor.u32 %v8995_v60, %v8297_v16  ;;  %v3181_v16 = vshll.u32 %v8950_v3, 16 }
 0x276   : > { %v10322_v44 = vadd.f32 %v3451_v35, %v2783_v42  ;;  %v8451_v35 = vld [vmem:[%s11493_s1 + $0x328] sm:$0xf0]  ;;  %v3176_v42 = vsel %vm3069_vm2, %v3166_v11, %v3175_v21  ;;  %v3178_v11 = vshrl.u32 %v8950_v3, 16 }
 0x277   : > { %4040 = vmatpush.bf16.msrb.mxu2 %v8298_v38  ;;  %v8454_v55 = vor.u32 %v9028_v51, %v8451_v35 }
 0x278   : > { %v2524_v8 = vpop.f32.mrf.mxu2 }
 0x279   : > { %v2784_v58 = vadd.f32 %v2524_v8, %v9853_v37  ;;  %v8449_v37 = vld [vmem:[%s11493_s1 + $0x320] sm:$0xf]  ;;  %4835 = vmatpush.bf16.msrb.mxu1 %v8454_v55 }
 0x27a   : > { %v3357_v14 = vpop.f32.mrf.mxu0 }
 0x27b   : > { %v2623_v47 = vpop.f32.mrf.mxu3  ;;  %v3456_v31 = vpop.f32.mrf.mxu1  ;;  %v10341_v53 = vadd.f32 %v3354_v62, %v2784_v58  ;;  %v8916_v58 = vld [vmem:[%s9289_s12 + $0x68] sm:$0xff] }
 0x27c   : > { %v2785_v63 = vadd.f32 %v2623_v47, %v9855_v10  ;;  %v9029_v10 = vld [vmem:[%s11493_s1 + $0x324] sm:$0xf0] }
 0x27d   : > { %v8450_v30 = vor.u32 %v9029_v10, %v8449_v37  ;;  %2566 = vmatmul.bf16.gmra.mxu2 %v2395_v23  ;;  %3396 = vmatmul.bf16.gmra.mxu0 %v3176_v42 }
 0x27e   : > { %v10343_v61 = vadd.f32 %v3453_v56, %v2785_v63  ;;  %3495 = vmatmul.bf16.gmra.mxu1 %v3176_v42  ;;  %v3180_v56 = vrot.slane %v3178_v11, 1  ;;  %v3183_v63 = vrot.slane %v3181_v16, 2  ;;  %v2396_v42 = vrot.slane %v8916_v58, 1 }
 0x27f   : > { %4736 = vmatpush.bf16.msrb.mxu0 %v8450_v30 }
 0x280   : > { %2665 = vmatmul.bf16.gmra.mxu3 %v2395_v23  ;;  %v2527_v60 = vpop.f32.mrf.mxu2  ;;  %v3184_v3 = vor.u32 %v3183_v63, %v3180_v56  ;;  %v8917_v56 = vld [vmem:[%s9289_s12 + $0x70] sm:$0xff] }
 0x281   : > { %v2786_v38 = vadd.f32 %v2527_v60, %v9861_v25  ;;  %v8951_v60 = vld [vmem:[%s9289_s12 + $0x70] sm:$0xff] }
 0x282   : > { %v3359_v62 = vpop.f32.mrf.mxu0  ;;  %v3185_v11 = vsel %vm3069_vm2, %v3175_v21, %v3184_v3  ;;  %v3190_v16 = vshll.u32 %v8951_v60, 16 }
 0x283   : > { %v2626_v8 = vpop.f32.mrf.mxu3  ;;  %v3458_v51 = vpop.f32.mrf.mxu1  ;;  %v10348_v35 = vadd.f32 %v3357_v14, %v2786_v38 }
 0x284   : > { %v2787_v47 = vadd.f32 %v2626_v8, %v9863_v52  ;;  %v2397_v52 = vsel %vm1676_vm1, %v2394_v2, %v2396_v42  ;;  %v3192_v21 = vrot.slane %v3190_v16, 2 }
 0x286   : > { %v10350_v23 = vadd.f32 %v3456_v31, %v2787_v47 }
 0x288   : > { %v2529_v55 = vpop.f32.mrf.mxu2 }
 0x289   : > { %v2788_v37 = vadd.f32 %v2529_v55, %v9869_v15  ;;  %v3187_v15 = vshrl.u32 %v8951_v60, 16  ;;  %v8291_v55 = vld [vmem:[%s11493_s1 + $0x298] sm:$0xf0]  ;;  %v2398_v60 = vrot.slane %v8917_v56, 1 }
 0x28a   : > { %v3362_v30 = vpop.f32.mrf.mxu0 }
 0x28b   : > { %v2628_v10 = vpop.f32.mrf.mxu3  ;;  %v3461_v8 = vpop.f32.mrf.mxu1  ;;  %v10357_v14 = vadd.f32 %v3359_v62, %v2788_v37  ;;  %v3189_v63 = vrot.slane %v3187_v15, 1 }
 0x28c   : > { %v2789_v25 = vadd.f32 %v2628_v10, %v9871_v46  ;;  %v8993_v10 = vld [vmem:[%s11493_s1 + $0x294] sm:$0xf0] }
 0x28d   : > { %2571 = vmatmul.bf16.gmra.mxu2 %v2397_v52  ;;  %3401 = vmatmul.bf16.gmra.mxu0 %v3185_v11 }
 0x28e   : > { %v10359_v31 = vadd.f32 %v3458_v51, %v2789_v25  ;;  %3500 = vmatmul.bf16.gmra.mxu1 %v3185_v11  ;;  %v8992_v51 = vld [vmem:[%s11493_s1 + $0x294] sm:$0xf]  ;;  %v3193_v11 = vor.u32 %v3192_v21, %v3189_v63  ;;  %v9027_v63 = vld [vmem:[%s11493_s1 + $0x314] sm:$0xf0] }
 0x290   : > { %2670 = vmatmul.bf16.gmra.mxu3 %v2397_v52  ;;  %v2532_v38 = vpop.f32.mrf.mxu2 }
 0x291   : > { %v2790_v46 = vadd.f32 %v2532_v38, %v9886_v28  ;;  %v8289_v28 = vld [vmem:[%s11493_s1 + $0x290] sm:$0xf] }
 0x292   : > { %v3364_v58 = vpop.f32.mrf.mxu0  ;;  %v8290_v52 = vor.u32 %v8993_v10, %v8289_v28 }
 0x293   : > { %v2631_v47 = vpop.f32.mrf.mxu3  ;;  %v3463_v62 = vpop.f32.mrf.mxu1  ;;  %v10373_v37 = vadd.f32 %v3362_v30, %v2790_v46 }
 0x294   : > { %v2791_v2 = vadd.f32 %v2631_v47, %v9891_v50  ;;  %v8294_v50 = vor.u32 %v8992_v51, %v8291_v55  ;;  %4041 = vmatpush.bf16.msrb.mxu2 %v8290_v52  ;;  %v2399_v47 = vsel %vm1676_vm1, %v2396_v42, %v2398_v60  ;;  %v3194_v55 = vsel %vm3069_vm2, %v3184_v3, %v3193_v11  ;;  %v8441_v42 = vld [vmem:[%s11493_s1 + $0x310] sm:$0xf] }
 0x295   : > { %11595 = vst [vmem:[#allocation31_spill] sm:$0xff] %v10373_v37  ;;  %v8952_v37 = vld [vmem:[%s9289_s12 + $0x78] sm:$0xff] }
 0x296   : > { %v10378_v25 = vadd.f32 %v3461_v8, %v2791_v2  ;;  %4140 = vmatpush.bf16.msrb.mxu3 %v8294_v50  ;;  %v3196_v3 = vshrl.u32 %v8952_v37, 16 }
 0x298   : > { %v2534_v15 = vpop.f32.mrf.mxu2 }
 0x299   : > { %v2792_v16 = vadd.f32 %v2534_v15, %v9897_v4  ;;  %v9026_v4 = vld [vmem:[%s11493_s1 + $0x314] sm:$0xf]  ;;  %v8918_v15 = vld [vmem:[%s9289_s12 + $0x78] sm:$0xff] }
 0x29a   : > { %v3367_v46 = vpop.f32.mrf.mxu0 }
 0x29b   : > { %v2633_v38 = vpop.f32.mrf.mxu3  ;;  %v3466_v51 = vpop.f32.mrf.mxu1  ;;  %v10385_v8 = vadd.f32 %v3364_v58, %v2792_v16  ;;  %v3199_v58 = vshll.u32 %v8952_v37, 16 }
 0x29c   : > { %v2793_v30 = vadd.f32 %v2633_v38, %v9899_v48  ;;  %v8443_v48 = vld [vmem:[%s11493_s1 + $0x318] sm:$0xf0]  ;;  %v3198_v38 = vrot.slane %v3196_v3, 1 }
 0x29d   : > { %2576 = vmatmul.bf16.gmra.mxu2 %v2399_v47  ;;  %3406 = vmatmul.bf16.gmra.mxu0 %v3194_v55  ;;  %v8446_v56 = vor.u32 %v9026_v4, %v8443_v48  ;;  %v3201_v37 = vrot.slane %v3199_v58, 2  ;;  %v8953_v58 = vld [vmem:[%s9289_s12 + $0x80] sm:$0xff] }
 0x29e   : > { %v10387_v2 = vadd.f32 %v3463_v62, %v2793_v30  ;;  %3505 = vmatmul.bf16.gmra.mxu1 %v3194_v55  ;;  %v8442_v62 = vor.u32 %v9027_v63, %v8441_v42  ;;  %v2400_v55 = vrot.slane %v8918_v15, 1  ;;  %v8919_v15 = vld [vmem:[%s9289_s12 + $0x80] sm:$0xff] }
 0x29f   : > { %4836 = vmatpush.bf16.msrb.mxu1 %v8446_v56  ;;  %v3202_v4 = vor.u32 %v3201_v37, %v3198_v38 }
 0x2a0   : > { %2675 = vmatmul.bf16.gmra.mxu3 %v2399_v47  ;;  %v2537_v21 = vpop.f32.mrf.mxu2  ;;  %4737 = vmatpush.bf16.msrb.mxu0 %v8442_v62  ;;  %v2401_v63 = vsel %vm1676_vm1, %v2398_v60, %v2400_v55  ;;  %v3208_v62 = vshll.u32 %v8953_v58, 16 }
 0x2a1   : > { %v2794_v28 = vadd.f32 %v2537_v21, %v9917_v40  ;;  %v3203_v3 = vsel %vm3069_vm2, %v3193_v11, %v3202_v4 }
 0x2a2   : > { %v3369_v52 = vpop.f32.mrf.mxu0 }
 0x2a3   : > { %v2636_v50 = vpop.f32.mrf.mxu3  ;;  %v3468_v16 = vpop.f32.mrf.mxu1  ;;  %v10404_v30 = vadd.f32 %v3367_v46, %v2794_v28 }
 0x2a4   : > { %v2795_v10 = vadd.f32 %v2636_v50, %v9919_v32 }
 0x2a6   : > { %v10406_v47 = vadd.f32 %v3466_v51, %v2795_v10 }
 0x2a8   : > { %v2539_v48 = vpop.f32.mrf.mxu2 }
 0x2a9   : > { %v2796_v40 = vadd.f32 %v2539_v48, %v9925_v20  ;;  %v3205_v20 = vshrl.u32 %v8953_v58, 16  ;;  %v2402_v48 = vrot.slane %v8919_v15, 1  ;;  %v8990_v58 = vld [vmem:[%s11493_s1 + $0x284] sm:$0xf] }
 0x2aa   : > { %v3372_v32 = vpop.f32.mrf.mxu0 }
 0x2ab   : > { %v2638_v42 = vpop.f32.mrf.mxu3  ;;  %v3471_v21 = vpop.f32.mrf.mxu1  ;;  %v10413_v46 = vadd.f32 %v3369_v52, %v2796_v40  ;;  %v3207_v38 = vrot.slane %v3205_v20, 1  ;;  %v3210_v52 = vrot.slane %v3208_v62, 2  ;;  %v8954_v62 = vld [vmem:[%s9289_s12 + $0x88] sm:$0xff] }
 0x2ac   : > { %v2797_v56 = vadd.f32 %v2638_v42, %v9927_v45 }
 0x2ad   : > { %2581 = vmatmul.bf16.gmra.mxu2 %v2401_v63  ;;  %3411 = vmatmul.bf16.gmra.mxu0 %v3203_v3  ;;  %v3211_v40 = vor.u32 %v3210_v52, %v3207_v38 }
 0x2ae   : > { %v10415_v51 = vadd.f32 %v3468_v16, %v2797_v56  ;;  %3510 = vmatmul.bf16.gmra.mxu1 %v3203_v3 }
 0x2af   : > { %v3212_v20 = vsel %vm3069_vm2, %v3202_v4, %v3211_v40  ;;  %v3214_v4 = vshrl.u32 %v8954_v62, 16 }
 0x2b0   : > { %2680 = vmatmul.bf16.gmra.mxu3 %v2401_v63  ;;  %v2542_v28 = vpop.f32.mrf.mxu2 }
 0x2b1   : > { %v2798_v45 = vadd.f32 %v2542_v28, %v9933_v39 }
 0x2b2   : > { %v3374_v10 = vpop.f32.mrf.mxu0 }
 0x2b3   : > { %v2641_v50 = vpop.f32.mrf.mxu3  ;;  %v3473_v11 = vpop.f32.mrf.mxu1  ;;  %v10420_v16 = vadd.f32 %v3372_v32, %v2798_v45  ;;  %v8283_v32 = vld [vmem:[%s11493_s1 + $0x288] sm:$0xf0] }
 0x2b4   : > { %v2799_v60 = vadd.f32 %v2641_v50, %v9935_v41  ;;  %v2403_v41 = vsel %vm1676_vm1, %v2400_v55, %v2402_v48  ;;  %v8286_v28 = vor.u32 %v8990_v58, %v8283_v32 }
 0x2b6   : > { %v10422_v37 = vadd.f32 %v3471_v21, %v2799_v60  ;;  %v3217_v60 = vshll.u32 %v8954_v62, 16  ;;  %4141 = vmatpush.bf16.msrb.mxu3 %v8286_v28 }
 0x2b8   : > { %v2544_v42 = vpop.f32.mrf.mxu2  ;;  %v3219_v58 = vrot.slane %v3217_v60, 2 }
 0x2b9   : > { %v2800_v56 = vadd.f32 %v2544_v42, %v9953_v33  ;;  %v8281_v33 = vld [vmem:[%s11493_s1 + $0x280] sm:$0xf] }
 0x2ba   : > { %v3377_v3 = vpop.f32.mrf.mxu0 }
 0x2bb   : > { %v2643_v63 = vpop.f32.mrf.mxu3  ;;  %v3476_v21 = vpop.f32.mrf.mxu1  ;;  %v10441_v55 = vadd.f32 %v3374_v10, %v2800_v56  ;;  %v8920_v56 = vld [vmem:[%s9289_s12 + $0x88] sm:$0xff] }
 0x2bc   : > { %v2801_v39 = vadd.f32 %v2643_v63, %v9955_v49  ;;  %v8991_v49 = vld [vmem:[%s11493_s1 + $0x284] sm:$0xf0]  ;;  %v8435_v63 = vld [vmem:[%s11493_s1 + $0x308] sm:$0xf0] }
 0x2bd   : > { %v8282_v45 = vor.u32 %v8991_v49, %v8281_v33  ;;  %2586 = vmatmul.bf16.gmra.mxu2 %v2403_v41  ;;  %3416 = vmatmul.bf16.gmra.mxu0 %v3212_v20  ;;  %v2404_v33 = vrot.slane %v8920_v56, 1 }
 0x2be   : > { %v10443_v50 = vadd.f32 %v3473_v11, %v2801_v39  ;;  %3515 = vmatmul.bf16.gmra.mxu1 %v3212_v20  ;;  %v9024_v11 = vld [vmem:[%s11493_s1 + $0x304] sm:$0xf] }
 0x2bf   : > { %4042 = vmatpush.bf16.msrb.mxu2 %v8282_v45  ;;  %v8438_v32 = vor.u32 %v9024_v11, %v8435_v63  ;;  %v2405_v11 = vsel %vm1676_vm1, %v2402_v48, %v2404_v33 }
 0x2c0   : > { %2685 = vmatmul.bf16.gmra.mxu3 %v2403_v41  ;;  %v2547_v15 = vpop.f32.mrf.mxu2  ;;  %v3216_v41 = vrot.slane %v3214_v4, 1 }
 0x2c1   : > { %v2802_v38 = vadd.f32 %v2547_v15, %v9973_v29  ;;  %v8433_v29 = vld [vmem:[%s11493_s1 + $0x300] sm:$0xf]  ;;  %4837 = vmatpush.bf16.msrb.mxu1 %v8438_v32 }
 0x2c2   : > { %v3379_v10 = vpop.f32.mrf.mxu0  ;;  %v3220_v49 = vor.u32 %v3219_v58, %v3216_v41 }
 0x2c3   : > { %v2646_v52 = vpop.f32.mrf.mxu3  ;;  %v3478_v39 = vpop.f32.mrf.mxu1  ;;  %v10460_v20 = vadd.f32 %v3377_v3, %v2802_v38 }
 0x2c4   : > { %v2803_v42 = vadd.f32 %v2646_v52, %v9975_v17  ;;  %v9025_v17 = vld [vmem:[%s11493_s1 + $0x304] sm:$0xf0]  ;;  %v3221_v3 = vsel %vm3069_vm2, %v3211_v40, %v3220_v49  ;;  %v10476_v40 = vld [vmem:[%s9289_s12 + $0x90] sm:$0xff] }
 0x2c5   : > { %v8434_v62 = vor.u32 %v9025_v17, %v8433_v29  ;;  %v2958_v29 = vld [vmem:[%s9289_s12 + $0x98] sm:$0x3] }
 0x2c6   : > { %v10462_v28 = vadd.f32 %v3476_v21, %v2803_v42  ;;  %v8955_v21 = vld [vmem:[%s9289_s12 + $0x90] sm:$0xff] }
 0x2c7   : > { %4738 = vmatpush.bf16.msrb.mxu0 %v8434_v62  ;;  %v3226_v56 = vshll.u32 %v8955_v21, 16 }
 0x2c8   : > { %v2549_v45 = vpop.f32.mrf.mxu2 }
 0x2c9   : > { %v2804_v4 = vadd.f32 %v2549_v45, %v9981_v6  ;;  %v3223_v6 = vshrl.u32 %v8955_v21, 16 }
 0x2ca   : > { %v3382_v52 = vpop.f32.mrf.mxu0 }
 0x2cb   : > { %v2648_v60 = vpop.f32.mrf.mxu3  ;;  %v3481_v63 = vpop.f32.mrf.mxu1  ;;  %v10469_v38 = vadd.f32 %v3379_v10, %v2804_v4  ;;  %v3225_v17 = vrot.slane %v3223_v6, 1  ;;  %v3049_v4 = vunpack.c.l.b16 %v2958_v29  ;;  %v9073_v29 = vld [vmem:[%s11493_s1 + $0x3f4] sm:$0xf0] }
 0x2cc   : > { %v2805_v15 = vadd.f32 %v2648_v60, %v9983_v43  ;;  %v2406_v60 = vrot.slane %v10476_v40, 1 }
 0x2cd   : > { %2591 = vmatmul.bf16.gmra.mxu2 %v2405_v11  ;;  %3421 = vmatmul.bf16.gmra.mxu0 %v3221_v3 }
 0x2ce   : > { %v10471_v42 = vadd.f32 %v3478_v39, %v2805_v15  ;;  %3520 = vmatmul.bf16.gmra.mxu1 %v3221_v3  ;;  %v3228_v39 = vrot.slane %v3226_v56, 2  ;;  %v3068_v3 = vpack.c.b16 %v3049_v4, %v3049_v4  ;;  %v2407_v6 = vsel %vm1676_vm1, %v2404_v33, %v2406_v60  ;;  %v2262_v56 = vld [vmem:[%s9289_s12 + $0x98] sm:$0x1]  ;;  %v8643_v33 = vld [vmem:[%s11493_s1 + $0x3f8] sm:$0xf0] }
 0x2d0   : > { %2690 = vmatmul.bf16.gmra.mxu3 %v2405_v11  ;;  %v2552_v43 = vpop.f32.mrf.mxu2  ;;  %v3229_v15 = vor.u32 %v3228_v39, %v3225_v17  ;;  %v3235_v40 = vshll.u32 %v3068_v3, 16 }
 0x2d1   : > { %v2806_v41 = vadd.f32 %v2552_v43, %v9991_v27 }
 0x2d2   : > { %v3384_v32 = vpop.f32.mrf.mxu0 }
 0x2d3   : > { %v2651_v48 = vpop.f32.mrf.mxu3  ;;  %v3483_v10 = vpop.f32.mrf.mxu1  ;;  %v10479_v62 = vadd.f32 %v3382_v52, %v2806_v41  ;;  %v3230_v52 = vsel %vm3069_vm2, %v3220_v49, %v3229_v15  ;;  %v8641_v49 = vld [vmem:[%s11493_s1 + $0x3f0] sm:$0xf] }
 0x2d4   : > { %v2807_v58 = vadd.f32 %v2651_v48, %v9993_v0  ;;  %v8642_v17 = vor.u32 %v9073_v29, %v8641_v49 }
 0x2d6   : > { %v10481_v45 = vadd.f32 %v3481_v63, %v2807_v58  ;;  %v3232_v58 = vshrl.u32 %v3068_v3, 16  ;;  %5561 = vmatpush.bf16.msra.mxu2 %v8642_v17 }
 0x2d8   : > { %v2554_v27 = vpop.f32.mrf.mxu2  ;;  %v3234_v3 = vrot.slane %v3232_v58, 1  ;;  %v9107_v58 = vld [vmem:[%s11493_s1 + $0x474] sm:$0xf0] }
 0x2d9   : > { %v2808_v11 = vadd.f32 %v2554_v27, %v10001_v22  ;;  %v2353_v22 = vunpack.c.l.b16 %v2262_v56  ;;  %v8795_v56 = vld [vmem:[%s11493_s1 + $0x478] sm:$0xf0] }
 0x2da   : > { %v3387_v43 = vpop.f32.mrf.mxu0 }
 0x2db   : > { %v2653_v0 = vpop.f32.mrf.mxu3  ;;  %v3486_v48 = vpop.f32.mrf.mxu1  ;;  %v10489_v63 = vadd.f32 %v3384_v32, %v2808_v11 }
 0x2dc   : > { %v2809_v21 = vadd.f32 %v2653_v0, %v10004_v12  ;;  %v9072_v12 = vld [vmem:[%s11493_s1 + $0x3f4] sm:$0xf]  ;;  %v2372_v0 = vpack.c.b16 %v2353_v22, %v2353_v22 }
 0x2dd   : > { %2596 = vmatmul.bf16.gmra.mxu2 %v2407_v6  ;;  %3426 = vmatmul.bf16.gmra.mxu0 %v3230_v52  ;;  %v8646_v32 = vor.u32 %v9072_v12, %v8643_v33 }
 0x2de   : > { %v10491_v41 = vadd.f32 %v3483_v10, %v2809_v21  ;;  %3525 = vmatmul.bf16.gmra.mxu1 %v3230_v52  ;;  %v3237_v21 = vrot.slane %v3235_v40, 2  ;;  %v9106_v52 = vld [vmem:[%s11493_s1 + $0x474] sm:$0xf]  ;;  %v2408_v33 = vrot.slane %v2372_v0, 1 }
 0x2df   : > { %5660 = vmatpush.bf16.msra.mxu3 %v8646_v32 }
 0x2e0   : > { %2695 = vmatmul.bf16.gmra.mxu3 %v2407_v6  ;;  %v2557_v10 = vpop.f32.mrf.mxu2  ;;  %v3238_v49 = vor.u32 %v3237_v21, %v3234_v3  ;;  %v8972_v3 = vld [vmem:[%s9289_s12 + $0x8] sm:$0xf0] }
 0x2e1   : > { %v2810_v39 = vadd.f32 %v2557_v10, %v10029_v24  ;;  %v8793_v24 = vld [vmem:[%s11493_s1 + $0x470] sm:$0xf] }
 0x2e2   : > { %v3389_v11 = vpop.f32.mrf.mxu0  ;;  %v8794_v22 = vor.u32 %v9107_v58, %v8793_v24  ;;  %v9007_v58 = vld [vmem:[%s9289_s12 + $0x18] sm:$0xff] }
 0x2e3   : > { %v2656_v4 = vpop.f32.mrf.mxu3  ;;  %v3488_v6 = vpop.f32.mrf.mxu1  ;;  %v10516_v12 = vadd.f32 %v3387_v43, %v2810_v39  ;;  %v2409_v39 = vsel %vm1676_vm1, %v2406_v60, %v2408_v33 }
 0x2e4   : > { %v2811_v27 = vadd.f32 %v2656_v4, %v10034_v1  ;;  %v8798_v1 = vor.u32 %v9106_v52, %v8795_v56  ;;  %6258 = vmatpush.bf16.msra.mxu0 %v8794_v22  ;;  %v3239_v4 = vsel %vm3069_vm2, %v3229_v15, %v3238_v49  ;;  %v9006_v52 = vld [vmem:[%s9289_s12 + $0x10] sm:$0xf0] }
 0x2e6   : > { %v10521_v40 = vadd.f32 %v3486_v48, %v2811_v27  ;;  %6357 = vmatpush.bf16.msra.mxu1 %v8798_v1 }
 0x2e8   : > { %v2559_v32 = vpop.f32.mrf.mxu2 }
 0x2e9   : > { %v2812_v29 = vadd.f32 %v2559_v32, %v10043_v26  ;;  %v8209_v26 = vld [vmem:[%s9289_s12 + $0x8] sm:$0xc] }
 0x2ea   : > { %v3392_v17 = vpop.f32.mrf.mxu0  ;;  %v8210_v1 = vor.u32 %v8972_v3, %v8209_v26 }
 0x2eb   : > { %v2658_v43 = vpop.f32.mrf.mxu3  ;;  %v3491_v48 = vpop.f32.mrf.mxu1  ;;  %v10527_v27 = vadd.f32 %v3389_v11, %v2812_v29  ;;  %v8973_v11 = vld [vmem:[%s9289_s12 + $0x10] sm:$0xff] }
 0x2ec   : > { %v2813_v10 = vadd.f32 %v2658_v43, %v10045_v57  ;;  %v8361_v57 = vld [vmem:[%s9289_s12 + $0x10] sm:$0xc]  ;;  %v3900_v32 = vrot.slane %v8210_v1, 2  ;;  %v3901_v29 = vrot.slane %v8973_v11, 2 }
 0x2ed   : > { %2601 = vmatmul.bf16.gmra.mxu2 %v2409_v39  ;;  %3431 = vmatmul.bf16.gmra.mxu0 %v3239_v4  ;;  %v8362_v22 = vor.u32 %v9006_v52, %v8361_v57 }
 0x2ee   : > { %v10529_v0 = vadd.f32 %v3488_v6, %v2813_v10  ;;  %3530 = vmatmul.bf16.gmra.mxu1 %v3239_v4  ;;  %v4597_v10 = vrot.slane %v9007_v58, 2  ;;  %v3902_v3 = vsel %vm3899_vm3, %v3900_v32, %v3901_v29  ;;  %v11603_v58 = vld [vmem:[#allocation38_spill] sm:$0xff] }
 0x2ef   : > { %v4596_v43 = vrot.slane %v8362_v22, 2  ;;  %v8974_v32 = vld [vmem:[%s9289_s12 + $0x18] sm:$0xff] }
 0x2f0   : > { %2700 = vmatmul.bf16.gmra.mxu3 %v2409_v39  ;;  %v2562_v21 = vpop.f32.mrf.mxu2 }
 0x2f1   : > { %v2814_v60 = vadd.f32 %v2562_v21, %v10052_v18  ;;  %v11598_v18 = vld [vmem:[#allocation36_spill] sm:$0xff] }
 0x2f2   : > { %v3394_v24 = vpop.f32.mrf.mxu0 }
 0x2f3   : > { %v2661_v56 = vpop.f32.mrf.mxu3  ;;  %v3493_v6 = vpop.f32.mrf.mxu1  ;;  %v10539_v33 = vadd.f32 %v3392_v17, %v2814_v60  ;;  %v4598_v17 = vsel %vm3899_vm3, %v4596_v43, %v4597_v10  ;;  %v9070_v43 = vld [vmem:[%s11493_s1 + $0x3e4] sm:$0xf] }
 0x2f4   : > { %v2815_v15 = vadd.f32 %v2661_v56, %v10054_v13  ;;  %v11599_v13 = vld [vmem:[#allocation37_spill] sm:$0xff] }
 0x2f5   : > { %11596 = vst [vmem:[#allocation32_spill] sm:$0xff] %v10539_v33 }
 0x2f6   : > { %v10541_v49 = vadd.f32 %v3491_v48, %v2815_v15  ;;  %v11602_v15 = vld [vmem:[#allocation3_spill] sm:$0xff] }
 0x2f8   : > { %11597 = vst [vmem:[#allocation33_spill] sm:$0xff] %v10541_v49  ;;  %v2564_v39 = vpop.f32.mrf.mxu2 }
 0x2f9   : > { %v2816_v4 = vadd.f32 %v2564_v39, %v11598_v18  ;;  %v9008_v18 = vld [vmem:[%s9289_s12 + $0x20] sm:$0xff] }
 0x2fa   : > { %v3397_v26 = vpop.f32.mrf.mxu0 }
 0x2fb   : > { %v2663_v21 = vpop.f32.mrf.mxu3  ;;  %v3496_v57 = vpop.f32.mrf.mxu1  ;;  %v10547_v48 = vadd.f32 %v3394_v24, %v2816_v4  ;;  %v8635_v24 = vld [vmem:[%s11493_s1 + $0x3e8] sm:$0xf0] }
 0x2fc   : > { %v2817_v56 = vadd.f32 %v2663_v21, %v11599_v13  ;;  %v8638_v4 = vor.u32 %v9070_v43, %v8635_v24  ;;  %v8633_v21 = vld [vmem:[%s11493_s1 + $0x3e0] sm:$0xf]  ;;  %v9071_v13 = vld [vmem:[%s11493_s1 + $0x3e4] sm:$0xf0] }
 0x2fd   : > { %11600 = vst [vmem:[#allocation34_spill] sm:$0xff] %v10547_v48  ;;  %4043 = vmatmul.bf16.vlgmr.msrb.gmra.mxu2 %v3902_v3  ;;  %4739 = vmatmul.bf16.vlgmr.msrb.gmra.mxu0 %v4598_v17 }
 0x2fe   : > { %v10549_v52 = vadd.f32 %v3493_v6, %v2817_v56  ;;  %4838 = vmatmul.bf16.vlgmr.msrb.gmra.mxu1 %v4598_v17  ;;  %5661 = vmatpush.bf16.msra.mxu3 %v8638_v4 }
 0x300   : > { %11601 = vst [vmem:[#allocation35_spill] sm:$0xff] %v10549_v52  ;;  %4142 = vmatmul.bf16.vlgmr.msrb.gmra.mxu3 %v3902_v3  ;;  %v2567_v60 = vpop.f32.mrf.mxu2  ;;  %v8634_v3 = vor.u32 %v9071_v13, %v8633_v21  ;;  %v11607_v52 = vld [vmem:[#allocation5_spill] sm:$0xff]  ;;  %v11610_v13 = vld [vmem:[#allocation6_spill] sm:$0xff] }
 0x301   : > { %v2818_v11 = vadd.f32 %v2567_v60, %v11602_v15  ;;  %v3903_v60 = vrot.slane %v8974_v32, 2  ;;  %v4599_v15 = vrot.slane %v9008_v18, 2  ;;  %v8785_v18 = vld [vmem:[%s11493_s1 + $0x460] sm:$0xf] }
 0x302   : > { %v3399_v39 = vpop.f32.mrf.mxu0  ;;  %5562 = vmatpush.bf16.msra.mxu2 %v8634_v3 }
 0x303   : > { %v2666_v1 = vpop.f32.mrf.mxu3  ;;  %v3498_v6 = vpop.f32.mrf.mxu1  ;;  %v10567_v56 = vadd.f32 %v3397_v26, %v2818_v11  ;;  %v3904_v33 = vsel %vm3899_vm3, %v3901_v29, %v3903_v60  ;;  %v9104_v26 = vld [vmem:[%s11493_s1 + $0x464] sm:$0xf]  ;;  %v9105_v29 = vld [vmem:[%s11493_s1 + $0x464] sm:$0xf0] }
 0x304   : > { %v2819_v22 = vadd.f32 %v2666_v1, %v11603_v58  ;;  %v11606_v58 = vld [vmem:[#allocation4_spill] sm:$0xff]  ;;  %v8786_v4 = vor.u32 %v9105_v29, %v8785_v18 }
 0x305   : > { %11604 = vst [vmem:[#allocation36_spill] sm:$0xff] %v10567_v56 }
 0x306   : > { %v10569_v17 = vadd.f32 %v3496_v57, %v2819_v22  ;;  %v8787_v57 = vld [vmem:[%s11493_s1 + $0x468] sm:$0xf0]  ;;  %v4600_v22 = vsel %vm3899_vm3, %v4597_v10, %v4599_v15  ;;  %6259 = vmatpush.bf16.msra.mxu0 %v8786_v4  ;;  %v11615_v4 = vld [vmem:[#allocation9_spill] sm:$0xff] }
 0x307   : > { %v8790_v32 = vor.u32 %v9104_v26, %v8787_v57  ;;  %v8975_v57 = vld [vmem:[%s9289_s12 + $0x20] sm:$0xff] }
 0x308   : > { %11605 = vst [vmem:[#allocation37_spill] sm:$0xff] %v10569_v17  ;;  %v2569_v1 = vpop.f32.mrf.mxu2  ;;  %v11622_v17 = vld [vmem:[#allocation13_spill] sm:$0xff] }
 0x309   : > { %v2820_v43 = vadd.f32 %v2569_v1, %v11606_v58  ;;  %6358 = vmatpush.bf16.msra.mxu1 %v8790_v32  ;;  %v11611_v58 = vld [vmem:[#allocation7_spill] sm:$0xff] }
 0x30a   : > { %v3402_v49 = vpop.f32.mrf.mxu0 }
 0x30b   : > { %v2668_v24 = vpop.f32.mrf.mxu3  ;;  %v3501_v11 = vpop.f32.mrf.mxu1 }
 0x30c   : > { %v2821_v48 = vadd.f32 %v2668_v24, %v11607_v52  ;;  %v10587_v52 = vadd.f32 %v3399_v39, %v2820_v43  ;;  %v9009_v43 = vld [vmem:[%s9289_s12 + $0x28] sm:$0xff] }
 0x30d   : > { %4048 = vmatmul.bf16.gmra.mxu2 %v3904_v33  ;;  %4744 = vmatmul.bf16.gmra.mxu0 %v4600_v22  ;;  %v4601_v18 = vrot.slane %v9009_v43, 2 }
 0x30e   : > { %11608 = vst [vmem:[#allocation3_spill] sm:$0xff] %v10587_v52  ;;  %v10589_v21 = vadd.f32 %v3498_v6, %v2821_v48  ;;  %4843 = vmatmul.bf16.gmra.mxu1 %v4600_v22  ;;  %v3905_v6 = vrot.slane %v8975_v57, 2  ;;  %v11614_v22 = vld [vmem:[#allocation8_spill] sm:$0xff] }
 0x310   : > { %11609 = vst [vmem:[#allocation38_spill] sm:$0xff] %v10589_v21  ;;  %4147 = vmatmul.bf16.gmra.mxu3 %v3904_v33  ;;  %v2572_v10 = vpop.f32.mrf.mxu2 }
 0x311   : > { %v2822_v3 = vadd.f32 %v2572_v10, %v11610_v13  ;;  %v3906_v13 = vsel %vm3899_vm3, %v3903_v60, %v3905_v6  ;;  %v9010_v60 = vld [vmem:[%s9289_s12 + $0x30] sm:$0xff] }
 0x312   : > { %v3404_v26 = vpop.f32.mrf.mxu0 }
 0x313   : > { %v2671_v1 = vpop.f32.mrf.mxu3  ;;  %v3503_v39 = vpop.f32.mrf.mxu1  ;;  %v10595_v52 = vadd.f32 %v3402_v49, %v2822_v3 }
 0x314   : > { %v2823_v24 = vadd.f32 %v2671_v1, %v11611_v58  ;;  %v4602_v58 = vsel %vm3899_vm3, %v4599_v15, %v4601_v18  ;;  %v9068_v15 = vld [vmem:[%s11493_s1 + $0x3d4] sm:$0xf] }
 0x315   : > { %11612 = vst [vmem:[#allocation4_spill] sm:$0xff] %v10595_v52 }
 0x316   : > { %v10597_v48 = vadd.f32 %v3501_v11, %v2823_v24  ;;  %v11618_v24 = vld [vmem:[#allocation10_spill] sm:$0xff] }
 0x318   : > { %11613 = vst [vmem:[#allocation5_spill] sm:$0xff] %v10597_v48  ;;  %v2574_v33 = vpop.f32.mrf.mxu2 }
 0x319   : > { %v2824_v32 = vadd.f32 %v2574_v33, %v11614_v22  ;;  %v11619_v33 = vld [vmem:[#allocation11_spill] sm:$0xff] }
 0x31a   : > { %v3407_v10 = vpop.f32.mrf.mxu0 }
 0x31b   : > { %v2673_v29 = vpop.f32.mrf.mxu3  ;;  %v3506_v1 = vpop.f32.mrf.mxu1  ;;  %v10603_v49 = vadd.f32 %v3404_v26, %v2824_v32  ;;  %v8625_v26 = vld [vmem:[%s11493_s1 + $0x3d0] sm:$0xf] }
 0x31c   : > { %v2825_v21 = vadd.f32 %v2673_v29, %v11615_v4  ;;  %v8976_v4 = vld [vmem:[%s9289_s12 + $0x28] sm:$0xff] }
 0x31d   : > { %11616 = vst [vmem:[#allocation6_spill] sm:$0xff] %v10603_v49  ;;  %4053 = vmatmul.bf16.gmra.mxu2 %v3906_v13  ;;  %4749 = vmatmul.bf16.gmra.mxu0 %v4602_v58 }
 0x31e   : > { %v10605_v11 = vadd.f32 %v3503_v39, %v2825_v21  ;;  %4848 = vmatmul.bf16.gmra.mxu1 %v4602_v58  ;;  %v8627_v21 = vld [vmem:[%s11493_s1 + $0x3d8] sm:$0xf0] }
 0x31f   : > { %v8630_v32 = vor.u32 %v9068_v15, %v8627_v21 }
 0x320   : > { %11617 = vst [vmem:[#allocation7_spill] sm:$0xff] %v10605_v11  ;;  %4152 = vmatmul.bf16.gmra.mxu3 %v3906_v13  ;;  %v2577_v3 = vpop.f32.mrf.mxu2  ;;  %v9069_v13 = vld [vmem:[%s11493_s1 + $0x3d4] sm:$0xf0]  ;;  %v11621_v11 = vld [vmem:[#allocation12_spill] sm:$0xff] }
 0x321   : > { %v2826_v57 = vadd.f32 %v2577_v3, %v11618_v24  ;;  %v8626_v3 = vor.u32 %v9069_v13, %v8625_v26  ;;  %v3907_v24 = vrot.slane %v8976_v4, 2  ;;  %5662 = vmatpush.bf16.msra.mxu3 %v8630_v32  ;;  %v11626_v4 = vld [vmem:[#allocation15_spill] sm:$0xff]  ;;  %v8977_v32 = vld [vmem:[%s9289_s12 + $0x30] sm:$0xff] }
 0x322   : > { %v3409_v29 = vpop.f32.mrf.mxu0 }
 0x323   : > { %v2676_v43 = vpop.f32.mrf.mxu3  ;;  %v3508_v48 = vpop.f32.mrf.mxu1  ;;  %v10620_v39 = vadd.f32 %v3407_v10, %v2826_v57  ;;  %5563 = vmatpush.bf16.msra.mxu2 %v8626_v3  ;;  %v3908_v57 = vsel %vm3899_vm3, %v3905_v6, %v3907_v24  ;;  %v8777_v6 = vld [vmem:[%s11493_s1 + $0x450] sm:$0xf]  ;;  %v9011_v3 = vld [vmem:[%s9289_s12 + $0x38] sm:$0xff] }
 0x324   : > { %v2827_v22 = vadd.f32 %v2676_v43, %v11619_v33  ;;  %v4603_v43 = vrot.slane %v9010_v60, 2 }
 0x325   : > { %11620 = vst [vmem:[#allocation8_spill] sm:$0xff] %v10620_v39 }
 0x326   : > { %v10625_v58 = vadd.f32 %v3506_v1, %v2827_v22  ;;  %v4604_v21 = vsel %vm3899_vm3, %v4601_v18, %v4603_v43 }
 0x328   : > { %v2579_v33 = vpop.f32.mrf.mxu2 }
 0x329   : > { %v2828_v49 = vadd.f32 %v2579_v33, %v11621_v11  ;;  %v11625_v11 = vld [vmem:[#allocation14_spill] sm:$0xff] }
 0x32a   : > { %v3412_v10 = vpop.f32.mrf.mxu0 }
 0x32b   : > { %v2678_v52 = vpop.f32.mrf.mxu3  ;;  %v3511_v15 = vpop.f32.mrf.mxu1  ;;  %v10631_v39 = vadd.f32 %v3409_v29, %v2828_v49 }
 0x32c   : > { %v2829_v56 = vadd.f32 %v2678_v52, %v11622_v17  ;;  %v9102_v17 = vld [vmem:[%s11493_s1 + $0x454] sm:$0xf]  ;;  %v8779_v52 = vld [vmem:[%s11493_s1 + $0x458] sm:$0xf0] }
 0x32d   : > { %11623 = vst [vmem:[#allocation9_spill] sm:$0xff] %v10631_v39  ;;  %4058 = vmatmul.bf16.gmra.mxu2 %v3908_v57  ;;  %4754 = vmatmul.bf16.gmra.mxu0 %v4604_v21 }
 0x32e   : > { %v10633_v1 = vadd.f32 %v3508_v48, %v2829_v56  ;;  %4853 = vmatmul.bf16.gmra.mxu1 %v4604_v21  ;;  %v8782_v56 = vor.u32 %v9102_v17, %v8779_v52  ;;  %v9103_v48 = vld [vmem:[%s11493_s1 + $0x454] sm:$0xf0]  ;;  %v3909_v21 = vrot.slane %v8977_v32, 2  ;;  %v4605_v17 = vrot.slane %v9011_v3, 2  ;;  %v11634_v3 = vld [vmem:[#allocation19_spill] sm:$0xff] }
 0x32f   : > { %v8778_v49 = vor.u32 %v9103_v48, %v8777_v6 }
 0x330   : > { %11624 = vst [vmem:[#allocation10_spill] sm:$0xff] %v10633_v1  ;;  %4157 = vmatmul.bf16.gmra.mxu3 %v3908_v57  ;;  %v2582_v18 = vpop.f32.mrf.mxu2  ;;  %6359 = vmatpush.bf16.msra.mxu1 %v8782_v56  ;;  %v11629_v1 = vld [vmem:[#allocation16_spill] sm:$0xff] }
 0x331   : > { %v2830_v22 = vadd.f32 %v2582_v18, %v11625_v11  ;;  %6260 = vmatpush.bf16.msra.mxu0 %v8778_v49  ;;  %v11630_v18 = vld [vmem:[#allocation17_spill] sm:$0xff] }
 0x332   : > { %v3414_v26 = vpop.f32.mrf.mxu0 }
 0x333   : > { %v2681_v29 = vpop.f32.mrf.mxu3  ;;  %v3513_v13 = vpop.f32.mrf.mxu1  ;;  %v10651_v33 = vadd.f32 %v3412_v10, %v2830_v22  ;;  %v11633_v22 = vld [vmem:[#allocation18_spill] sm:$0xff] }
 0x334   : > { %v2831_v60 = vadd.f32 %v2681_v29, %v11626_v4  ;;  %v3910_v29 = vsel %vm3899_vm3, %v3907_v24, %v3909_v21  ;;  %v4606_v4 = vsel %vm3899_vm3, %v4603_v43, %v4605_v17  ;;  %v8978_v24 = vld [vmem:[%s9289_s12 + $0x38] sm:$0xff] }
 0x335   : > { %11627 = vst [vmem:[#allocation11_spill] sm:$0xff] %v10651_v33 }
 0x336   : > { %v10653_v57 = vadd.f32 %v3511_v15, %v2831_v60 }
 0x338   : > { %11628 = vst [vmem:[#allocation12_spill] sm:$0xff] %v10653_v57  ;;  %v2584_v52 = vpop.f32.mrf.mxu2  ;;  %v9012_v57 = vld [vmem:[%s9289_s12 + $0x40] sm:$0xff] }
 0x339   : > { %v2832_v6 = vadd.f32 %v2584_v52, %v11629_v1 }
 0x33a   : > { %v3417_v56 = vpop.f32.mrf.mxu0 }
 0x33b   : > { %v2683_v48 = vpop.f32.mrf.mxu3  ;;  %v3516_v49 = vpop.f32.mrf.mxu1  ;;  %v10659_v10 = vadd.f32 %v3414_v26, %v2832_v6  ;;  %v3911_v26 = vrot.slane %v8978_v24, 2 }
 0x33c   : > { %v2833_v11 = vadd.f32 %v2683_v48, %v11630_v18 }
 0x33d   : > { %11631 = vst [vmem:[#allocation13_spill] sm:$0xff] %v10659_v10  ;;  %4063 = vmatmul.bf16.gmra.mxu2 %v3910_v29  ;;  %4759 = vmatmul.bf16.gmra.mxu0 %v4606_v4 }
 0x33e   : > { %v10661_v15 = vadd.f32 %v3513_v13, %v2833_v11  ;;  %4858 = vmatmul.bf16.gmra.mxu1 %v4606_v4  ;;  %v4607_v13 = vrot.slane %v9012_v57, 2  ;;  %v11637_v11 = vld [vmem:[#allocation20_spill] sm:$0xff] }
 0x340   : > { %11632 = vst [vmem:[#allocation14_spill] sm:$0xff] %v10661_v15  ;;  %4162 = vmatmul.bf16.gmra.mxu3 %v3910_v29  ;;  %v2587_v1 = vpop.f32.mrf.mxu2  ;;  %v11638_v15 = vld [vmem:[#allocation21_spill] sm:$0xff]  ;;  %v4608_v57 = vsel %vm3899_vm3, %v4605_v17, %v4607_v13 }
 0x341   : > { %v2834_v60 = vadd.f32 %v2587_v1, %v11633_v22  ;;  %v3912_v22 = vsel %vm3899_vm3, %v3909_v21, %v3911_v26  ;;  %v9067_v21 = vld [vmem:[%s11493_s1 + $0x3c4] sm:$0xf0] }
 0x342   : > { %v3419_v48 = vpop.f32.mrf.mxu0 }
 0x343   : > { %v2686_v32 = vpop.f32.mrf.mxu3  ;;  %v3518_v18 = vpop.f32.mrf.mxu1  ;;  %v10667_v33 = vadd.f32 %v3417_v56, %v2834_v60  ;;  %v8619_v56 = vld [vmem:[%s11493_s1 + $0x3c8] sm:$0xf0] }
 0x344   : > { %v2835_v52 = vadd.f32 %v2686_v32, %v11634_v3  ;;  %v9066_v32 = vld [vmem:[%s11493_s1 + $0x3c4] sm:$0xf]  ;;  %v8617_v3 = vld [vmem:[%s11493_s1 + $0x3c0] sm:$0xf] }
 0x345   : > { %11635 = vst [vmem:[#allocation15_spill] sm:$0xff] %v10667_v33  ;;  %v8622_v60 = vor.u32 %v9066_v32, %v8619_v56 }
 0x346   : > { %v10669_v43 = vadd.f32 %v3516_v49, %v2835_v52  ;;  %v8618_v52 = vor.u32 %v9067_v21, %v8617_v3 }
 0x347   : > { %5663 = vmatpush.bf16.msra.mxu3 %v8622_v60 }
 0x348   : > { %11636 = vst [vmem:[#allocation16_spill] sm:$0xff] %v10669_v43  ;;  %v2589_v6 = vpop.f32.mrf.mxu2  ;;  %5564 = vmatpush.bf16.msra.mxu2 %v8618_v52  ;;  %v8979_v43 = vld [vmem:[%s9289_s12 + $0x40] sm:$0xff] }
 0x349   : > { %v2836_v29 = vadd.f32 %v2589_v6, %v11637_v11  ;;  %v3913_v52 = vrot.slane %v8979_v43, 2 }
 0x34a   : > { %v3422_v1 = vpop.f32.mrf.mxu0 }
 0x34b   : > { %v2688_v4 = vpop.f32.mrf.mxu3  ;;  %v3521_v49 = vpop.f32.mrf.mxu1  ;;  %v3914_v39 = vsel %vm3899_vm3, %v3911_v26, %v3913_v52  ;;  %v8980_v26 = vld [vmem:[%s9289_s12 + $0x48] sm:$0xff] }
 0x34c   : > { %v2837_v10 = vadd.f32 %v2688_v4, %v11638_v15  ;;  %v10687_v15 = vadd.f32 %v3419_v48, %v2836_v29  ;;  %v11641_v4 = vld [vmem:[#allocation22_spill] sm:$0xff]  ;;  %v8771_v48 = vld [vmem:[%s11493_s1 + $0x448] sm:$0xf0] }
 0x34d   : > { %4068 = vmatmul.bf16.gmra.mxu2 %v3912_v22  ;;  %4764 = vmatmul.bf16.gmra.mxu0 %v4608_v57  ;;  %v9013_v29 = vld [vmem:[%s9289_s12 + $0x48] sm:$0xff] }
 0x34e   : > { %11639 = vst [vmem:[#allocation17_spill] sm:$0xff] %v10687_v15  ;;  %v10689_v24 = vadd.f32 %v3518_v18, %v2837_v10  ;;  %4863 = vmatmul.bf16.gmra.mxu1 %v4608_v57  ;;  %v9100_v10 = vld [vmem:[%s11493_s1 + $0x444] sm:$0xf]  ;;  %v9101_v57 = vld [vmem:[%s11493_s1 + $0x444] sm:$0xf0] }
 0x350   : > { %11640 = vst [vmem:[#allocation18_spill] sm:$0xff] %v10689_v24  ;;  %4167 = vmatmul.bf16.gmra.mxu3 %v3912_v22  ;;  %v2592_v17 = vpop.f32.mrf.mxu2  ;;  %v8774_v22 = vor.u32 %v9100_v10, %v8771_v48  ;;  %v11643_v24 = vld [vmem:[#allocation24_spill] sm:$0xff] }
 0x351   : > { %v2838_v6 = vadd.f32 %v2592_v17, %v10220_v9  ;;  %v8769_v9 = vld [vmem:[%s11493_s1 + $0x440] sm:$0xf]  ;;  %v4609_v17 = vrot.slane %v9013_v29, 2 }
 0x352   : > { %v3424_v56 = vpop.f32.mrf.mxu0  ;;  %v8770_v3 = vor.u32 %v9101_v57, %v8769_v9  ;;  %6360 = vmatpush.bf16.msra.mxu1 %v8774_v22  ;;  %v11646_v22 = vld [vmem:[#allocation25_spill] sm:$0xff] }
 0x353   : > { %v2691_v11 = vpop.f32.mrf.mxu3  ;;  %v3523_v18 = vpop.f32.mrf.mxu1  ;;  %v10707_v60 = vadd.f32 %v3422_v1, %v2838_v6  ;;  %v4610_v6 = vsel %vm3899_vm3, %v4607_v13, %v4609_v17 }
 0x354   : > { %v2839_v32 = vadd.f32 %v2691_v11, %v11641_v4  ;;  %6261 = vmatpush.bf16.msra.mxu0 %v8770_v3  ;;  %v11642_v4 = vld [vmem:[#allocation23_spill] sm:$0xff] }
 0x356   : > { %v10709_v21 = vadd.f32 %v3521_v49, %v2839_v32 }
 0x358   : > { %v2594_v11 = vpop.f32.mrf.mxu2 }
 0x359   : > { %v2840_v10 = vadd.f32 %v2594_v11, %v11642_v4  ;;  %v9014_v11 = vld [vmem:[%s9289_s12 + $0x50] sm:$0xff] }
 0x35a   : > { %v3427_v33 = vpop.f32.mrf.mxu0 }
 0x35b   : > { %v2693_v48 = vpop.f32.mrf.mxu3  ;;  %v3526_v1 = vpop.f32.mrf.mxu1  ;;  %v10715_v49 = vadd.f32 %v3424_v56, %v2840_v10  ;;  %v4611_v56 = vrot.slane %v9014_v11, 2  ;;  %v11648_v10 = vld [vmem:[#allocation26_spill] sm:$0xff] }
 0x35c   : > { %v2841_v15 = vadd.f32 %v2693_v48, %v11643_v24 }
 0x35d   : > { %11644 = vst [vmem:[#allocation19_spill] sm:$0xff] %v10715_v49  ;;  %4073 = vmatmul.bf16.gmra.mxu2 %v3914_v39  ;;  %4769 = vmatmul.bf16.gmra.mxu0 %v4610_v6 }
 0x35e   : > { %v10717_v32 = vadd.f32 %v3523_v18, %v2841_v15  ;;  %4868 = vmatmul.bf16.gmra.mxu1 %v4610_v6  ;;  %v3915_v15 = vrot.slane %v8980_v26, 2  ;;  %v11649_v6 = vld [vmem:[#allocation27_spill] sm:$0xff]  ;;  %v11652_v26 = vld [vmem:[#allocation28_spill] sm:$0xff] }
 0x360   : > { %11645 = vst [vmem:[#allocation20_spill] sm:$0xff] %v10717_v32  ;;  %4172 = vmatmul.bf16.gmra.mxu3 %v3914_v39  ;;  %v2597_v43 = vpop.f32.mrf.mxu2 }
 0x361   : > { %v2842_v29 = vadd.f32 %v2597_v43, %v10236_v34  ;;  %v3916_v43 = vsel %vm3899_vm3, %v3913_v52, %v3915_v15  ;;  %v8611_v52 = vld [vmem:[%s11493_s1 + $0x3b8] sm:$0xf0] }
 0x362   : > { %v3429_v57 = vpop.f32.mrf.mxu0 }
 0x363   : > { %v2696_v24 = vpop.f32.mrf.mxu3  ;;  %v3528_v3 = vpop.f32.mrf.mxu1  ;;  %v10723_v4 = vadd.f32 %v3427_v33, %v2842_v29  ;;  %v9065_v29 = vld [vmem:[%s11493_s1 + $0x3b4] sm:$0xf0] }
 0x364   : > { %v2843_v9 = vadd.f32 %v2696_v24, %v11646_v22  ;;  %v4612_v22 = vsel %vm3899_vm3, %v4609_v17, %v4611_v56  ;;  %v8609_v17 = vld [vmem:[%s11493_s1 + $0x3b0] sm:$0xf] }
 0x366   : > { %v10725_v13 = vadd.f32 %v3526_v1, %v2843_v9  ;;  %v9064_v1 = vld [vmem:[%s11493_s1 + $0x3b4] sm:$0xf] }
 0x368   : > { %11647 = vst [vmem:[#allocation21_spill] sm:$0xff] %v10725_v13  ;;  %v2599_v18 = vpop.f32.mrf.mxu2 }
 0x369   : > { %v2844_v39 = vadd.f32 %v2599_v18, %v11648_v10 }
 0x36a   : > { %v3432_v34 = vpop.f32.mrf.mxu0 }
 0x36b   : > { %v2698_v48 = vpop.f32.mrf.mxu3  ;;  %v3531_v24 = vpop.f32.mrf.mxu1  ;;  %v10731_v49 = vadd.f32 %v3429_v57, %v2844_v39  ;;  %v8610_v57 = vor.u32 %v9065_v29, %v8609_v17  ;;  %v8981_v39 = vld [vmem:[%s9289_s12 + $0x50] sm:$0xff]  ;;  %v9099_v17 = vld [vmem:[%s11493_s1 + $0x434] sm:$0xf0] }
 0x36c   : > { %v2845_v32 = vadd.f32 %v2698_v48, %v11649_v6  ;;  %v9015_v48 = vld [vmem:[%s9289_s12 + $0x58] sm:$0xff] }
 0x36d   : > { %11650 = vst [vmem:[#allocation22_spill] sm:$0xff] %v10731_v49  ;;  %4078 = vmatmul.bf16.gmra.mxu2 %v3916_v43  ;;  %4774 = vmatmul.bf16.gmra.mxu0 %v4612_v22  ;;  %v11653_v49 = vld [vmem:[#allocation29_spill] sm:$0xff] }
 0x36e   : > { %v10733_v33 = vadd.f32 %v3528_v3, %v2845_v32  ;;  %4873 = vmatmul.bf16.gmra.mxu1 %v4612_v22  ;;  %v8614_v32 = vor.u32 %v9064_v1, %v8611_v52  ;;  %5565 = vmatpush.bf16.msra.mxu2 %v8610_v57  ;;  %v8763_v22 = vld [vmem:[%s11493_s1 + $0x438] sm:$0xf0]  ;;  %v8761_v1 = vld [vmem:[%s11493_s1 + $0x430] sm:$0xf]  ;;  %v4613_v57 = vrot.slane %v9015_v48, 2 }
 0x36f   : > { %v8762_v29 = vor.u32 %v9099_v17, %v8761_v1 }
 0x370   : > { %11651 = vst [vmem:[#allocation23_spill] sm:$0xff] %v10733_v33  ;;  %4177 = vmatmul.bf16.gmra.mxu3 %v3916_v43  ;;  %v2602_v9 = vpop.f32.mrf.mxu2  ;;  %v9098_v43 = vld [vmem:[%s11493_s1 + $0x434] sm:$0xf] }
 0x371   : > { %v2846_v3 = vadd.f32 %v2602_v9, %v11652_v26  ;;  %5664 = vmatpush.bf16.msra.mxu3 %v8614_v32  ;;  %v3917_v9 = vrot.slane %v8981_v39, 2  ;;  %6262 = vmatpush.bf16.msra.mxu0 %v8762_v29 }
 0x372   : > { %v3434_v10 = vpop.f32.mrf.mxu0 }
 0x373   : > { %v2701_v11 = vpop.f32.mrf.mxu3  ;;  %v3533_v6 = vpop.f32.mrf.mxu1  ;;  %v10760_v52 = vadd.f32 %v3432_v34, %v2846_v3  ;;  %v3918_v3 = vsel %vm3899_vm3, %v3915_v15, %v3917_v9  ;;  %v8982_v15 = vld [vmem:[%s9289_s12 + $0x58] sm:$0xff] }
 0x374   : > { %v2847_v18 = vadd.f32 %v2701_v11, %v10278_v59  ;;  %v8766_v59 = vor.u32 %v9098_v43, %v8763_v22 }
 0x376   : > { %v10765_v32 = vadd.f32 %v3531_v24, %v2847_v18  ;;  %6361 = vmatpush.bf16.msra.mxu1 %v8766_v59  ;;  %v4614_v24 = vsel %vm3899_vm3, %v4611_v56, %v4613_v57  ;;  %v9016_v59 = vld [vmem:[%s9289_s12 + $0x60] sm:$0xff] }
 0x378   : > { %v2604_v26 = vpop.f32.mrf.mxu2 }
 0x379   : > { %v2848_v11 = vadd.f32 %v2604_v26, %v10285_v7 }
 0x37a   : > { %v4740_v34 = vpop.f32.mrf.mxu0 }
 0x37b   : > { %v2703_v33 = vpop.f32.mrf.mxu3  ;;  %v4839_v43 = vpop.f32.mrf.mxu1  ;;  %v10771_v18 = vadd.f32 %v3434_v10, %v2848_v11  ;;  %v4615_v10 = vrot.slane %v9016_v59, 2  ;;  %v11654_v11 = vld [vmem:[#allocation30_spill] sm:$0xff]  ;;  %v9017_v59 = vld [vmem:[%s9289_s12 + $0x68] sm:$0xff] }
 0x37c   : > { %v2849_v13 = vadd.f32 %v2703_v33, %v11653_v49 }
 0x37d   : > { %4083 = vmatmul.bf16.gmra.mxu2 %v3918_v3  ;;  %4779 = vmatmul.bf16.gmra.mxu0 %v4614_v24 }
 0x37e   : > { %v10773_v39 = vadd.f32 %v3533_v6, %v2849_v13  ;;  %4878 = vmatmul.bf16.gmra.mxu1 %v4614_v24  ;;  %v3919_v13 = vrot.slane %v8982_v15, 2 }
 0x380   : > { %4182 = vmatmul.bf16.gmra.mxu3 %v3918_v3  ;;  %v4044_v7 = vpop.f32.mrf.mxu2 }
 0x381   : > { %v4305_v48 = vadd.f32 %v4044_v7, %v10292_v54  ;;  %v4616_v7 = vsel %vm3899_vm3, %v4613_v57, %v4615_v10  ;;  %v9062_v57 = vld [vmem:[%s11493_s1 + $0x3a4] sm:$0xf] }
 0x382   : > { %v4742_v22 = vpop.f32.mrf.mxu0 }
 0x383   : > { %v4143_v49 = vpop.f32.mrf.mxu3  ;;  %v4841_v1 = vpop.f32.mrf.mxu1  ;;  %v10779_v17 = vadd.f32 %v4740_v34, %v4305_v48 }
 0x384   : > { %v4306_v33 = vadd.f32 %v4143_v49, %v10294_v36  ;;  %v3920_v36 = vsel %vm3899_vm3, %v3917_v9, %v3919_v13  ;;  %v8983_v9 = vld [vmem:[%s9289_s12 + $0x60] sm:$0xff] }
 0x386   : > { %v10781_v56 = vadd.f32 %v4839_v43, %v4306_v33 }
 0x388   : > { %v4046_v6 = vpop.f32.mrf.mxu2 }
 0x389   : > { %v4307_v29 = vadd.f32 %v4046_v6, %v10301_v5 }
 0x38a   : > { %v4745_v54 = vpop.f32.mrf.mxu0 }
 0x38b   : > { %v4145_v26 = vpop.f32.mrf.mxu3  ;;  %v4844_v24 = vpop.f32.mrf.mxu1  ;;  %v10787_v34 = vadd.f32 %v4742_v22, %v4307_v29  ;;  %v8603_v22 = vld [vmem:[%s11493_s1 + $0x3a8] sm:$0xf0] }
 0x38c   : > { %v4308_v3 = vadd.f32 %v4145_v26, %v11654_v11  ;;  %v8606_v6 = vor.u32 %v9062_v57, %v8603_v22 }
 0x38d   : > { %4088 = vmatmul.bf16.gmra.mxu2 %v3920_v36  ;;  %4784 = vmatmul.bf16.gmra.mxu0 %v4616_v7 }
 0x38e   : > { %v10789_v43 = vadd.f32 %v4841_v1, %v4308_v3  ;;  %4883 = vmatmul.bf16.gmra.mxu1 %v4616_v7  ;;  %5665 = vmatpush.bf16.msra.mxu3 %v8606_v6  ;;  %v3921_v3 = vrot.slane %v8983_v9, 2 }
 0x390   : > { %11655 = vst [vmem:[#allocation24_spill] sm:$0xff] %v10789_v43  ;;  %4187 = vmatmul.bf16.gmra.mxu3 %v3920_v36  ;;  %v4049_v5 = vpop.f32.mrf.mxu2  ;;  %v4617_v36 = vrot.slane %v9017_v59, 2  ;;  %v3922_v43 = vsel %vm3899_vm3, %v3919_v13, %v3921_v3 }
 0x391   : > { %v4309_v48 = vadd.f32 %v4049_v5, %v10320_v19  ;;  %v8601_v19 = vld [vmem:[%s11493_s1 + $0x3a0] sm:$0xf] }
 0x392   : > { %v4747_v15 = vpop.f32.mrf.mxu0 }
 0x393   : > { %v4148_v49 = vpop.f32.mrf.mxu3  ;;  %v4846_v1 = vpop.f32.mrf.mxu1  ;;  %v10807_v29 = vadd.f32 %v4745_v54, %v4309_v48  ;;  %v9096_v54 = vld [vmem:[%s11493_s1 + $0x424] sm:$0xf] }
 0x394   : > { %v4310_v33 = vadd.f32 %v4148_v49, %v10322_v44  ;;  %v9063_v44 = vld [vmem:[%s11493_s1 + $0x3a4] sm:$0xf0] }
 0x395   : > { %v8602_v26 = vor.u32 %v9063_v44, %v8601_v19 }
 0x396   : > { %v10809_v11 = vadd.f32 %v4844_v24, %v4310_v33  ;;  %v8755_v24 = vld [vmem:[%s11493_s1 + $0x428] sm:$0xf0]  ;;  %v4618_v33 = vsel %vm3899_vm3, %v4615_v10, %v4617_v36 }
 0x397   : > { %5566 = vmatpush.bf16.msra.mxu2 %v8602_v26  ;;  %v8758_v9 = vor.u32 %v9096_v54, %v8755_v24 }
 0x398   : > { %v4051_v7 = vpop.f32.mrf.mxu2 }
 0x399   : > { %v4311_v5 = vadd.f32 %v4051_v7, %v10341_v53  ;;  %v8753_v53 = vld [vmem:[%s11493_s1 + $0x420] sm:$0xf]  ;;  %6362 = vmatpush.bf16.msra.mxu1 %v8758_v9 }
 0x39a   : > { %v4750_v22 = vpop.f32.mrf.mxu0 }
 0x39b   : > { %v4150_v49 = vpop.f32.mrf.mxu3  ;;  %v4849_v48 = vpop.f32.mrf.mxu1  ;;  %v10827_v13 = vadd.f32 %v4747_v15, %v4311_v5  ;;  %v9018_v5 = vld [vmem:[%s9289_s12 + $0x70] sm:$0xff] }
 0x39c   : > { %v4312_v57 = vadd.f32 %v4150_v49, %v10343_v61  ;;  %v9097_v61 = vld [vmem:[%s11493_s1 + $0x424] sm:$0xf0]  ;;  %v4619_v24 = vrot.slane %v9018_v5, 2 }
 0x39d   : > { %v8754_v59 = vor.u32 %v9097_v61, %v8753_v53  ;;  %4093 = vmatmul.bf16.gmra.mxu2 %v3922_v43  ;;  %4789 = vmatmul.bf16.gmra.mxu0 %v4618_v33  ;;  %v8984_v49 = vld [vmem:[%s9289_s12 + $0x68] sm:$0xff] }
 0x39e   : > { %v10829_v6 = vadd.f32 %v4846_v1, %v4312_v57  ;;  %4888 = vmatmul.bf16.gmra.mxu1 %v4618_v33  ;;  %v3923_v57 = vrot.slane %v8984_v49, 2  ;;  %v8985_v49 = vld [vmem:[%s9289_s12 + $0x70] sm:$0xff] }
 0x39f   : > { %6263 = vmatpush.bf16.msra.mxu0 %v8754_v59  ;;  %v4620_v59 = vsel %vm3899_vm3, %v4617_v36, %v4619_v24  ;;  %v9060_v36 = vld [vmem:[%s11493_s1 + $0x394] sm:$0xf] }
 0x3a0   : > { %4192 = vmatmul.bf16.gmra.mxu3 %v3922_v43  ;;  %v4054_v10 = vpop.f32.mrf.mxu2 }
 0x3a1   : > { %v4313_v19 = vadd.f32 %v4054_v10, %v10348_v35  ;;  %v11657_v10 = vld [vmem:[#allocation31_spill] sm:$0xff] }
 0x3a2   : > { %v4752_v7 = vpop.f32.mrf.mxu0 }
 0x3a3   : > { %v4153_v44 = vpop.f32.mrf.mxu3  ;;  %v4851_v15 = vpop.f32.mrf.mxu1  ;;  %v10835_v54 = vadd.f32 %v4750_v22, %v4313_v19 }
 0x3a4   : > { %v4314_v26 = vadd.f32 %v4153_v44, %v10350_v23  ;;  %v3924_v23 = vsel %vm3899_vm3, %v3921_v3, %v3923_v57  ;;  %v9019_v3 = vld [vmem:[%s9289_s12 + $0x78] sm:$0xff] }
 0x3a6   : > { %v10837_v1 = vadd.f32 %v4849_v48, %v4314_v26 }
 0x3a8   : > { %v4056_v43 = vpop.f32.mrf.mxu2 }
 0x3a9   : > { %v4315_v33 = vadd.f32 %v4056_v43, %v10357_v14 }
 0x3aa   : > { %v4755_v35 = vpop.f32.mrf.mxu0 }
 0x3ab   : > { %v4155_v9 = vpop.f32.mrf.mxu3  ;;  %v4854_v61 = vpop.f32.mrf.mxu1  ;;  %v10843_v22 = vadd.f32 %v4752_v7, %v4315_v33  ;;  %v8595_v7 = vld [vmem:[%s11493_s1 + $0x398] sm:$0xf0] }
 0x3ac   : > { %v4316_v53 = vadd.f32 %v4155_v9, %v10359_v31  ;;  %v8598_v33 = vor.u32 %v9060_v36, %v8595_v7 }
 0x3ad   : > { %4098 = vmatmul.bf16.gmra.mxu2 %v3924_v23  ;;  %4794 = vmatmul.bf16.gmra.mxu0 %v4620_v59 }
 0x3ae   : > { %v10845_v48 = vadd.f32 %v4851_v15, %v4316_v53  ;;  %4893 = vmatmul.bf16.gmra.mxu1 %v4620_v59  ;;  %v8593_v15 = vld [vmem:[%s11493_s1 + $0x390] sm:$0xf]  ;;  %5666 = vmatpush.bf16.msra.mxu3 %v8598_v33  ;;  %v4621_v59 = vrot.slane %v9019_v3, 2  ;;  %v8986_v33 = vld [vmem:[%s9289_s12 + $0x78] sm:$0xff] }
 0x3b0   : > { %11656 = vst [vmem:[#allocation25_spill] sm:$0xff] %v10845_v48  ;;  %4197 = vmatmul.bf16.gmra.mxu3 %v3924_v23  ;;  %v4059_v14 = vpop.f32.mrf.mxu2  ;;  %v3925_v23 = vrot.slane %v8985_v49, 2  ;;  %v4622_v7 = vsel %vm3899_vm3, %v4619_v24, %v4621_v59 }
 0x3b1   : > { %v4317_v19 = vadd.f32 %v4059_v14, %v11657_v10 }
 0x3b2   : > { %v4757_v26 = vpop.f32.mrf.mxu0 }
 0x3b3   : > { %v4158_v31 = vpop.f32.mrf.mxu3  ;;  %v4856_v5 = vpop.f32.mrf.mxu1  ;;  %v10860_v43 = vadd.f32 %v4755_v35, %v4317_v19  ;;  %v3926_v19 = vsel %vm3899_vm3, %v3923_v57, %v3925_v23  ;;  %v8745_v57 = vld [vmem:[%s11493_s1 + $0x410] sm:$0xf] }
 0x3b4   : > { %v4318_v44 = vadd.f32 %v4158_v31, %v10378_v25  ;;  %v9061_v25 = vld [vmem:[%s11493_s1 + $0x394] sm:$0xf0] }
 0x3b5   : > { %11658 = vst [vmem:[#allocation26_spill] sm:$0xff] %v10860_v43  ;;  %v8594_v53 = vor.u32 %v9061_v25, %v8593_v15 }
 0x3b6   : > { %v10865_v9 = vadd.f32 %v4854_v61, %v4318_v44 }
 0x3b7   : > { %5567 = vmatpush.bf16.msra.mxu2 %v8594_v53  ;;  %v9020_v53 = vld [vmem:[%s9289_s12 + $0x80] sm:$0xff] }
 0x3b8   : > { %v4061_v14 = vpop.f32.mrf.mxu2 }
 0x3b9   : > { %v4319_v10 = vadd.f32 %v4061_v14, %v10385_v8  ;;  %v9094_v8 = vld [vmem:[%s11493_s1 + $0x414] sm:$0xf] }
 0x3ba   : > { %v4760_v35 = vpop.f32.mrf.mxu0 }
 0x3bb   : > { %v4160_v31 = vpop.f32.mrf.mxu3  ;;  %v4859_v36 = vpop.f32.mrf.mxu1  ;;  %v10871_v43 = vadd.f32 %v4757_v26, %v4319_v10 }
 0x3bc   : > { %v4320_v48 = vadd.f32 %v4160_v31, %v10387_v2  ;;  %v8747_v2 = vld [vmem:[%s11493_s1 + $0x418] sm:$0xf0]  ;;  %v3927_v31 = vrot.slane %v8986_v33, 2 }
 0x3bd   : > { %4103 = vmatmul.bf16.gmra.mxu2 %v3926_v19  ;;  %4799 = vmatmul.bf16.gmra.mxu0 %v4622_v7  ;;  %v8750_v24 = vor.u32 %v9094_v8, %v8747_v2 }
 0x3be   : > { %v10873_v61 = vadd.f32 %v4856_v5, %v4320_v48  ;;  %4898 = vmatmul.bf16.gmra.mxu1 %v4622_v7  ;;  %v9095_v48 = vld [vmem:[%s11493_s1 + $0x414] sm:$0xf0] }
 0x3bf   : > { %v8746_v26 = vor.u32 %v9095_v48, %v8745_v57  ;;  %6363 = vmatpush.bf16.msra.mxu1 %v8750_v24 }
 0x3c0   : > { %4202 = vmatmul.bf16.gmra.mxu3 %v3926_v19  ;;  %v4064_v44 = vpop.f32.mrf.mxu2  ;;  %v4623_v19 = vrot.slane %v9020_v53, 2 }
 0x3c1   : > { %v4321_v49 = vadd.f32 %v4064_v44, %v10404_v30  ;;  %6264 = vmatpush.bf16.msra.mxu0 %v8746_v26 }
 0x3c2   : > { %v4762_v15 = vpop.f32.mrf.mxu0  ;;  %v4624_v48 = vsel %vm3899_vm3, %v4621_v59, %v4623_v19 }
 0x3c3   : > { %v4163_v3 = vpop.f32.mrf.mxu3  ;;  %v4861_v25 = vpop.f32.mrf.mxu1  ;;  %v10891_v14 = vadd.f32 %v4760_v35, %v4321_v49 }
 0x3c4   : > { %v4322_v5 = vadd.f32 %v4163_v3, %v10406_v47  ;;  %v3928_v47 = vsel %vm3899_vm3, %v3925_v23, %v3927_v31  ;;  %v8987_v23 = vld [vmem:[%s9289_s12 + $0x80] sm:$0xff] }
 0x3c6   : > { %v10893_v10 = vadd.f32 %v4859_v36, %v4322_v5  ;;  %v9021_v5 = vld [vmem:[%s9289_s12 + $0x88] sm:$0xff] }
 0x3c8   : > { %v4066_v7 = vpop.f32.mrf.mxu2 }
 0x3c9   : > { %v4323_v8 = vadd.f32 %v4066_v7, %v10413_v46 }
 0x3ca   : > { %v4765_v57 = vpop.f32.mrf.mxu0 }
 0x3cb   : > { %v4165_v2 = vpop.f32.mrf.mxu3  ;;  %v4864_v24 = vpop.f32.mrf.mxu1  ;;  %v10899_v35 = vadd.f32 %v4762_v15, %v4323_v8  ;;  %v3929_v15 = vrot.slane %v8987_v23, 2 }
 0x3cc   : > { %v4324_v30 = vadd.f32 %v4165_v2, %v10415_v51 }
 0x3cd   : > { %4108 = vmatmul.bf16.gmra.mxu2 %v3928_v47  ;;  %4804 = vmatmul.bf16.gmra.mxu0 %v4624_v48 }
 0x3ce   : > { %v10901_v36 = vadd.f32 %v4861_v25, %v4324_v30  ;;  %4903 = vmatmul.bf16.gmra.mxu1 %v4624_v48  ;;  %v4625_v25 = vrot.slane %v9021_v5, 2  ;;  %v3930_v30 = vsel %vm3899_vm3, %v3927_v31, %v3929_v15 }
 0x3d0   : > { %4207 = vmatmul.bf16.gmra.mxu3 %v3928_v47  ;;  %v4069_v46 = vpop.f32.mrf.mxu2 }
 0x3d1   : > { %v4325_v44 = vadd.f32 %v4069_v46, %v10420_v16 }
 0x3d2   : > { %v4767_v49 = vpop.f32.mrf.mxu0 }
 0x3d3   : > { %v4168_v51 = vpop.f32.mrf.mxu3  ;;  %v4866_v3 = vpop.f32.mrf.mxu1  ;;  %v10907_v33 = vadd.f32 %v4765_v57, %v4325_v44  ;;  %v8587_v57 = vld [vmem:[%s11493_s1 + $0x388] sm:$0xf0] }
 0x3d4   : > { %v4326_v26 = vadd.f32 %v4168_v51, %v10422_v37  ;;  %v9058_v37 = vld [vmem:[%s11493_s1 + $0x384] sm:$0xf] }
 0x3d5   : > { %v8590_v48 = vor.u32 %v9058_v37, %v8587_v57 }
 0x3d6   : > { %v10909_v59 = vadd.f32 %v4864_v24, %v4326_v26  ;;  %v4626_v24 = vsel %vm3899_vm3, %v4623_v19, %v4625_v25 }
 0x3d7   : > { %5667 = vmatpush.bf16.msra.mxu3 %v8590_v48 }
 0x3d8   : > { %v4071_v53 = vpop.f32.mrf.mxu2 }
 0x3d9   : > { %v4327_v7 = vadd.f32 %v4071_v53, %v10441_v55  ;;  %v8585_v55 = vld [vmem:[%s11493_s1 + $0x380] sm:$0xf]  ;;  %v8988_v53 = vld [vmem:[%s9289_s12 + $0x88] sm:$0xff] }
 0x3da   : > { %v4770_v16 = vpop.f32.mrf.mxu0 }
 0x3db   : > { %v4170_v8 = vpop.f32.mrf.mxu3  ;;  %v4869_v47 = vpop.f32.mrf.mxu1  ;;  %v10927_v31 = vadd.f32 %v4767_v49, %v4327_v7  ;;  %v9092_v49 = vld [vmem:[%s11493_s1 + $0x404] sm:$0xf] }
 0x3dc   : > { %v4328_v2 = vadd.f32 %v4170_v8, %v10443_v50  ;;  %v9059_v50 = vld [vmem:[%s11493_s1 + $0x384] sm:$0xf0]  ;;  %v9022_v8 = vld [vmem:[%s9289_s12 + $0x90] sm:$0xff] }
 0x3dd   : > { %v8586_v46 = vor.u32 %v9059_v50, %v8585_v55  ;;  %4113 = vmatmul.bf16.gmra.mxu2 %v3930_v30  ;;  %4809 = vmatmul.bf16.gmra.mxu0 %v4626_v24  ;;  %v4627_v48 = vrot.slane %v9022_v8, 2 }
 0x3de   : > { %v10929_v44 = vadd.f32 %v4866_v3, %v4328_v2  ;;  %4908 = vmatmul.bf16.gmra.mxu1 %v4626_v24  ;;  %v8739_v3 = vld [vmem:[%s11493_s1 + $0x408] sm:$0xf0]  ;;  %v3931_v24 = vrot.slane %v8988_v53, 2 }
 0x3df   : > { %5568 = vmatpush.bf16.msra.mxu2 %v8586_v46  ;;  %v8742_v2 = vor.u32 %v9092_v49, %v8739_v3 }
 0x3e0   : > { %4212 = vmatmul.bf16.gmra.mxu3 %v3930_v30  ;;  %v4074_v19 = vpop.f32.mrf.mxu2  ;;  %v3932_v49 = vsel %vm3899_vm3, %v3929_v15, %v3931_v24  ;;  %v8989_v15 = vld [vmem:[%s9289_s12 + $0x90] sm:$0xff] }
 0x3e1   : > { %v4329_v51 = vadd.f32 %v4074_v19, %v10460_v20  ;;  %v8737_v20 = vld [vmem:[%s11493_s1 + $0x400] sm:$0xf]  ;;  %6364 = vmatpush.bf16.msra.mxu1 %v8742_v2 }
 0x3e2   : > { %v4772_v5 = vpop.f32.mrf.mxu0 }
 0x3e3   : > { %v4173_v26 = vpop.f32.mrf.mxu3  ;;  %v4871_v7 = vpop.f32.mrf.mxu1  ;;  %v10947_v30 = vadd.f32 %v4770_v16, %v4329_v51  ;;  %v4628_v51 = vsel %vm3899_vm3, %v4625_v25, %v4627_v48  ;;  %v9023_v25 = vld [vmem:[%s9289_s12 + $0x98] sm:$0xff] }
 0x3e4   : > { %v4330_v23 = vadd.f32 %v4173_v26, %v10462_v28  ;;  %v9093_v28 = vld [vmem:[%s11493_s1 + $0x404] sm:$0xf0] }
 0x3e5   : > { %v8738_v37 = vor.u32 %v9093_v28, %v8737_v20  ;;  %v3933_v20 = vrot.slane %v8989_v15, 2  ;;  %v4629_v28 = vrot.slane %v9023_v25, 2 }
 0x3e6   : > { %v10949_v57 = vadd.f32 %v4869_v47, %v4330_v23 }
 0x3e7   : > { %6265 = vmatpush.bf16.msra.mxu0 %v8738_v37 }
 0x3e8   : > { %v4076_v55 = vpop.f32.mrf.mxu2 }
 0x3e9   : > { %v4331_v50 = vadd.f32 %v4076_v55, %v10469_v38 }
 0x3ea   : > { %v4775_v26 = vpop.f32.mrf.mxu0 }
 0x3eb   : > { %v4175_v46 = vpop.f32.mrf.mxu3  ;;  %v4874_v16 = vpop.f32.mrf.mxu1  ;;  %v10955_v47 = vadd.f32 %v4772_v5, %v4331_v50 }
 0x3ec   : > { %v4332_v19 = vadd.f32 %v4175_v46, %v10471_v42 }
 0x3ed   : > { %4118 = vmatmul.bf16.gmra.mxu2 %v3932_v49  ;;  %4814 = vmatmul.bf16.gmra.mxu0 %v4628_v51 }
 0x3ee   : > { %v10957_v23 = vadd.f32 %v4871_v7, %v4332_v19  ;;  %4913 = vmatmul.bf16.gmra.mxu1 %v4628_v51  ;;  %v3788_v51 = vld [vmem:[%s9289_s12 + $0x98] sm:$0x3] }
 0x3f0   : > { %4217 = vmatmul.bf16.gmra.mxu3 %v3932_v49  ;;  %v4079_v38 = vpop.f32.mrf.mxu2  ;;  %v4630_v49 = vsel %vm3899_vm3, %v4627_v48, %v4629_v28 }
 0x3f1   : > { %v4333_v53 = vadd.f32 %v4079_v38, %v10479_v62 }
 0x3f2   : > { %v4777_v8 = vpop.f32.mrf.mxu0 }
 0x3f3   : > { %v4178_v42 = vpop.f32.mrf.mxu3  ;;  %v4876_v2 = vpop.f32.mrf.mxu1  ;;  %v10963_v5 = vadd.f32 %v4775_v26, %v4333_v53  ;;  %v4485_v26 = vld [vmem:[%s9289_s12 + $0xa0] sm:$0x3] }
 0x3f4   : > { %v4334_v3 = vadd.f32 %v4178_v42, %v10481_v45  ;;  %v3934_v45 = vsel %vm3899_vm3, %v3931_v24, %v3933_v20 }
 0x3f6   : > { %v10965_v7 = vadd.f32 %v4874_v16, %v4334_v3 }
 0x3f8   : > { %v4081_v37 = vpop.f32.mrf.mxu2 }
 0x3f9   : > { %v4335_v55 = vadd.f32 %v4081_v37, %v10489_v63  ;;  %v3879_v63 = vunpack.c.l.b16 %v3788_v51 }
 0x3fa   : > { %v4780_v46 = vpop.f32.mrf.mxu0 }
 0x3fb   : > { %v4180_v50 = vpop.f32.mrf.mxu3  ;;  %v4879_v19 = vpop.f32.mrf.mxu1  ;;  %v10972_v38 = vadd.f32 %v4777_v8, %v4335_v55  ;;  %v3898_v8 = vpack.c.b16 %v3879_v63, %v3879_v63 }
 0x3fc   : > { %v4336_v62 = vadd.f32 %v4180_v50, %v10491_v41  ;;  %v4576_v41 = vunpack.c.l.b16 %v4485_v26  ;;  %v8513_v50 = vld [vmem:[%s9289_s12 + $0x10] sm:$0xc] }
 0x3fd   : > { %4123 = vmatmul.bf16.gmra.mxu2 %v3934_v45  ;;  %4819 = vmatmul.bf16.gmra.mxu0 %v4630_v49  ;;  %v3935_v55 = vrot.slane %v3898_v8, 2 }
 0x3fe   : > { %v10975_v16 = vadd.f32 %v4876_v2, %v4336_v62  ;;  %4918 = vmatmul.bf16.gmra.mxu1 %v4630_v49  ;;  %v4595_v2 = vpack.c.b16 %v4576_v41, %v4576_v41  ;;  %v9040_v62 = vld [vmem:[%s9289_s12 + $0x10] sm:$0xf0] }
 0x3ff   : > { %v8514_v26 = vor.u32 %v9040_v62, %v8513_v50  ;;  %v3936_v63 = vsel %vm3899_vm3, %v3933_v20, %v3935_v55  ;;  %v8665_v20 = vld [vmem:[%s9289_s12 + $0x10] sm:$0x8]  ;;  %v9074_v55 = vld [vmem:[%s9289_s12 + $0x10] sm:$0xf0]  ;;  %v11664_v50 = vld [vmem:[#allocation32_spill] sm:$0xff] }
 0x400   : > { %11659 = vst [vmem:[#allocation27_spill] sm:$0xff] %v10975_v16  ;;  %4222 = vmatmul.bf16.gmra.mxu3 %v3934_v45  ;;  %v4084_v53 = vpop.f32.mrf.mxu2  ;;  %v4631_v45 = vrot.slane %v4595_v2, 2 }
 0x401   : > { %v4337_v24 = vadd.f32 %v4084_v53, %v10516_v12 }
 0x402   : > { %v4782_v3 = vpop.f32.mrf.mxu0 }
 0x403   : > { %v4183_v42 = vpop.f32.mrf.mxu3  ;;  %v4881_v15 = vpop.f32.mrf.mxu1  ;;  %v10979_v25 = vadd.f32 %v4780_v46, %v4337_v24  ;;  %v9041_v46 = vld [vmem:[%s9289_s12 + $0x18] sm:$0xff] }
 0x404   : > { %v4338_v48 = vadd.f32 %v4183_v42, %v10521_v40  ;;  %v5305_v8 = vshll.u32 %v9041_v46, 16 }
 0x405   : > { %11660 = vst [vmem:[#allocation28_spill] sm:$0xff] %v10979_v25  ;;  %v11668_v25 = vld [vmem:[#allocation35_spill] sm:$0xff] }
 0x406   : > { %v10981_v37 = vadd.f32 %v4879_v19, %v4338_v48  ;;  %v4632_v19 = vsel %vm3899_vm3, %v4629_v28, %v4631_v45  ;;  %v5297_v48 = vshll.u32 %v8514_v26, 16 }
 0x408   : > { %11661 = vst [vmem:[#allocation29_spill] sm:$0xff] %v10981_v37  ;;  %v4086_v49 = vpop.f32.mrf.mxu2 }
 0x409   : > { %v4339_v51 = vadd.f32 %v4086_v49, %v10527_v27  ;;  %v5294_v27 = vshrl.u32 %v8514_v26, 16  ;;  %v6816_v26 = vld [vmem:[%s11494_s2] sm:$0xff] }
 0x40a   : > { %v4785_v53 = vpop.f32.mrf.mxu0 }
 0x40b   : > { %v4185_v12 = vpop.f32.mrf.mxu3  ;;  %v4884_v41 = vpop.f32.mrf.mxu1  ;;  %v10990_v24 = vadd.f32 %v4782_v3, %v4339_v51  ;;  %v5296_v28 = vrot.slane %v5294_v27, 2  ;;  %v11665_v3 = vld [vmem:[#allocation33_spill] sm:$0xff]  ;;  %v5299_v51 = vrot.slane %v5297_v48, 3 }
 0x40c   : > { %v4340_v40 = vadd.f32 %v4185_v12, %v10529_v0  ;;  %v5302_v0 = vshrl.u32 %v9041_v46, 16  ;;  %v9075_v46 = vld [vmem:[%s9289_s12 + $0x18] sm:$0xff] }
 0x40d   : > { %11662 = vst [vmem:[#allocation30_spill] sm:$0xff] %v10990_v24  ;;  %4128 = vmatmul.bf16.gmra.mxu2 %v3936_v63  ;;  %4824 = vmatmul.bf16.gmra.mxu0 %v4632_v19  ;;  %v5300_v48 = vor.u32 %v5299_v51, %v5296_v28 }
 0x40e   : > { %v10992_v42 = vadd.f32 %v4881_v15, %v4340_v40  ;;  %4923 = vmatmul.bf16.gmra.mxu1 %v4632_v19  ;;  %v5304_v12 = vrot.slane %v5302_v0, 2  ;;  %v5307_v40 = vrot.slane %v5305_v8, 3  ;;  %v8666_v19 = vor.u32 %v9074_v55, %v8665_v20 }
 0x410   : > { %11663 = vst [vmem:[#allocation31_spill] sm:$0xff] %v10992_v42  ;;  %4227 = vmatmul.bf16.gmra.mxu3 %v3936_v63  ;;  %v4089_v2 = vpop.f32.mrf.mxu2  ;;  %v9146_v42 = vmov 0   ;;  %v5308_v0 = vor.u32 %v5307_v40, %v5304_v12  ;;  %v6123_v8 = vrot.slane %v8666_v19, 3  ;;  %v11671_v12 = vld [vmem:[#allocation36_spill] sm:$0xff] }
 0x411   : > { %v4341_v62 = vadd.f32 %v4089_v2, %v11664_v50  ;;  %9135 = vset.pattern.permute.xlu0 %v9146_v42  ;;  %9136 = vset.pattern.permute.xlu1 %v9146_v42  ;;  %v6124_v50 = vrot.slane %v9075_v46, 3  ;;  %v11672_v46 = vld [vmem:[#allocation37_spill] sm:$0xff] }
 0x412   : > { %v4787_v15 = vpop.f32.mrf.mxu0  ;;  %6854 = vperm.xlu0 %9135, %v6816_v26   ;;  %9137 = vset.pattern.permute.xlu2 %v9146_v42  ;;  %v5309_v55 = vsel %vm5292_vm4, %v5300_v48, %v5308_v0  ;;  %v9042_v42 = vld [vmem:[%s9289_s12 + $0x20] sm:$0xff] }
 0x413   : > { %v4188_v49 = vpop.f32.mrf.mxu3  ;;  %v4886_v63 = vpop.f32.mrf.mxu1  ;;  %v11002_v27 = vadd.f32 %v4785_v53, %v4341_v62  ;;  %v6817_v53 = vld [vmem:[%s11494_s2 + $0x8] sm:$0xff]  ;;  %v6125_v62 = vsel %vm6122_vm5, %v6123_v8, %v6124_v50 }
 0x414   : > { %v4342_v45 = vadd.f32 %v4188_v49, %v11665_v3  ;;  %v11667_v3 = vld [vmem:[#allocation34_spill] sm:$0xff] }
 0x416   : > { %v11004_v2 = vadd.f32 %v4884_v41, %v4342_v45 }
 0x418   : > { %11666 = vst [vmem:[#allocation32_spill] sm:$0xff] %v11004_v2  ;;  %v4091_v49 = vpop.f32.mrf.mxu2 }
 0x419   : > { %v4343_v24 = vadd.f32 %v4091_v49, %v11667_v3 }
 0x41a   : > { %v4790_v20 = vpop.f32.mrf.mxu0  ;;  %6859 = vperm.xlu0 %9135, %v6817_v53  }
 0x41b   : > { %v4190_v37 = vpop.f32.mrf.mxu3  ;;  %v4889_v41 = vpop.f32.mrf.mxu1  ;;  %v11014_v28 = vadd.f32 %v4787_v15, %v4343_v24 }
 0x41c   : > { %v4344_v16 = vadd.f32 %v4190_v37, %v11668_v25  ;;  %v5311_v25 = vshrl.u32 %v9042_v42, 16  ;;  %v5314_v37 = vshll.u32 %v9042_v42, 16 }
 0x41d   : > { %11669 = vst [vmem:[#allocation33_spill] sm:$0xff] %v11014_v28  ;;  %5569 = vmatmul.bf16.vlgmr.msra.gmra.mxu2 %v5309_v55  ;;  %6266 = vmatmul.bf16.vlgmr.msra.gmra.mxu0 %v6125_v62 }
 0x41e   : > { %v11016_v45 = vadd.f32 %v4886_v63, %v4344_v16  ;;  %6365 = vmatmul.bf16.vlgmr.msra.gmra.mxu1 %v6125_v62  ;;  %v5313_v8 = vrot.slane %v5311_v25, 2  ;;  %v5316_v24 = vrot.slane %v5314_v37, 3  ;;  %v6818_v16 = vld [vmem:[%s11494_s2 + $0x10] sm:$0xff]  ;;  %v9076_v63 = vld [vmem:[%s9289_s12 + $0x20] sm:$0xff]  ;;  %v11676_v25 = vld [vmem:[#allocation38_spill] sm:$0xff] }
 0x41f   : > { %6864 = vperm.xlu1 %9136, %v6818_v16   ;;  %v6126_v42 = vrot.slane %v9076_v63, 3  ;;  %v11675_v62 = vld [vmem:[#allocation3_spill] sm:$0xff]  ;;  %v6819_v16 = vld [vmem:[%s11494_s2 + $0x18] sm:$0xff]  ;;  %v11679_v63 = vld [vmem:[#allocation4_spill] sm:$0xff] }
 0x420   : > { %11670 = vst [vmem:[#allocation34_spill] sm:$0xff] %v11016_v45  ;;  %5668 = vmatmul.bf16.vlgmr.msra.gmra.mxu3 %v5309_v55  ;;  %v4094_v51 = vpop.f32.mrf.mxu2  ;;  %v5317_v55 = vor.u32 %v5316_v24, %v5313_v8  ;;  %v9043_v45 = vld [vmem:[%s9289_s12 + $0x28] sm:$0xff] }
 0x421   : > { %v4345_v40 = vadd.f32 %v4094_v51, %v11671_v12  ;;  %v5320_v8 = vshrl.u32 %v9043_v45, 16 }
 0x422   : > { %v4792_v48 = vpop.f32.mrf.mxu0 }
 0x423   : > { %v4193_v26 = vpop.f32.mrf.mxu3  ;;  %v4891_v15 = vpop.f32.mrf.mxu1  ;;  %v11024_v49 = vadd.f32 %v4790_v20, %v4345_v40 }
 0x424   : > { %v4346_v19 = vadd.f32 %v4193_v26, %v11672_v46  ;;  %v5318_v46 = vsel %vm5292_vm4, %v5308_v0, %v5317_v55  ;;  %v5323_v0 = vshll.u32 %v9043_v45, 16  ;;  %v11681_v45 = vld [vmem:[#allocation6_spill] sm:$0xff] }
 0x425   : > { %11673 = vst [vmem:[#allocation35_spill] sm:$0xff] %v11024_v49 }
 0x426   : > { %v11026_v3 = vadd.f32 %v4889_v41, %v4346_v19  ;;  %v6127_v41 = vsel %vm6122_vm5, %v6124_v50, %v6126_v42 }
 0x427   : > { %6869 = vperm.xlu1 %9136, %v6819_v16   ;;  %v5322_v16 = vrot.slane %v5320_v8, 2 }
 0x428   : > { %11674 = vst [vmem:[#allocation36_spill] sm:$0xff] %v11026_v3  ;;  %v4096_v53 = vpop.f32.mrf.mxu2 }
 0x429   : > { %v4347_v51 = vadd.f32 %v4096_v53, %v11675_v62 }
 0x42a   : > { %v4795_v37 = vpop.f32.mrf.mxu0 }
 0x42b   : > { %v4195_v12 = vpop.f32.mrf.mxu3  ;;  %v4894_v20 = vpop.f32.mrf.mxu1  ;;  %v11036_v40 = vadd.f32 %v4792_v48, %v4347_v51  ;;  %v5325_v48 = vrot.slane %v5323_v0, 3 }
 0x42c   : > { %v4348_v26 = vadd.f32 %v4195_v12, %v11676_v25  ;;  %v11680_v12 = vld [vmem:[#allocation5_spill] sm:$0xff] }
 0x42d   : > { %11677 = vst [vmem:[#allocation37_spill] sm:$0xff] %v11036_v40  ;;  %5574 = vmatmul.bf16.gmra.mxu2 %v5318_v46  ;;  %6271 = vmatmul.bf16.gmra.mxu0 %v6127_v41  ;;  %v9077_v40 = vld [vmem:[%s9289_s12 + $0x28] sm:$0xff] }
 0x42e   : > { %v11038_v19 = vadd.f32 %v4891_v15, %v4348_v26  ;;  %6370 = vmatmul.bf16.gmra.mxu1 %v6127_v41  ;;  %v6128_v41 = vrot.slane %v9077_v40, 3 }
 0x430   : > { %11678 = vst [vmem:[#allocation3_spill] sm:$0xff] %v11038_v19  ;;  %5673 = vmatmul.bf16.gmra.mxu3 %v5318_v46  ;;  %v4099_v24 = vpop.f32.mrf.mxu2  ;;  %v5326_v46 = vor.u32 %v5325_v48, %v5322_v16  ;;  %v6129_v0 = vsel %vm6122_vm5, %v6126_v42, %v6128_v41  ;;  %v6822_v42 = vld [vmem:[%s11494_s2 + $0x30] sm:$0xff] }
 0x431   : > { %v4349_v53 = vadd.f32 %v4099_v24, %v11679_v63  ;;  %v11682_v24 = vld [vmem:[#allocation7_spill] sm:$0xff]  ;;  %6884 = vperm.xlu0 %9135, %v6822_v42  }
 0x432   : > { %v4797_v50 = vpop.f32.mrf.mxu0  ;;  %v6820_v42 = vld [vmem:[%s11494_s2 + $0x20] sm:$0xff] }
 0x433   : > { %v4198_v62 = vpop.f32.mrf.mxu3  ;;  %v4896_v51 = vpop.f32.mrf.mxu1  ;;  %v11043_v15 = vadd.f32 %v4795_v37, %v4349_v53  ;;  %6874 = vperm.xlu2 %9137, %v6820_v42  }
 0x434   : > { %v4350_v25 = vadd.f32 %v4198_v62, %v11680_v12  ;;  %v5327_v62 = vsel %vm5292_vm4, %v5317_v55, %v5326_v46  ;;  %v9044_v12 = vld [vmem:[%s9289_s12 + $0x30] sm:$0xff] }
 0x435   : > { %v5332_v40 = vshll.u32 %v9044_v12, 16 }
 0x436   : > { %v11045_v26 = vadd.f32 %v4894_v20, %v4350_v25  ;;  %v5329_v20 = vshrl.u32 %v9044_v12, 16 }
 0x438   : > { %v4101_v19 = vpop.f32.mrf.mxu2  ;;  %v5331_v48 = vrot.slane %v5329_v20, 2  ;;  %v11688_v20 = vld [vmem:[#allocation10_spill] sm:$0xff] }
 0x439   : > { %v4351_v3 = vadd.f32 %v4101_v19, %v11681_v45 }
 0x43a   : > { %v4800_v28 = vpop.f32.mrf.mxu0 }
 0x43b   : > { %v4200_v49 = vpop.f32.mrf.mxu3  ;;  %v4899_v8 = vpop.f32.mrf.mxu1  ;;  %v11052_v2 = vadd.f32 %v4797_v50, %v4351_v3  ;;  %v5334_v3 = vrot.slane %v5332_v40, 3 }
 0x43c   : > { %v4352_v63 = vadd.f32 %v4200_v49, %v11682_v24  ;;  %v11684_v49 = vld [vmem:[#allocation8_spill] sm:$0xff] }
 0x43d   : > { %5579 = vmatmul.bf16.gmra.mxu2 %v5327_v62  ;;  %6276 = vmatmul.bf16.gmra.mxu0 %v6129_v0 }
 0x43e   : > { %v11054_v37 = vadd.f32 %v4896_v51, %v4352_v63  ;;  %6375 = vmatmul.bf16.gmra.mxu1 %v6129_v0  ;;  %v9078_v51 = vld [vmem:[%s9289_s12 + $0x30] sm:$0xff]  ;;  %v5335_v63 = vor.u32 %v5334_v3, %v5331_v48 }
 0x43f   : > { %v11687_v0 = vld [vmem:[#allocation9_spill] sm:$0xff] }
 0x440   : > { %11683 = vst [vmem:[#allocation38_spill] sm:$0xff] %v11054_v37  ;;  %5678 = vmatmul.bf16.gmra.mxu3 %v5327_v62  ;;  %v4104_v19 = vpop.f32.mrf.mxu2  ;;  %v6130_v62 = vrot.slane %v9078_v51, 3  ;;  %v9045_v37 = vld [vmem:[%s9289_s12 + $0x38] sm:$0xff] }
 0x441   : > { %v4353_v53 = vadd.f32 %v4104_v19, %v11684_v49  ;;  %v5341_v3 = vshll.u32 %v9045_v37, 16 }
 0x442   : > { %v4802_v16 = vpop.f32.mrf.mxu0 }
 0x443   : > { %v4203_v25 = vpop.f32.mrf.mxu3  ;;  %v4901_v50 = vpop.f32.mrf.mxu1  ;;  %v11062_v45 = vadd.f32 %v4800_v28, %v4353_v53  ;;  %v6823_v28 = vld [vmem:[%s11494_s2 + $0x38] sm:$0xff]  ;;  %v6131_v53 = vsel %vm6122_vm5, %v6128_v41, %v6130_v62 }
 0x444   : > { %v4354_v55 = vadd.f32 %v4203_v25, %v10625_v58  ;;  %v5336_v25 = vsel %vm5292_vm4, %v5326_v46, %v5335_v63  ;;  %6889 = vperm.xlu1 %9136, %v6823_v28   ;;  %v5338_v46 = vshrl.u32 %v9045_v37, 16 }
 0x445   : > { %11685 = vst [vmem:[#allocation4_spill] sm:$0xff] %v11062_v45  ;;  %v9046_v45 = vld [vmem:[%s9289_s12 + $0x40] sm:$0xff] }
 0x446   : > { %v11064_v24 = vadd.f32 %v4899_v8, %v4354_v55  ;;  %v5340_v42 = vrot.slane %v5338_v46, 2  ;;  %v11696_v46 = vld [vmem:[#allocation14_spill] sm:$0xff] }
 0x448   : > { %11686 = vst [vmem:[#allocation5_spill] sm:$0xff] %v11064_v24  ;;  %v4106_v12 = vpop.f32.mrf.mxu2 }
 0x449   : > { %v4355_v58 = vadd.f32 %v4106_v12, %v11687_v0  ;;  %v11691_v12 = vld [vmem:[#allocation11_spill] sm:$0xff] }
 0x44a   : > { %v4805_v40 = vpop.f32.mrf.mxu0 }
 0x44b   : > { %v4205_v19 = vpop.f32.mrf.mxu3  ;;  %v4904_v8 = vpop.f32.mrf.mxu1  ;;  %v11077_v55 = vadd.f32 %v4802_v16, %v4355_v58  ;;  %v5343_v16 = vrot.slane %v5341_v3, 3 }
 0x44c   : > { %v4356_v49 = vadd.f32 %v4205_v19, %v11688_v20  ;;  %v11692_v20 = vld [vmem:[#allocation12_spill] sm:$0xff] }
 0x44d   : > { %11689 = vst [vmem:[#allocation6_spill] sm:$0xff] %v11077_v55  ;;  %5584 = vmatmul.bf16.gmra.mxu2 %v5336_v25  ;;  %6281 = vmatmul.bf16.gmra.mxu0 %v6131_v53  ;;  %v5344_v28 = vor.u32 %v5343_v16, %v5340_v42  ;;  %v5347_v42 = vshrl.u32 %v9046_v45, 16 }
 0x44e   : > { %v11079_v48 = vadd.f32 %v4901_v50, %v4356_v49  ;;  %6380 = vmatmul.bf16.gmra.mxu1 %v6131_v53  ;;  %v6821_v50 = vld [vmem:[%s11494_s2 + $0x28] sm:$0xff]  ;;  %v9079_v49 = vld [vmem:[%s9289_s12 + $0x38] sm:$0xff] }
 0x44f   : > { %6879 = vperm.xlu2 %9137, %v6821_v50   ;;  %v6132_v53 = vrot.slane %v9079_v49, 3  ;;  %v5345_v55 = vsel %vm5292_vm4, %v5335_v63, %v5344_v28  ;;  %v6825_v50 = vld [vmem:[%s11494_s2 + $0x48] sm:$0xff]  ;;  %v5350_v63 = vshll.u32 %v9046_v45, 16  ;;  %v11699_v49 = vld [vmem:[#allocation15_spill] sm:$0xff] }
 0x450   : > { %11690 = vst [vmem:[#allocation7_spill] sm:$0xff] %v11079_v48  ;;  %5683 = vmatmul.bf16.gmra.mxu3 %v5336_v25  ;;  %v4109_v51 = vpop.f32.mrf.mxu2  ;;  %6899 = vperm.xlu0 %9135, %v6825_v50  }
 0x451   : > { %v4357_v0 = vadd.f32 %v4109_v51, %v11691_v12  ;;  %v11695_v12 = vld [vmem:[#allocation13_spill] sm:$0xff] }
 0x452   : > { %v4807_v41 = vpop.f32.mrf.mxu0 }
 0x453   : > { %v4208_v19 = vpop.f32.mrf.mxu3  ;;  %v4906_v58 = vpop.f32.mrf.mxu1  ;;  %v11087_v25 = vadd.f32 %v4805_v40, %v4357_v0 }
 0x454   : > { %v4358_v24 = vadd.f32 %v4208_v19, %v11692_v20 }
 0x455   : > { %11693 = vst [vmem:[#allocation8_spill] sm:$0xff] %v11087_v25  ;;  %v9047_v25 = vld [vmem:[%s9289_s12 + $0x48] sm:$0xff] }
 0x456   : > { %v11089_v37 = vadd.f32 %v4904_v8, %v4358_v24  ;;  %v6133_v24 = vsel %vm6122_vm5, %v6130_v62, %v6132_v53  ;;  %v5349_v62 = vrot.slane %v5347_v42, 2  ;;  %v11702_v42 = vld [vmem:[#allocation18_spill] sm:$0xff] }
 0x458   : > { %11694 = vst [vmem:[#allocation9_spill] sm:$0xff] %v11089_v37  ;;  %v4111_v51 = vpop.f32.mrf.mxu2 }
 0x459   : > { %v4359_v19 = vadd.f32 %v4111_v51, %v11695_v12 }
 0x45a   : > { %v4810_v3 = vpop.f32.mrf.mxu0 }
 0x45b   : > { %v4210_v20 = vpop.f32.mrf.mxu3  ;;  %v4909_v40 = vpop.f32.mrf.mxu1  ;;  %v11099_v8 = vadd.f32 %v4807_v41, %v4359_v19  ;;  %v5352_v41 = vrot.slane %v5350_v63, 3  ;;  %v9080_v19 = vld [vmem:[%s9289_s12 + $0x40] sm:$0xff] }
 0x45c   : > { %v4360_v48 = vadd.f32 %v4210_v20, %v11696_v46  ;;  %v11700_v20 = vld [vmem:[#allocation16_spill] sm:$0xff] }
 0x45d   : > { %11697 = vst [vmem:[#allocation10_spill] sm:$0xff] %v11099_v8  ;;  %5589 = vmatmul.bf16.gmra.mxu2 %v5345_v55  ;;  %6286 = vmatmul.bf16.gmra.mxu0 %v6133_v24  ;;  %v5353_v50 = vor.u32 %v5352_v41, %v5349_v62  ;;  %v5356_v62 = vshrl.u32 %v9047_v25, 16 }
 0x45e   : > { %v11101_v0 = vadd.f32 %v4906_v58, %v4360_v48  ;;  %6385 = vmatmul.bf16.gmra.mxu1 %v6133_v24  ;;  %v6826_v48 = vld [vmem:[%s11494_s2 + $0x50] sm:$0xff]  ;;  %v6134_v24 = vrot.slane %v9080_v19, 3 }
 0x45f   : > { %6904 = vperm.xlu1 %9136, %v6826_v48   ;;  %v5354_v8 = vsel %vm5292_vm4, %v5344_v28, %v5353_v50  ;;  %v6824_v48 = vld [vmem:[%s11494_s2 + $0x40] sm:$0xff]  ;;  %v5359_v28 = vshll.u32 %v9047_v25, 16 }
 0x460   : > { %11698 = vst [vmem:[#allocation11_spill] sm:$0xff] %v11101_v0  ;;  %5688 = vmatmul.bf16.gmra.mxu3 %v5345_v55  ;;  %v4114_v16 = vpop.f32.mrf.mxu2  ;;  %6894 = vperm.xlu2 %9137, %v6824_v48  }
 0x461   : > { %v4361_v51 = vadd.f32 %v4114_v16, %v11699_v49  ;;  %v11701_v49 = vld [vmem:[#allocation17_spill] sm:$0xff] }
 0x462   : > { %v4812_v37 = vpop.f32.mrf.mxu0 }
 0x463   : > { %v4213_v12 = vpop.f32.mrf.mxu3  ;;  %v4911_v58 = vpop.f32.mrf.mxu1  ;;  %v11109_v55 = vadd.f32 %v4810_v3, %v4361_v51 }
 0x464   : > { %v4362_v46 = vadd.f32 %v4213_v12, %v11700_v20 }
 0x466   : > { %v11111_v45 = vadd.f32 %v4909_v40, %v4362_v46  ;;  %v6135_v40 = vsel %vm6122_vm5, %v6132_v53, %v6134_v24  ;;  %v5358_v53 = vrot.slane %v5356_v62, 2  ;;  %v11707_v62 = vld [vmem:[#allocation20_spill] sm:$0xff] }
 0x468   : > { %v4116_v16 = vpop.f32.mrf.mxu2 }
 0x469   : > { %v4363_v12 = vadd.f32 %v4116_v16, %v11701_v49 }
 0x46a   : > { %v4815_v63 = vpop.f32.mrf.mxu0 }
 0x46b   : > { %v4215_v20 = vpop.f32.mrf.mxu3  ;;  %v4914_v3 = vpop.f32.mrf.mxu1  ;;  %v11121_v51 = vadd.f32 %v4812_v37, %v4363_v12  ;;  %v5361_v37 = vrot.slane %v5359_v28, 3  ;;  %v9081_v12 = vld [vmem:[%s9289_s12 + $0x48] sm:$0xff] }
 0x46c   : > { %v4364_v0 = vadd.f32 %v4215_v20, %v11702_v42 }
 0x46d   : > { %11703 = vst [vmem:[#allocation12_spill] sm:$0xff] %v11121_v51  ;;  %5594 = vmatmul.bf16.gmra.mxu2 %v5354_v8  ;;  %6291 = vmatmul.bf16.gmra.mxu0 %v6135_v40  ;;  %v5362_v42 = vor.u32 %v5361_v37, %v5358_v53  ;;  %v9048_v51 = vld [vmem:[%s9289_s12 + $0x50] sm:$0xff] }
 0x46e   : > { %v11123_v46 = vadd.f32 %v4911_v58, %v4364_v0  ;;  %6390 = vmatmul.bf16.gmra.mxu1 %v6135_v40  ;;  %v6828_v0 = vld [vmem:[%s11494_s2 + $0x60] sm:$0xff]  ;;  %v5365_v53 = vshrl.u32 %v9048_v51, 16 }
 0x46f   : > { %6914 = vperm.xlu0 %9135, %v6828_v0   ;;  %v11706_v40 = vld [vmem:[#allocation19_spill] sm:$0xff]  ;;  %v6829_v0 = vld [vmem:[%s11494_s2 + $0x68] sm:$0xff] }
 0x470   : > { %11704 = vst [vmem:[#allocation13_spill] sm:$0xff] %v11123_v46  ;;  %5693 = vmatmul.bf16.gmra.mxu3 %v5354_v8  ;;  %v4119_v41 = vpop.f32.mrf.mxu2  ;;  %v5363_v46 = vsel %vm5292_vm4, %v5353_v50, %v5362_v42  ;;  %6919 = vperm.xlu1 %9136, %v6829_v0   ;;  %v5368_v50 = vshll.u32 %v9048_v51, 16 }
 0x471   : > { %v4365_v19 = vadd.f32 %v4119_v41, %v10707_v60  ;;  %v6136_v60 = vrot.slane %v9081_v12, 3 }
 0x472   : > { %v4817_v20 = vpop.f32.mrf.mxu0 }
 0x473   : > { %v4218_v16 = vpop.f32.mrf.mxu3  ;;  %v4916_v58 = vpop.f32.mrf.mxu1  ;;  %v11131_v8 = vadd.f32 %v4815_v63, %v4365_v19 }
 0x474   : > { %v4366_v49 = vadd.f32 %v4218_v16, %v10709_v21 }
 0x476   : > { %v11133_v25 = vadd.f32 %v4914_v3, %v4366_v49  ;;  %v6137_v3 = vsel %vm6122_vm5, %v6134_v24, %v6136_v60  ;;  %v5367_v24 = vrot.slane %v5365_v53, 2  ;;  %v11712_v53 = vld [vmem:[#allocation23_spill] sm:$0xff] }
 0x478   : > { %11705 = vst [vmem:[#allocation14_spill] sm:$0xff] %v11133_v25  ;;  %v4121_v48 = vpop.f32.mrf.mxu2  ;;  %v9049_v25 = vld [vmem:[%s9289_s12 + $0x58] sm:$0xff] }
 0x479   : > { %v4367_v21 = vadd.f32 %v4121_v48, %v11706_v40  ;;  %v11710_v40 = vld [vmem:[#allocation21_spill] sm:$0xff] }
 0x47a   : > { %v4820_v28 = vpop.f32.mrf.mxu0 }
 0x47b   : > { %v4220_v41 = vpop.f32.mrf.mxu3  ;;  %v4919_v63 = vpop.f32.mrf.mxu1  ;;  %v11143_v19 = vadd.f32 %v4817_v20, %v4367_v21  ;;  %v5370_v20 = vrot.slane %v5368_v50, 3 }
 0x47c   : > { %v4368_v16 = vadd.f32 %v4220_v41, %v11707_v62 }
 0x47d   : > { %11708 = vst [vmem:[#allocation15_spill] sm:$0xff] %v11143_v19  ;;  %5599 = vmatmul.bf16.gmra.mxu2 %v5363_v46  ;;  %6296 = vmatmul.bf16.gmra.mxu0 %v6137_v3  ;;  %v5371_v0 = vor.u32 %v5370_v20, %v5367_v24  ;;  %v5374_v24 = vshrl.u32 %v9049_v25, 16 }
 0x47e   : > { %v11145_v49 = vadd.f32 %v4916_v58, %v4368_v16  ;;  %6395 = vmatmul.bf16.gmra.mxu1 %v6137_v3  ;;  %v6827_v58 = vld [vmem:[%s11494_s2 + $0x58] sm:$0xff]  ;;  %v9082_v16 = vld [vmem:[%s9289_s12 + $0x50] sm:$0xff] }
 0x47f   : > { %6909 = vperm.xlu2 %9137, %v6827_v58   ;;  %v5372_v19 = vsel %vm5292_vm4, %v5362_v42, %v5371_v0  ;;  %v6831_v58 = vld [vmem:[%s11494_s2 + $0x78] sm:$0xff]  ;;  %v5377_v42 = vshll.u32 %v9049_v25, 16 }
 0x480   : > { %11709 = vst [vmem:[#allocation16_spill] sm:$0xff] %v11145_v49  ;;  %5698 = vmatmul.bf16.gmra.mxu3 %v5363_v46  ;;  %v4124_v37 = vpop.f32.mrf.mxu2  ;;  %6929 = vperm.xlu0 %9135, %v6831_v58  }
 0x481   : > { %v4369_v12 = vadd.f32 %v4124_v37, %v10723_v4  ;;  %v6138_v4 = vrot.slane %v9082_v16, 3  ;;  %v11711_v37 = vld [vmem:[#allocation22_spill] sm:$0xff] }
 0x482   : > { %v4822_v62 = vpop.f32.mrf.mxu0 }
 0x483   : > { %v4223_v48 = vpop.f32.mrf.mxu3  ;;  %v4921_v21 = vpop.f32.mrf.mxu1  ;;  %v11153_v46 = vadd.f32 %v4820_v28, %v4369_v12 }
 0x484   : > { %v4370_v41 = vadd.f32 %v4223_v48, %v11710_v40 }
 0x486   : > { %v11155_v51 = vadd.f32 %v4919_v63, %v4370_v41  ;;  %v6139_v63 = vsel %vm6122_vm5, %v6136_v60, %v6138_v4  ;;  %v5376_v60 = vrot.slane %v5374_v24, 2 }
 0x488   : > { %v4126_v3 = vpop.f32.mrf.mxu2 }
 0x489   : > { %v4371_v48 = vadd.f32 %v4126_v3, %v11711_v37 }
 0x48a   : > { %v4825_v50 = vpop.f32.mrf.mxu0 }
 0x48b   : > { %v4225_v40 = vpop.f32.mrf.mxu3  ;;  %v4924_v28 = vpop.f32.mrf.mxu1  ;;  %v11165_v12 = vadd.f32 %v4822_v62, %v4371_v48  ;;  %v5379_v62 = vrot.slane %v5377_v42, 3  ;;  %v9083_v48 = vld [vmem:[%s9289_s12 + $0x58] sm:$0xff] }
 0x48c   : > { %v4372_v49 = vadd.f32 %v4225_v40, %v11712_v53 }
 0x48d   : > { %5604 = vmatmul.bf16.gmra.mxu2 %v5372_v19  ;;  %6301 = vmatmul.bf16.gmra.mxu0 %v6139_v63  ;;  %v5380_v53 = vor.u32 %v5379_v62, %v5376_v60  ;;  %v6855_v62 = vpop.permute.xlu0 %6854 }
 0x48e   : > { %v11167_v41 = vadd.f32 %v4921_v21, %v4372_v49  ;;  %6400 = vmatmul.bf16.gmra.mxu1 %v6139_v63  ;;  %v6832_v49 = vld [vmem:[%s11494_s2 + $0x80] sm:$0xff] }
 0x48f   : > { %6934 = vperm.xlu1 %9136, %v6832_v49  }
 0x490   : > { %5703 = vmatmul.bf16.gmra.mxu3 %v5372_v19  ;;  %v4129_v20 = vpop.f32.mrf.mxu2 }
 0x491   : > { %v4373_v16 = vadd.f32 %v4129_v20, %v10760_v52  ;;  %v6140_v52 = vrot.slane %v9083_v48, 3  ;;  %v5381_v20 = vsel %vm5292_vm4, %v5371_v0, %v5380_v53 }
 0x492   : > { %v4827_v40 = vpop.f32.mrf.mxu0 }
 0x493   : > { %v4228_v3 = vpop.f32.mrf.mxu3  ;;  %v4926_v21 = vpop.f32.mrf.mxu1  ;;  %v11175_v19 = vadd.f32 %v4825_v50, %v4373_v16  ;;  %v6830_v50 = vld [vmem:[%s11494_s2 + $0x70] sm:$0xff] }
 0x494   : > { %v4374_v37 = vadd.f32 %v4228_v3, %v10765_v32  ;;  %v9050_v3 = vld [vmem:[%s9289_s12 + $0x60] sm:$0xff]  ;;  %6924 = vperm.xlu2 %9137, %v6830_v50  }
 0x495   : > { %11713 = vst [vmem:[#allocation17_spill] sm:$0xff] %v11175_v19 }
 0x496   : > { %v11177_v25 = vadd.f32 %v4924_v28, %v4374_v37  ;;  %v6141_v28 = vsel %vm6122_vm5, %v6138_v4, %v6140_v52 }
 0x498   : > { %11714 = vst [vmem:[#allocation18_spill] sm:$0xff] %v11177_v25  ;;  %v4131_v58 = vpop.f32.mrf.mxu2 }
 0x499   : > { %v4375_v32 = vadd.f32 %v4131_v58, %v10771_v18  ;;  %v5383_v18 = vshrl.u32 %v9050_v3, 16 }
 0x49a   : > { %v6267_v42 = vpop.f32.mrf.mxu0 }
 0x49b   : > { %v4230_v63 = vpop.f32.mrf.mxu3  ;;  %v6366_v16 = vpop.f32.mrf.mxu1  ;;  %v11187_v37 = vadd.f32 %v4827_v40, %v4375_v32  ;;  %v5385_v40 = vrot.slane %v5383_v18, 2 }
 0x49c   : > { %v4376_v24 = vadd.f32 %v4230_v63, %v10773_v39  ;;  %v5386_v39 = vshll.u32 %v9050_v3, 16 }
 0x49d   : > { %11715 = vst [vmem:[#allocation19_spill] sm:$0xff] %v11187_v37  ;;  %5609 = vmatmul.bf16.gmra.mxu2 %v5381_v20  ;;  %6306 = vmatmul.bf16.gmra.mxu0 %v6141_v28 }
 0x49e   : > { %v11189_v60 = vadd.f32 %v4926_v21, %v4376_v24  ;;  %6405 = vmatmul.bf16.gmra.mxu1 %v6141_v28  ;;  %v5388_v32 = vrot.slane %v5386_v39, 3  ;;  %v6834_v21 = vld [vmem:[%s11494_s2 + $0x90] sm:$0xff]  ;;  %v11717_v39 = vld [vmem:[#allocation24_spill] sm:$0xff] }
 0x49f   : > { %6944 = vperm.xlu0 %9135, %v6834_v21  }
 0x4a0   : > { %11716 = vst [vmem:[#allocation20_spill] sm:$0xff] %v11189_v60  ;;  %5708 = vmatmul.bf16.gmra.mxu3 %v5381_v20  ;;  %v5570_v0 = vpop.f32.mrf.mxu2  ;;  %v11198_v20 = vld [vmem:[%s9289_s12 + $0x60] sm:$0xff] }
 0x4a1   : > { %v5831_v49 = vadd.f32 %v5570_v0, %v10779_v17  ;;  %v11497_v50 = vrot.slane %v11198_v20, 3 }
 0x4a2   : > { %v6269_v58 = vpop.f32.mrf.mxu0 }
 0x4a3   : > { %v5669_v48 = vpop.f32.mrf.mxu3  ;;  %v6528_v63 = vadd.f32 %v6267_v42, %v5831_v49  ;;  %v6368_v24 = vpop.f32.mrf.mxu1  ;;  %v6835_v42 = vld [vmem:[%s11494_s2 + $0x98] sm:$0xff]  ;;  %v6143_v60 = vsel %vm6122_vm5, %v6140_v52, %v11497_v50 }
 0x4a4   : > { %v5832_v4 = vadd.f32 %v5669_v48, %v10781_v56  ;;  %v11205_v56 = vor.u32 %v5388_v32, %v5385_v40  ;;  %6949 = vperm.xlu1 %9136, %v6835_v42   ;;  %v6860_v49 = vpop.permute.xlu0 %6859  ;;  %v9051_v40 = vld [vmem:[%s9289_s12 + $0x68] sm:$0xff]  ;;  %v6865_v50 = vpop.permute.xlu1 %6864 }
 0x4a5   : > { %v7032_v32 = vmul.f32 %v6855_v62, %v6528_v63 }
 0x4a6   : > { %v6529_v3 = vadd.f32 %v6366_v16, %v5832_v4  ;;  %v5390_v4 = vsel %vm5292_vm4, %v5380_v53, %v11205_v56  ;;  %v5395_v53 = vshll.u32 %v9051_v40, 16 }
 0x4a8   : > { %v6744_v17 = vpack.c.bf16 %v6529_v3, %v6528_v63  ;;  %v5572_v28 = vpop.f32.mrf.mxu2  ;;  %v7033_v37 = vmul.f32 %v6855_v62, %v6529_v3 }
 0x4a9   : > { %v5833_v18 = vadd.f32 %v5572_v28, %v10787_v34 }
 0x4aa   : > { %6780 = vst [vmem:[%s11203_s9] sm:$0xff] %v6744_v17  ;;  %v6272_v48 = vpop.f32.mrf.mxu0  ;;  %v7187_v52 = vmul.f32 %v7033_v37, %v6529_v3 }
 0x4ab   : > { %v5671_v16 = vpop.f32.mrf.mxu3  ;;  %v6530_v21 = vadd.f32 %v6269_v58, %v5833_v18  ;;  %v6371_v17 = vpop.f32.mrf.mxu1  ;;  %v6837_v58 = vld [vmem:[%s11494_s2 + $0xa8] sm:$0xff]  ;;  %v7186_v18 = vmul.f32 %v7032_v32, %v6528_v63 }
 0x4ac   : > { %v5834_v0 = vadd.f32 %v5671_v16, %v11717_v39  ;;  %v5392_v16 = vshrl.u32 %v9051_v40, 16  ;;  %6959 = vperm.xlu0 %9135, %v6837_v58  }
 0x4ad   : > { %v7034_v34 = vmul.f32 %v6860_v49, %v6530_v21  ;;  %5614 = vmatmul.bf16.gmra.mxu2 %v5390_v4  ;;  %6311 = vmatmul.bf16.gmra.mxu0 %v6143_v60 }
 0x4ae   : > { %v6531_v25 = vadd.f32 %v6368_v24, %v5834_v0  ;;  %6410 = vmatmul.bf16.gmra.mxu1 %v6143_v60  ;;  %v6838_v60 = vld [vmem:[%s11494_s2 + $0xb0] sm:$0xff]  ;;  %v5394_v3 = vrot.slane %v5392_v16, 2 }
 0x4af   : > { %v7104_v39 = vadd.f32 %v7034_v34, %v7032_v32  ;;  %v7188_v19 = vmul.f32 %v7034_v34, %v6530_v21  ;;  %6964 = vperm.xlu1 %9136, %v6838_v60   ;;  %v5397_v34 = vrot.slane %v5395_v53, 3 }
 0x4b0   : > { %v6745_v28 = vpack.c.bf16 %v6531_v25, %v6530_v21  ;;  %v7035_v42 = vmul.f32 %v6860_v49, %v6531_v25  ;;  %5713 = vmatmul.bf16.gmra.mxu3 %v5390_v4  ;;  %v5575_v0 = vpop.f32.mrf.mxu2 }
 0x4b1   : > { %v7258_v49 = vadd.f32 %v7188_v19, %v7186_v18  ;;  %v5835_v4 = vadd.f32 %v5575_v0, %v10807_v29 }
 0x4b2   : > { %6781 = vst [vmem:[%s11203_s9 + $0x8] sm:$0xff] %v6745_v28  ;;  %v7145_v62 = vadd.f32 %v7035_v42, %v7033_v37  ;;  %v7189_v24 = vmul.f32 %v7035_v42, %v6531_v25  ;;  %v6274_v21 = vpop.f32.mrf.mxu0  ;;  %v6833_v25 = vld [vmem:[%s11494_s2 + $0x88] sm:$0xff] }
 0x4b3   : > { %v5674_v40 = vpop.f32.mrf.mxu3  ;;  %v6532_v37 = vadd.f32 %v6272_v48, %v5835_v4  ;;  %v6373_v28 = vpop.f32.mrf.mxu1  ;;  %v11233_v42 = vld [vmem:[%s9289_s12 + $0x68] sm:$0xff]  ;;  %6939 = vperm.xlu2 %9137, %v6833_v25   ;;  %v9052_v25 = vld [vmem:[%s9289_s12 + $0x70] sm:$0xff] }
 0x4b4   : > { %v7299_v63 = vadd.f32 %v7189_v24, %v7187_v52  ;;  %v5836_v32 = vadd.f32 %v5674_v40, %v10809_v11  ;;  %v11235_v52 = vor.u32 %v5397_v34, %v5394_v3  ;;  %v6840_v11 = vld [vmem:[%s11494_s2 + $0xc0] sm:$0xff]  ;;  %v6144_v24 = vrot.slane %v11233_v42, 3  ;;  %v6870_v3 = vpop.permute.xlu1 %6869 }
 0x4b5   : > { %v7036_v29 = vmul.f32 %v6865_v50, %v6532_v37  ;;  %6974 = vperm.xlu0 %9135, %v6840_v11  }
 0x4b6   : > { %v6533_v19 = vadd.f32 %v6371_v17, %v5836_v32 }
 0x4b7   : > { %v7105_v16 = vadd.f32 %v7104_v39, %v7036_v29  ;;  %v7190_v53 = vmul.f32 %v7036_v29, %v6532_v37 }
 0x4b8   : > { %v6746_v58 = vpack.c.bf16 %v6533_v19, %v6532_v37  ;;  %v7037_v18 = vmul.f32 %v6865_v50, %v6533_v19  ;;  %v5577_v60 = vpop.f32.mrf.mxu2  ;;  %v6841_v50 = vld [vmem:[%s11494_s2 + $0xc8] sm:$0xff] }
 0x4b9   : > { %v7259_v17 = vadd.f32 %v7258_v49, %v7190_v53  ;;  %v5837_v4 = vadd.f32 %v5577_v60, %v10827_v13  ;;  %6979 = vperm.xlu1 %9136, %v6841_v50   ;;  %v11718_v49 = vrot.slane %v11198_v20, 3  ;;  %v6875_v60 = vpop.permute.xlu2 %6874  ;;  %v6844_v50 = vld [vmem:[%s11494_s2 + $0xe0] sm:$0xff] }
 0x4ba   : > { %6782 = vst [vmem:[%s11203_s9 + $0x10] sm:$0xff] %v6746_v58  ;;  %v7146_v48 = vadd.f32 %v7145_v62, %v7037_v18  ;;  %v7191_v0 = vmul.f32 %v7037_v18, %v6533_v19  ;;  %v6277_v34 = vpop.f32.mrf.mxu0  ;;  %v5399_v62 = vsel %vm5292_vm4, %v11205_v56, %v11235_v52  ;;  %v5401_v18 = vshrl.u32 %v9052_v25, 16 }
 0x4bb   : > { %v5676_v40 = vpop.f32.mrf.mxu3  ;;  %v6534_v37 = vadd.f32 %v6274_v21, %v5837_v4  ;;  %v6376_v19 = vpop.f32.mrf.mxu1  ;;  %v6145_v13 = vsel %vm6122_vm5, %v11718_v49, %v6144_v24  ;;  %v5404_v56 = vshll.u32 %v9052_v25, 16  ;;  %v6843_v21 = vld [vmem:[%s11494_s2 + $0xd8] sm:$0xff] }
 0x4bc   : > { %v7300_v32 = vadd.f32 %v7299_v63, %v7191_v0  ;;  %v5838_v39 = vadd.f32 %v5676_v40, %v10829_v6  ;;  %v5403_v25 = vrot.slane %v5401_v18, 2 }
 0x4bd   : > { %v7038_v63 = vmul.f32 %v6870_v3, %v6534_v37  ;;  %5619 = vmatmul.bf16.gmra.mxu2 %v5399_v62  ;;  %6316 = vmatmul.bf16.gmra.mxu0 %v6145_v13 }
 0x4be   : > { %v6535_v29 = vadd.f32 %v6373_v28, %v5838_v39  ;;  %6415 = vmatmul.bf16.gmra.mxu1 %v6145_v13  ;;  %6989 = vperm.xlu0 %9135, %v6843_v21  }
 0x4bf   : > { %v7106_v11 = vadd.f32 %v7105_v16, %v7038_v63  ;;  %v7192_v53 = vmul.f32 %v7038_v63, %v6534_v37 }
 0x4c0   : > { %v6747_v6 = vpack.c.bf16 %v6535_v29, %v6534_v37  ;;  %v7039_v58 = vmul.f32 %v6870_v3, %v6535_v29  ;;  %5718 = vmatmul.bf16.gmra.mxu3 %v5399_v62  ;;  %v5580_v28 = vpop.f32.mrf.mxu2  ;;  %v5406_v37 = vrot.slane %v5404_v56, 3 }
 0x4c1   : > { %v7260_v4 = vadd.f32 %v7259_v17, %v7192_v53  ;;  %v5839_v40 = vadd.f32 %v5580_v28, %v10835_v54  ;;  %6994 = vperm.xlu1 %9136, %v6844_v50  }
 0x4c2   : > { %6783 = vst [vmem:[%s11203_s9 + $0x18] sm:$0xff] %v6747_v6  ;;  %v7147_v20 = vadd.f32 %v7146_v48, %v7039_v58  ;;  %v7193_v0 = vmul.f32 %v7039_v58, %v6535_v29  ;;  %v6279_v62 = vpop.f32.mrf.mxu0  ;;  %v6836_v48 = vld [vmem:[%s11494_s2 + $0xa0] sm:$0xff]  ;;  %v11269_v29 = vld [vmem:[%s9289_s12 + $0x70] sm:$0xff] }
 0x4c3   : > { %v5679_v39 = vpop.f32.mrf.mxu3  ;;  %v6536_v49 = vadd.f32 %v6277_v34, %v5839_v40  ;;  %v6378_v13 = vpop.f32.mrf.mxu1  ;;  %6954 = vperm.xlu2 %9137, %v6836_v48   ;;  %v6146_v56 = vrot.slane %v11269_v29, 3 }
 0x4c4   : > { %v7301_v3 = vadd.f32 %v7300_v32, %v7193_v0  ;;  %v5840_v16 = vadd.f32 %v5679_v39, %v10837_v1  ;;  %v11271_v32 = vor.u32 %v5406_v37, %v5403_v25  ;;  %v6846_v1 = vld [vmem:[%s11494_s2 + $0xf0] sm:$0xff]  ;;  %v6880_v39 = vpop.permute.xlu2 %6879  ;;  %v9053_v25 = vld [vmem:[%s9289_s12 + $0x78] sm:$0xff] }
 0x4c5   : > { %v7040_v54 = vmul.f32 %v6875_v60, %v6536_v49  ;;  %v6839_v37 = vld [vmem:[%s11494_s2 + $0xb8] sm:$0xff] }
 0x4c6   : > { %v6537_v17 = vadd.f32 %v6376_v19, %v5840_v16  ;;  %7004 = vperm.xlu0 %9135, %v6846_v1   ;;  %v6847_v19 = vld [vmem:[%s11494_s2 + $0xf8] sm:$0xff] }
 0x4c7   : > { %v7107_v58 = vadd.f32 %v7106_v11, %v7040_v54  ;;  %v7194_v18 = vmul.f32 %v7040_v54, %v6536_v49  ;;  %v11719_v11 = vld [vmem:[#allocation25_spill] sm:$0xff]  ;;  %v5410_v54 = vshrl.u32 %v9053_v25, 16 }
 0x4c8   : > { %v6748_v63 = vpack.c.bf16 %v6537_v17, %v6536_v49  ;;  %v7041_v6 = vmul.f32 %v6875_v60, %v6537_v17  ;;  %v5582_v53 = vpop.f32.mrf.mxu2 }
 0x4c9   : > { %v7261_v0 = vadd.f32 %v7260_v4, %v7194_v18  ;;  %v5841_v28 = vadd.f32 %v5582_v53, %v10843_v22  ;;  %7009 = vperm.xlu1 %9136, %v6847_v19   ;;  %v6147_v22 = vsel %vm6122_vm5, %v6144_v24, %v6146_v56  ;;  %v6850_v18 = vld [vmem:[%s11494_s2 + $0x110] sm:$0xff]  ;;  %v11720_v53 = vld [vmem:[#allocation26_spill] sm:$0xff] }
 0x4ca   : > { %6784 = vst [vmem:[%s11203_s9 + $0x20] sm:$0xff] %v6748_v63  ;;  %v7148_v34 = vadd.f32 %v7147_v20, %v7041_v6  ;;  %v7195_v21 = vmul.f32 %v7041_v6, %v6537_v17  ;;  %v6282_v16 = vpop.f32.mrf.mxu0  ;;  %v5408_v20 = vsel %vm5292_vm4, %v11235_v52, %v11271_v32  ;;  %v5413_v63 = vshll.u32 %v9053_v25, 16 }
 0x4cb   : > { %v5681_v60 = vpop.f32.mrf.mxu3  ;;  %v6538_v48 = vadd.f32 %v6279_v62, %v5841_v28  ;;  %v6381_v4 = vpop.f32.mrf.mxu1  ;;  %6969 = vperm.xlu2 %9137, %v6839_v37   ;;  %v6849_v62 = vld [vmem:[%s11494_s2 + $0x108] sm:$0xff] }
 0x4cc   : > { %v7302_v50 = vadd.f32 %v7301_v3, %v7195_v21  ;;  %v5842_v40 = vadd.f32 %v5681_v60, %v11719_v11 }
 0x4cd   : > { %v7042_v49 = vmul.f32 %v6880_v39, %v6538_v48  ;;  %5624 = vmatmul.bf16.gmra.mxu2 %v5408_v20  ;;  %6321 = vmatmul.bf16.gmra.mxu0 %v6147_v22 }
 0x4ce   : > { %v6539_v3 = vadd.f32 %v6378_v13, %v5842_v40  ;;  %6420 = vmatmul.bf16.gmra.mxu1 %v6147_v22  ;;  %7019 = vperm.xlu0 %9135, %v6849_v62  }
 0x4cf   : > { %v7108_v6 = vadd.f32 %v7107_v58, %v7042_v49  ;;  %v7196_v42 = vmul.f32 %v7042_v49, %v6538_v48  ;;  %v6885_v58 = vpop.permute.xlu0 %6884 }
 0x4d0   : > { %v6749_v52 = vpack.c.bf16 %v6539_v3, %v6538_v48  ;;  %v7043_v17 = vmul.f32 %v6880_v39, %v6539_v3  ;;  %5723 = vmatmul.bf16.gmra.mxu3 %v5408_v20  ;;  %v5585_v13 = vpop.f32.mrf.mxu2  ;;  %v5412_v39 = vrot.slane %v5410_v54, 2  ;;  %v6842_v20 = vld [vmem:[%s11494_s2 + $0xd0] sm:$0xff]  ;;  %v11308_v48 = vld [vmem:[%s9289_s12 + $0x78] sm:$0xff] }
 0x4d1   : > { %v7262_v21 = vadd.f32 %v7261_v0, %v7196_v42  ;;  %v5843_v19 = vadd.f32 %v5585_v13, %v11720_v53  ;;  %7024 = vperm.xlu1 %9136, %v6850_v18   ;;  %v6890_v18 = vpop.permute.xlu1 %6889 }
 0x4d2   : > { %6785 = vst [vmem:[%s11203_s9 + $0x28] sm:$0xff] %v6749_v52  ;;  %v7149_v24 = vadd.f32 %v7148_v34, %v7043_v17  ;;  %v7197_v1 = vmul.f32 %v7043_v17, %v6539_v3  ;;  %v6284_v40 = vpop.f32.mrf.mxu0  ;;  %v5415_v34 = vrot.slane %v5413_v63, 3  ;;  %v6148_v17 = vrot.slane %v11308_v48, 3 }
 0x4d3   : > { %v5684_v28 = vpop.f32.mrf.mxu3  ;;  %v6540_v25 = vadd.f32 %v6282_v16, %v5843_v19  ;;  %v6383_v37 = vpop.f32.mrf.mxu1  ;;  %6984 = vperm.xlu2 %9137, %v6842_v20   ;;  %v9054_v19 = vld [vmem:[%s9289_s12 + $0x80] sm:$0xff] }
 0x4d4   : > { %v7303_v60 = vadd.f32 %v7302_v50, %v7197_v1  ;;  %v5844_v11 = vadd.f32 %v5684_v28, %v10865_v9  ;;  %v11310_v49 = vor.u32 %v5415_v34, %v5412_v39  ;;  %v5422_v39 = vshll.u32 %v9054_v19, 16 }
 0x4d5   : > { %v7044_v22 = vmul.f32 %v6885_v58, %v6540_v25 }
 0x4d6   : > { %v6541_v0 = vadd.f32 %v6381_v4, %v5844_v11 }
 0x4d7   : > { %v7109_v9 = vadd.f32 %v7108_v6, %v7044_v22  ;;  %v7198_v52 = vmul.f32 %v7044_v22, %v6540_v25  ;;  %v5417_v6 = vsel %vm5292_vm4, %v11271_v32, %v11310_v49 }
 0x4d8   : > { %v6750_v3 = vpack.c.bf16 %v6541_v0, %v6540_v25  ;;  %v7045_v50 = vmul.f32 %v6885_v58, %v6541_v0  ;;  %v5587_v62 = vpop.f32.mrf.mxu2  ;;  %v5419_v58 = vshrl.u32 %v9054_v19, 16 }
 0x4d9   : > { %v7263_v16 = vadd.f32 %v7262_v21, %v7198_v52  ;;  %v5845_v42 = vadd.f32 %v5587_v62, %v10871_v43  ;;  %v6149_v43 = vsel %vm6122_vm5, %v6146_v56, %v6148_v17  ;;  %v5424_v62 = vrot.slane %v5422_v39, 3 }
 0x4da   : > { %6786 = vst [vmem:[%s11203_s9 + $0x30] sm:$0xff] %v6750_v3  ;;  %v7150_v54 = vadd.f32 %v7149_v24, %v7045_v50  ;;  %v7199_v63 = vmul.f32 %v7045_v50, %v6541_v0  ;;  %v6287_v53 = vpop.f32.mrf.mxu0  ;;  %v6845_v24 = vld [vmem:[%s11494_s2 + $0xe8] sm:$0xff]  ;;  %v6895_v50 = vpop.permute.xlu2 %6894 }
 0x4db   : > { %v5686_v1 = vpop.f32.mrf.mxu3  ;;  %v6542_v28 = vadd.f32 %v6284_v40, %v5845_v42  ;;  %v6386_v21 = vpop.f32.mrf.mxu1  ;;  %6999 = vperm.xlu2 %9137, %v6845_v24  }
 0x4dc   : > { %v7304_v13 = vadd.f32 %v7303_v60, %v7199_v63  ;;  %v5846_v4 = vadd.f32 %v5686_v1, %v10873_v61  ;;  %v5421_v63 = vrot.slane %v5419_v58, 2  ;;  %v11335_v1 = vld [vmem:[%s9289_s12 + $0x80] sm:$0xff] }
 0x4dd   : > { %v7046_v60 = vmul.f32 %v6890_v18, %v6542_v28  ;;  %5629 = vmatmul.bf16.gmra.mxu2 %v5417_v6  ;;  %6326 = vmatmul.bf16.gmra.mxu0 %v6149_v43  ;;  %v6150_v19 = vrot.slane %v11335_v1, 3 }
 0x4de   : > { %v6543_v61 = vadd.f32 %v6383_v37, %v5846_v4  ;;  %6425 = vmatmul.bf16.gmra.mxu1 %v6149_v43 }
 0x4df   : > { %v7110_v40 = vadd.f32 %v7109_v9, %v7046_v60  ;;  %v7200_v34 = vmul.f32 %v7046_v60, %v6542_v28  ;;  %v6848_v9 = vld [vmem:[%s11494_s2 + $0x100] sm:$0xff] }
 0x4e0   : > { %v6751_v32 = vpack.c.bf16 %v6543_v61, %v6542_v28  ;;  %v7047_v11 = vmul.f32 %v6890_v18, %v6543_v61  ;;  %5728 = vmatmul.bf16.gmra.mxu3 %v5417_v6  ;;  %v5590_v29 = vpop.f32.mrf.mxu2  ;;  %v11337_v18 = vor.u32 %v5424_v62, %v5421_v63 }
 0x4e1   : > { %v7264_v0 = vadd.f32 %v7263_v16, %v7200_v34  ;;  %v5847_v56 = vadd.f32 %v5590_v29, %v10891_v14  ;;  %v6851_v34 = vld [vmem:[%s11494_s2 + $0x118] sm:$0xff] }
 0x4e2   : > { %6787 = vst [vmem:[%s11203_s9 + $0x38] sm:$0xff] %v6751_v32  ;;  %v7151_v20 = vadd.f32 %v7150_v54, %v7047_v11  ;;  %v7201_v25 = vmul.f32 %v7047_v11, %v6543_v61  ;;  %v6289_v52 = vpop.f32.mrf.mxu0  ;;  %v6900_v11 = vpop.permute.xlu0 %6899  ;;  %v5426_v39 = vsel %vm5292_vm4, %v11310_v49, %v11337_v18 }
 0x4e3   : > { %v5689_v37 = vpop.f32.mrf.mxu3  ;;  %v6544_v42 = vadd.f32 %v6287_v53, %v5847_v56  ;;  %v6388_v54 = vpop.f32.mrf.mxu1  ;;  %7014 = vperm.xlu2 %9137, %v6848_v9  }
 0x4e4   : > { %v7305_v22 = vadd.f32 %v7304_v13, %v7201_v25  ;;  %v5848_v3 = vadd.f32 %v5689_v37, %v10893_v10 }
 0x4e5   : > { %v7048_v14 = vmul.f32 %v6895_v50, %v6544_v42 }
 0x4e6   : > { %v6545_v16 = vadd.f32 %v6386_v21, %v5848_v3 }
 0x4e7   : > { %v7111_v10 = vadd.f32 %v7110_v40, %v7048_v14  ;;  %v7202_v6 = vmul.f32 %v7048_v14, %v6544_v42  ;;  %v9055_v40 = vld [vmem:[%s9289_s12 + $0x88] sm:$0xff] }
 0x4e8   : > { %v6752_v4 = vpack.c.bf16 %v6545_v16, %v6544_v42  ;;  %v7049_v13 = vmul.f32 %v6895_v50, %v6545_v16  ;;  %v5592_v43 = vpop.f32.mrf.mxu2  ;;  %v5428_v56 = vshrl.u32 %v9055_v40, 16  ;;  %v5431_v37 = vshll.u32 %v9055_v40, 16 }
 0x4e9   : > { %v7265_v53 = vadd.f32 %v7264_v0, %v7202_v6  ;;  %v5849_v61 = vadd.f32 %v5592_v43, %v10899_v35  ;;  %v6151_v35 = vsel %vm6122_vm5, %v6148_v17, %v6150_v19  ;;  %v11359_v6 = vld [vmem:[%s9289_s12 + $0x88] sm:$0xff] }
 0x4ea   : > { %6788 = vst [vmem:[%s11203_s9 + $0x40] sm:$0xff] %v6752_v4  ;;  %v7152_v24 = vadd.f32 %v7151_v20, %v7049_v13  ;;  %v7203_v28 = vmul.f32 %v7049_v13, %v6545_v16  ;;  %v6292_v58 = vpop.f32.mrf.mxu0  ;;  %v5430_v14 = vrot.slane %v5428_v56, 2  ;;  %v5433_v4 = vrot.slane %v5431_v37, 3 }
 0x4eb   : > { %v5691_v60 = vpop.f32.mrf.mxu3  ;;  %v6546_v20 = vadd.f32 %v6289_v52, %v5849_v61  ;;  %v6391_v25 = vpop.f32.mrf.mxu1  ;;  %7029 = vperm.xlu2 %9137, %v6851_v34  }
 0x4ec   : > { %v7306_v32 = vadd.f32 %v7305_v22, %v7203_v28  ;;  %v5850_v21 = vadd.f32 %v5691_v60, %v10901_v36 }
 0x4ed   : > { %v7050_v29 = vmul.f32 %v6900_v11, %v6546_v20  ;;  %5634 = vmatmul.bf16.gmra.mxu2 %v5426_v39  ;;  %6331 = vmatmul.bf16.gmra.mxu0 %v6151_v35 }
 0x4ee   : > { %v6547_v36 = vadd.f32 %v6388_v54, %v5850_v21  ;;  %6430 = vmatmul.bf16.gmra.mxu1 %v6151_v35  ;;  %v6905_v54 = vpop.permute.xlu1 %6904 }
 0x4ef   : > { %v7112_v22 = vadd.f32 %v7111_v10, %v7050_v29  ;;  %v7204_v3 = vmul.f32 %v7050_v29, %v6546_v20  ;;  %v9056_v29 = vld [vmem:[%s9289_s12 + $0x90] sm:$0xff] }
 0x4f0   : > { %v6753_v49 = vpack.c.bf16 %v6547_v36, %v6546_v20  ;;  %v7051_v0 = vmul.f32 %v6900_v11, %v6547_v36  ;;  %5733 = vmatmul.bf16.gmra.mxu3 %v5426_v39  ;;  %v5595_v48 = vpop.f32.mrf.mxu2 }
 0x4f1   : > { %v7266_v63 = vadd.f32 %v7265_v53, %v7204_v3  ;;  %v5851_v17 = vadd.f32 %v5595_v48, %v10907_v33  ;;  %v11361_v53 = vor.u32 %v5433_v4, %v5430_v14  ;;  %v5437_v3 = vshrl.u32 %v9056_v29, 16 }
 0x4f2   : > { %6789 = vst [vmem:[%s11203_s9 + $0x48] sm:$0xff] %v6753_v49  ;;  %v7153_v50 = vadd.f32 %v7152_v24, %v7051_v0  ;;  %v7205_v52 = vmul.f32 %v7051_v0, %v6547_v36  ;;  %v6294_v16 = vpop.f32.mrf.mxu0 }
 0x4f3   : > { %v5694_v62 = vpop.f32.mrf.mxu3  ;;  %v6548_v13 = vadd.f32 %v6292_v58, %v5851_v17  ;;  %v6393_v10 = vpop.f32.mrf.mxu1  ;;  %v5435_v36 = vsel %vm5292_vm4, %v11337_v18, %v11361_v53  ;;  %v5440_v18 = vshll.u32 %v9056_v29, 16  ;;  %v5439_v14 = vrot.slane %v5437_v3, 2 }
 0x4f4   : > { %v7307_v9 = vadd.f32 %v7306_v32, %v7205_v52  ;;  %v5852_v42 = vadd.f32 %v5694_v62, %v10909_v59  ;;  %v6152_v59 = vrot.slane %v11359_v6, 3 }
 0x4f5   : > { %v7052_v24 = vmul.f32 %v6905_v54, %v6548_v13  ;;  %v5442_v4 = vrot.slane %v5440_v18, 3 }
 0x4f6   : > { %v6549_v28 = vadd.f32 %v6391_v25, %v5852_v42  ;;  %v6910_v25 = vpop.permute.xlu2 %6909 }
 0x4f7   : > { %v7113_v33 = vadd.f32 %v7112_v22, %v7052_v24  ;;  %v7206_v60 = vmul.f32 %v7052_v24, %v6548_v13 }
 0x4f8   : > { %v6754_v43 = vpack.c.bf16 %v6549_v28, %v6548_v13  ;;  %v7053_v61 = vmul.f32 %v6905_v54, %v6549_v28  ;;  %v5597_v11 = vpop.f32.mrf.mxu2  ;;  %v6915_v54 = vpop.permute.xlu0 %6914 }
 0x4f9   : > { %v7267_v39 = vadd.f32 %v7266_v63, %v7206_v60  ;;  %v5853_v58 = vadd.f32 %v5597_v11, %v10927_v31  ;;  %v6153_v31 = vsel %vm6122_vm5, %v6150_v19, %v6152_v59  ;;  %v11382_v60 = vor.u32 %v5442_v4, %v5439_v14  ;;  %v11401_v14 = vld [vmem:[%s9289_s12 + $0x98] sm:$0xff]  ;;  %v5181_v4 = vld [vmem:[%s9289_s12 + $0xa0] sm:$0x7] }
 0x4fa   : > { %6790 = vst [vmem:[%s11203_s9 + $0x50] sm:$0xff] %v6754_v43  ;;  %v7154_v32 = vadd.f32 %v7153_v50, %v7053_v61  ;;  %v7207_v21 = vmul.f32 %v7053_v61, %v6549_v28  ;;  %v6297_v35 = vpop.f32.mrf.mxu0  ;;  %v11380_v28 = vld [vmem:[%s9289_s12 + $0x90] sm:$0xff] }
 0x4fb   : > { %v5696_v40 = vpop.f32.mrf.mxu3  ;;  %v6550_v49 = vadd.f32 %v6294_v16, %v5853_v58  ;;  %v6396_v0 = vpop.f32.mrf.mxu1  ;;  %v5444_v29 = vsel %vm5292_vm4, %v11361_v53, %v11382_v60 }
 0x4fc   : > { %v7308_v34 = vadd.f32 %v7307_v9, %v7207_v21  ;;  %v5854_v20 = vadd.f32 %v5696_v40, %v10929_v44 }
 0x4fd   : > { %v7054_v37 = vmul.f32 %v6910_v25, %v6550_v49  ;;  %5639 = vmatmul.bf16.gmra.mxu2 %v5435_v36  ;;  %6336 = vmatmul.bf16.gmra.mxu0 %v6153_v31 }
 0x4fe   : > { %v6551_v56 = vadd.f32 %v6393_v10, %v5854_v20  ;;  %6435 = vmatmul.bf16.gmra.mxu1 %v6153_v31 }
 0x4ff   : > { %v7114_v50 = vadd.f32 %v7113_v33, %v7054_v37  ;;  %v7208_v52 = vmul.f32 %v7054_v37, %v6550_v49 }
 0x500   : > { %v6755_v44 = vpack.c.bf16 %v6551_v56, %v6550_v49  ;;  %v7055_v22 = vmul.f32 %v6910_v25, %v6551_v56  ;;  %5738 = vmatmul.bf16.gmra.mxu3 %v5435_v36  ;;  %v5600_v17 = vpop.f32.mrf.mxu2  ;;  %v9057_v49 = vld [vmem:[%s9289_s12 + $0x98] sm:$0xff] }
 0x501   : > { %v7268_v1 = vadd.f32 %v7267_v39, %v7208_v52  ;;  %v5855_v19 = vadd.f32 %v5600_v17, %v10947_v30  ;;  %v5449_v53 = vshll.u32 %v9057_v49, 16 }
 0x502   : > { %6791 = vst [vmem:[%s11203_s9 + $0x58] sm:$0xff] %v6755_v44  ;;  %v7155_v48 = vadd.f32 %v7154_v32, %v7055_v22  ;;  %v7209_v63 = vmul.f32 %v7055_v22, %v6551_v56  ;;  %v6299_v16 = vpop.f32.mrf.mxu0  ;;  %v5446_v22 = vshrl.u32 %v9057_v49, 16 }
 0x503   : > { %v5699_v62 = vpop.f32.mrf.mxu3  ;;  %v6552_v13 = vadd.f32 %v6297_v35, %v5855_v19  ;;  %v6398_v10 = vpop.f32.mrf.mxu1 }
 0x504   : > { %v7309_v9 = vadd.f32 %v7308_v34, %v7209_v63  ;;  %v5856_v42 = vadd.f32 %v5699_v62, %v10949_v57  ;;  %v6154_v57 = vrot.slane %v11380_v28, 3  ;;  %v6920_v35 = vpop.permute.xlu1 %6919  ;;  %v6925_v19 = vpop.permute.xlu2 %6924 }
 0x505   : > { %v7056_v43 = vmul.f32 %v6915_v54, %v6552_v13 }
 0x506   : > { %v6553_v24 = vadd.f32 %v6396_v0, %v5856_v42  ;;  %v5451_v42 = vrot.slane %v5449_v53, 3 }
 0x507   : > { %v7115_v30 = vadd.f32 %v7114_v50, %v7056_v43  ;;  %v7210_v32 = vmul.f32 %v7056_v43, %v6552_v13 }
 0x508   : > { %v6756_v61 = vpack.c.bf16 %v6553_v24, %v6552_v13  ;;  %v7057_v33 = vmul.f32 %v6915_v54, %v6553_v24  ;;  %v5602_v39 = vpop.f32.mrf.mxu2 }
 0x509   : > { %v7269_v58 = vadd.f32 %v7268_v1, %v7210_v32  ;;  %v5857_v40 = vadd.f32 %v5602_v39, %v10955_v47  ;;  %v6155_v47 = vsel %vm6122_vm5, %v6152_v59, %v6154_v57 }
 0x50a   : > { %6792 = vst [vmem:[%s11203_s9 + $0x60] sm:$0xff] %v6756_v61  ;;  %v7156_v21 = vadd.f32 %v7155_v48, %v7057_v33  ;;  %v7211_v11 = vmul.f32 %v7057_v33, %v6553_v24  ;;  %v6302_v36 = vpop.f32.mrf.mxu0 }
 0x50b   : > { %v5701_v34 = vpop.f32.mrf.mxu3  ;;  %v6554_v0 = vadd.f32 %v6299_v16, %v5857_v40  ;;  %v6401_v31 = vpop.f32.mrf.mxu1 }
 0x50c   : > { %v7310_v20 = vadd.f32 %v7309_v9, %v7211_v11  ;;  %v5858_v25 = vadd.f32 %v5701_v34, %v10957_v23  ;;  %v5448_v9 = vrot.slane %v5446_v22, 2 }
 0x50d   : > { %v7058_v37 = vmul.f32 %v6920_v35, %v6554_v0  ;;  %5644 = vmatmul.bf16.gmra.mxu2 %v5444_v29  ;;  %6341 = vmatmul.bf16.gmra.mxu0 %v6155_v47 }
 0x50e   : > { %v6555_v56 = vadd.f32 %v6398_v10, %v5858_v25  ;;  %6440 = vmatmul.bf16.gmra.mxu1 %v6155_v47  ;;  %v11404_v61 = vor.u32 %v5451_v42, %v5448_v9 }
 0x50f   : > { %v7116_v3 = vadd.f32 %v7115_v30, %v7058_v37  ;;  %v7212_v18 = vmul.f32 %v7058_v37, %v6554_v0 }
 0x510   : > { %v6757_v23 = vpack.c.bf16 %v6555_v56, %v6554_v0  ;;  %v7059_v44 = vmul.f32 %v6920_v35, %v6555_v56  ;;  %5743 = vmatmul.bf16.gmra.mxu3 %v5444_v29  ;;  %v5605_v6 = vpop.f32.mrf.mxu2  ;;  %v6930_v35 = vpop.permute.xlu0 %6929  ;;  %v5453_v29 = vsel %vm5292_vm4, %v11382_v60, %v11404_v61 }
 0x511   : > { %v7270_v48 = vadd.f32 %v7269_v58, %v7212_v18  ;;  %v5859_v59 = vadd.f32 %v5605_v6, %v10963_v5  ;;  %v5272_v5 = vunpack.c.l.b16 %v5181_v4 }
 0x512   : > { %6793 = vst [vmem:[%s11203_s9 + $0x68] sm:$0xff] %v6757_v23  ;;  %v7157_v50 = vadd.f32 %v7156_v21, %v7059_v44  ;;  %v7213_v52 = vmul.f32 %v7059_v44, %v6555_v56  ;;  %v6304_v62 = vpop.f32.mrf.mxu0  ;;  %v6011_v56 = vld [vmem:[%s9289_s12 + $0xa0] sm:$0x7]  ;;  %s8801_s12 = sshll.u32 %s11752_s16, 2 }
 0x513   : > { %v5704_v63 = vpop.f32.mrf.mxu3  ;;  %v6556_v54 = vadd.f32 %v6302_v36, %v5859_v59  ;;  %v6403_v16 = vpop.f32.mrf.mxu1  ;;  %v5291_v49 = vpack.c.b16 %v5272_v5, %v5272_v5  ;;  %v6102_v18 = vunpack.c.l.b16 %v6011_v56  ;;  %s210_s28 = scalar_lea.vmem %s11496_s4, %s8801_s12 }
 0x514   : > { %v7311_v17 = vadd.f32 %v7310_v20, %v7213_v52  ;;  %v5860_v1 = vadd.f32 %v5704_v63, %v10965_v7  ;;  %v6156_v7 = vrot.slane %v11401_v14, 3  ;;  %v11721_v20 = vld [vmem:[#allocation27_spill] sm:$0xff] }
 0x515   : > { %v7060_v10 = vmul.f32 %v6925_v19, %v6556_v54  ;;  %v5455_v60 = vshrl.u32 %v5291_v49, 16  ;;  %v5458_v22 = vshll.u32 %v5291_v49, 16  ;;  %v6121_v4 = vpack.c.b16 %v6102_v18, %v6102_v18 }
 0x516   : > { %v6557_v13 = vadd.f32 %v6401_v31, %v5860_v1 }
 0x517   : > { %v7117_v33 = vadd.f32 %v7116_v3, %v7060_v10  ;;  %v7214_v30 = vmul.f32 %v7060_v10, %v6556_v54  ;;  %v5457_v9 = vrot.slane %v5455_v60, 2  ;;  %v5460_v42 = vrot.slane %v5458_v22, 3 }
 0x518   : > { %v6758_v24 = vpack.c.bf16 %v6557_v13, %v6556_v54  ;;  %v7061_v43 = vmul.f32 %v6925_v19, %v6557_v13  ;;  %v5607_v11 = vpop.f32.mrf.mxu2  ;;  %v6935_v19 = vpop.permute.xlu1 %6934 }
 0x519   : > { %v7271_v39 = vadd.f32 %v7270_v48, %v7214_v30  ;;  %v5861_v58 = vadd.f32 %v5607_v11, %v10972_v38  ;;  %v6157_v38 = vsel %vm6122_vm5, %v6154_v57, %v6156_v7  ;;  %v11722_v57 = vld [vmem:[#allocation28_spill] sm:$0xff]  ;;  %v5461_v5 = vor.u32 %v5460_v42, %v5457_v9 }
 0x51a   : > { %6794 = vst [vmem:[%s11203_s9 + $0x70] sm:$0xff] %v6758_v24  ;;  %v7158_v32 = vadd.f32 %v7157_v50, %v7061_v43  ;;  %v7215_v21 = vmul.f32 %v7061_v43, %v6557_v13  ;;  %v6307_v36 = vpop.f32.mrf.mxu0 }
 0x51b   : > { %v5706_v40 = vpop.f32.mrf.mxu3  ;;  %v6558_v0 = vadd.f32 %v6304_v62, %v5861_v58  ;;  %v6406_v31 = vpop.f32.mrf.mxu1 }
 0x51c   : > { %v7312_v34 = vadd.f32 %v7311_v17, %v7215_v21  ;;  %v5862_v25 = vadd.f32 %v5706_v40, %v11721_v20  ;;  %v11723_v17 = vld [vmem:[#allocation29_spill] sm:$0xff]  ;;  %v11724_v40 = vld [vmem:[#allocation30_spill] sm:$0xff] }
 0x51d   : > { %v7062_v37 = vmul.f32 %v6930_v35, %v6558_v0  ;;  %5649 = vmatmul.bf16.gmra.mxu2 %v5453_v29  ;;  %6346 = vmatmul.bf16.gmra.mxu0 %v6157_v38 }
 0x51e   : > { %v6559_v47 = vadd.f32 %v6403_v16, %v5862_v25  ;;  %6445 = vmatmul.bf16.gmra.mxu1 %v6157_v38 }
 0x51f   : > { %v7118_v53 = vadd.f32 %v7117_v33, %v7062_v37  ;;  %v7216_v3 = vmul.f32 %v7062_v37, %v6558_v0 }
 0x520   : > { %v6759_v23 = vpack.c.bf16 %v6559_v47, %v6558_v0  ;;  %v7063_v44 = vmul.f32 %v6930_v35, %v6559_v47  ;;  %5748 = vmatmul.bf16.gmra.mxu3 %v5453_v29  ;;  %v5610_v52 = vpop.f32.mrf.mxu2  ;;  %v11725_v35 = vld [vmem:[#allocation31_spill] sm:$0xff]  ;;  %v6940_v29 = vpop.permute.xlu2 %6939  ;;  %v5462_v0 = vsel %vm5292_vm4, %v11404_v61, %v5461_v5 }
 0x521   : > { %v7272_v6 = vadd.f32 %v7271_v39, %v7216_v3  ;;  %v5863_v48 = vadd.f32 %v5610_v52, %v11722_v57 }
 0x522   : > { %6795 = vst [vmem:[%s11203_s9 + $0x78] sm:$0xff] %v6759_v23  ;;  %v7159_v50 = vadd.f32 %v7158_v32, %v7063_v44  ;;  %v7217_v28 = vmul.f32 %v7063_v44, %v6559_v47  ;;  %v6309_v62 = vpop.f32.mrf.mxu0  ;;  %v6158_v32 = vrot.slane %v6121_v4, 3  ;;  %v11727_v4 = vld [vmem:[#allocation33_spill] sm:$0xff] }
 0x523   : > { %v5709_v59 = vpop.f32.mrf.mxu3  ;;  %v6560_v54 = vadd.f32 %v6307_v36, %v5863_v48  ;;  %v6408_v16 = vpop.f32.mrf.mxu1 }
 0x524   : > { %v7313_v63 = vadd.f32 %v7312_v34, %v7217_v28  ;;  %v5864_v1 = vadd.f32 %v5709_v59, %v11723_v17  ;;  %v6159_v47 = vsel %vm6122_vm5, %v6156_v7, %v6158_v32  ;;  %v11726_v28 = vld [vmem:[#allocation32_spill] sm:$0xff] }
 0x525   : > { %v7064_v10 = vmul.f32 %v6935_v19, %v6560_v54 }
 0x526   : > { %v6561_v13 = vadd.f32 %v6406_v31, %v5864_v1 }
 0x527   : > { %v7119_v33 = vadd.f32 %v7118_v53, %v7064_v10  ;;  %v7218_v30 = vmul.f32 %v7064_v10, %v6560_v54 }
 0x528   : > { %v6760_v24 = vpack.c.bf16 %v6561_v13, %v6560_v54  ;;  %v7065_v43 = vmul.f32 %v6935_v19, %v6561_v13  ;;  %v5612_v39 = vpop.f32.mrf.mxu2 }
 0x529   : > { %v7273_v58 = vadd.f32 %v7272_v6, %v7218_v30  ;;  %v5865_v34 = vadd.f32 %v5612_v39, %v11724_v40  ;;  %v6945_v6 = vpop.permute.xlu0 %6944 }
 0x52a   : > { %6796 = vst [vmem:[%s11203_s9 + $0x80] sm:$0xff] %v6760_v24  ;;  %v7160_v21 = vadd.f32 %v7159_v50, %v7065_v43  ;;  %v7219_v11 = vmul.f32 %v7065_v43, %v6561_v13  ;;  %v6312_v49 = vpop.f32.mrf.mxu0  ;;  %v11728_v43 = vld [vmem:[#allocation34_spill] sm:$0xff] }
 0x52b   : > { %v5711_v20 = vpop.f32.mrf.mxu3  ;;  %v6562_v31 = vadd.f32 %v6309_v62, %v5865_v34  ;;  %v6411_v38 = vpop.f32.mrf.mxu1 }
 0x52c   : > { %v7314_v25 = vadd.f32 %v7313_v63, %v7219_v11  ;;  %v5866_v36 = vadd.f32 %v5711_v20, %v11725_v35  ;;  %v6950_v11 = vpop.permute.xlu1 %6949 }
 0x52d   : > { %v7066_v37 = vmul.f32 %v6940_v29, %v6562_v31  ;;  %5654 = vmatmul.bf16.gmra.mxu2 %v5462_v0  ;;  %6351 = vmatmul.bf16.gmra.mxu0 %v6159_v47 }
 0x52e   : > { %v6563_v56 = vadd.f32 %v6408_v16, %v5866_v36  ;;  %6450 = vmatmul.bf16.gmra.mxu1 %v6159_v47  ;;  %v11730_v47 = vld [vmem:[#allocation36_spill] sm:$0xff] }
 0x52f   : > { %v7120_v60 = vadd.f32 %v7119_v33, %v7066_v37  ;;  %v7220_v22 = vmul.f32 %v7066_v37, %v6562_v31 }
 0x530   : > { %v6761_v23 = vpack.c.bf16 %v6563_v56, %v6562_v31  ;;  %v7067_v44 = vmul.f32 %v6940_v29, %v6563_v56  ;;  %5753 = vmatmul.bf16.gmra.mxu3 %v5462_v0  ;;  %v5615_v61 = vpop.f32.mrf.mxu2 }
 0x531   : > { %v7274_v18 = vadd.f32 %v7273_v58, %v7220_v22  ;;  %v5867_v14 = vadd.f32 %v5615_v61, %v11002_v27 }
 0x532   : > { %6797 = vst [vmem:[%s11203_s9 + $0x88] sm:$0xff] %v6761_v23  ;;  %v7161_v53 = vadd.f32 %v7160_v21, %v7067_v44  ;;  %v7221_v3 = vmul.f32 %v7067_v44, %v6563_v56  ;;  %v6314_v57 = vpop.f32.mrf.mxu0 }
 0x533   : > { %v5714_v50 = vpop.f32.mrf.mxu3  ;;  %v6564_v48 = vadd.f32 %v6312_v49, %v5867_v14  ;;  %v6413_v59 = vpop.f32.mrf.mxu1  ;;  %v11729_v49 = vld [vmem:[#allocation35_spill] sm:$0xff] }
 0x534   : > { %v7315_v7 = vadd.f32 %v7314_v25, %v7221_v3  ;;  %v5868_v52 = vadd.f32 %v5714_v50, %v11726_v28 }
 0x535   : > { %v7068_v17 = vmul.f32 %v6945_v6, %v6564_v48 }
 0x536   : > { %v6565_v63 = vadd.f32 %v6411_v38, %v5868_v52 }
 0x537   : > { %v7121_v62 = vadd.f32 %v7120_v60, %v7068_v17  ;;  %v7222_v9 = vmul.f32 %v7068_v17, %v6564_v48  ;;  %v6955_v60 = vpop.permute.xlu2 %6954 }
 0x538   : > { %v6762_v1 = vpack.c.bf16 %v6565_v63, %v6564_v48  ;;  %v7069_v19 = vmul.f32 %v6945_v6, %v6565_v63  ;;  %v5617_v16 = vpop.f32.mrf.mxu2  ;;  %v11731_v6 = vld [vmem:[#allocation37_spill] sm:$0xff] }
 0x539   : > { %v7275_v27 = vadd.f32 %v7274_v18, %v7222_v9  ;;  %v5869_v13 = vadd.f32 %v5617_v16, %v11727_v4  ;;  %v6960_v9 = vpop.permute.xlu0 %6959 }
 0x53a   : > { %6798 = vst [vmem:[%s11203_s9 + $0x90] sm:$0xff] %v6762_v1  ;;  %v7162_v42 = vadd.f32 %v7161_v53, %v7069_v19  ;;  %v7223_v54 = vmul.f32 %v7069_v19, %v6565_v63  ;;  %v6317_v33 = vpop.f32.mrf.mxu0  ;;  %v11732_v63 = vld [vmem:[#allocation3_spill] sm:$0xff] }
 0x53b   : > { %v5716_v10 = vpop.f32.mrf.mxu3  ;;  %v6566_v30 = vadd.f32 %v6314_v57, %v5869_v13  ;;  %v6416_v32 = vpop.f32.mrf.mxu1 }
 0x53c   : > { %v7316_v24 = vadd.f32 %v7315_v7, %v7223_v54  ;;  %v5870_v5 = vadd.f32 %v5716_v10, %v11728_v43 }
 0x53d   : > { %v7070_v39 = vmul.f32 %v6950_v11, %v6566_v30 }
 0x53e   : > { %v6567_v21 = vadd.f32 %v6413_v59, %v5870_v5 }
 0x53f   : > { %v7122_v34 = vadd.f32 %v7121_v62, %v7070_v39  ;;  %v7224_v20 = vmul.f32 %v7070_v39, %v6566_v30 }
 0x540   : > { %v6763_v58 = vpack.c.bf16 %v6567_v21, %v6566_v30  ;;  %v7071_v40 = vmul.f32 %v6950_v11, %v6567_v21  ;;  %v5620_v36 = vpop.f32.mrf.mxu2 }
 0x541   : > { %v7276_v29 = vadd.f32 %v7275_v27, %v7224_v20  ;;  %v5871_v0 = vadd.f32 %v5620_v36, %v11729_v49 }
 0x542   : > { %6799 = vst [vmem:[%s11203_s9 + $0x98] sm:$0xff] %v6763_v58  ;;  %v7163_v25 = vadd.f32 %v7162_v42, %v7071_v40  ;;  %v7225_v35 = vmul.f32 %v7071_v40, %v6567_v21  ;;  %v6319_v37 = vpop.f32.mrf.mxu0  ;;  %v6965_v40 = vpop.permute.xlu1 %6964 }
 0x543   : > { %v5719_v31 = vpop.f32.mrf.mxu3  ;;  %v6568_v23 = vadd.f32 %v6317_v33, %v5871_v0  ;;  %v6418_v44 = vpop.f32.mrf.mxu1 }
 0x544   : > { %v7317_v38 = vadd.f32 %v7316_v24, %v7225_v35  ;;  %v5872_v56 = vadd.f32 %v5719_v31, %v11730_v47 }
 0x545   : > { %v7072_v53 = vmul.f32 %v6955_v60, %v6568_v23 }
 0x546   : > { %v6569_v22 = vadd.f32 %v6416_v32, %v5872_v56  ;;  %v11733_v56 = vld [vmem:[#allocation38_spill] sm:$0xff] }
 0x547   : > { %v7123_v18 = vadd.f32 %v7122_v34, %v7072_v53  ;;  %v7226_v14 = vmul.f32 %v7072_v53, %v6568_v23 }
 0x548   : > { %v6764_v3 = vpack.c.bf16 %v6569_v22, %v6568_v23  ;;  %v7073_v61 = vmul.f32 %v6955_v60, %v6569_v22  ;;  %v5622_v28 = vpop.f32.mrf.mxu2 }
 0x549   : > { %v7277_v52 = vadd.f32 %v7276_v29, %v7226_v14  ;;  %v5873_v57 = vadd.f32 %v5622_v28, %v11731_v6  ;;  %v11734_v6 = vld [vmem:[#allocation4_spill] sm:$0xff] }
 0x54a   : > { %6800 = vst [vmem:[%s11203_s9 + $0xa0] sm:$0xff] %v6764_v3  ;;  %v7164_v50 = vadd.f32 %v7163_v25, %v7073_v61  ;;  %v7227_v7 = vmul.f32 %v7073_v61, %v6569_v22  ;;  %v6322_v1 = vpop.f32.mrf.mxu0  ;;  %v6970_v22 = vpop.permute.xlu2 %6969 }
 0x54b   : > { %v5721_v48 = vpop.f32.mrf.mxu3  ;;  %v6570_v19 = vadd.f32 %v6319_v37, %v5873_v57  ;;  %v6421_v62 = vpop.f32.mrf.mxu1 }
 0x54c   : > { %v7318_v59 = vadd.f32 %v7317_v38, %v7227_v7  ;;  %v5874_v17 = vadd.f32 %v5721_v48, %v11732_v63  ;;  %v11735_v63 = vld [vmem:[#allocation5_spill] sm:$0xff] }
 0x54d   : > { %v7074_v54 = vmul.f32 %v6960_v9, %v6570_v19 }
 0x54e   : > { %v6571_v42 = vadd.f32 %v6418_v44, %v5874_v17 }
 0x54f   : > { %v7124_v4 = vadd.f32 %v7123_v18, %v7074_v54  ;;  %v7228_v13 = vmul.f32 %v7074_v54, %v6570_v19 }
 0x550   : > { %v6765_v16 = vpack.c.bf16 %v6571_v42, %v6570_v19  ;;  %v7075_v27 = vmul.f32 %v6960_v9, %v6571_v42  ;;  %v5625_v43 = vpop.f32.mrf.mxu2  ;;  %v6975_v9 = vpop.permute.xlu0 %6974 }
 0x551   : > { %v7278_v5 = vadd.f32 %v7277_v52, %v7228_v13  ;;  %v5875_v33 = vadd.f32 %v5625_v43, %v11043_v15 }
 0x552   : > { %6801 = vst [vmem:[%s11203_s9 + $0xa8] sm:$0xff] %v6765_v16  ;;  %v7165_v10 = vadd.f32 %v7164_v50, %v7075_v27  ;;  %v7229_v24 = vmul.f32 %v7075_v27, %v6571_v42  ;;  %v6324_v11 = vpop.f32.mrf.mxu0 }
 0x553   : > { %v5724_v30 = vpop.f32.mrf.mxu3  ;;  %v6572_v39 = vadd.f32 %v6322_v1, %v5875_v33  ;;  %v6423_v58 = vpop.f32.mrf.mxu1  ;;  %v11736_v33 = vld [vmem:[#allocation6_spill] sm:$0xff] }
 0x554   : > { %v7319_v32 = vadd.f32 %v7318_v59, %v7229_v24  ;;  %v5876_v21 = vadd.f32 %v5724_v30, %v11045_v26 }
 0x555   : > { %v7076_v20 = vmul.f32 %v6965_v40, %v6572_v39 }
 0x556   : > { %v6573_v34 = vadd.f32 %v6421_v62, %v5876_v21 }
 0x557   : > { %v7125_v36 = vadd.f32 %v7124_v4, %v7076_v20  ;;  %v7230_v29 = vmul.f32 %v7076_v20, %v6572_v39  ;;  %v6980_v20 = vpop.permute.xlu1 %6979 }
 0x558   : > { %v6766_v25 = vpack.c.bf16 %v6573_v34, %v6572_v39  ;;  %v7077_v35 = vmul.f32 %v6965_v40, %v6573_v34  ;;  %v5627_v31 = vpop.f32.mrf.mxu2 }
 0x559   : > { %v7279_v15 = vadd.f32 %v7278_v5, %v7230_v29  ;;  %v5877_v38 = vadd.f32 %v5627_v31, %v11052_v2 }
 0x55a   : > { %6802 = vst [vmem:[%s11203_s9 + $0xb0] sm:$0xff] %v6766_v25  ;;  %v7166_v49 = vadd.f32 %v7165_v10, %v7077_v35  ;;  %v7231_v0 = vmul.f32 %v7077_v35, %v6573_v34  ;;  %v6327_v23 = vpop.f32.mrf.mxu0 }
 0x55b   : > { %v5726_v47 = vpop.f32.mrf.mxu3  ;;  %v6574_v44 = vadd.f32 %v6324_v11, %v5877_v38  ;;  %v6426_v60 = vpop.f32.mrf.mxu1  ;;  %v11737_v11 = vld [vmem:[#allocation7_spill] sm:$0xff] }
 0x55c   : > { %v7320_v26 = vadd.f32 %v7319_v32, %v7231_v0  ;;  %v5878_v37 = vadd.f32 %v5726_v47, %v11733_v56 }
 0x55d   : > { %v7078_v3 = vmul.f32 %v6970_v22, %v6574_v44 }
 0x55e   : > { %v6575_v53 = vadd.f32 %v6423_v58, %v5878_v37 }
 0x55f   : > { %v7126_v14 = vadd.f32 %v7125_v36, %v7078_v3  ;;  %v7232_v50 = vmul.f32 %v7078_v3, %v6574_v44 }
 0x560   : > { %v6767_v61 = vpack.c.bf16 %v6575_v53, %v6574_v44  ;;  %v7079_v18 = vmul.f32 %v6970_v22, %v6575_v53  ;;  %v5630_v52 = vpop.f32.mrf.mxu2  ;;  %v11739_v44 = vld [vmem:[#allocation9_spill] sm:$0xff] }
 0x561   : > { %v7280_v2 = vadd.f32 %v7279_v15, %v7232_v50  ;;  %v5879_v57 = vadd.f32 %v5630_v52, %v11734_v6 }
 0x562   : > { %6803 = vst [vmem:[%s11203_s9 + $0xb8] sm:$0xff] %v6767_v61  ;;  %v7167_v7 = vadd.f32 %v7166_v49, %v7079_v18  ;;  %v7233_v28 = vmul.f32 %v7079_v18, %v6575_v53  ;;  %v6329_v1 = vpop.f32.mrf.mxu0  ;;  %v6985_v61 = vpop.permute.xlu2 %6984 }
 0x563   : > { %v5729_v48 = vpop.f32.mrf.mxu3  ;;  %v6576_v19 = vadd.f32 %v6327_v23, %v5879_v57  ;;  %v6428_v62 = vpop.f32.mrf.mxu1 }
 0x564   : > { %v7321_v59 = vadd.f32 %v7320_v26, %v7233_v28  ;;  %v5880_v17 = vadd.f32 %v5729_v48, %v11735_v63  ;;  %v11738_v26 = vld [vmem:[#allocation8_spill] sm:$0xff] }
 0x565   : > { %v7080_v54 = vmul.f32 %v6975_v9, %v6576_v19 }
 0x566   : > { %v6577_v42 = vadd.f32 %v6426_v60, %v5880_v17 }
 0x567   : > { %v7127_v4 = vadd.f32 %v7126_v14, %v7080_v54  ;;  %v7234_v13 = vmul.f32 %v7080_v54, %v6576_v19 }
 0x568   : > { %v6768_v16 = vpack.c.bf16 %v6577_v42, %v6576_v19  ;;  %v7081_v27 = vmul.f32 %v6975_v9, %v6577_v42  ;;  %v5632_v43 = vpop.f32.mrf.mxu2  ;;  %v11741_v19 = vld [vmem:[#allocation11_spill] sm:$0xff] }
 0x569   : > { %v7281_v5 = vadd.f32 %v7280_v2, %v7234_v13  ;;  %v5881_v30 = vadd.f32 %v5632_v43, %v11736_v33 }
 0x56a   : > { %6804 = vst [vmem:[%s11203_s9 + $0xc0] sm:$0xff] %v6768_v16  ;;  %v7168_v10 = vadd.f32 %v7167_v7, %v7081_v27  ;;  %v7235_v24 = vmul.f32 %v7081_v27, %v6577_v42  ;;  %v6332_v58 = vpop.f32.mrf.mxu0  ;;  %v6990_v16 = vpop.permute.xlu0 %6989 }
 0x56b   : > { %v5731_v32 = vpop.f32.mrf.mxu3  ;;  %v6578_v40 = vadd.f32 %v6329_v1, %v5881_v30  ;;  %v6431_v34 = vpop.f32.mrf.mxu1 }
 0x56c   : > { %v7322_v21 = vadd.f32 %v7321_v59, %v7235_v24  ;;  %v5882_v39 = vadd.f32 %v5731_v32, %v11737_v11  ;;  %v11740_v59 = vld [vmem:[#allocation10_spill] sm:$0xff] }
 0x56d   : > { %v7082_v35 = vmul.f32 %v6980_v20, %v6578_v40 }
 0x56e   : > { %v6579_v25 = vadd.f32 %v6428_v62, %v5882_v39 }
 0x56f   : > { %v7128_v49 = vadd.f32 %v7127_v4, %v7082_v35  ;;  %v7236_v0 = vmul.f32 %v7082_v35, %v6578_v40 }
 0x570   : > { %v6769_v36 = vpack.c.bf16 %v6579_v25, %v6578_v40  ;;  %v7083_v29 = vmul.f32 %v6980_v20, %v6579_v25  ;;  %v5635_v38 = vpop.f32.mrf.mxu2 }
 0x571   : > { %v7282_v47 = vadd.f32 %v7281_v5, %v7236_v0  ;;  %v5883_v56 = vadd.f32 %v5635_v38, %v11738_v26  ;;  %v11742_v26 = vld [vmem:[#allocation12_spill] sm:$0xff] }
 0x572   : > { %6805 = vst [vmem:[%s11203_s9 + $0xc8] sm:$0xff] %v6769_v36  ;;  %v7169_v31 = vadd.f32 %v7168_v10, %v7083_v29  ;;  %v7237_v15 = vmul.f32 %v7083_v29, %v6579_v25  ;;  %v6334_v22 = vpop.f32.mrf.mxu0  ;;  %v6995_v25 = vpop.permute.xlu1 %6994 }
 0x573   : > { %v5734_v37 = vpop.f32.mrf.mxu3  ;;  %v6580_v53 = vadd.f32 %v6332_v58, %v5883_v56  ;;  %v6433_v3 = vpop.f32.mrf.mxu1 }
 0x574   : > { %v7323_v23 = vadd.f32 %v7322_v21, %v7237_v15  ;;  %v5884_v60 = vadd.f32 %v5734_v37, %v11739_v44 }
 0x575   : > { %v7084_v14 = vmul.f32 %v6985_v61, %v6580_v53 }
 0x576   : > { %v6581_v18 = vadd.f32 %v6431_v34, %v5884_v60 }
 0x577   : > { %v7129_v28 = vadd.f32 %v7128_v49, %v7084_v14  ;;  %v7238_v52 = vmul.f32 %v7084_v14, %v6580_v53 }
 0x578   : > { %v6770_v50 = vpack.c.bf16 %v6581_v18, %v6580_v53  ;;  %v7085_v7 = vmul.f32 %v6985_v61, %v6581_v18  ;;  %v5637_v57 = vpop.f32.mrf.mxu2 }
 0x579   : > { %v7283_v48 = vadd.f32 %v7282_v47, %v7238_v52  ;;  %v5885_v63 = vadd.f32 %v5637_v57, %v11740_v59 }
 0x57a   : > { %6806 = vst [vmem:[%s11203_s9 + $0xd0] sm:$0xff] %v6770_v50  ;;  %v7170_v2 = vadd.f32 %v7169_v31, %v7085_v7  ;;  %v7239_v6 = vmul.f32 %v7085_v7, %v6581_v18  ;;  %v6337_v9 = vpop.f32.mrf.mxu0 }
 0x57b   : > { %v5736_v17 = vpop.f32.mrf.mxu3  ;;  %v6582_v42 = vadd.f32 %v6334_v22, %v5885_v63  ;;  %v6436_v54 = vpop.f32.mrf.mxu1 }
 0x57c   : > { %v7324_v1 = vadd.f32 %v7323_v23, %v7239_v6  ;;  %v5886_v62 = vadd.f32 %v5736_v17, %v11741_v19  ;;  %v11743_v23 = vld [vmem:[#allocation13_spill] sm:$0xff]  ;;  %v11744_v17 = vld [vmem:[#allocation14_spill] sm:$0xff] }
 0x57d   : > { %v7086_v4 = vmul.f32 %v6990_v16, %v6582_v42 }
 0x57e   : > { %v6583_v27 = vadd.f32 %v6433_v3, %v5886_v62  ;;  %v7000_v3 = vpop.permute.xlu2 %6999 }
 0x57f   : > { %v7130_v24 = vadd.f32 %v7129_v28, %v7086_v4  ;;  %v7240_v43 = vmul.f32 %v7086_v4, %v6582_v42 }
 0x580   : > { %v6771_v13 = vpack.c.bf16 %v6583_v27, %v6582_v42  ;;  %v7087_v10 = vmul.f32 %v6990_v16, %v6583_v27  ;;  %v5640_v30 = vpop.f32.mrf.mxu2  ;;  %v7005_v42 = vpop.permute.xlu0 %7004 }
 0x581   : > { %v7284_v32 = vadd.f32 %v7283_v48, %v7240_v43  ;;  %v5887_v21 = vadd.f32 %v5640_v30, %v11109_v55 }
 0x582   : > { %6807 = vst [vmem:[%s11203_s9 + $0xd8] sm:$0xff] %v6771_v13  ;;  %v7171_v5 = vadd.f32 %v7170_v2, %v7087_v10  ;;  %v7241_v33 = vmul.f32 %v7087_v10, %v6583_v27  ;;  %v6339_v40 = vpop.f32.mrf.mxu0 }
 0x583   : > { %v5739_v11 = vpop.f32.mrf.mxu3  ;;  %v6584_v34 = vadd.f32 %v6337_v9, %v5887_v21  ;;  %v6438_v20 = vpop.f32.mrf.mxu1 }
 0x584   : > { %v7325_v39 = vadd.f32 %v7324_v1, %v7241_v33  ;;  %v5888_v58 = vadd.f32 %v5739_v11, %v11111_v45  ;;  %v11745_v33 = vld [vmem:[#allocation15_spill] sm:$0xff]  ;;  %v11746_v11 = vld [vmem:[#allocation16_spill] sm:$0xff] }
 0x585   : > { %v7088_v36 = vmul.f32 %v6995_v25, %v6584_v34 }
 0x586   : > { %v6585_v35 = vadd.f32 %v6436_v54, %v5888_v58 }
 0x587   : > { %v7131_v0 = vadd.f32 %v7130_v24, %v7088_v36  ;;  %v7242_v31 = vmul.f32 %v7088_v36, %v6584_v34 }
 0x588   : > { %v6772_v29 = vpack.c.bf16 %v6585_v35, %v6584_v34  ;;  %v7089_v49 = vmul.f32 %v6995_v25, %v6585_v35  ;;  %v5642_v47 = vpop.f32.mrf.mxu2 }
 0x589   : > { %v7285_v55 = vadd.f32 %v7284_v32, %v7242_v31  ;;  %v5889_v56 = vadd.f32 %v5642_v47, %v11742_v26 }
 0x58a   : > { %6808 = vst [vmem:[%s11203_s9 + $0xe0] sm:$0xff] %v6772_v29  ;;  %v7172_v15 = vadd.f32 %v7171_v5, %v7089_v49  ;;  %v7243_v38 = vmul.f32 %v7089_v49, %v6585_v35  ;;  %v6342_v60 = vpop.f32.mrf.mxu0 }
 0x58b   : > { %v5741_v37 = vpop.f32.mrf.mxu3  ;;  %v6586_v22 = vadd.f32 %v6339_v40, %v5889_v56  ;;  %v6441_v53 = vpop.f32.mrf.mxu1 }
 0x58c   : > { %v7326_v45 = vadd.f32 %v7325_v39, %v7243_v38  ;;  %v5890_v44 = vadd.f32 %v5741_v37, %v11743_v23  ;;  %v7010_v40 = vpop.permute.xlu1 %7009  ;;  %v7015_v23 = vpop.permute.xlu2 %7014 }
 0x58d   : > { %v7090_v18 = vmul.f32 %v7000_v3, %v6586_v22 }
 0x58e   : > { %v6587_v61 = vadd.f32 %v6438_v20, %v5890_v44 }
 0x58f   : > { %v7132_v7 = vadd.f32 %v7131_v0, %v7090_v18  ;;  %v7244_v28 = vmul.f32 %v7090_v18, %v6586_v22 }
 0x590   : > { %v6773_v14 = vpack.c.bf16 %v6587_v61, %v6586_v22  ;;  %v7091_v50 = vmul.f32 %v7000_v3, %v6587_v61  ;;  %v5645_v6 = vpop.f32.mrf.mxu2 }
 0x591   : > { %v7286_v57 = vadd.f32 %v7285_v55, %v7244_v28  ;;  %v5891_v48 = vadd.f32 %v5645_v6, %v11131_v8 }
 0x592   : > { %6809 = vst [vmem:[%s11203_s9 + $0xe8] sm:$0xff] %v6773_v14  ;;  %v7173_v52 = vadd.f32 %v7172_v15, %v7091_v50  ;;  %v7245_v2 = vmul.f32 %v7091_v50, %v6587_v61  ;;  %v6344_v19 = vpop.f32.mrf.mxu0 }
 0x593   : > { %v5744_v59 = vpop.f32.mrf.mxu3  ;;  %v6588_v62 = vadd.f32 %v6342_v60, %v5891_v48  ;;  %v6443_v9 = vpop.f32.mrf.mxu1 }
 0x594   : > { %v7327_v63 = vadd.f32 %v7326_v45, %v7245_v2  ;;  %v5892_v1 = vadd.f32 %v5744_v59, %v11744_v17  ;;  %v7020_v48 = vpop.permute.xlu0 %7019 }
 0x595   : > { %v7092_v16 = vmul.f32 %v7005_v42, %v6588_v62 }
 0x596   : > { %v6589_v54 = vadd.f32 %v6441_v53, %v5892_v1 }
 0x597   : > { %v7133_v13 = vadd.f32 %v7132_v7, %v7092_v16  ;;  %v7246_v10 = vmul.f32 %v7092_v16, %v6588_v62 }
 0x598   : > { %v6774_v27 = vpack.c.bf16 %v6589_v54, %v6588_v62  ;;  %v7093_v4 = vmul.f32 %v7005_v42, %v6589_v54  ;;  %v5647_v5 = vpop.f32.mrf.mxu2 }
 0x599   : > { %v7287_v8 = vadd.f32 %v7286_v57, %v7246_v10  ;;  %v5893_v30 = vadd.f32 %v5647_v5, %v11745_v33 }
 0x59a   : > { %6810 = vst [vmem:[%s11203_s9 + $0xf0] sm:$0xff] %v6774_v27  ;;  %v7174_v24 = vadd.f32 %v7173_v52, %v7093_v4  ;;  %v7247_v43 = vmul.f32 %v7093_v4, %v6589_v54  ;;  %v6347_v20 = vpop.f32.mrf.mxu0  ;;  %v11747_v4 = vld [vmem:[#allocation17_spill] sm:$0xff] }
 0x59b   : > { %v5746_v32 = vpop.f32.mrf.mxu3  ;;  %v6590_v58 = vadd.f32 %v6344_v19, %v5893_v30  ;;  %v6446_v35 = vpop.f32.mrf.mxu1 }
 0x59c   : > { %v7328_v21 = vadd.f32 %v7327_v63, %v7247_v43  ;;  %v5894_v39 = vadd.f32 %v5746_v32, %v11746_v11 }
 0x59d   : > { %v7094_v25 = vmul.f32 %v7010_v40, %v6590_v58 }
 0x59e   : > { %v6591_v34 = vadd.f32 %v6443_v9, %v5894_v39 }
 0x59f   : > { %v7134_v49 = vadd.f32 %v7133_v13, %v7094_v25  ;;  %v7248_v0 = vmul.f32 %v7094_v25, %v6590_v58  ;;  %v11749_v25 = vld [vmem:[#allocation19_spill] sm:$0xff] }
 0x5a0   : > { %v6775_v36 = vpack.c.bf16 %v6591_v34, %v6590_v58  ;;  %v7095_v29 = vmul.f32 %v7010_v40, %v6591_v34  ;;  %v5650_v38 = vpop.f32.mrf.mxu2 }
 0x5a1   : > { %v7288_v47 = vadd.f32 %v7287_v8, %v7248_v0  ;;  %v5895_v55 = vadd.f32 %v5650_v38, %v11153_v46  ;;  %v7025_v8 = vpop.permute.xlu1 %7024  ;;  %v11750_v0 = vld [vmem:[#allocation20_spill] sm:$0xff] }
 0x5a2   : > { %6811 = vst [vmem:[%s11203_s9 + $0xf8] sm:$0xff] %v6775_v36  ;;  %v7175_v31 = vadd.f32 %v7174_v24, %v7095_v29  ;;  %v7249_v15 = vmul.f32 %v7095_v29, %v6591_v34  ;;  %v6349_v3 = vpop.f32.mrf.mxu0  ;;  %v11748_v24 = vld [vmem:[#allocation18_spill] sm:$0xff] }
 0x5a3   : > { %v5749_v26 = vpop.f32.mrf.mxu3  ;;  %v6592_v45 = vadd.f32 %v6347_v20, %v5895_v55  ;;  %v6448_v14 = vpop.f32.mrf.mxu1 }
 0x5a4   : > { %v7329_v56 = vadd.f32 %v7328_v21, %v7249_v15  ;;  %v5896_v37 = vadd.f32 %v5749_v26, %v11155_v51 }
 0x5a5   : > { %v7096_v60 = vmul.f32 %v7015_v23, %v6592_v45 }
 0x5a6   : > { %v6593_v44 = vadd.f32 %v6446_v35, %v5896_v37 }
 0x5a7   : > { %v7135_v61 = vadd.f32 %v7134_v49, %v7096_v60  ;;  %v7250_v18 = vmul.f32 %v7096_v60, %v6592_v45 }
 0x5a8   : > { %v6776_v22 = vpack.c.bf16 %v6593_v44, %v6592_v45  ;;  %v7097_v53 = vmul.f32 %v7015_v23, %v6593_v44  ;;  %v5652_v28 = vpop.f32.mrf.mxu2 }
 0x5a9   : > { %v7289_v46 = vadd.f32 %v7288_v47, %v7250_v18  ;;  %v5897_v52 = vadd.f32 %v5652_v28, %v11165_v12  ;;  %v7030_v47 = vpop.permute.xlu2 %7029 }
 0x5aa   : > { %6812 = vst [vmem:[%s11203_s9 + $0x100] sm:$0xff] %v6776_v22  ;;  %v7176_v50 = vadd.f32 %v7175_v31, %v7097_v53  ;;  %v7251_v7 = vmul.f32 %v7097_v53, %v6593_v44  ;;  %v6352_v54 = vpop.f32.mrf.mxu0 }
 0x5ab   : > { %v5751_v2 = vpop.f32.mrf.mxu3  ;;  %v6594_v57 = vadd.f32 %v6349_v3, %v5897_v52  ;;  %v6451_v12 = vpop.f32.mrf.mxu1 }
 0x5ac   : > { %v7330_v51 = vadd.f32 %v7329_v56, %v7251_v7  ;;  %v5898_v6 = vadd.f32 %v5751_v2, %v11167_v41 }
 0x5ad   : > { %v7098_v63 = vmul.f32 %v7020_v48, %v6594_v57 }
 0x5ae   : > { %v6595_v59 = vadd.f32 %v6448_v14, %v5898_v6 }
 0x5af   : > { %v7136_v19 = vadd.f32 %v7135_v61, %v7098_v63  ;;  %v7252_v62 = vmul.f32 %v7098_v63, %v6594_v57 }
 0x5b0   : > { %v6777_v17 = vpack.c.bf16 %v6595_v59, %v6594_v57  ;;  %v7099_v1 = vmul.f32 %v7020_v48, %v6595_v59  ;;  %v5655_v16 = vpop.f32.mrf.mxu2 }
 0x5b1   : > { %v7290_v27 = vadd.f32 %v7289_v46, %v7252_v62  ;;  %v5899_v13 = vadd.f32 %v5655_v16, %v11747_v4 }
 0x5b2   : > { %6813 = vst [vmem:[%s11203_s9 + $0x108] sm:$0xff] %v6777_v17  ;;  %v7177_v9 = vadd.f32 %v7176_v50, %v7099_v1  ;;  %v7253_v42 = vmul.f32 %v7099_v1, %v6595_v59  ;;  %v6354_v49 = vpop.f32.mrf.mxu0 }
 0x5b3   : > { %v5754_v10 = vpop.f32.mrf.mxu3  ;;  %v6596_v5 = vadd.f32 %v6352_v54, %v5899_v13  ;;  %v6453_v15 = vpop.f32.mrf.mxu1 }
 0x5b4   : > { %v7331_v41 = vadd.f32 %v7330_v51, %v7253_v42  ;;  %v5900_v43 = vadd.f32 %v5754_v10, %v11748_v24 }
 0x5b5   : > { %v7100_v30 = vmul.f32 %v7025_v8, %v6596_v5 }
 0x5b6   : > { %v6597_v33 = vadd.f32 %v6451_v12, %v5900_v43 }
 0x5b7   : > { %v7137_v11 = vadd.f32 %v7136_v19, %v7100_v30  ;;  %v7254_v39 = vmul.f32 %v7100_v30, %v6596_v5 }
 0x5b8   : > { %v6778_v32 = vpack.c.bf16 %v6597_v33, %v6596_v5  ;;  %v7101_v21 = vmul.f32 %v7025_v8, %v6597_v33  ;;  %v5657_v34 = vpop.f32.mrf.mxu2 }
 0x5b9   : > { %v7291_v20 = vadd.f32 %v7290_v27, %v7254_v39  ;;  %v5901_v35 = vadd.f32 %v5657_v34, %v11749_v25 }
 0x5ba   : > { %6814 = vst [vmem:[%s11203_s9 + $0x110] sm:$0xff] %v6778_v32  ;;  %v7178_v58 = vadd.f32 %v7177_v9, %v7101_v21  ;;  %v7255_v40 = vmul.f32 %v7101_v21, %v6597_v33 }
 0x5bb   : > { %v5756_v36 = vpop.f32.mrf.mxu3  ;;  %v6598_v38 = vadd.f32 %v6354_v49, %v5901_v35 }
 0x5bc   : > { %v7332_v29 = vadd.f32 %v7331_v41, %v7255_v40  ;;  %v5902_v31 = vadd.f32 %v5756_v36, %v11750_v0 }
 0x5bd   : > { %v7102_v26 = vmul.f32 %v7030_v47, %v6598_v38 }
 0x5be   : > { %v6599_v55 = vadd.f32 %v6453_v15, %v5902_v31 }
 0x5bf   : > { %v7138_v45 = vadd.f32 %v7137_v11, %v7102_v26  ;;  %v7256_v23 = vmul.f32 %v7102_v26, %v6598_v38 }
 0x5c0   : > { %v6779_v56 = vpack.c.bf16 %v6599_v55, %v6598_v38  ;;  %v7103_v37 = vmul.f32 %v7030_v47, %v6599_v55 }
 0x5c1   : > { %v7139_v22 = vrot.slane %v7138_v45, 4  ;;  %v7292_v53 = vadd.f32 %v7291_v20, %v7256_v23 }
 0x5c2   : > { %6815 = vst [vmem:[%s11203_s9 + $0x118] sm:$0xff] %v6779_v56  ;;  %v7179_v44 = vadd.f32 %v7178_v58, %v7103_v37  ;;  %v7257_v60 = vmul.f32 %v7103_v37, %v6599_v55 }
 0x5c3   : > { %v7140_v18 = vadd.f32 %v7139_v22, %v7138_v45  ;;  %v7293_v14 = vrot.slane %v7292_v53, 4 }
 0x5c4   : > { %v7180_v3 = vrot.slane %v7179_v44, 4  ;;  %v7333_v61 = vadd.f32 %v7332_v29, %v7257_v60 }
 0x5c5   : > { %v7141_v28 = vrot.slane %v7140_v18, 2  ;;  %v7294_v46 = vadd.f32 %v7293_v14, %v7292_v53 }
 0x5c6   : > { %v7181_v50 = vadd.f32 %v7180_v3, %v7179_v44  ;;  %v7334_v7 = vrot.slane %v7333_v61, 4 }
 0x5c7   : > { %v7142_v51 = vadd.f32 %v7141_v28, %v7140_v18  ;;  %v7295_v6 = vrot.slane %v7294_v46, 2 }
 0x5c8   : > { %v7182_v52 = vrot.slane %v7181_v50, 2  ;;  %v7335_v2 = vadd.f32 %v7334_v7, %v7333_v61 }
 0x5c9   : > { %v7143_v59 = vrot.slane %v7142_v51, 1  ;;  %v7296_v63 = vadd.f32 %v7295_v6, %v7294_v46 }
 0x5ca   : > { %v7183_v57 = vadd.f32 %v7182_v52, %v7181_v50  ;;  %v7336_v48 = vrot.slane %v7335_v2, 2 }
 0x5cb   : > { %v7297_v19 = vrot.slane %v7296_v63, 1  ;;  %v7144_v9 = vadd.f32 %v7143_v59, %v7142_v51 }
 0x5cc   : > { %v7184_v17 = vrot.slane %v7183_v57, 1  ;;  %v7337_v1 = vadd.f32 %v7336_v48, %v7335_v2 }
 0x5cd   : > { %v7298_v42 = vadd.f32 %v7297_v19, %v7296_v63 }
 0x5ce   : > { %v7338_v62 = vrot.slane %v7337_v1, 1  ;;  %v7185_v54 = vadd.f32 %v7184_v17, %v7183_v57 }
 0x5cf   : > { %v7341_v27 = vsel %vm7340_vm6, %v7144_v9, %v7298_v42 }
 0x5d0   : > { %v7339_v16 = vadd.f32 %v7338_v62, %v7337_v1 }
 0x5d2   : > { %v7342_v12 = vsel %vm7340_vm6, %v7185_v54, %v7339_v16 }
 0x5d3   : > { %v7345_v4 = vrot.slane %v7342_v12, 6 }
 0x5d5   : > { %v7347_v13 = vsel %vm7346_vm7, %v7341_v27, %v7345_v4 }
 0x5d6   : > { %7349 = vst [vmem:[%s210_s28] sm:$0xf] %v7347_v13 }
 0x5d7 PF: > { %s15_s15 = sadd.s32 1, %s9144_s15  }
 0x5d8   : > { %p12_p4 = scmp.ge.s32.totalorder %s15_s15, 4  }
 0x5da   :  { %14 = sbr.rel (!%p12_p4) target bundleno = 1 (0x1), region = 82 }

</bundles_post_ra>
